<compile_context>
chip_gen: v7x
topology: tpu7x:2x2x1
jax: 0.10.0
libtpu: 0.0.40
codegen_flags: <defaults>
</compile_context>

<pallas_src>
import functools

import jax
import jax.numpy as jnp
from jax.experimental import pallas as pl
from jax.experimental.pallas import tpu as pltpu

LIN_TM = 1024    # row tile for the fused pointwise-linear (+neighbor-proj) kernel
EDGE_TM = 1024   # row tile for the fused DenseEdgeConv kernel
DUP_EPS = 1e-9       # "identical point" threshold on squared distance
DUP_PENALTY = 1e9    # replaces torch's max(D) factor; identical ranking


def _round_up(n, m):
    return ((n + m - 1) // m) * m


def _pick_tile(m, cap):
    """Row tile: multiple of 8, <= cap, and small enough that the grid has at
    least 2 steps whenever m >= 16 (so both v7x TensorCores get work)."""
    half = _round_up(max((m + 1) // 2, 8), 8)
    return max(8, min(cap, half, _round_up(m, 8)))


# ----------------------------- Pallas kernels ------------------------------ #

def _linear_proj_kernel(*refs, n_pieces, relu):
    """out_main = act(sum_i piece_i @ w_i + b);  out_n = out_main @ wn.

    Used for layer0 and the layer{2,3,4}_prep 1x1 convs.  The running feature
    concat is never materialized: each concat piece arrives as its own input
    with the matching row-slice of the full weight matrix.  `wn` precomputes
    the next DenseEdgeConv's per-neighbor projection (w0[C:2C]) so only
    12-wide rows have to be gathered per neighbor.
    """
    pieces = refs[:n_pieces]
    ws = refs[n_pieces:2 * n_pieces]
    b_ref, wn_ref, y_ref, n_ref = refs[2 * n_pieces:]
    acc = jnp.dot(pieces[0][...], ws[0][...], preferred_element_type=jnp.float32)
    for p_ref, w_ref in zip(pieces[1:], ws[1:]):
        acc = acc + jnp.dot(p_ref[...], w_ref[...],
                            preferred_element_type=jnp.float32)
    acc = acc + b_ref[...]
    if relu:
        acc = jnp.maximum(acc, 0.0)
    y_ref[...] = acc.astype(y_ref.dtype)
    n_ref[...] = jnp.dot(acc, wn_ref[...],
                         preferred_element_type=jnp.float32).astype(n_ref.dtype)


def linear_and_neighbor_proj(pieces, weights, bias, wn, relu):
    """pieces: list of (M, Ci); weights: list of (Ci, 24); bias (24,); wn (24, g)."""
    M = pieces[0].shape[0]
    cout = weights[0].shape[1]
    gn = wn.shape[1]
    tm = _pick_tile(M, LIN_TM)
    in_specs = (
        [pl.BlockSpec((tm, p.shape[1]), lambda i: (i, 0)) for p in pieces]
        + [pl.BlockSpec(w.shape, lambda i: (0, 0)) for w in weights]
        + [pl.BlockSpec((1, cout), lambda i: (0, 0)),
           pl.BlockSpec((cout, gn), lambda i: (0, 0))])
    return pl.pallas_call(
        functools.partial(_linear_proj_kernel, n_pieces=len(pieces), relu=relu),
        out_shape=(jax.ShapeDtypeStruct((M, cout), jnp.float32),
                   jax.ShapeDtypeStruct((M, gn), jnp.float32)),
        grid=(pl.cdiv(M, tm),),
        in_specs=in_specs,
        out_specs=(pl.BlockSpec((tm, cout), lambda i: (i, 0)),
                   pl.BlockSpec((tm, gn), lambda i: (i, 0))),
        compiler_params=pltpu.CompilerParams(dimension_semantics=("parallel",)),
    )(*pieces, *weights, bias.reshape(1, cout), wn)


def _pdist_dup_kernel(p_ref, d_ref):
    p = p_ref[0]                                    # (N, C)
    n = p.shape[0]
    r = jnp.sum(p * p, axis=1, keepdims=True)       # (N, 1)
    d = r - 2.0 * jnp.dot(p, p.T, preferred_element_type=jnp.float32) + r.T
    # group_knn(unique=True): a point duplicating an earlier point gets its
    # whole distance column penalized so it is never picked as a neighbor.
    # Exact np.unique equality is approximated by D <= DUP_EPS; a large finite
    # constant replaces torch's global max(D) factor (same ranking, no extra
    # full-array reduction pass).
    row = jax.lax.broadcasted_iota(jnp.int32, (n, n), 0)
    col = jax.lax.broadcasted_iota(jnp.int32, (n, n), 1)
    dup = jnp.any((row < col) & (d <= DUP_EPS), axis=0, keepdims=True)  # (1, N)
    d_ref[0] = d + DUP_PENALTY * dup.astype(jnp.float32)


def pairwise_dist_with_dup(points):
    """points: (B, N, C) -> squared pairwise distances, duplicate columns penalized.

    # TODO(synk): for production N (>~1.5k) on v7x tile this over query rows
    # (block (1, tq, N)) to respect the 64 MiB VMEM; fine as-is at small N.
    """
    B, N, C = points.shape
    return pl.pallas_call(
        _pdist_dup_kernel,
        out_shape=jax.ShapeDtypeStruct((B, N, N), jnp.float32),
        grid=(B,),
        in_specs=[pl.BlockSpec((1, N, C), lambda b: (b, 0, 0))],
        out_specs=pl.BlockSpec((1, N, N), lambda b: (b, 0, 0)),
        compiler_params=pltpu.CompilerParams(dimension_semantics=("parallel",)),
    )(points)


def _edge_kernel(x_ref, n0_ref, wc_ref, bc_ref, wf0_ref, w21_ref, o_ref):
    """Fused DenseEdgeConv(in=C, growth=g, n=3) for one row tile.

    x   : (tm, C)    center features
    n0  : (tm, k, g) gathered neighbor projections  (= feat[idx] @ w0[C:2C])
    wc  : (C, 3g)    merged center weights [w0[:C]-w0[C:], w1[g:], w2[2g:]]
    bc  : (1, 3g)    [b0, b1, b2]
    wf0 : (g, 2g)    merged [w1[:g], w2[g:2g]]
    w21 : (g, g)     w2[:g]
    out : (tm, 3g+C) = [max_k f2, max_k f1, max_k f0, x]   (torch channel order)
    """
    tm, _ = x_ref.shape
    k, g = n0_ref.shape[1], n0_ref.shape[2]

    x = x_ref[...]
    c = jnp.dot(x, wc_ref[...], preferred_element_type=jnp.float32) + bc_ref[...]
    c0 = c[:, None, 0 * g:1 * g]                      # (tm, 1, g)
    c1 = c[:, None, 1 * g:2 * g]
    c2 = c[:, None, 2 * g:3 * g]

    f0 = jnp.maximum(n0_ref[...] + c0, 0.0)           # (tm, k, g)
    h = jnp.dot(f0.reshape(tm * k, g), wf0_ref[...],
                preferred_element_type=jnp.float32).reshape(tm, k, 2 * g)
    f1 = jnp.maximum(h[:, :, :g] + c1, 0.0)           # (tm, k, g)
    f2 = (jnp.dot(f1.reshape(tm * k, g), w21_ref[...],
                  preferred_element_type=jnp.float32).reshape(tm, k, g)
          + h[:, :, g:] + c2)                         # (tm, k, g)

    o_ref[...] = jnp.concatenate(
        [jnp.max(f2, axis=1), jnp.max(f1, axis=1), jnp.max(f0, axis=1), x],
        axis=-1).astype(o_ref.dtype)


def fused_dense_edge_conv(x_flat, n0, ep):
    """x_flat: (M, C), n0: (M, k, g) -> (M, 3*g + C)."""
    M, C = x_flat.shape
    k, g = n0.shape[1], n0.shape[2]
    cout = 3 * g + C
    tm = _pick_tile(M, EDGE_TM)
    return pl.pallas_call(
        _edge_kernel,
        out_shape=jax.ShapeDtypeStruct((M, cout), jnp.float32),
        grid=(pl.cdiv(M, tm),),
        in_specs=[
            pl.BlockSpec((tm, C), lambda i: (i, 0)),
            pl.BlockSpec((tm, k, g), lambda i: (i, 0, 0)),
            pl.BlockSpec((C, 3 * g), lambda i: (0, 0)),
            pl.BlockSpec((1, 3 * g), lambda i: (0, 0)),
            pl.BlockSpec((g, 2 * g), lambda i: (0, 0)),
            pl.BlockSpec((g, g), lambda i: (0, 0)),
        ],
        out_specs=pl.BlockSpec((tm, cout), lambda i: (i, 0)),
        compiler_params=pltpu.CompilerParams(dimension_semantics=("parallel",)),
    )(x_flat, n0, ep["wc"], ep["bc"].reshape(1, 3 * g), ep["wf0"], ep["w21"])


# ------------------------------- glue (JAX) -------------------------------- #

def _merge_edge_params(p, cin=24):
    """Fold the DenseEdgeConv weights into the merged/lane-wider forms."""
    g = p["b0"].shape[0]
    w0, w1, w2 = p["w0"], p["w1"], p["w2"]
    return dict(
        wn=w0[cin:],                                                   # (C, g)
        wc=jnp.concatenate([w0[:cin] - w0[cin:], w1[g:], w2[2 * g:]], axis=1),
        bc=jnp.concatenate([p["b0"], p["b1"], p["b2"]]),
        wf0=jnp.concatenate([w1[:g], w2[g:2 * g]], axis=1),            # (g, 2g)
        w21=w2[:g],                                                    # (g, g)
    )


def dense_edge_conv(x_flat, n_flat, ep, k, B, N):
    """x_flat: (M, 24) edge-conv input features; n_flat: (M, g) = x @ w0[C:]."""
    C = x_flat.shape[1]
    g = n_flat.shape[1]
    D = pairwise_dist_with_dup(x_flat.reshape(B, N, C))
    # torch.topk(-D, k+1, sorted=True) then drop the self column.
    _, idx = jax.lax.top_k(-D, k + 1)
    idx = idx[:, :, 1:]                                               # (B, N, k)
    # TODO(synk): top-k and the neighbor gather stay in XLA (no clean Pallas
    # equivalent); only the g(=12)-wide projection is gathered, not features.
    n0 = jax.vmap(lambda n, i: n[i])(n_flat.reshape(B, N, g), idx)    # (B,N,k,g)
    return fused_dense_edge_conv(x_flat, n0.reshape(B * N, k, g), ep)


def feature_extraction(xyz_ncw, params, k=16):
    """xyz_ncw: (B, 3, N) (PyTorch NCW) -> (B, 264, N)."""
    x_nc = jnp.transpose(xyz_ncw, (0, 2, 1)).astype(jnp.float32)      # (B, N, 3)
    B, N, _ = x_nc.shape
    M = B * N
    edge = {li: _merge_edge_params(params[f"layer{li}"]) for li in (1, 2, 3, 4)}

    # layer0: Conv2d(3, 24, [1,1]) (no activation) + layer1 neighbor projection
    w0, b0 = params["layer0"]
    x0, n1 = linear_and_neighbor_proj([x_nc.reshape(M, 3)], [w0], b0,
                                      edge[1]["wn"], relu=False)      # (M,24),(M,12)
    y1 = dense_edge_conv(x0, n1, edge[1], k, B, N)                    # (M, 60)

    pieces = [y1, x0]
    for li in (2, 3, 4):
        wp, bp = params[f"layer{li}_prep"]
        # Split the prep weight rows to match the concat pieces [y_{li-1},...,x0]
        ws, off = [], 0
        for p in pieces:
            ws.append(wp[off:off + p.shape[1]])
            off += p.shape[1]
        prep, n_all = linear_and_neighbor_proj(pieces, ws, bp,
                                               edge[li]["wn"], relu=True)
        y = dense_edge_conv(prep, n_all, edge[li], k, B, N)           # (M, 60)
        pieces = [y] + pieces

    # single concat of [y4, y3, y2, y1, x0] instead of per-layer rewrites
    out = jnp.concatenate(pieces, axis=-1).reshape(B, N, -1)          # (B, N, 264)
    return jnp.transpose(out, (0, 2, 1))                              # (B, 264, N)


# ----------------------------- parameter init ------------------------------ #

def _linear(key, cin, cout):
    kw, kb = jax.random.split(key)
    bound = cin ** -0.5
    w = jax.random.uniform(kw, (cin, cout), jnp.float32, -bound, bound)
    b = jax.random.uniform(kb, (cout,), jnp.float32, -bound, bound)
    return w, b


def _dense_params(key, cin=24, growth=12):
    k0, k1, k2 = jax.random.split(key, 3)
    w0, b0 = _linear(k0, 2 * cin, growth)
    w1, b1 = _linear(k1, cin + growth, growth)
    w2, b2 = _linear(k2, cin + 2 * growth, growth)
    return dict(w0=w0, b0=b0, w1=w1, b1=b1, w2=w2, b2=b2)


def init_params(key):
    keys = jax.random.split(key, 8)
    return {
        "layer0": _linear(keys[0], 3, 24),
        "layer1": _dense_params(keys[1]),
        "layer2_prep": _linear(keys[2], 84, 24),
        "layer2": _dense_params(keys[3]),
        "layer3_prep": _linear(keys[4], 144, 24),
        "layer3": _dense_params(keys[5]),
        "layer4_prep": _linear(keys[6], 204, 24),
        "layer4": _dense_params(keys[7]),
    }


# ---------------------------------- main ----------------------------------- #

if __name__ == "__main__":
    key = jax.random.PRNGKey(0)
    pkey, xkey = jax.random.split(key)
    params = init_params(pkey)

    B, N = 2, 64  # small shapes; N >= knn + 1
    xyz_normalized = jax.random.normal(xkey, (B, 3, N), dtype=jnp.float32)

    out = jax.jit(feature_extraction)(xyz_normalized, params)
    out = jax.block_until_ready(out)

    assert out.shape == (B, 264, N), out.shape
    assert jnp.all(jnp.isfinite(out))
    print("KERNEL_OK")
</pallas_src>

<mosaic_0001>
module attributes {stable_mosaic.version = 11 : i64} {
  func.func @_linear_proj_kernel(%arg0: i32, %arg1: memref<64x3xf32, #tpu.memory_space<vmem>>, %arg2: memref<3x24xf32, #tpu.memory_space<vmem>>, %arg3: memref<1x24xf32, #tpu.memory_space<vmem>>, %arg4: memref<24x12xf32, #tpu.memory_space<vmem>>, %arg5: memref<64x24xf32, #tpu.memory_space<vmem>>, %arg6: memref<64x12xf32, #tpu.memory_space<vmem>>) attributes {dimension_semantics = [#tpu.dimension_semantics<parallel>], iteration_bounds = array<i64: 2>, scalar_prefetch = 0 : i64, scratch_operands = 0 : i64, tpu.core_type = #tpu.core_type<tc>, window_params = [{transform_indices = @transform_0, window_bounds = array<i64: 64, 3>}, {pipeline_mode = #tpu.pipeline_mode<synchronous>, transform_indices = @transform_1, window_bounds = array<i64: 3, 24>}, {pipeline_mode = #tpu.pipeline_mode<synchronous>, transform_indices = @transform_2, window_bounds = array<i64: 1, 24>}, {pipeline_mode = #tpu.pipeline_mode<synchronous>, transform_indices = @transform_3, window_bounds = array<i64: 24, 12>}, {transform_indices = @transform_4, window_bounds = array<i64: 64, 24>}, {transform_indices = @transform_5, window_bounds = array<i64: 64, 12>}]} {
    %c0 = arith.constant 0 : index
    %c0_0 = arith.constant 0 : index
    %0 = vector.load %arg1[%c0, %c0_0] : memref<64x3xf32, #tpu.memory_space<vmem>>, vector<64x3xf32>
    %c0_1 = arith.constant 0 : index
    %c0_2 = arith.constant 0 : index
    %1 = vector.load %arg2[%c0_1, %c0_2] : memref<3x24xf32, #tpu.memory_space<vmem>>, vector<3x24xf32>
    %cst = arith.constant dense<0.000000e+00> : vector<64x24xf32>
    %2 = tpu.matmul %0, %1, %cst {dimension_numbers = #tpu.dot_dimension_numbers<[1], [0], [0], [1], [0, 0, 1, 1], [], []>} : vector<64x3xf32>, vector<3x24xf32>, vector<64x24xf32> -> vector<64x24xf32>
    %c0_3 = arith.constant 0 : index
    %c0_4 = arith.constant 0 : index
    %3 = vector.load %arg3[%c0_3, %c0_4] : memref<1x24xf32, #tpu.memory_space<vmem>>, vector<1x24xf32>
    %4 = vector.broadcast %3 : vector<1x24xf32> to vector<64x24xf32>
    %5 = arith.addf %2, %4 : vector<64x24xf32>
    %c0_5 = arith.constant 0 : index
    %c0_6 = arith.constant 0 : index
    %6 = vector.load %arg5[%c0_5, %c0_6] : memref<64x24xf32, #tpu.memory_space<vmem>>, vector<64x24xf32>
    tpu.vector_store %arg5[%c0_5, %c0_6], %5 {strides = array<i32>} : memref<64x24xf32, #tpu.memory_space<vmem>>, vector<64x24xf32>,
    %c0_7 = arith.constant 0 : index
    %c0_8 = arith.constant 0 : index
    %7 = vector.load %arg4[%c0_7, %c0_8] : memref<24x12xf32, #tpu.memory_space<vmem>>, vector<24x12xf32>
    %cst_9 = arith.constant dense<0.000000e+00> : vector<64x12xf32>
    %8 = tpu.matmul %5, %7, %cst_9 {dimension_numbers = #tpu.dot_dimension_numbers<[1], [0], [0], [1], [0, 0, 1, 1], [], []>} : vector<64x24xf32>, vector<24x12xf32>, vector<64x12xf32> -> vector<64x12xf32>
    %c0_10 = arith.constant 0 : index
    %c0_11 = arith.constant 0 : index
    %9 = vector.load %arg6[%c0_10, %c0_11] : memref<64x12xf32, #tpu.memory_space<vmem>>, vector<64x12xf32>
    tpu.vector_store %arg6[%c0_10, %c0_11], %8 {strides = array<i32>} : memref<64x12xf32, #tpu.memory_space<vmem>>, vector<64x12xf32>,
    return
  }
  func.func @transform_0(%arg0: i32) -> (i32, i32) {
    %c0_i32 = arith.constant 0 : i32
    %c0_i32_0 = arith.constant 0 : i32
    return %arg0, %c0_i32 : i32, i32
  }
  func.func @transform_1(%arg0: i32) -> (i32, i32) {
    %c0_i32 = arith.constant 0 : i32
    %c0_i32_0 = arith.constant 0 : i32
    %c0_i32_1 = arith.constant 0 : i32
    return %c0_i32, %c0_i32_0 : i32, i32
  }
  func.func @transform_2(%arg0: i32) -> (i32, i32) {
    %c0_i32 = arith.constant 0 : i32
    %c0_i32_0 = arith.constant 0 : i32
    %c0_i32_1 = arith.constant 0 : i32
    return %c0_i32, %c0_i32_0 : i32, i32
  }
  func.func @transform_3(%arg0: i32) -> (i32, i32) {
    %c0_i32 = arith.constant 0 : i32
    %c0_i32_0 = arith.constant 0 : i32
    %c0_i32_1 = arith.constant 0 : i32
    return %c0_i32, %c0_i32_0 : i32, i32
  }
  func.func @transform_4(%arg0: i32) -> (i32, i32) {
    %c0_i32 = arith.constant 0 : i32
    %c0_i32_0 = arith.constant 0 : i32
    return %arg0, %c0_i32 : i32, i32
  }
  func.func @transform_5(%arg0: i32) -> (i32, i32) {
    %c0_i32 = arith.constant 0 : i32
    %c0_i32_0 = arith.constant 0 : i32
    return %arg0, %c0_i32 : i32, i32
  }
}

module attributes {stable_mosaic.version = 11 : i64} {
  func.func @_pdist_dup_kernel(%arg0: i32, %arg1: memref<1x64x24xf32, #tpu.memory_space<vmem>>, %arg2: memref<1x64x64xf32, #tpu.memory_space<vmem>>) attributes {dimension_semantics = [#tpu.dimension_semantics<parallel>], iteration_bounds = array<i64: 2>, scalar_prefetch = 0 : i64, scratch_operands = 0 : i64, tpu.core_type = #tpu.core_type<tc>, window_params = [{transform_indices = @transform_0, window_bounds = array<i64: 1, 64, 24>}, {transform_indices = @transform_1, window_bounds = array<i64: 1, 64, 64>}]} {
    %c0 = arith.constant 0 : index
    %c0_0 = arith.constant 0 : index
    %c0_1 = arith.constant 0 : index
    %0 = vector.load %arg1[%c0, %c0_0, %c0_1] : memref<1x64x24xf32, #tpu.memory_space<vmem>>, vector<1x64x24xf32>
    %1 = vector.shape_cast %0 : vector<1x64x24xf32> to vector<64x24xf32>
    %2 = arith.mulf %1, %1 : vector<64x24xf32>
    %cst = arith.constant dense<0.000000e+00> : vector<64xf32>
    %3 = vector.multi_reduction <add>, %2, %cst [1] : vector<64x24xf32> to vector<64xf32>
    %4 = vector.shape_cast %3 : vector<64xf32> to vector<64x1xf32>
    %5 = tpu.transpose %1, [1, 0] : vector<64x24xf32> -> vector<24x64xf32>
    %cst_2 = arith.constant dense<0.000000e+00> : vector<64x64xf32>
    %6 = tpu.matmul %1, %5, %cst_2 {dimension_numbers = #tpu.dot_dimension_numbers<[1], [0], [0], [1], [0, 0, 1, 1], [], []>} : vector<64x24xf32>, vector<24x64xf32>, vector<64x64xf32> -> vector<64x64xf32>
    %cst_3 = arith.constant 2.000000e+00 : f32
    %7 = vector.broadcast %cst_3 : f32 to vector<64x64xf32>
    %8 = arith.mulf %7, %6 : vector<64x64xf32>
    %9 = vector.broadcast %4 : vector<64x1xf32> to vector<64x64xf32>
    %10 = arith.subf %9, %8 : vector<64x64xf32>
    %11 = tpu.transpose %4, [1, 0] : vector<64x1xf32> -> vector<1x64xf32>
    %12 = vector.broadcast %11 : vector<1x64xf32> to vector<64x64xf32>
    %13 = arith.addf %10, %12 : vector<64x64xf32>
    %14 = tpu.iota {dimensions = array<i32: 0>} : vector<64x64xi32>
    %15 = tpu.iota {dimensions = array<i32: 1>} : vector<64x64xi32>
    %16 = arith.cmpi slt, %14, %15 : vector<64x64xi32>
    %cst_4 = arith.constant 9.99999971E-10 : f32
    %17 = vector.broadcast %cst_4 : f32 to vector<64x64xf32>
    %18 = arith.cmpf ole, %13, %17 : vector<64x64xf32>
    %19 = arith.andi %16, %18 : vector<64x64xi1>
    %cst_5 = arith.constant 1.000000e+00 : f32
    %cst_6 = arith.constant 0.000000e+00 : f32
    %20 = vector.broadcast %cst_5 : f32 to vector<64x64xf32>
    %21 = vector.broadcast %cst_6 : f32 to vector<64x64xf32>
    %22 = arith.select %19, %20, %21 : vector<64x64xi1>, vector<64x64xf32>
    %cst_7 = arith.constant dense<0xFF800000> : vector<64xf32>
    %23 = vector.multi_reduction <maximumf>, %22, %cst_7 [0] : vector<64x64xf32> to vector<64xf32>
    %cst_8 = arith.constant 0.000000e+00 : f32
    %24 = vector.broadcast %cst_8 : f32 to vector<64xf32>
    %25 = arith.cmpf ogt, %23, %24 : vector<64xf32>
    %26 = vector.shape_cast %25 : vector<64xi1> to vector<1x64xi1>
    %27 = arith.extui %26 : vector<1x64xi1> to vector<1x64xi32>
    %28 = arith.sitofp %27 : vector<1x64xi32> to vector<1x64xf32>
    %cst_9 = arith.constant 1.000000e+09 : f32
    %29 = vector.broadcast %cst_9 : f32 to vector<1x64xf32>
    %30 = arith.mulf %29, %28 : vector<1x64xf32>
    %31 = vector.broadcast %30 : vector<1x64xf32> to vector<64x64xf32>
    %32 = arith.addf %13, %31 : vector<64x64xf32>
    %c0_10 = arith.constant 0 : index
    %c0_11 = arith.constant 0 : index
    %c0_12 = arith.constant 0 : index
    %33 = vector.load %arg2[%c0_10, %c0_11, %c0_12] : memref<1x64x64xf32, #tpu.memory_space<vmem>>, vector<1x64x64xf32>
    %34 = vector.shape_cast %33 : vector<1x64x64xf32> to vector<64x64xf32>
    %35 = vector.shape_cast %32 : vector<64x64xf32> to vector<1x64x64xf32>
    tpu.vector_store %arg2[%c0_10, %c0_11, %c0_12], %35 {strides = array<i32>} : memref<1x64x64xf32, #tpu.memory_space<vmem>>, vector<1x64x64xf32>,
    return
  }
  func.func @transform_0(%arg0: i32) -> (i32, i32, i32) {
    %c0_i32 = arith.constant 0 : i32
    %c0_i32_0 = arith.constant 0 : i32
    %c0_i32_1 = arith.constant 0 : i32
    return %arg0, %c0_i32, %c0_i32_0 : i32, i32, i32
  }
  func.func @transform_1(%arg0: i32) -> (i32, i32, i32) {
    %c0_i32 = arith.constant 0 : i32
    %c0_i32_0 = arith.constant 0 : i32
    %c0_i32_1 = arith.constant 0 : i32
    return %arg0, %c0_i32, %c0_i32_0 : i32, i32, i32
  }
}

module attributes {stable_mosaic.version = 11 : i64} {
  func.func @_edge_kernel(%arg0: i32, %arg1: memref<64x24xf32, #tpu.memory_space<vmem>>, %arg2: memref<64x16x12xf32, #tpu.memory_space<vmem>>, %arg3: memref<24x36xf32, #tpu.memory_space<vmem>>, %arg4: memref<1x36xf32, #tpu.memory_space<vmem>>, %arg5: memref<12x24xf32, #tpu.memory_space<vmem>>, %arg6: memref<12x12xf32, #tpu.memory_space<vmem>>, %arg7: memref<64x60xf32, #tpu.memory_space<vmem>>) attributes {dimension_semantics = [#tpu.dimension_semantics<parallel>], iteration_bounds = array<i64: 2>, scalar_prefetch = 0 : i64, scratch_operands = 0 : i64, tpu.core_type = #tpu.core_type<tc>, window_params = [{transform_indices = @transform_0, window_bounds = array<i64: 64, 24>}, {transform_indices = @transform_1, window_bounds = array<i64: 64, 16, 12>}, {pipeline_mode = #tpu.pipeline_mode<synchronous>, transform_indices = @transform_2, window_bounds = array<i64: 24, 36>}, {pipeline_mode = #tpu.pipeline_mode<synchronous>, transform_indices = @transform_3, window_bounds = array<i64: 1, 36>}, {pipeline_mode = #tpu.pipeline_mode<synchronous>, transform_indices = @transform_4, window_bounds = array<i64: 12, 24>}, {pipeline_mode = #tpu.pipeline_mode<synchronous>, transform_indices = @transform_5, window_bounds = array<i64: 12, 12>}, {transform_indices = @transform_6, window_bounds = array<i64: 64, 60>}]} {
    %c0 = arith.constant 0 : index
    %c0_0 = arith.constant 0 : index
    %0 = vector.load %arg1[%c0, %c0_0] : memref<64x24xf32, #tpu.memory_space<vmem>>, vector<64x24xf32>
    %c0_1 = arith.constant 0 : index
    %c0_2 = arith.constant 0 : index
    %1 = vector.load %arg3[%c0_1, %c0_2] : memref<24x36xf32, #tpu.memory_space<vmem>>, vector<24x36xf32>
    %cst = arith.constant dense<0.000000e+00> : vector<64x36xf32>
    %2 = tpu.matmul %0, %1, %cst {dimension_numbers = #tpu.dot_dimension_numbers<[1], [0], [0], [1], [0, 0, 1, 1], [], []>} : vector<64x24xf32>, vector<24x36xf32>, vector<64x36xf32> -> vector<64x36xf32>
    %c0_3 = arith.constant 0 : index
    %c0_4 = arith.constant 0 : index
    %3 = vector.load %arg4[%c0_3, %c0_4] : memref<1x36xf32, #tpu.memory_space<vmem>>, vector<1x36xf32>
    %4 = vector.broadcast %3 : vector<1x36xf32> to vector<64x36xf32>
    %5 = arith.addf %2, %4 : vector<64x36xf32>
    %6 = vector.extract_strided_slice %5 {offsets = [0, 0], sizes = [64, 12], strides = [1, 1]} : vector<64x36xf32> to vector<64x12xf32>
    %7 = vector.shape_cast %6 : vector<64x12xf32> to vector<64x1x12xf32>
    %8 = vector.extract_strided_slice %5 {offsets = [0, 12], sizes = [64, 12], strides = [1, 1]} : vector<64x36xf32> to vector<64x12xf32>
    %9 = vector.shape_cast %8 : vector<64x12xf32> to vector<64x1x12xf32>
    %10 = vector.extract_strided_slice %5 {offsets = [0, 24], sizes = [64, 12], strides = [1, 1]} : vector<64x36xf32> to vector<64x12xf32>
    %11 = vector.shape_cast %10 : vector<64x12xf32> to vector<64x1x12xf32>
    %c0_5 = arith.constant 0 : index
    %c0_6 = arith.constant 0 : index
    %c0_7 = arith.constant 0 : index
    %12 = vector.load %arg2[%c0_5, %c0_6, %c0_7] : memref<64x16x12xf32, #tpu.memory_space<vmem>>, vector<64x16x12xf32>
    %13 = vector.broadcast %7 : vector<64x1x12xf32> to vector<64x16x12xf32>
    %14 = arith.addf %12, %13 : vector<64x16x12xf32>
    %cst_8 = arith.constant 0.000000e+00 : f32
    %15 = vector.broadcast %cst_8 : f32 to vector<64x16x12xf32>
    %16 = arith.maximumf %14, %15 : vector<64x16x12xf32>
    %17 = vector.shape_cast %16 : vector<64x16x12xf32> to vector<1024x12xf32>
    %c0_9 = arith.constant 0 : index
    %c0_10 = arith.constant 0 : index
    %18 = vector.load %arg5[%c0_9, %c0_10] : memref<12x24xf32, #tpu.memory_space<vmem>>, vector<12x24xf32>
    %cst_11 = arith.constant dense<0.000000e+00> : vector<1024x24xf32>
    %19 = tpu.matmul %17, %18, %cst_11 {dimension_numbers = #tpu.dot_dimension_numbers<[1], [0], [0], [1], [0, 0, 1, 1], [], []>} : vector<1024x12xf32>, vector<12x24xf32>, vector<1024x24xf32> -> vector<1024x24xf32>
    %20 = vector.shape_cast %19 : vector<1024x24xf32> to vector<64x16x24xf32>
    %21 = vector.extract_strided_slice %20 {offsets = [0, 0, 0], sizes = [64, 16, 12], strides = [1, 1, 1]} : vector<64x16x24xf32> to vector<64x16x12xf32>
    %22 = vector.broadcast %9 : vector<64x1x12xf32> to vector<64x16x12xf32>
    %23 = arith.addf %21, %22 : vector<64x16x12xf32>
    %cst_12 = arith.constant 0.000000e+00 : f32
    %24 = vector.broadcast %cst_12 : f32 to vector<64x16x12xf32>
    %25 = arith.maximumf %23, %24 : vector<64x16x12xf32>
    %26 = vector.shape_cast %25 : vector<64x16x12xf32> to vector<1024x12xf32>
    %c0_13 = arith.constant 0 : index
    %c0_14 = arith.constant 0 : index
    %27 = vector.load %arg6[%c0_13, %c0_14] : memref<12x12xf32, #tpu.memory_space<vmem>>, vector<12x12xf32>
    %cst_15 = arith.constant dense<0.000000e+00> : vector<1024x12xf32>
    %28 = tpu.matmul %26, %27, %cst_15 {dimension_numbers = #tpu.dot_dimension_numbers<[1], [0], [0], [1], [0, 0, 1, 1], [], []>} : vector<1024x12xf32>, vector<12x12xf32>, vector<1024x12xf32> -> vector<1024x12xf32>
    %29 = vector.shape_cast %28 : vector<1024x12xf32> to vector<64x16x12xf32>
    %30 = vector.extract_strided_slice %20 {offsets = [0, 0, 12], sizes = [64, 16, 12], strides = [1, 1, 1]} : vector<64x16x24xf32> to vector<64x16x12xf32>
    %31 = arith.addf %29, %30 : vector<64x16x12xf32>
    %32 = vector.broadcast %11 : vector<64x1x12xf32> to vector<64x16x12xf32>
    %33 = arith.addf %31, %32 : vector<64x16x12xf32>
    %cst_16 = arith.constant dense<0xFF800000> : vector<64x12xf32>
    %34 = vector.multi_reduction <maximumf>, %33, %cst_16 [1] : vector<64x16x12xf32> to vector<64x12xf32>
    %cst_17 = arith.constant dense<0xFF800000> : vector<64x12xf32>
    %35 = vector.multi_reduction <maximumf>, %25, %cst_17 [1] : vector<64x16x12xf32> to vector<64x12xf32>
    %cst_18 = arith.constant dense<0xFF800000> : vector<64x12xf32>
    %36 = vector.multi_reduction <maximumf>, %16, %cst_18 [1] : vector<64x16x12xf32> to vector<64x12xf32>
    %37 = tpu.concatenate %34, %35, %36, %0 in 1 : vector<64x12xf32>, vector<64x12xf32>, vector<64x12xf32>, vector<64x24xf32> -> vector<64x60xf32>
    %c0_19 = arith.constant 0 : index
    %c0_20 = arith.constant 0 : index
    %38 = vector.load %arg7[%c0_19, %c0_20] : memref<64x60xf32, #tpu.memory_space<vmem>>, vector<64x60xf32>
    tpu.vector_store %arg7[%c0_19, %c0_20], %37 {strides = array<i32>} : memref<64x60xf32, #tpu.memory_space<vmem>>, vector<64x60xf32>,
    return
  }
  func.func @transform_0(%arg0: i32) -> (i32, i32) {
    %c0_i32 = arith.constant 0 : i32
    %c0_i32_0 = arith.constant 0 : i32
    return %arg0, %c0_i32 : i32, i32
  }
  func.func @transform_1(%arg0: i32) -> (i32, i32, i32) {
    %c0_i32 = arith.constant 0 : i32
    %c0_i32_0 = arith.constant 0 : i32
    %c0_i32_1 = arith.constant 0 : i32
    return %arg0, %c0_i32, %c0_i32_0 : i32, i32, i32
  }
  func.func @transform_2(%arg0: i32) -> (i32, i32) {
    %c0_i32 = arith.constant 0 : i32
    %c0_i32_0 = arith.constant 0 : i32
    %c0_i32_1 = arith.constant 0 : i32
    return %c0_i32, %c0_i32_0 : i32, i32
  }
  func.func @transform_3(%arg0: i32) -> (i32, i32) {
    %c0_i32 = arith.constant 0 : i32
    %c0_i32_0 = arith.constant 0 : i32
    %c0_i32_1 = arith.constant 0 : i32
    return %c0_i32, %c0_i32_0 : i32, i32
  }
  func.func @transform_4(%arg0: i32) -> (i32, i32) {
    %c0_i32 = arith.constant 0 : i32
    %c0_i32_0 = arith.constant 0 : i32
    %c0_i32_1 = arith.constant 0 : i32
    return %c0_i32, %c0_i32_0 : i32, i32
  }
  func.func @transform_5(%arg0: i32) -> (i32, i32) {
    %c0_i32 = arith.constant 0 : i32
    %c0_i32_0 = arith.constant 0 : i32
    %c0_i32_1 = arith.constant 0 : i32
    return %c0_i32, %c0_i32_0 : i32, i32
  }
  func.func @transform_6(%arg0: i32) -> (i32, i32) {
    %c0_i32 = arith.constant 0 : i32
    %c0_i32_0 = arith.constant 0 : i32
    return %arg0, %c0_i32 : i32, i32
  }
}

module attributes {stable_mosaic.version = 11 : i64} {
  func.func @_linear_proj_kernel(%arg0: i32, %arg1: memref<64x60xf32, #tpu.memory_space<vmem>>, %arg2: memref<64x24xf32, #tpu.memory_space<vmem>>, %arg3: memref<60x24xf32, #tpu.memory_space<vmem>>, %arg4: memref<24x24xf32, #tpu.memory_space<vmem>>, %arg5: memref<1x24xf32, #tpu.memory_space<vmem>>, %arg6: memref<24x12xf32, #tpu.memory_space<vmem>>, %arg7: memref<64x24xf32, #tpu.memory_space<vmem>>, %arg8: memref<64x12xf32, #tpu.memory_space<vmem>>) attributes {dimension_semantics = [#tpu.dimension_semantics<parallel>], iteration_bounds = array<i64: 2>, scalar_prefetch = 0 : i64, scratch_operands = 0 : i64, tpu.core_type = #tpu.core_type<tc>, window_params = [{transform_indices = @transform_0, window_bounds = array<i64: 64, 60>}, {transform_indices = @transform_1, window_bounds = array<i64: 64, 24>}, {pipeline_mode = #tpu.pipeline_mode<synchronous>, transform_indices = @transform_2, window_bounds = array<i64: 60, 24>}, {pipeline_mode = #tpu.pipeline_mode<synchronous>, transform_indices = @transform_3, window_bounds = array<i64: 24, 24>}, {pipeline_mode = #tpu.pipeline_mode<synchronous>, transform_indices = @transform_4, window_bounds = array<i64: 1, 24>}, {pipeline_mode = #tpu.pipeline_mode<synchronous>, transform_indices = @transform_5, window_bounds = array<i64: 24, 12>}, {transform_indices = @transform_6, window_bounds = array<i64: 64, 24>}, {transform_indices = @transform_7, window_bounds = array<i64: 64, 12>}]} {
    %c0 = arith.constant 0 : index
    %c0_0 = arith.constant 0 : index
    %0 = vector.load %arg1[%c0, %c0_0] : memref<64x60xf32, #tpu.memory_space<vmem>>, vector<64x60xf32>
    %c0_1 = arith.constant 0 : index
    %c0_2 = arith.constant 0 : index
    %1 = vector.load %arg3[%c0_1, %c0_2] : memref<60x24xf32, #tpu.memory_space<vmem>>, vector<60x24xf32>
    %cst = arith.constant dense<0.000000e+00> : vector<64x24xf32>
    %2 = tpu.matmul %0, %1, %cst {dimension_numbers = #tpu.dot_dimension_numbers<[1], [0], [0], [1], [0, 0, 1, 1], [], []>} : vector<64x60xf32>, vector<60x24xf32>, vector<64x24xf32> -> vector<64x24xf32>
    %c0_3 = arith.constant 0 : index
    %c0_4 = arith.constant 0 : index
    %3 = vector.load %arg2[%c0_3, %c0_4] : memref<64x24xf32, #tpu.memory_space<vmem>>, vector<64x24xf32>
    %c0_5 = arith.constant 0 : index
    %c0_6 = arith.constant 0 : index
    %4 = vector.load %arg4[%c0_5, %c0_6] : memref<24x24xf32, #tpu.memory_space<vmem>>, vector<24x24xf32>
    %cst_7 = arith.constant dense<0.000000e+00> : vector<64x24xf32>
    %5 = tpu.matmul %3, %4, %cst_7 {dimension_numbers = #tpu.dot_dimension_numbers<[1], [0], [0], [1], [0, 0, 1, 1], [], []>} : vector<64x24xf32>, vector<24x24xf32>, vector<64x24xf32> -> vector<64x24xf32>
    %6 = arith.addf %2, %5 : vector<64x24xf32>
    %c0_8 = arith.constant 0 : index
    %c0_9 = arith.constant 0 : index
    %7 = vector.load %arg5[%c0_8, %c0_9] : memref<1x24xf32, #tpu.memory_space<vmem>>, vector<1x24xf32>
    %8 = vector.broadcast %7 : vector<1x24xf32> to vector<64x24xf32>
    %9 = arith.addf %6, %8 : vector<64x24xf32>
    %cst_10 = arith.constant 0.000000e+00 : f32
    %10 = vector.broadcast %cst_10 : f32 to vector<64x24xf32>
    %11 = arith.maximumf %9, %10 : vector<64x24xf32>
    %c0_11 = arith.constant 0 : index
    %c0_12 = arith.constant 0 : index
    %12 = vector.load %arg7[%c0_11, %c0_12] : memref<64x24xf32, #tpu.memory_space<vmem>>, vector<64x24xf32>
    tpu.vector_store %arg7[%c0_11, %c0_12], %11 {strides = array<i32>} : memref<64x24xf32, #tpu.memory_space<vmem>>, vector<64x24xf32>,
    %c0_13 = arith.constant 0 : index
    %c0_14 = arith.constant 0 : index
    %13 = vector.load %arg6[%c0_13, %c0_14] : memref<24x12xf32, #tpu.memory_space<vmem>>, vector<24x12xf32>
    %cst_15 = arith.constant dense<0.000000e+00> : vector<64x12xf32>
    %14 = tpu.matmul %11, %13, %cst_15 {dimension_numbers = #tpu.dot_dimension_numbers<[1], [0], [0], [1], [0, 0, 1, 1], [], []>} : vector<64x24xf32>, vector<24x12xf32>, vector<64x12xf32> -> vector<64x12xf32>
    %c0_16 = arith.constant 0 : index
    %c0_17 = arith.constant 0 : index
    %15 = vector.load %arg8[%c0_16, %c0_17] : memref<64x12xf32, #tpu.memory_space<vmem>>, vector<64x12xf32>
    tpu.vector_store %arg8[%c0_16, %c0_17], %14 {strides = array<i32>} : memref<64x12xf32, #tpu.memory_space<vmem>>, vector<64x12xf32>,
    return
  }
  func.func @transform_0(%arg0: i32) -> (i32, i32) {
    %c0_i32 = arith.constant 0 : i32
    %c0_i32_0 = arith.constant 0 : i32
    return %arg0, %c0_i32 : i32, i32
  }
  func.func @transform_1(%arg0: i32) -> (i32, i32) {
    %c0_i32 = arith.constant 0 : i32
    %c0_i32_0 = arith.constant 0 : i32
    return %arg0, %c0_i32 : i32, i32
  }
  func.func @transform_2(%arg0: i32) -> (i32, i32) {
    %c0_i32 = arith.constant 0 : i32
    %c0_i32_0 = arith.constant 0 : i32
    %c0_i32_1 = arith.constant 0 : i32
    return %c0_i32, %c0_i32_0 : i32, i32
  }
  func.func @transform_3(%arg0: i32) -> (i32, i32) {
    %c0_i32 = arith.constant 0 : i32
    %c0_i32_0 = arith.constant 0 : i32
    %c0_i32_1 = arith.constant 0 : i32
    return %c0_i32, %c0_i32_0 : i32, i32
  }
  func.func @transform_4(%arg0: i32) -> (i32, i32) {
    %c0_i32 = arith.constant 0 : i32
    %c0_i32_0 = arith.constant 0 : i32
    %c0_i32_1 = arith.constant 0 : i32
    return %c0_i32, %c0_i32_0 : i32, i32
  }
  func.func @transform_5(%arg0: i32) -> (i32, i32) {
    %c0_i32 = arith.constant 0 : i32
    %c0_i32_0 = arith.constant 0 : i32
    %c0_i32_1 = arith.constant 0 : i32
    return %c0_i32, %c0_i32_0 : i32, i32
  }
  func.func @transform_6(%arg0: i32) -> (i32, i32) {
    %c0_i32 = arith.constant 0 : i32
    %c0_i32_0 = arith.constant 0 : i32
    return %arg0, %c0_i32 : i32, i32
  }
  func.func @transform_7(%arg0: i32) -> (i32, i32) {
    %c0_i32 = arith.constant 0 : i32
    %c0_i32_0 = arith.constant 0 : i32
    return %arg0, %c0_i32 : i32, i32
  }
}

module attributes {stable_mosaic.version = 11 : i64} {
  func.func @_linear_proj_kernel(%arg0: i32, %arg1: memref<64x60xf32, #tpu.memory_space<vmem>>, %arg2: memref<64x60xf32, #tpu.memory_space<vmem>>, %arg3: memref<64x24xf32, #tpu.memory_space<vmem>>, %arg4: memref<60x24xf32, #tpu.memory_space<vmem>>, %arg5: memref<60x24xf32, #tpu.memory_space<vmem>>, %arg6: memref<24x24xf32, #tpu.memory_space<vmem>>, %arg7: memref<1x24xf32, #tpu.memory_space<vmem>>, %arg8: memref<24x12xf32, #tpu.memory_space<vmem>>, %arg9: memref<64x24xf32, #tpu.memory_space<vmem>>, %arg10: memref<64x12xf32, #tpu.memory_space<vmem>>) attributes {dimension_semantics = [#tpu.dimension_semantics<parallel>], iteration_bounds = array<i64: 2>, scalar_prefetch = 0 : i64, scratch_operands = 0 : i64, tpu.core_type = #tpu.core_type<tc>, window_params = [{transform_indices = @transform_0, window_bounds = array<i64: 64, 60>}, {transform_indices = @transform_1, window_bounds = array<i64: 64, 60>}, {transform_indices = @transform_2, window_bounds = array<i64: 64, 24>}, {pipeline_mode = #tpu.pipeline_mode<synchronous>, transform_indices = @transform_3, window_bounds = array<i64: 60, 24>}, {pipeline_mode = #tpu.pipeline_mode<synchronous>, transform_indices = @transform_4, window_bounds = array<i64: 60, 24>}, {pipeline_mode = #tpu.pipeline_mode<synchronous>, transform_indices = @transform_5, window_bounds = array<i64: 24, 24>}, {pipeline_mode = #tpu.pipeline_mode<synchronous>, transform_indices = @transform_6, window_bounds = array<i64: 1, 24>}, {pipeline_mode = #tpu.pipeline_mode<synchronous>, transform_indices = @transform_7, window_bounds = array<i64: 24, 12>}, {transform_indices = @transform_8, window_bounds = array<i64: 64, 24>}, {transform_indices = @transform_9, window_bounds = array<i64: 64, 12>}]} {
    %c0 = arith.constant 0 : index
    %c0_0 = arith.constant 0 : index
    %0 = vector.load %arg1[%c0, %c0_0] : memref<64x60xf32, #tpu.memory_space<vmem>>, vector<64x60xf32>
    %c0_1 = arith.constant 0 : index
    %c0_2 = arith.constant 0 : index
    %1 = vector.load %arg4[%c0_1, %c0_2] : memref<60x24xf32, #tpu.memory_space<vmem>>, vector<60x24xf32>
    %cst = arith.constant dense<0.000000e+00> : vector<64x24xf32>
    %2 = tpu.matmul %0, %1, %cst {dimension_numbers = #tpu.dot_dimension_numbers<[1], [0], [0], [1], [0, 0, 1, 1], [], []>} : vector<64x60xf32>, vector<60x24xf32>, vector<64x24xf32> -> vector<64x24xf32>
    %c0_3 = arith.constant 0 : index
    %c0_4 = arith.constant 0 : index
    %3 = vector.load %arg2[%c0_3, %c0_4] : memref<64x60xf32, #tpu.memory_space<vmem>>, vector<64x60xf32>
    %c0_5 = arith.constant 0 : index
    %c0_6 = arith.constant 0 : index
    %4 = vector.load %arg5[%c0_5, %c0_6] : memref<60x24xf32, #tpu.memory_space<vmem>>, vector<60x24xf32>
    %cst_7 = arith.constant dense<0.000000e+00> : vector<64x24xf32>
    %5 = tpu.matmul %3, %4, %cst_7 {dimension_numbers = #tpu.dot_dimension_numbers<[1], [0], [0], [1], [0, 0, 1, 1], [], []>} : vector<64x60xf32>, vector<60x24xf32>, vector<64x24xf32> -> vector<64x24xf32>
    %6 = arith.addf %2, %5 : vector<64x24xf32>
    %c0_8 = arith.constant 0 : index
    %c0_9 = arith.constant 0 : index
    %7 = vector.load %arg3[%c0_8, %c0_9] : memref<64x24xf32, #tpu.memory_space<vmem>>, vector<64x24xf32>
    %c0_10 = arith.constant 0 : index
    %c0_11 = arith.constant 0 : index
    %8 = vector.load %arg6[%c0_10, %c0_11] : memref<24x24xf32, #tpu.memory_space<vmem>>, vector<24x24xf32>
    %cst_12 = arith.constant dense<0.000000e+00> : vector<64x24xf32>
    %9 = tpu.matmul %7, %8, %cst_12 {dimension_numbers = #tpu.dot_dimension_numbers<[1], [0], [0], [1], [0, 0, 1, 1], [], []>} : vector<64x24xf32>, vector<24x24xf32>, vector<64x24xf32> -> vector<64x24xf32>
    %10 = arith.addf %6, %9 : vector<64x24xf32>
    %c0_13 = arith.constant 0 : index
    %c0_14 = arith.constant 0 : index
    %11 = vector.load %arg7[%c0_13, %c0_14] : memref<1x24xf32, #tpu.memory_space<vmem>>, vector<1x24xf32>
    %12 = vector.broadcast %11 : vector<1x24xf32> to vector<64x24xf32>
    %13 = arith.addf %10, %12 : vector<64x24xf32>
    %cst_15 = arith.constant 0.000000e+00 : f32
    %14 = vector.broadcast %cst_15 : f32 to vector<64x24xf32>
    %15 = arith.maximumf %13, %14 : vector<64x24xf32>
    %c0_16 = arith.constant 0 : index
    %c0_17 = arith.constant 0 : index
    %16 = vector.load %arg9[%c0_16, %c0_17] : memref<64x24xf32, #tpu.memory_space<vmem>>, vector<64x24xf32>
    tpu.vector_store %arg9[%c0_16, %c0_17], %15 {strides = array<i32>} : memref<64x24xf32, #tpu.memory_space<vmem>>, vector<64x24xf32>,
    %c0_18 = arith.constant 0 : index
    %c0_19 = arith.constant 0 : index
    %17 = vector.load %arg8[%c0_18, %c0_19] : memref<24x12xf32, #tpu.memory_space<vmem>>, vector<24x12xf32>
    %cst_20 = arith.constant dense<0.000000e+00> : vector<64x12xf32>
    %18 = tpu.matmul %15, %17, %cst_20 {dimension_numbers = #tpu.dot_dimension_numbers<[1], [0], [0], [1], [0, 0, 1, 1], [], []>} : vector<64x24xf32>, vector<24x12xf32>, vector<64x12xf32> -> vector<64x12xf32>
    %c0_21 = arith.constant 0 : index
    %c0_22 = arith.constant 0 : index
    %19 = vector.load %arg10[%c0_21, %c0_22] : memref<64x12xf32, #tpu.memory_space<vmem>>, vector<64x12xf32>
    tpu.vector_store %arg10[%c0_21, %c0_22], %18 {strides = array<i32>} : memref<64x12xf32, #tpu.memory_space<vmem>>, vector<64x12xf32>,
    return
  }
  func.func @transform_0(%arg0: i32) -> (i32, i32) {
    %c0_i32 = arith.constant 0 : i32
    %c0_i32_0 = arith.constant 0 : i32
    return %arg0, %c0_i32 : i32, i32
  }
  func.func @transform_1(%arg0: i32) -> (i32, i32) {
    %c0_i32 = arith.constant 0 : i32
    %c0_i32_0 = arith.constant 0 : i32
    return %arg0, %c0_i32 : i32, i32
  }
  func.func @transform_2(%arg0: i32) -> (i32, i32) {
    %c0_i32 = arith.constant 0 : i32
    %c0_i32_0 = arith.constant 0 : i32
    return %arg0, %c0_i32 : i32, i32
  }
  func.func @transform_3(%arg0: i32) -> (i32, i32) {
    %c0_i32 = arith.constant 0 : i32
    %c0_i32_0 = arith.constant 0 : i32
    %c0_i32_1 = arith.constant 0 : i32
    return %c0_i32, %c0_i32_0 : i32, i32
  }
  func.func @transform_4(%arg0: i32) -> (i32, i32) {
    %c0_i32 = arith.constant 0 : i32
    %c0_i32_0 = arith.constant 0 : i32
    %c0_i32_1 = arith.constant 0 : i32
    return %c0_i32, %c0_i32_0 : i32, i32
  }
  func.func @transform_5(%arg0: i32) -> (i32, i32) {
    %c0_i32 = arith.constant 0 : i32
    %c0_i32_0 = arith.constant 0 : i32
    %c0_i32_1 = arith.constant 0 : i32
    return %c0_i32, %c0_i32_0 : i32, i32
  }
  func.func @transform_6(%arg0: i32) -> (i32, i32) {
    %c0_i32 = arith.constant 0 : i32
    %c0_i32_0 = arith.constant 0 : i32
    %c0_i32_1 = arith.constant 0 : i32
    return %c0_i32, %c0_i32_0 : i32, i32
  }
  func.func @transform_7(%arg0: i32) -> (i32, i32) {
    %c0_i32 = arith.constant 0 : i32
    %c0_i32_0 = arith.constant 0 : i32
    %c0_i32_1 = arith.constant 0 : i32
    return %c0_i32, %c0_i32_0 : i32, i32
  }
  func.func @transform_8(%arg0: i32) -> (i32, i32) {
    %c0_i32 = arith.constant 0 : i32
    %c0_i32_0 = arith.constant 0 : i32
    return %arg0, %c0_i32 : i32, i32
  }
  func.func @transform_9(%arg0: i32) -> (i32, i32) {
    %c0_i32 = arith.constant 0 : i32
    %c0_i32_0 = arith.constant 0 : i32
    return %arg0, %c0_i32 : i32, i32
  }
}

module attributes {stable_mosaic.version = 11 : i64} {
  func.func @_linear_proj_kernel(%arg0: i32, %arg1: memref<64x60xf32, #tpu.memory_space<vmem>>, %arg2: memref<64x60xf32, #tpu.memory_space<vmem>>, %arg3: memref<64x60xf32, #tpu.memory_space<vmem>>, %arg4: memref<64x24xf32, #tpu.memory_space<vmem>>, %arg5: memref<60x24xf32, #tpu.memory_space<vmem>>, %arg6: memref<60x24xf32, #tpu.memory_space<vmem>>, %arg7: memref<60x24xf32, #tpu.memory_space<vmem>>, %arg8: memref<24x24xf32, #tpu.memory_space<vmem>>, %arg9: memref<1x24xf32, #tpu.memory_space<vmem>>, %arg10: memref<24x12xf32, #tpu.memory_space<vmem>>, %arg11: memref<64x24xf32, #tpu.memory_space<vmem>>, %arg12: memref<64x12xf32, #tpu.memory_space<vmem>>) attributes {dimension_semantics = [#tpu.dimension_semantics<parallel>], iteration_bounds = array<i64: 2>, scalar_prefetch = 0 : i64, scratch_operands = 0 : i64, tpu.core_type = #tpu.core_type<tc>, window_params = [{transform_indices = @transform_0, window_bounds = array<i64: 64, 60>}, {transform_indices = @transform_1, window_bounds = array<i64: 64, 60>}, {transform_indices = @transform_2, window_bounds = array<i64: 64, 60>}, {transform_indices = @transform_3, window_bounds = array<i64: 64, 24>}, {pipeline_mode = #tpu.pipeline_mode<synchronous>, transform_indices = @transform_4, window_bounds = array<i64: 60, 24>}, {pipeline_mode = #tpu.pipeline_mode<synchronous>, transform_indices = @transform_5, window_bounds = array<i64: 60, 24>}, {pipeline_mode = #tpu.pipeline_mode<synchronous>, transform_indices = @transform_6, window_bounds = array<i64: 60, 24>}, {pipeline_mode = #tpu.pipeline_mode<synchronous>, transform_indices = @transform_7, window_bounds = array<i64: 24, 24>}, {pipeline_mode = #tpu.pipeline_mode<synchronous>, transform_indices = @transform_8, window_bounds = array<i64: 1, 24>}, {pipeline_mode = #tpu.pipeline_mode<synchronous>, transform_indices = @transform_9, window_bounds = array<i64: 24, 12>}, {transform_indices = @transform_10, window_bounds = array<i64: 64, 24>}, {transform_indices = @transform_11, window_bounds = array<i64: 64, 12>}]} {
    %c0 = arith.constant 0 : index
    %c0_0 = arith.constant 0 : index
    %0 = vector.load %arg1[%c0, %c0_0] : memref<64x60xf32, #tpu.memory_space<vmem>>, vector<64x60xf32>
    %c0_1 = arith.constant 0 : index
    %c0_2 = arith.constant 0 : index
    %1 = vector.load %arg5[%c0_1, %c0_2] : memref<60x24xf32, #tpu.memory_space<vmem>>, vector<60x24xf32>
    %cst = arith.constant dense<0.000000e+00> : vector<64x24xf32>
    %2 = tpu.matmul %0, %1, %cst {dimension_numbers = #tpu.dot_dimension_numbers<[1], [0], [0], [1], [0, 0, 1, 1], [], []>} : vector<64x60xf32>, vector<60x24xf32>, vector<64x24xf32> -> vector<64x24xf32>
    %c0_3 = arith.constant 0 : index
    %c0_4 = arith.constant 0 : index
    %3 = vector.load %arg2[%c0_3, %c0_4] : memref<64x60xf32, #tpu.memory_space<vmem>>, vector<64x60xf32>
    %c0_5 = arith.constant 0 : index
    %c0_6 = arith.constant 0 : index
    %4 = vector.load %arg6[%c0_5, %c0_6] : memref<60x24xf32, #tpu.memory_space<vmem>>, vector<60x24xf32>
    %cst_7 = arith.constant dense<0.000000e+00> : vector<64x24xf32>
    %5 = tpu.matmul %3, %4, %cst_7 {dimension_numbers = #tpu.dot_dimension_numbers<[1], [0], [0], [1], [0, 0, 1, 1], [], []>} : vector<64x60xf32>, vector<60x24xf32>, vector<64x24xf32> -> vector<64x24xf32>
    %6 = arith.addf %2, %5 : vector<64x24xf32>
    %c0_8 = arith.constant 0 : index
    %c0_9 = arith.constant 0 : index
    %7 = vector.load %arg3[%c0_8, %c0_9] : memref<64x60xf32, #tpu.memory_space<vmem>>, vector<64x60xf32>
    %c0_10 = arith.constant 0 : index
    %c0_11 = arith.constant 0 : index
    %8 = vector.load %arg7[%c0_10, %c0_11] : memref<60x24xf32, #tpu.memory_space<vmem>>, vector<60x24xf32>
    %cst_12 = arith.constant dense<0.000000e+00> : vector<64x24xf32>
    %9 = tpu.matmul %7, %8, %cst_12 {dimension_numbers = #tpu.dot_dimension_numbers<[1], [0], [0], [1], [0, 0, 1, 1], [], []>} : vector<64x60xf32>, vector<60x24xf32>, vector<64x24xf32> -> vector<64x24xf32>
    %10 = arith.addf %6, %9 : vector<64x24xf32>
    %c0_13 = arith.constant 0 : index
    %c0_14 = arith.constant 0 : index
    %11 = vector.load %arg4[%c0_13, %c0_14] : memref<64x24xf32, #tpu.memory_space<vmem>>, vector<64x24xf32>
    %c0_15 = arith.constant 0 : index
    %c0_16 = arith.constant 0 : index
    %12 = vector.load %arg8[%c0_15, %c0_16] : memref<24x24xf32, #tpu.memory_space<vmem>>, vector<24x24xf32>
    %cst_17 = arith.constant dense<0.000000e+00> : vector<64x24xf32>
    %13 = tpu.matmul %11, %12, %cst_17 {dimension_numbers = #tpu.dot_dimension_numbers<[1], [0], [0], [1], [0, 0, 1, 1], [], []>} : vector<64x24xf32>, vector<24x24xf32>, vector<64x24xf32> -> vector<64x24xf32>
    %14 = arith.addf %10, %13 : vector<64x24xf32>
    %c0_18 = arith.constant 0 : index
    %c0_19 = arith.constant 0 : index
    %15 = vector.load %arg9[%c0_18, %c0_19] : memref<1x24xf32, #tpu.memory_space<vmem>>, vector<1x24xf32>
    %16 = vector.broadcast %15 : vector<1x24xf32> to vector<64x24xf32>
    %17 = arith.addf %14, %16 : vector<64x24xf32>
    %cst_20 = arith.constant 0.000000e+00 : f32
    %18 = vector.broadcast %cst_20 : f32 to vector<64x24xf32>
    %19 = arith.maximumf %17, %18 : vector<64x24xf32>
    %c0_21 = arith.constant 0 : index
    %c0_22 = arith.constant 0 : index
    %20 = vector.load %arg11[%c0_21, %c0_22] : memref<64x24xf32, #tpu.memory_space<vmem>>, vector<64x24xf32>
    tpu.vector_store %arg11[%c0_21, %c0_22], %19 {strides = array<i32>} : memref<64x24xf32, #tpu.memory_space<vmem>>, vector<64x24xf32>,
    %c0_23 = arith.constant 0 : index
    %c0_24 = arith.constant 0 : index
    %21 = vector.load %arg10[%c0_23, %c0_24] : memref<24x12xf32, #tpu.memory_space<vmem>>, vector<24x12xf32>
    %cst_25 = arith.constant dense<0.000000e+00> : vector<64x12xf32>
    %22 = tpu.matmul %19, %21, %cst_25 {dimension_numbers = #tpu.dot_dimension_numbers<[1], [0], [0], [1], [0, 0, 1, 1], [], []>} : vector<64x24xf32>, vector<24x12xf32>, vector<64x12xf32> -> vector<64x12xf32>
    %c0_26 = arith.constant 0 : index
    %c0_27 = arith.constant 0 : index
    %23 = vector.load %arg12[%c0_26, %c0_27] : memref<64x12xf32, #tpu.memory_space<vmem>>, vector<64x12xf32>
    tpu.vector_store %arg12[%c0_26, %c0_27], %22 {strides = array<i32>} : memref<64x12xf32, #tpu.memory_space<vmem>>, vector<64x12xf32>,
    return
  }
  func.func @transform_0(%arg0: i32) -> (i32, i32) {
    %c0_i32 = arith.constant 0 : i32
    %c0_i32_0 = arith.constant 0 : i32
    return %arg0, %c0_i32 : i32, i32
  }
  func.func @transform_1(%arg0: i32) -> (i32, i32) {
    %c0_i32 = arith.constant 0 : i32
    %c0_i32_0 = arith.constant 0 : i32
    return %arg0, %c0_i32 : i32, i32
  }
  func.func @transform_2(%arg0: i32) -> (i32, i32) {
    %c0_i32 = arith.constant 0 : i32
    %c0_i32_0 = arith.constant 0 : i32
    return %arg0, %c0_i32 : i32, i32
  }
  func.func @transform_3(%arg0: i32) -> (i32, i32) {
    %c0_i32 = arith.constant 0 : i32
    %c0_i32_0 = arith.constant 0 : i32
    return %arg0, %c0_i32 : i32, i32
  }
  func.func @transform_4(%arg0: i32) -> (i32, i32) {
    %c0_i32 = arith.constant 0 : i32
    %c0_i32_0 = arith.constant 0 : i32
    %c0_i32_1 = arith.constant 0 : i32
    return %c0_i32, %c0_i32_0 : i32, i32
  }
  func.func @transform_5(%arg0: i32) -> (i32, i32) {
    %c0_i32 = arith.constant 0 : i32
    %c0_i32_0 = arith.constant 0 : i32
    %c0_i32_1 = arith.constant 0 : i32
    return %c0_i32, %c0_i32_0 : i32, i32
  }
  func.func @transform_6(%arg0: i32) -> (i32, i32) {
    %c0_i32 = arith.constant 0 : i32
    %c0_i32_0 = arith.constant 0 : i32
    %c0_i32_1 = arith.constant 0 : i32
    return %c0_i32, %c0_i32_0 : i32, i32
  }
  func.func @transform_7(%arg0: i32) -> (i32, i32) {
    %c0_i32 = arith.constant 0 : i32
    %c0_i32_0 = arith.constant 0 : i32
    %c0_i32_1 = arith.constant 0 : i32
    return %c0_i32, %c0_i32_0 : i32, i32
  }
  func.func @transform_8(%arg0: i32) -> (i32, i32) {
    %c0_i32 = arith.constant 0 : i32
    %c0_i32_0 = arith.constant 0 : i32
    %c0_i32_1 = arith.constant 0 : i32
    return %c0_i32, %c0_i32_0 : i32, i32
  }
  func.func @transform_9(%arg0: i32) -> (i32, i32) {
    %c0_i32 = arith.constant 0 : i32
    %c0_i32_0 = arith.constant 0 : i32
    %c0_i32_1 = arith.constant 0 : i32
    return %c0_i32, %c0_i32_0 : i32, i32
  }
  func.func @transform_10(%arg0: i32) -> (i32, i32) {
    %c0_i32 = arith.constant 0 : i32
    %c0_i32_0 = arith.constant 0 : i32
    return %arg0, %c0_i32 : i32, i32
  }
  func.func @transform_11(%arg0: i32) -> (i32, i32) {
    %c0_i32 = arith.constant 0 : i32
    %c0_i32_0 = arith.constant 0 : i32
    return %arg0, %c0_i32 : i32, i32
  }
}

</mosaic_0001>

<bundles_post_ra>
// kernel: neg.4
= control target key start
LH: loop header
LB: loop body
LE: loop exit
PB: predicated region body
PF: predicated region fallthrough
CT: control target
= control target key end

     0   :  { %s264_s0 = inlined_call_operand.vmem [shape: f32[2,64,64], index: 0, kind: input, shape index: {}]   ;;  %s265_s1 = inlined_call_operand.vmem [shape: f32[2,64,64], index: 1, kind: output, shape index: {}]  }
   0x1   :  { %v2_v0 = vld [vmem:[%s264_s0] sm:$0xff]  ;;  %v130_v2 = vld [vmem:[%s264_s0 + $0x8] sm:$0xff]  ;;  %v134_v7 = vld [vmem:[%s264_s0 + $0x10] sm:$0xff] }
   0x2   :  { %v128_v1 = vld [vmem:[%s264_s0 + $0x40] sm:$0xff]  ;;  %v5_v3 = vxor.u32 2147483648, %v2_v0  ;;  %v20_v5 = vxor.u32 2147483648, %v130_v2  ;;  %v132_v6 = vld [vmem:[%s264_s0 + $0x48] sm:$0xff]  ;;  %v136_v8 = vld [vmem:[%s264_s0 + $0x50] sm:$0xff]  ;;  %v36_v10 = vxor.u32 2147483648, %v134_v7 }
   0x3   :  { %v12_v4 = vxor.u32 2147483648, %v128_v1  ;;  %v28_v9 = vxor.u32 2147483648, %v132_v6  ;;  %v44_v11 = vxor.u32 2147483648, %v136_v8  ;;  %v138_v12 = vld [vmem:[%s264_s0 + $0x18] sm:$0xff]  ;;  %v142_v14 = vld [vmem:[%s264_s0 + $0x20] sm:$0xff]  ;;  %v146_v19 = vld [vmem:[%s264_s0 + $0x28] sm:$0xff] }
   0x4   :  { %v140_v13 = vld [vmem:[%s264_s0 + $0x58] sm:$0xff]  ;;  %7 = vst [vmem:[%s265_s1] sm:$0xff] %v5_v3  ;;  %131 = vst [vmem:[%s265_s1 + $0x8] sm:$0xff] %v20_v5  ;;  %v52_v15 = vxor.u32 2147483648, %v138_v12  ;;  %v68_v17 = vxor.u32 2147483648, %v142_v14  ;;  %v144_v18 = vld [vmem:[%s264_s0 + $0x60] sm:$0xff]  ;;  %v84_v22 = vxor.u32 2147483648, %v146_v19 }
   0x5   :  { %129 = vst [vmem:[%s265_s1 + $0x40] sm:$0xff] %v12_v4  ;;  %v60_v16 = vxor.u32 2147483648, %v140_v13  ;;  %v148_v20 = vld [vmem:[%s264_s0 + $0x68] sm:$0xff]  ;;  %133 = vst [vmem:[%s265_s1 + $0x48] sm:$0xff] %v28_v9  ;;  %v76_v21 = vxor.u32 2147483648, %v144_v18  ;;  %v150_v24 = vld [vmem:[%s264_s0 + $0x30] sm:$0xff] }
   0x6   :  { %135 = vst [vmem:[%s265_s1 + $0x10] sm:$0xff] %v36_v10  ;;  %137 = vst [vmem:[%s265_s1 + $0x50] sm:$0xff] %v44_v11  ;;  %v92_v23 = vxor.u32 2147483648, %v148_v20  ;;  %v152_v25 = vld [vmem:[%s264_s0 + $0x70] sm:$0xff]  ;;  %v154_v26 = vld [vmem:[%s264_s0 + $0x38] sm:$0xff]  ;;  %v100_v27 = vxor.u32 2147483648, %v150_v24 }
   0x7   :  { %139 = vst [vmem:[%s265_s1 + $0x18] sm:$0xff] %v52_v15  ;;  %141 = vst [vmem:[%s265_s1 + $0x58] sm:$0xff] %v60_v16  ;;  %v108_v28 = vxor.u32 2147483648, %v152_v25  ;;  %v116_v29 = vxor.u32 2147483648, %v154_v26  ;;  %v156_v30 = vld [vmem:[%s264_s0 + $0x78] sm:$0xff] }
   0x8   :  { %143 = vst [vmem:[%s265_s1 + $0x20] sm:$0xff] %v68_v17  ;;  %145 = vst [vmem:[%s265_s1 + $0x60] sm:$0xff] %v76_v21  ;;  %v124_v31 = vxor.u32 2147483648, %v156_v30 }
   0x9   :  { %147 = vst [vmem:[%s265_s1 + $0x28] sm:$0xff] %v84_v22  ;;  %149 = vst [vmem:[%s265_s1 + $0x68] sm:$0xff] %v92_v23 }
   0xa   :  { %151 = vst [vmem:[%s265_s1 + $0x30] sm:$0xff] %v100_v27  ;;  %153 = vst [vmem:[%s265_s1 + $0x70] sm:$0xff] %v108_v28 }
   0xb   :  { %155 = vst [vmem:[%s265_s1 + $0x38] sm:$0xff] %v116_v29  ;;  %157 = vst [vmem:[%s265_s1 + $0x78] sm:$0xff] %v124_v31 }

// kernel: feature_extraction.12
= control target key start
LH: loop header
LB: loop body
LE: loop exit
PB: predicated region body
PF: predicated region fallthrough
CT: control target
= control target key end

     0   :  { %s765_s18 = smov 0   ;;  %s847_s0 = inlined_call_operand.vmem [shape: f32[128,3], index: 0, kind: input, shape index: {}]   ;;  %s848_s1 = inlined_call_operand.vmem [shape: f32[3,24], index: 1, kind: input, shape index: {}]   ;;  %s849_s2 = inlined_call_operand.vmem [shape: f32[1,24], index: 2, kind: input, shape index: {}]   ;;  %s850_s3 = inlined_call_operand.vmem [shape: f32[24,12], index: 3, kind: input, shape index: {}]   ;;  %s851_s4 = inlined_call_operand.vmem [shape: f32[128,24], index: 4, kind: output, shape index: {0}]   ;;  %s852_s5 = inlined_call_operand.vmem [shape: f32[128,12], index: 5, kind: output, shape index: {1}]  }
   0x1 LB: > { %s632_s19 = sadd.s32 4294967295, %s733_s18   ;;  %p636_p0 = scmp.ge.s32.totalorder %s733_s18, 1  ;;  %s733_s18 = sphi %s765_s18, %s16_s18  }
   0x2   : > { %p191_p1 = scmp.lt.s32.totalorder %s733_s18, 3 }
   0x4   : > { %p192_p2 = pnand %p636_p0, %p191_p1 }
   0x5   : > { %v250_v0 = vld [vmem:[%s848_s1] sm:$0x7] (!%p192_p2)  ;;  %vm283_vm0 = vcmask (!%p192_p2), 1042432   ;;  %s637_s22 = sshll.u32 (!%p192_p2), %s632_s19, 3  ;;  %v402_v2 = vld [vmem:[%s850_s3 + $0x8] sm:$0xff] (!%p192_p2)  ;;  %vm258_vm1 = vcmask (!%p192_p2), 23552  }
   0x6   : > { %195 = sbr.rel (%p192_p2) target bundleno = 460 (0x1cc), region = 36  ;;  %v401_v1 = vld [vmem:[%s850_s3] sm:$0xff] (!%p192_p2)  ;;  %683 = vmatprep.subr.msk.mxu0 (!%p192_p2), %vm283_vm0, %v250_v0  ;;  %p225_p3 = scmp.lt.s32.totalorder (!%p192_p2), %s637_s22, 15  ;;  %v403_v12 = vld [vmem:[%s850_s3 + $0x10] sm:$0xff] (!%p192_p2)  ;;  %vm392_vm2 = vcmask (!%p192_p2), 195584   ;;  %vm533_vm3 = vcmask (!%p192_p2), 97280  }
   0x7   : > { %684 = vmatpush3.msk.msra.mxu0 (!%p192_p2), %vm283_vm0, %v250_v0  ;;  %v715_v3 = vpack.c.bf16 (!%p192_p2), %v402_v2, %v401_v1  ;;  %v643_v13 = vld [vmem:[%s849_s2] ss:$0 sm:$0xff] (!%p192_p2) }
   0x9   : > { %716 = vmatprep.subr.bf16.mxu1 (!%p192_p2), %v715_v3 }
   0xa   : > { %718 = vmatpush3.bf16.msra.mxu1 (!%p192_p2), %v715_v3 }
   0xb   : > { %701 = vmatprep.subr.mxu1 (!%p192_p2), %v403_v12 }
   0xd   : > { %s854_s22 = smov (!%p225_p3, %s637_s22), 15 }
   0xe   : > { %s782_s27 = sshll.u32 %s854_s22, 3  ;;  %702 = vmatpush3.msra.mxu1 %v403_v12 }
   0xf   : > { %s228_s30 = scalar_lea.vmem %s847_s0, %s782_s27  ;;  %s806_s12 = scalar_lea.vmem %s851_s4, %s782_s27 }
  0x10   : > { %v242_v4 = vld [vmem:[%s228_s30] sm:$0xff]  ;;  %v243_v5 = vld [vmem:[%s228_s30 + $0x8] sm:$0xff]  ;;  %v244_v6 = vld [vmem:[%s228_s30 + $0x10] sm:$0xff]  ;;  %s240_s15 = scalar_lea.vmem %s852_s5, %s782_s27 }
  0x11   : > { %685 = vmatprep.mubr.msk.f32.mxu0 %vm258_vm1, %v242_v4  ;;  %v245_v7 = vld [vmem:[%s228_s30 + $0x18] sm:$0xff]  ;;  %v246_v8 = vld [vmem:[%s228_s30 + $0x20] sm:$0xff]  ;;  %v247_v9 = vld [vmem:[%s228_s30 + $0x28] sm:$0xff] }
  0x12   : > { %686 = vmatmul.mubr.msk.f32.vlgmr.msra.gmra.mrb[0].mxu0 %vm258_vm1, %v243_v5  ;;  %v248_v10 = vld [vmem:[%s228_s30 + $0x30] sm:$0xff]  ;;  %v249_v11 = vld [vmem:[%s228_s30 + $0x38] sm:$0xff] }
  0x13   : > { %688 = vmatprep.mubr.msk.f32.mxu0 %vm258_vm1, %v244_v6 }
  0x16   : > { %689 = vmatmul.mubr.msk.f32.gmra.mrb[2].mxu0 %vm258_vm1, %v245_v7 }
  0x17   : > { %691 = vmatprep.mubr.msk.f32.mxu0 %vm258_vm1, %v246_v8 }
  0x1a   : > { %692 = vmatmul.mubr.msk.f32.gmra.mrb[4].mxu0 %vm258_vm1, %v247_v9 }
  0x1b   : > { %694 = vmatprep.mubr.msk.f32.mxu0 %vm258_vm1, %v248_v10 }
  0x1e   : > { %695 = vmatmul.mubr.msk.f32.gmra.mrb[6].mxu0 %vm258_vm1, %v249_v11 }
  0xe5   : > { %v687_v14 = vpop.f32.mrb[0].mxu0 }
  0xe6   : > { %v359_v15 = vadd.f32 %v687_v14, %v643_v13  ;;  %v353_v16 = vpop.f32.mrb[1].mxu0 }
  0xe7   : > { %v354_v17 = vadd.f32 %v643_v13, %v353_v16 }
  0xe8   : > { %394 = vst.msk [vmem:[%s806_s12 + $0x8] sm:$0xff] %vm392_vm2, %v359_v15 }
  0xe9   : > { %393 = vst.msk [vmem:[%s806_s12] sm:$0xff] %vm392_vm2, %v354_v17  ;;  %v690_v18 = vpop.f32.mrb[2].mxu0  ;;  %703 = vmatprep.mubr.msk.f32.mxu1 %vm392_vm2, %v354_v17 }
  0xea   : > { %v369_v19 = vadd.f32 %v690_v18, %v643_v13  ;;  %v363_v20 = vpop.f32.mrb[3].mxu0  ;;  %704 = vmatmul.mubr.msk.f32.vlgmr.msra.gmra.mrb[0].mxu1 %vm392_vm2, %v359_v15 }
  0xeb   : > { %v364_v21 = vadd.f32 %v643_v13, %v363_v20 }
  0xec   : > { %396 = vst.msk [vmem:[%s806_s12 + $0x18] sm:$0xff] %vm392_vm2, %v369_v19 }
  0xed   : > { %395 = vst.msk [vmem:[%s806_s12 + $0x10] sm:$0xff] %vm392_vm2, %v364_v21  ;;  %v693_v22 = vpop.f32.mrb[4].mxu0  ;;  %706 = vmatprep.mubr.msk.f32.mxu1 %vm392_vm2, %v364_v21 }
  0xee   : > { %v379_v23 = vadd.f32 %v693_v22, %v643_v13  ;;  %v373_v24 = vpop.f32.mrb[5].mxu0  ;;  %707 = vmatmul.mubr.msk.f32.gmra.mrb[2].mxu1 %vm392_vm2, %v369_v19 }
  0xef   : > { %v374_v25 = vadd.f32 %v643_v13, %v373_v24 }
  0xf0   : > { %398 = vst.msk [vmem:[%s806_s12 + $0x28] sm:$0xff] %vm392_vm2, %v379_v23 }
  0xf1   : > { %397 = vst.msk [vmem:[%s806_s12 + $0x20] sm:$0xff] %vm392_vm2, %v374_v25  ;;  %v696_v26 = vpop.f32.mrb[6].mxu0  ;;  %709 = vmatprep.mubr.msk.f32.mxu1 %vm392_vm2, %v374_v25 }
  0xf2   : > { %v389_v27 = vadd.f32 %v696_v26, %v643_v13  ;;  %v383_v28 = vpop.f32.mrb[7].mxu0  ;;  %710 = vmatmul.mubr.msk.f32.gmra.mrb[4].mxu1 %vm392_vm2, %v379_v23 }
  0xf3   : > { %v384_v29 = vadd.f32 %v643_v13, %v383_v28 }
  0xf4   : > { %400 = vst.msk [vmem:[%s806_s12 + $0x38] sm:$0xff] %vm392_vm2, %v389_v27 }
  0xf5   : > { %399 = vst.msk [vmem:[%s806_s12 + $0x30] sm:$0xff] %vm392_vm2, %v384_v29  ;;  %712 = vmatprep.mubr.msk.f32.mxu1 %vm392_vm2, %v384_v29 }
  0xf6   : > { %713 = vmatmul.mubr.msk.f32.gmra.mrb[6].mxu1 %vm392_vm2, %v389_v27 }
 0x1bd   : > { %v705_v30 = vpop.f32.mrb[0].mxu1 }
 0x1be   : > { %535 = vst.msk [vmem:[%s240_s15 + $0x8] sm:$0xff] %vm533_vm3, %v705_v30  ;;  %v494_v31 = vpop.f32.mrb[1].mxu1 }
 0x1bf   : > { %534 = vst.msk [vmem:[%s240_s15] sm:$0xff] %vm533_vm3, %v494_v31 }
 0x1c1   : > { %v708_v32 = vpop.f32.mrb[2].mxu1 }
 0x1c2   : > { %537 = vst.msk [vmem:[%s240_s15 + $0x18] sm:$0xff] %vm533_vm3, %v708_v32  ;;  %v504_v33 = vpop.f32.mrb[3].mxu1 }
 0x1c3   : > { %536 = vst.msk [vmem:[%s240_s15 + $0x10] sm:$0xff] %vm533_vm3, %v504_v33 }
 0x1c5   : > { %v711_v34 = vpop.f32.mrb[4].mxu1 }
 0x1c6   : > { %539 = vst.msk [vmem:[%s240_s15 + $0x28] sm:$0xff] %vm533_vm3, %v711_v34  ;;  %v514_v35 = vpop.f32.mrb[5].mxu1 }
 0x1c7   : > { %538 = vst.msk [vmem:[%s240_s15 + $0x20] sm:$0xff] %vm533_vm3, %v514_v35 }
 0x1c9   : > { %v714_v36 = vpop.f32.mrb[6].mxu1 }
 0x1ca   : > { %541 = vst.msk [vmem:[%s240_s15 + $0x38] sm:$0xff] %vm533_vm3, %v714_v36  ;;  %v524_v37 = vpop.f32.mrb[7].mxu1 }
 0x1cb   : > { %540 = vst.msk [vmem:[%s240_s15 + $0x30] sm:$0xff] %vm533_vm3, %v524_v37 }
 0x1cc PF: > { %s16_s18 = sadd.s32 1, %s733_s18  }
 0x1cd   : > { %p13_p4 = scmp.ge.s32.totalorder %s16_s18, 4  }
 0x1cf   :  { %15 = sbr.rel (!%p13_p4) target bundleno = 1 (0x1), region = 78 }

// kernel: sub.4
= control target key start
LH: loop header
LB: loop body
LE: loop exit
PB: predicated region body
PF: predicated region fallthrough
CT: control target
= control target key end

     0   :  { %s78_s0 = inlined_call_operand.vmem [shape: f32[24,12], index: 0, kind: input, shape index: {}]   ;;  %s79_s1 = inlined_call_operand.vmem [shape: f32[24,12], index: 1, kind: input, shape index: {}]   ;;  %s80_s2 = inlined_call_operand.vmem [shape: f32[24,12], index: 2, kind: output, shape index: {}]  }
   0x1   :  { %v3_v0 = vld [vmem:[%s78_s0] sm:$0xff]  ;;  %v30_v2 = vld [vmem:[%s78_s0 + $0x8] sm:$0xff]  ;;  %v33_v5 = vld [vmem:[%s78_s0 + $0x10] sm:$0xff] }
   0x2   :  { %v4_v1 = vld [vmem:[%s79_s1] sm:$0xff]  ;;  %v31_v4 = vld [vmem:[%s79_s1 + $0x8] sm:$0xff]  ;;  %v34_v6 = vld [vmem:[%s79_s1 + $0x10] sm:$0xff] }
   0x3   :  { %v7_v3 = vsub.f32 %v3_v0, %v4_v1  ;;  %v16_v7 = vsub.f32 %v30_v2, %v31_v4  ;;  %v26_v8 = vsub.f32 %v33_v5, %v34_v6 }
   0x5   :  { %9 = vst [vmem:[%s80_s2] sm:$0xff] %v7_v3  ;;  %32 = vst [vmem:[%s80_s2 + $0x8] sm:$0xff] %v16_v7 }
   0x6   :  { %35 = vst [vmem:[%s80_s2 + $0x10] sm:$0xff] %v26_v8 }

// kernel: feature_extraction.13
= control target key start
LH: loop header
LB: loop body
LE: loop exit
PB: predicated region body
PF: predicated region fallthrough
CT: control target
= control target key end

     0   :  { %s621_s6 = smov 0   ;;  %s773_s0 = inlined_call_operand.vmem [shape: f32[2,64,24], index: 0, kind: input, shape index: {}]   ;;  %s774_s1 = inlined_call_operand.vmem [shape: f32[2,64,64], index: 1, kind: output, shape index: {}]  }
   0x1 LB: > { %s487_s7 = sadd.s32 4294967295, %s608_s6   ;;  %p491_p0 = scmp.ge.s32.totalorder %s608_s6, 1  ;;  %s608_s6 = sphi %s621_s6, %s11_s6  }
   0x2   : > { %p87_p1 = scmp.lt.s32.totalorder %s608_s6, 3 }
   0x4   : > { %p88_p2 = pnand %p491_p0, %p87_p1 }
   0x5   : > { %p107_p3 = scmp.lt.s32.totalorder (!%p88_p2), %s487_s7, 1  ;;  %vm133_vm0 = vcmask (!%p88_p2), 195584   ;;  %v335_v45 = vlaneseq (!%p88_p2) }
   0x6   : > { %91 = sbr.rel (%p88_p2) target bundleno = 345 (0x159), region = 24  ;;  %vm641_vm1 = vmpackc.low (!%p88_p2), %vm133_vm0, %vm133_vm0 }
   0x7   : > { %v336_v46 = vshrl.u32 (!%p88_p2), %v335_v45, 7  ;;  %v701_v48 = vand.u32 (!%p88_p2), 127, %v335_v45 }
   0x9   : > { %v337_v52 = vsub.s32 (!%p88_p2), 0, %v336_v46  ;;  %v349_v56 = vadd.s32 (!%p88_p2), 8, %v336_v46  ;;  %v350_v57 = vadd.s32 (!%p88_p2), 16, %v336_v46  ;;  %v351_v58 = vadd.s32 (!%p88_p2), 24, %v336_v46 }
   0xa   : > { %v352_v59 = vadd.s32 (!%p88_p2), 32, %v336_v46  ;;  %v353_v60 = vadd.s32 (!%p88_p2), 40, %v336_v46  ;;  %v354_v63 = vadd.s32 (!%p88_p2), 48, %v336_v46  ;;  %vm358_vm2 = vcmp.lt.s32.totalorder (!%p88_p2), %v336_v46, %v701_v48 }
   0xb   : > { %vm359_vm3 = vcmp.lt.s32.totalorder (!%p88_p2), %v349_v56, %v701_v48  ;;  %vm360_vm4 = vcmp.lt.s32.totalorder (!%p88_p2), %v350_v57, %v701_v48  ;;  %vm361_vm8 = vcmp.lt.s32.totalorder (!%p88_p2), %v351_v58, %v701_v48 }
   0xc   : > { %vm362_vm11 = vcmp.lt.s32.totalorder (!%p88_p2), %v352_v59, %v701_v48  ;;  %vm363_vm15 = vcmp.lt.s32.totalorder (!%p88_p2), %v353_v60, %v701_v48 }
   0xd   : > { %s794_s7 = smov (!%p107_p3, %s487_s7), 1 }
   0xe   : > { %s515_s8 = sshll.u32 %s794_s7, 6 }
   0xf   : > { %s637_s11 = scalar_lea.vmem %s773_s0, %s515_s8  ;;  %s116_s14 = scalar_lea.vmem %s774_s1, %s515_s8 }
  0x10   : > { %v117_v1 = vld [vmem:[%s637_s11] sm:$0xff]  ;;  %v118_v2 = vld [vmem:[%s637_s11 + $0x8] sm:$0xff]  ;;  %v119_v3 = vld [vmem:[%s637_s11 + $0x10] sm:$0xff] }
  0x11   : > { %v561_v4 = vpack.c.bf16 %v118_v2, %v117_v1  ;;  %v125_v5 = vmul.f32 %v117_v1, %v117_v1  ;;  %v120_v6 = vld [vmem:[%s637_s11 + $0x18] sm:$0xff]  ;;  %v127_v7 = vmul.f32 %v119_v3, %v119_v3  ;;  %v121_v8 = vld [vmem:[%s637_s11 + $0x20] sm:$0xff]  ;;  %549 = vmatprep.mubr.msk.f32.mxu0 %vm133_vm0, %v117_v1  ;;  %v126_v9 = vmul.f32 %v118_v2, %v118_v2  ;;  %v122_v15 = vld [vmem:[%s637_s11 + $0x28] sm:$0xff] }
  0x12   : > { %v567_v10 = vpack.c.bf16 %v120_v6, %v119_v3  ;;  %555 = vmatprep.mubr.msk.f32.mxu1 %vm133_vm0, %v121_v8  ;;  %v128_v13 = vmul.f32 %v120_v6, %v120_v6  ;;  %v129_v17 = vmul.f32 %v121_v8, %v121_v8  ;;  %v130_v18 = vmul.f32 %v122_v15, %v122_v15  ;;  %v123_v19 = vld [vmem:[%s637_s11 + $0x30] sm:$0xff]  ;;  %v124_v21 = vld [vmem:[%s637_s11 + $0x38] sm:$0xff] }
  0x13   : > { %563 = vmatprep.subr.msk.bf16.mxu0 %vm641_vm1, %v561_v4  ;;  %585 = vmatprep.subr.msk.bf16.mxu1 %vm641_vm1, %v561_v4  ;;  %v134_v11 = vsel %vm133_vm0, %v125_v5, 0.0  ;;  %v140_v12 = vsel %vm133_vm0, %v127_v7, 0.0  ;;  %v137_v14 = vsel %vm133_vm0, %v126_v9, 0.0  ;;  %v573_v20 = vpack.c.bf16 %v122_v15, %v121_v8 }
  0x14   : > { %566 = vmatpush3.bf16.xpose.msk.msra.mxu0 %vm641_vm1, %v561_v4  ;;  %589 = vmatpush3.bf16.xpose.msk.msra.mxu1 %vm641_vm1, %v561_v4  ;;  %v143_v16 = vsel %vm133_vm0, %v128_v13, 0.0  ;;  %v146_v22 = vsel %vm133_vm0, %v129_v17, 0.0  ;;  %v149_v23 = vsel %vm133_vm0, %v130_v18, 0.0  ;;  %v131_v24 = vmul.f32 %v123_v19, %v123_v19 }
  0x15   : > { %135 = vadd.xlane.f32.xlu0 %v134_v11  ;;  %569 = vmatprep.subr.msk.bf16.mxu0 %vm641_vm1, %v567_v10  ;;  %v132_v25 = vmul.f32 %v124_v21, %v124_v21  ;;  %v579_v28 = vpack.c.bf16 %v124_v21, %v123_v19  ;;  %v610_v18 = vmov 0.0  }
  0x16   : > { %586 = vmatprep.subr.msk.bf16.mxu1 %vm641_vm1, %v567_v10  ;;  %141 = vadd.xlane.f32.xlu1 %v140_v12  ;;  %v152_v26 = vsel %vm133_vm0, %v131_v24, 0.0 }
  0x17   : > { %v155_v27 = vsel %vm133_vm0, %v132_v25, 0.0 }
  0x19   : > { %138 = vadd.xlane.f32.xlu0 %v137_v14 }
  0x1a   : > { %144 = vadd.xlane.f32.xlu1 %v143_v16  ;;  %v355_v16 = vadd.s32 56, %v336_v46 }
  0x1c   : > { %572 = vmatpush3.bf16.xpose.msk.msra.mxu0 %vm641_vm1, %v567_v10  ;;  %590 = vmatpush3.bf16.xpose.msk.msra.mxu1 %vm641_vm1, %v567_v10 }
  0x1d   : > { %575 = vmatprep.subr.msk.bf16.mxu0 %vm641_vm1, %v573_v20  ;;  %587 = vmatprep.subr.msk.bf16.mxu1 %vm641_vm1, %v573_v20 }
  0x1e   : > { %147 = vadd.xlane.f32.xlu0 %v146_v22  ;;  %150 = vadd.xlane.f32.xlu1 %v149_v23 }
  0x22   : > { %153 = vadd.xlane.f32.xlu0 %v152_v26  ;;  %156 = vadd.xlane.f32.xlu1 %v155_v27 }
  0x24   : > { %578 = vmatpush3.bf16.xpose.msk.msra.mxu0 %vm641_vm1, %v573_v20  ;;  %591 = vmatpush3.bf16.xpose.msk.msra.mxu1 %vm641_vm1, %v573_v20 }
  0x25   : > { %581 = vmatprep.subr.msk.bf16.mxu0 %vm641_vm1, %v579_v28  ;;  %588 = vmatprep.subr.msk.bf16.mxu1 %vm641_vm1, %v579_v28 }
  0x2c   : > { %584 = vmatpush3.bf16.xpose.msk.msra.mxu0 %vm641_vm1, %v579_v28  ;;  %592 = vmatpush3.bf16.xpose.msk.msra.mxu1 %vm641_vm1, %v579_v28 }
  0x33   : > { %550 = vmatmul.mubr.msk.f32.vlgmr.msra.gmra.mrb[0].mxu0 %vm133_vm0, %v118_v2  ;;  %556 = vmatmul.mubr.msk.f32.vlgmr.msra.gmra.mrb[0].mxu1 %vm133_vm0, %v122_v15 }
  0x34   : > { %552 = vmatprep.mubr.msk.f32.mxu0 %vm133_vm0, %v119_v3  ;;  %558 = vmatprep.mubr.msk.f32.mxu1 %vm133_vm0, %v123_v19 }
  0x37   : > { %553 = vmatmul.mubr.msk.f32.gmra.mrb[2].mxu0 %vm133_vm0, %v120_v6  ;;  %559 = vmatmul.mubr.msk.f32.gmra.mrb[2].mxu1 %vm133_vm0, %v124_v21 }
  0xa2   : > { %v136_v29 = vpop.xlane.xlu0 %135 }
  0xa3   : > { %303 = vxpose.xlu0.b32.start [1/8] (short) (narrow) %v136_v29, 8  ;;  %v142_v31 = vpop.xlane.xlu1 %141 }
  0xa6   : > { %v139_v30 = vpop.xlane.xlu0 %138 }
  0xa7   : > { %304 = vxpose.xlu0.b32.cont [2/8] (short) (narrow) %v139_v30, 8  ;;  %v145_v32 = vpop.xlane.xlu1 %144 }
  0xab   : > { %305 = vxpose.xlu0.b32.cont [3/8] (short) (narrow) %v142_v31, 8  ;;  %v148_v33 = vpop.xlane.xlu0 %147  ;;  %v151_v34 = vpop.xlane.xlu1 %150 }
  0xaf   : > { %306 = vxpose.xlu0.b32.cont [4/8] (short) (narrow) %v145_v32, 8  ;;  %v154_v35 = vpop.xlane.xlu0 %153  ;;  %v157_v36 = vpop.xlane.xlu1 %156 }
  0xb3   : > { %307 = vxpose.xlu0.b32.cont [5/8] (short) (narrow) %v148_v33, 8 }
  0xb7   : > { %308 = vxpose.xlu0.b32.cont [6/8] (short) (narrow) %v151_v34, 8 }
  0xbb   : > { %309 = vxpose.xlu0.b32.cont [7/8] (short) (narrow) %v154_v35, 8 }
  0xbf   : > { %310 = vxpose.xlu0.b32.end [8/8] (short) (narrow) %v157_v36, 8 }
 0x106   : > { %v551_v37 = vpop.f32.mrb[0].mxu0  ;;  %v557_v38 = vpop.f32.mrb[0].mxu1 }
 0x107   : > { %v248_v39 = vpop.f32.mrb[1].mxu0  ;;  %v268_v40 = vpop.f32.mrb[1].mxu1  ;;  %v288_v47 = vmul.f32 2.0, %v551_v37  ;;  %v292_v53 = vmul.f32 2.0, %v557_v38 }
 0x108   : > { %v287_v49 = vmul.f32 2.0, %v248_v39  ;;  %v291_v54 = vmul.f32 2.0, %v268_v40 }
 0x109   : > { %v296_v61 = vsub.f32 %v139_v30, %v288_v47  ;;  %v300_v5 = vsub.f32 %v151_v34, %v292_v53 }
 0x10a   : > { %v554_v41 = vpop.f32.mrb[2].mxu0  ;;  %v560_v42 = vpop.f32.mrb[2].mxu1  ;;  %v295_v1 = vsub.f32 %v136_v29, %v287_v49  ;;  %v299_v6 = vsub.f32 %v148_v33, %v291_v54 }
 0x10b   : > { %v258_v43 = vpop.f32.mrb[3].mxu0  ;;  %v278_v44 = vpop.f32.mrb[3].mxu1  ;;  %v290_v50 = vmul.f32 2.0, %v554_v41  ;;  %v294_v62 = vmul.f32 2.0, %v560_v42 }
 0x10c   : > { %v289_v51 = vmul.f32 2.0, %v258_v43  ;;  %v293_v55 = vmul.f32 2.0, %v278_v44 }
 0x10d   : > { %v298_v2 = vsub.f32 %v145_v32, %v290_v50  ;;  %v302_v12 = vsub.f32 %v157_v36, %v294_v62 }
 0x10e   : > { %v297_v3 = vsub.f32 %v142_v31, %v289_v51  ;;  %v301_v7 = vsub.f32 %v154_v35, %v293_v55 }
 0x123   : > { %v319_v0 = vpop.trf.xlu0 }
 0x124   : > { %v338_v4 = vrot.slane %v319_v0, %v337_v52 }
 0x126   : > { %v705_v8 = vadd.f32 %v338_v4, %v295_v1  ;;  %v707_v9 = vadd.f32 %v338_v4, %v296_v61  ;;  %v709_v10 = vadd.f32 %v338_v4, %v297_v3  ;;  %v711_v11 = vadd.f32 %v338_v4, %v298_v2 }
 0x127   : > { %v714_v13 = vadd.f32 %v338_v4, %v299_v6  ;;  %v716_v14 = vadd.f32 %v338_v4, %v300_v5  ;;  %v718_v15 = vadd.f32 %v338_v4, %v301_v7  ;;  %v346_v17 = vadd.f32 %v338_v4, %v302_v12 }
 0x128   : > { %vm366_vm5 = vcmp.le.f32.partialorder %v705_v8, 1e-09  ;;  %vm367_vm6 = vcmp.le.f32.partialorder %v707_v9, 1e-09  ;;  %vm368_vm7 = vcmp.le.f32.partialorder %v709_v10, 1e-09 }
 0x129   : > { %vm369_vm9 = vcmp.le.f32.partialorder %v711_v11, 1e-09  ;;  %vm374_vm10 = vmand %vm358_vm2, %vm366_vm5  ;;  %vm370_vm13 = vcmp.le.f32.partialorder %v714_v13, 1e-09  ;;  %vm371_vm0 = vcmp.le.f32.partialorder %v716_v14, 1e-09  ;;  %vm364_vm2 = vcmp.lt.s32.totalorder %v354_v63, %v701_v48 }
 0x12a   : > { %vm375_vm14 = vmand %vm359_vm3, %vm367_vm6  ;;  %v382_v19 = vsel %vm374_vm10, 1.0, %v610_v18  ;;  %vm372_vm5 = vcmp.le.f32.partialorder %v718_v15, 1e-09  ;;  %vm365_vm3 = vcmp.lt.s32.totalorder %v355_v16, %v701_v48  ;;  %vm373_vm6 = vcmp.le.f32.partialorder %v346_v17, 1e-09 }
 0x12b   : > { %vm376_vm1 = vmand %vm360_vm4, %vm368_vm7  ;;  %v383_v20 = vsel %vm375_vm14, 1.0, %v610_v18  ;;  %vm777_vm4 = vcmask 523264  }
 0x12c   : > { %vm377_vm12 = vmand %vm361_vm8, %vm369_vm9  ;;  %v384_v21 = vsel %vm376_vm1, 1.0, %v610_v18  ;;  %v391_v23 = vsel %vm777_vm4, %v382_v19, -inf }
 0x12d   : > { %vm378_vm10 = vmand %vm362_vm11, %vm370_vm13  ;;  %v385_v22 = vsel %vm377_vm12, 1.0, %v610_v18 }
 0x12e   : > { %vm379_vm7 = vmand %vm363_vm15, %vm371_vm0  ;;  %v386_v24 = vsel %vm378_vm10, 1.0, %v610_v18 }
 0x12f   : > { %vm778_vm14 = vmmov %vm777_vm4  ;;  %v387_v26 = vsel %vm379_vm7, 1.0, %v610_v18 }
 0x130   : > { %v392_v25 = vsel %vm778_vm14, %v383_v20, -inf  ;;  %vm380_vm8 = vmand %vm364_vm2, %vm372_vm5 }
 0x131   : > { %vm779_vm9 = vmmov %vm777_vm4  ;;  %v388_v29 = vsel %vm380_vm8, 1.0, %v610_v18 }
 0x132   : > { %v393_v27 = vsel %vm779_vm9, %v384_v21, -inf  ;;  %vm780_vm1 = vmmov %vm777_vm4 }
 0x133   : > { %v395_v28 = vsel %vm780_vm1, %v386_v24, -inf  ;;  %vm381_vm11 = vmand %vm365_vm3, %vm373_vm6 }
 0x134   : > { %vm781_vm13 = vmmov %vm780_vm1  ;;  %v396_v31 = vmax.f32 %v391_v23, %v395_v28  ;;  %v389_v33 = vsel %vm381_vm11, 1.0, %v610_v18 }
 0x135   : > { %v394_v30 = vsel %vm781_vm13, %v385_v22, -inf  ;;  %vm782_vm12 = vmmov %vm780_vm1 }
 0x136   : > { %v397_v32 = vsel %vm782_vm12, %v387_v26, -inf  ;;  %vm783_vm4 = vmmov %vm780_vm1 }
 0x137   : > { %v398_v34 = vmax.f32 %v392_v25, %v397_v32  ;;  %v399_v35 = vsel %vm783_vm4, %v388_v29, -inf  ;;  %vm784_vm15 = vmmov %vm780_vm1 }
 0x138   : > { %v400_v36 = vmax.f32 %v393_v27, %v399_v35  ;;  %v401_v37 = vsel %vm784_vm15, %v389_v33, -inf  ;;  %vm785_vm2 = vmmov %vm780_vm1 }
 0x139   : > { %v402_v38 = vmax.f32 %v394_v30, %v401_v37  ;;  %v403_v39 = vmax.f32 %v396_v31, %v398_v34  ;;  %vm786_vm5 = vmmov %vm780_vm1 }
 0x13a   : > { %vm787_vm3 = vmmov %vm780_vm1 }
 0x13b   : > { %v404_v40 = vmax.f32 %v400_v36, %v402_v38  ;;  %vm788_vm6 = vmmov %vm780_vm1 }
 0x13c   : > { %vm789_vm10 = vmmov %vm780_vm1 }
 0x13d   : > { %v405_v41 = vmax.f32 %v403_v39, %v404_v40  ;;  %vm790_vm7 = vmmov %vm780_vm1 }
 0x13e   : > { %vm791_vm14 = vmmov %vm780_vm1 }
 0x13f   : > { %v406_v42 = vrot.slane %v405_v41, 4  ;;  %vm792_vm8 = vmmov %vm780_vm1 }
 0x141   : > { %v407_v43 = vmax.f32 %v405_v41, %v406_v42 }
 0x143   : > { %v408_v44 = vrot.slane %v407_v43, 2 }
 0x145   : > { %v409_v45 = vmax.f32 %v407_v43, %v408_v44 }
 0x147   : > { %v410_v46 = vrot.slane %v409_v45, 1 }
 0x149   : > { %v411_v47 = vmax.f32 %v409_v45, %v410_v46 }
 0x14b   : > { %vm412_vm0 = vcmp.gt.f32.partialorder %v411_v47, 0.0 }
 0x14c   : > { %v512_v48 = vsel %vm412_vm0, 1.0, %v610_v18 }
 0x14d   : > { %v415_v49 = vmul.f32 1e+09, %v512_v48 }
 0x14f   : > { %v416_v50 = vadd.f32 %v415_v49, %v705_v8  ;;  %v417_v51 = vadd.f32 %v415_v49, %v707_v9  ;;  %v418_v52 = vadd.f32 %v415_v49, %v709_v10  ;;  %v419_v53 = vadd.f32 %v415_v49, %v711_v11 }
 0x150   : > { %v420_v54 = vadd.f32 %v415_v49, %v714_v13  ;;  %v421_v55 = vadd.f32 %v415_v49, %v716_v14  ;;  %v422_v56 = vadd.f32 %v415_v49, %v718_v15  ;;  %v423_v57 = vadd.f32 %v415_v49, %v346_v17 }
 0x151   : > { %424 = vst.msk [vmem:[%s116_s14] sm:$0xff] %vm785_vm2, %v416_v50 }
 0x152   : > { %425 = vst.msk [vmem:[%s116_s14 + $0x8] sm:$0xff] %vm786_vm5, %v417_v51 }
 0x153   : > { %426 = vst.msk [vmem:[%s116_s14 + $0x10] sm:$0xff] %vm787_vm3, %v418_v52 }
 0x154   : > { %427 = vst.msk [vmem:[%s116_s14 + $0x18] sm:$0xff] %vm788_vm6, %v419_v53 }
 0x155   : > { %428 = vst.msk [vmem:[%s116_s14 + $0x20] sm:$0xff] %vm789_vm10, %v420_v54 }
 0x156   : > { %429 = vst.msk [vmem:[%s116_s14 + $0x28] sm:$0xff] %vm790_vm7, %v421_v55 }
 0x157   : > { %430 = vst.msk [vmem:[%s116_s14 + $0x30] sm:$0xff] %vm791_vm14, %v422_v56 }
 0x158   : > { %431 = vst.msk [vmem:[%s116_s14 + $0x38] sm:$0xff] %vm792_vm8, %v423_v57 }
 0x159 PF: > { %s11_s6 = sadd.s32 1, %s608_s6  }
 0x15a   : > { %p8_p4 = scmp.ge.s32.totalorder %s11_s6, 4  }
 0x15c   :  { %10 = sbr.rel (!%p8_p4) target bundleno = 1 (0x1), region = 54 }

// kernel: feature_extraction.15
= control target key start
LH: loop header
LB: loop body
LE: loop exit
PB: predicated region body
PF: predicated region fallthrough
CT: control target
= control target key end

     0   :  { %s1118_s24 = smov 0   ;;  %s1252_s0 = inlined_call_operand.vmem [shape: f32[128,60], index: 0, kind: input, shape index: {}]   ;;  %s1253_s1 = inlined_call_operand.vmem [shape: f32[128,24], index: 1, kind: input, shape index: {}]   ;;  %s1254_s2 = inlined_call_operand.vmem [shape: f32[60,24], index: 2, kind: input, shape index: {}]   ;;  %s1255_s3 = inlined_call_operand.vmem [shape: f32[24,24], index: 3, kind: input, shape index: {}]   ;;  %s1256_s4 = inlined_call_operand.vmem [shape: f32[1,24], index: 4, kind: input, shape index: {}]   ;;  %s1257_s5 = inlined_call_operand.vmem [shape: f32[24,12], index: 5, kind: input, shape index: {}]   ;;  %s1258_s6 = inlined_call_operand.vmem [shape: f32[128,24], index: 6, kind: output, shape index: {0}]   ;;  %s1259_s7 = inlined_call_operand.vmem [shape: f32[128,12], index: 7, kind: output, shape index: {1}]  }
   0x1 LB: > { %s883_s25 = sadd.s32 4294967295, %s1075_s24   ;;  %p887_p0 = scmp.ge.s32.totalorder %s1075_s24, 1  ;;  %s1075_s24 = sphi %s1118_s24, %s18_s24  }
   0x2   : > { %p252_p1 = scmp.lt.s32.totalorder %s1075_s24, 3 }
   0x4   : > { %p253_p2 = pnand %p887_p0, %p252_p1 }
   0x5   : > { %v342_v0 = vld [vmem:[%s1255_s3] sm:$0xff] (!%p253_p2)  ;;  %v343_v1 = vld [vmem:[%s1255_s3 + $0x8] sm:$0xff] (!%p253_p2)  ;;  %s888_s30 = sshll.u32 (!%p253_p2), %s883_s25, 3  ;;  %v344_v3 = vld [vmem:[%s1255_s3 + $0x10] sm:$0xff] (!%p253_p2)  ;;  %vm345_vm0 = vcmask (!%p253_p2), 195584   ;;  %vm500_vm1 = vcmask (!%p253_p2), 1043456  }
   0x6   : > { %256 = sbr.rel (%p253_p2) target bundleno = 478 (0x1de), region = 44  ;;  %v1026_v2 = vpack.c.bf16 (!%p253_p2), %v343_v1, %v342_v0  ;;  %p295_p3 = scmp.lt.s32.totalorder (!%p253_p2), %s888_s30, 15  ;;  %v326_v4 = vld [vmem:[%s1254_s2] sm:$0xff] (!%p253_p2)  ;;  %v327_v5 = vld [vmem:[%s1254_s2 + $0x8] sm:$0xff] (!%p253_p2)  ;;  %v328_v6 = vld [vmem:[%s1254_s2 + $0x10] sm:$0xff] (!%p253_p2)  ;;  %vm1077_vm2 = vmmov (!%p253_p2), 1  }
   0x7   : > { %v329_v7 = vld [vmem:[%s1254_s2 + $0x18] sm:$0xff] (!%p253_p2)  ;;  %v1030_v8 = vpack.c.bf16 (!%p253_p2), %v327_v5, %v326_v4  ;;  %v330_v13 = vld [vmem:[%s1254_s2 + $0x20] sm:$0xff] (!%p253_p2)  ;;  %v331_v14 = vld [vmem:[%s1254_s2 + $0x28] sm:$0xff] (!%p253_p2)  ;;  %vm475_vm4 = vcmask (!%p253_p2), 490496   ;;  %vm772_vm5 = vcmask (!%p253_p2), 97280  }
   0x8   : > { %1027 = vmatprep.subr.bf16.mxu0 (!%p253_p2), %v1026_v2  ;;  %v1034_v12 = vpack.c.bf16 (!%p253_p2), %v329_v7, %v328_v6  ;;  %v1038_v17 = vpack.c.bf16 (!%p253_p2), %v331_v14, %v330_v13  ;;  %v332_v18 = vld [vmem:[%s1254_s2 + $0x30] sm:$0xff] (!%p253_p2)  ;;  %v333_v19 = vld [vmem:[%s1254_s2 + $0x38] sm:$0xf] (!%p253_p2)  ;;  %vm1043_vm3 = vmpackc.low (!%p253_p2), %vm500_vm1, %vm1077_vm2 }
   0x9   : > { %1029 = vmatpush3.bf16.msra.mxu0 (!%p253_p2), %v1026_v2  ;;  %v1042_v22 = vpack.c.bf16 (!%p253_p2), %v333_v19, %v332_v18  ;;  %v640_v32 = vld [vmem:[%s1257_s5] sm:$0xff] (!%p253_p2)  ;;  %v641_v33 = vld [vmem:[%s1257_s5 + $0x8] sm:$0xff] (!%p253_p2)  ;;  %v642_v35 = vld [vmem:[%s1257_s5 + $0x10] sm:$0xff] (!%p253_p2) }
   0xa   : > { %966 = vmatprep.subr.mxu0 (!%p253_p2), %v344_v3  ;;  %v1048_v34 = vpack.c.bf16 (!%p253_p2), %v641_v33, %v640_v32  ;;  %v913_v36 = vld [vmem:[%s1256_s4] ss:$0 sm:$0xff] (!%p253_p2) }
   0xc   : > { %1049 = vmatprep.subr.bf16.mxu1 (!%p253_p2), %v1048_v34 }
   0xd   : > { %s1261_s30 = smov (!%p295_p3, %s888_s30), 15  ;;  %967 = vmatpush3.msra.mxu0 %v344_v3  ;;  %1051 = vmatpush3.bf16.msra.mxu1 %v1048_v34 }
   0xe   : > { %s1147_s18 = sshll.u32 %s1261_s30, 3  ;;  %1031 = vmatprep.subr.bf16.mxu0 %v1030_v8  ;;  %1012 = vmatprep.subr.mxu1 %v642_v35 }
   0xf   : > { %s1153_s21 = scalar_lea.vmem %s1253_s1, %s1147_s18  ;;  %s298_s10 = scalar_lea.vmem %s1252_s0, %s1147_s18 }
  0x10   : > { %v334_v9 = vld [vmem:[%s1153_s21] sm:$0xff]  ;;  %v335_v10 = vld [vmem:[%s1153_s21 + $0x8] sm:$0xff]  ;;  %v336_v11 = vld [vmem:[%s1153_s21 + $0x10] sm:$0xff]  ;;  %s1211_s22 = scalar_lea.vmem %s1258_s6, %s1147_s18  ;;  %s316_s26 = scalar_lea.vmem %s1259_s7, %s1147_s18 }
  0x11   : > { %968 = vmatprep.mubr.msk.f32.mxu0 %vm345_vm0, %v334_v9  ;;  %v337_v15 = vld [vmem:[%s1153_s21 + $0x18] sm:$0xff]  ;;  %v338_v16 = vld [vmem:[%s1153_s21 + $0x20] sm:$0xff]  ;;  %v339_v20 = vld [vmem:[%s1153_s21 + $0x28] sm:$0xff]  ;;  %1013 = vmatpush3.msra.mxu1 %v642_v35 }
  0x12   : > { %969 = vmatmul.mubr.msk.f32.vlgmr.msra.gmra.mrb[0].mxu0 %vm345_vm0, %v335_v10  ;;  %v340_v21 = vld [vmem:[%s1153_s21 + $0x30] sm:$0xff]  ;;  %v341_v23 = vld [vmem:[%s1153_s21 + $0x38] sm:$0xff]  ;;  %v318_v24 = vld [vmem:[%s298_s10] sm:$0xff] }
  0x13   : > { %1033 = vmatpush3.bf16.msra.mxu0 %v1030_v8  ;;  %971 = vmatprep.mubr.msk.f32.mxu0 %vm345_vm0, %v336_v11  ;;  %v319_v25 = vld [vmem:[%s298_s10 + $0x8] sm:$0xff]  ;;  %v320_v26 = vld [vmem:[%s298_s10 + $0x10] sm:$0xff]  ;;  %v321_v27 = vld [vmem:[%s298_s10 + $0x18] sm:$0xff] }
  0x14   : > { %1035 = vmatprep.subr.bf16.mxu0 %v1034_v12  ;;  %v322_v28 = vld [vmem:[%s298_s10 + $0x20] sm:$0xff]  ;;  %v323_v29 = vld [vmem:[%s298_s10 + $0x28] sm:$0xff]  ;;  %v324_v30 = vld [vmem:[%s298_s10 + $0x30] sm:$0xff] }
  0x15   : > { %v325_v31 = vld [vmem:[%s298_s10 + $0x38] sm:$0xff] }
  0x16   : > { %972 = vmatmul.mubr.msk.f32.gmra.mrb[2].mxu0 %vm345_vm0, %v337_v15 }
  0x17   : > { %1037 = vmatpush3.bf16.msra.mxu0 %v1034_v12  ;;  %974 = vmatprep.mubr.msk.f32.mxu0 %vm345_vm0, %v338_v16 }
  0x18   : > { %1039 = vmatprep.subr.bf16.mxu0 %v1038_v17 }
  0x1a   : > { %975 = vmatmul.mubr.msk.f32.gmra.mrb[4].mxu0 %vm345_vm0, %v339_v20 }
  0x1b   : > { %1041 = vmatpush3.bf16.msra.mxu0 %v1038_v17  ;;  %977 = vmatprep.mubr.msk.f32.mxu0 %vm345_vm0, %v340_v21 }
  0x1c   : > { %1044 = vmatprep.subr.msk.bf16.mxu0 %vm1043_vm3, %v1042_v22 }
  0x1e   : > { %978 = vmatmul.mubr.msk.f32.gmra.mrb[6].mxu0 %vm345_vm0, %v341_v23 }
  0x1f   : > { %1047 = vmatpush3.bf16.msk.msra.mxu0 %vm1043_vm3, %v1042_v22  ;;  %996 = vmatprep.mubr.msk.f32.mxu0 %vm475_vm4, %v318_v24 }
  0x22   : > { %997 = vmatmul.mubr.msk.f32.vlgmr.msra.gmra.mrb[0].mxu0 %vm475_vm4, %v319_v25 }
  0x23   : > { %999 = vmatprep.mubr.msk.f32.mxu0 %vm475_vm4, %v320_v26 }
  0x26   : > { %1000 = vmatmul.mubr.msk.f32.gmra.mrb[2].mxu0 %vm475_vm4, %v321_v27 }
  0x27   : > { %1002 = vmatprep.mubr.msk.f32.mxu0 %vm475_vm4, %v322_v28 }
  0x2a   : > { %1003 = vmatmul.mubr.msk.f32.gmra.mrb[4].mxu0 %vm475_vm4, %v323_v29 }
  0x2b   : > { %1005 = vmatprep.mubr.msk.f32.mxu0 %vm475_vm4, %v324_v30 }
  0x2e   : > { %1006 = vmatmul.mubr.msk.f32.gmra.mrb[6].mxu0 %vm475_vm4, %v325_v31 }
  0xf5   : > { %v998_v37 = vpop.f32.mrb[0].mxu0 }
  0xf6   : > { %v617_v38 = vadd.f32 %v998_v37, %v913_v36  ;;  %v570_v39 = vpop.f32.mrb[1].mxu0 }
  0xf7   : > { %v616_v40 = vadd.f32 %v913_v36, %v570_v39 }
  0xf8   : > { %v625_v41 = vmax.f32 %v617_v38, 0.0 }
  0xf9   : > { %v624_v42 = vmax.f32 %v616_v40, 0.0  ;;  %v1001_v43 = vpop.f32.mrb[2].mxu0 }
  0xfa   : > { %633 = vst.msk [vmem:[%s1211_s22 + $0x8] sm:$0xff] %vm345_vm0, %v625_v41  ;;  %v619_v44 = vadd.f32 %v1001_v43, %v913_v36  ;;  %v580_v45 = vpop.f32.mrb[3].mxu0 }
  0xfb   : > { %632 = vst.msk [vmem:[%s1211_s22] sm:$0xff] %vm345_vm0, %v624_v42  ;;  %v618_v46 = vadd.f32 %v913_v36, %v580_v45  ;;  %1014 = vmatprep.mubr.msk.f32.mxu1 %vm345_vm0, %v624_v42 }
  0xfc   : > { %v627_v47 = vmax.f32 %v619_v44, 0.0  ;;  %1015 = vmatmul.mubr.msk.f32.vlgmr.msra.gmra.mrb[0].mxu1 %vm345_vm0, %v625_v41 }
  0xfd   : > { %v626_v48 = vmax.f32 %v618_v46, 0.0  ;;  %v1004_v49 = vpop.f32.mrb[4].mxu0 }
  0xfe   : > { %635 = vst.msk [vmem:[%s1211_s22 + $0x18] sm:$0xff] %vm345_vm0, %v627_v47  ;;  %v621_v50 = vadd.f32 %v1004_v49, %v913_v36  ;;  %v590_v51 = vpop.f32.mrb[5].mxu0 }
  0xff   : > { %634 = vst.msk [vmem:[%s1211_s22 + $0x10] sm:$0xff] %vm345_vm0, %v626_v48  ;;  %v620_v52 = vadd.f32 %v913_v36, %v590_v51  ;;  %1017 = vmatprep.mubr.msk.f32.mxu1 %vm345_vm0, %v626_v48 }
 0x100   : > { %v629_v53 = vmax.f32 %v621_v50, 0.0  ;;  %1018 = vmatmul.mubr.msk.f32.gmra.mrb[2].mxu1 %vm345_vm0, %v627_v47 }
 0x101   : > { %v628_v54 = vmax.f32 %v620_v52, 0.0  ;;  %v1007_v55 = vpop.f32.mrb[6].mxu0 }
 0x102   : > { %637 = vst.msk [vmem:[%s1211_s22 + $0x28] sm:$0xff] %vm345_vm0, %v629_v53  ;;  %v623_v56 = vadd.f32 %v1007_v55, %v913_v36  ;;  %v600_v57 = vpop.f32.mrb[7].mxu0 }
 0x103   : > { %636 = vst.msk [vmem:[%s1211_s22 + $0x20] sm:$0xff] %vm345_vm0, %v628_v54  ;;  %v622_v58 = vadd.f32 %v913_v36, %v600_v57  ;;  %1020 = vmatprep.mubr.msk.f32.mxu1 %vm345_vm0, %v628_v54 }
 0x104   : > { %v631_v59 = vmax.f32 %v623_v56, 0.0  ;;  %1021 = vmatmul.mubr.msk.f32.gmra.mrb[4].mxu1 %vm345_vm0, %v629_v53 }
 0x105   : > { %v630_v60 = vmax.f32 %v622_v58, 0.0 }
 0x106   : > { %639 = vst.msk [vmem:[%s1211_s22 + $0x38] sm:$0xff] %vm345_vm0, %v631_v59 }
 0x107   : > { %638 = vst.msk [vmem:[%s1211_s22 + $0x30] sm:$0xff] %vm345_vm0, %v630_v60  ;;  %1023 = vmatprep.mubr.msk.f32.mxu1 %vm345_vm0, %v630_v60 }
 0x108   : > { %1024 = vmatmul.mubr.msk.f32.gmra.mrb[6].mxu1 %vm345_vm0, %v631_v59 }
 0x1cf   : > { %v1016_v61 = vpop.f32.mrb[0].mxu1 }
 0x1d0   : > { %774 = vst.msk [vmem:[%s316_s26 + $0x8] sm:$0xff] %vm772_vm5, %v1016_v61  ;;  %v733_v62 = vpop.f32.mrb[1].mxu1 }
 0x1d1   : > { %773 = vst.msk [vmem:[%s316_s26] sm:$0xff] %vm772_vm5, %v733_v62 }
 0x1d3   : > { %v1019_v63 = vpop.f32.mrb[2].mxu1 }
 0x1d4   : > { %776 = vst.msk [vmem:[%s316_s26 + $0x18] sm:$0xff] %vm772_vm5, %v1019_v63  ;;  %v743_v0 = vpop.f32.mrb[3].mxu1 }
 0x1d5   : > { %775 = vst.msk [vmem:[%s316_s26 + $0x10] sm:$0xff] %vm772_vm5, %v743_v0 }
 0x1d7   : > { %v1022_v1 = vpop.f32.mrb[4].mxu1 }
 0x1d8   : > { %778 = vst.msk [vmem:[%s316_s26 + $0x28] sm:$0xff] %vm772_vm5, %v1022_v1  ;;  %v753_v2 = vpop.f32.mrb[5].mxu1 }
 0x1d9   : > { %777 = vst.msk [vmem:[%s316_s26 + $0x20] sm:$0xff] %vm772_vm5, %v753_v2 }
 0x1db   : > { %v1025_v3 = vpop.f32.mrb[6].mxu1 }
 0x1dc   : > { %780 = vst.msk [vmem:[%s316_s26 + $0x38] sm:$0xff] %vm772_vm5, %v1025_v3  ;;  %v763_v4 = vpop.f32.mrb[7].mxu1 }
 0x1dd   : > { %779 = vst.msk [vmem:[%s316_s26 + $0x30] sm:$0xff] %vm772_vm5, %v763_v4 }
 0x1de PF: > { %s18_s24 = sadd.s32 1, %s1075_s24  }
 0x1df   : > { %p15_p4 = scmp.ge.s32.totalorder %s18_s24, 4  }
 0x1e1   :  { %17 = sbr.rel (!%p15_p4) target bundleno = 1 (0x1), region = 89 }

// kernel: feature_extraction.18
= control target key start
LH: loop header
LB: loop body
LE: loop exit
PB: predicated region body
PF: predicated region fallthrough
CT: control target
= control target key end

     0   :  { %s1453_s30 = smov 0   ;;  %s1645_s0 = inlined_call_operand.vmem [shape: f32[128,60], index: 0, kind: input, shape index: {}]   ;;  %s1646_s1 = inlined_call_operand.vmem [shape: f32[128,60], index: 1, kind: input, shape index: {}]   ;;  %s1647_s2 = inlined_call_operand.vmem [shape: f32[128,24], index: 2, kind: input, shape index: {}]   ;;  %s1648_s3 = inlined_call_operand.vmem [shape: f32[60,24], index: 3, kind: input, shape index: {}]   ;;  %s1649_s4 = inlined_call_operand.vmem [shape: f32[60,24], index: 4, kind: input, shape index: {}]   ;;  %s1650_s5 = inlined_call_operand.vmem [shape: f32[24,24], index: 5, kind: input, shape index: {}]   ;;  %s1651_s6 = inlined_call_operand.vmem [shape: f32[1,24], index: 6, kind: input, shape index: {}]   ;;  %s1652_s7 = inlined_call_operand.vmem [shape: f32[24,12], index: 7, kind: input, shape index: {}]   ;;  %s1653_s8 = inlined_call_operand.vmem [shape: f32[128,24], index: 8, kind: output, shape index: {0}]   ;;  %s1654_s9 = inlined_call_operand.vmem [shape: f32[128,12], index: 9, kind: output, shape index: {1}]  }
   0x1 LB: > { %s1127_s10 = sadd.s32 4294967295, %s1400_s30   ;;  %p1131_p0 = scmp.ge.s32.totalorder %s1400_s30, 1  ;;  %s1400_s30 = sphi %s1453_s30, %s20_s30  }
   0x2   : > { %p313_p1 = scmp.lt.s32.totalorder %s1400_s30, 3 }
   0x4   : > { %p314_p2 = pnand %p1131_p0, %p313_p1 }
   0x5   : > { %v402_v0 = vld [vmem:[%s1648_s3] sm:$0xff] (!%p314_p2)  ;;  %v403_v1 = vld [vmem:[%s1648_s3 + $0x8] sm:$0xff] (!%p314_p2)  ;;  %v404_v2 = vld [vmem:[%s1648_s3 + $0x10] sm:$0xff] (!%p314_p2)  ;;  %s1132_s17 = sshll.u32 (!%p314_p2), %s1127_s10, 3  ;;  %vm426_vm0 = vcmask (!%p314_p2), 490496   ;;  %vm451_vm1 = vcmask (!%p314_p2), 1043456  }
   0x6   : > { %317 = sbr.rel (%p314_p2) target bundleno = 486 (0x1e6), region = 52  ;;  %v1343_v3 = vpack.c.bf16 (!%p314_p2), %v403_v1, %v402_v0  ;;  %v405_v4 = vld [vmem:[%s1648_s3 + $0x18] sm:$0xff] (!%p314_p2)  ;;  %p365_p3 = scmp.lt.s32.totalorder (!%p314_p2), %s1132_s17, 15  ;;  %v406_v6 = vld [vmem:[%s1648_s3 + $0x20] sm:$0xff] (!%p314_p2)  ;;  %v407_v7 = vld [vmem:[%s1648_s3 + $0x28] sm:$0xff] (!%p314_p2)  ;;  %vm1402_vm2 = vmmov (!%p314_p2), 1  }
   0x7   : > { %v1347_v5 = vpack.c.bf16 (!%p314_p2), %v405_v4, %v404_v2  ;;  %v418_v8 = vld [vmem:[%s1649_s4] sm:$0xff] (!%p314_p2)  ;;  %v419_v9 = vld [vmem:[%s1649_s4 + $0x8] sm:$0xff] (!%p314_p2)  ;;  %v420_v11 = vld [vmem:[%s1649_s4 + $0x10] sm:$0xff] (!%p314_p2)  ;;  %v1351_v13 = vpack.c.bf16 (!%p314_p2), %v407_v7, %v406_v6  ;;  %vm703_vm4 = vcmask (!%p314_p2), 195584   ;;  %vm1004_vm5 = vcmask (!%p314_p2), 97280  }
   0x8   : > { %1344 = vmatprep.subr.bf16.mxu0 (!%p314_p2), %v1343_v3  ;;  %v1325_v10 = vpack.c.bf16 (!%p314_p2), %v419_v9, %v418_v8  ;;  %v421_v12 = vld [vmem:[%s1649_s4 + $0x18] sm:$0xff] (!%p314_p2)  ;;  %v422_v15 = vld [vmem:[%s1649_s4 + $0x20] sm:$0xff] (!%p314_p2)  ;;  %v423_v16 = vld [vmem:[%s1649_s4 + $0x28] sm:$0xff] (!%p314_p2) }
   0x9   : > { %1346 = vmatpush3.bf16.msra.mxu0 (!%p314_p2), %v1343_v3  ;;  %v1329_v14 = vpack.c.bf16 (!%p314_p2), %v421_v12, %v420_v11  ;;  %v408_v17 = vld [vmem:[%s1648_s3 + $0x30] sm:$0xff] (!%p314_p2)  ;;  %v409_v18 = vld [vmem:[%s1648_s3 + $0x38] sm:$0xf] (!%p314_p2)  ;;  %v1333_v20 = vpack.c.bf16 (!%p314_p2), %v423_v16, %v422_v15  ;;  %vm1526_vm3 = vmpackc.low (!%p314_p2), %vm451_vm1, %vm1402_vm2 }
   0xa   : > { %1348 = vmatprep.subr.bf16.mxu0 (!%p314_p2), %v1347_v5  ;;  %1326 = vmatprep.subr.bf16.mxu1 (!%p314_p2), %v1325_v10  ;;  %v1355_v21 = vpack.c.bf16 (!%p314_p2), %v409_v18, %v408_v17  ;;  %v424_v22 = vld [vmem:[%s1649_s4 + $0x30] sm:$0xff] (!%p314_p2)  ;;  %v425_v23 = vld [vmem:[%s1649_s4 + $0x38] sm:$0xf] (!%p314_p2)  ;;  %v700_v26 = vld [vmem:[%s1650_s5] sm:$0xff] (!%p314_p2) }
   0xb   : > { %1328 = vmatpush3.bf16.msra.mxu1 (!%p314_p2), %v1325_v10  ;;  %v701_v27 = vld [vmem:[%s1650_s5 + $0x8] sm:$0xff] (!%p314_p2)  ;;  %v1337_v28 = vpack.c.bf16 (!%p314_p2), %v425_v23, %v424_v22  ;;  %v872_v30 = vld [vmem:[%s1652_s7] sm:$0xff] (!%p314_p2)  ;;  %v702_v35 = vld [vmem:[%s1650_s5 + $0x10] sm:$0xff] (!%p314_p2) }
   0xc   : > { %1330 = vmatprep.subr.bf16.mxu1 (!%p314_p2), %v1329_v14  ;;  %v1361_v29 = vpack.c.bf16 (!%p314_p2), %v701_v27, %v700_v26  ;;  %v873_v31 = vld [vmem:[%s1652_s7 + $0x8] sm:$0xff] (!%p314_p2)  ;;  %v874_v56 = vld [vmem:[%s1652_s7 + $0x10] sm:$0xff] (!%p314_p2)  ;;  %v1168_v1 = vld [vmem:[%s1651_s6] ss:$0 sm:$0xff] (!%p314_p2) }
   0xd   : > { %s1658_s17 = smov (!%p365_p3, %s1132_s17), 15  ;;  %1350 = vmatpush3.bf16.msra.mxu0 %v1347_v5  ;;  %v1365_v34 = vpack.c.bf16 %v873_v31, %v872_v30 }
   0xe   : > { %s1491_s12 = sshll.u32 %s1658_s17, 3  ;;  %1352 = vmatprep.subr.bf16.mxu0 %v1351_v13 }
   0xf   : > { %s1509_s23 = scalar_lea.vmem %s1645_s0, %s1491_s12  ;;  %s1515_s26 = scalar_lea.vmem %s1646_s1, %s1491_s12  ;;  %1332 = vmatpush3.bf16.msra.mxu1 %v1329_v14 }
  0x10   : > { %v394_v19 = vld [vmem:[%s1509_s23] sm:$0xff]  ;;  %1334 = vmatprep.subr.bf16.mxu1 %v1333_v20  ;;  %v395_v32 = vld [vmem:[%s1509_s23 + $0x8] sm:$0xff]  ;;  %v396_v33 = vld [vmem:[%s1509_s23 + $0x10] sm:$0xff]  ;;  %s380_s25 = scalar_lea.vmem %s1647_s2, %s1491_s12  ;;  %s1604_s11 = scalar_lea.vmem %s1653_s8, %s1491_s12 }
  0x11   : > { %1277 = vmatprep.mubr.msk.f32.mxu0 %vm426_vm0, %v394_v19  ;;  %v410_v24 = vld [vmem:[%s1515_s26] sm:$0xff]  ;;  %1354 = vmatpush3.bf16.msra.mxu0 %v1351_v13  ;;  %v411_v36 = vld [vmem:[%s1515_s26 + $0x8] sm:$0xff]  ;;  %v397_v37 = vld [vmem:[%s1509_s23 + $0x18] sm:$0xff]  ;;  %s392_s15 = scalar_lea.vmem %s1654_s9, %s1491_s12 }
  0x12   : > { %1249 = vmatprep.mubr.msk.f32.mxu1 %vm426_vm0, %v410_v24  ;;  %1357 = vmatprep.subr.msk.bf16.mxu0 %vm1526_vm3, %v1355_v21  ;;  %v412_v38 = vld [vmem:[%s1515_s26 + $0x10] sm:$0xff]  ;;  %v398_v39 = vld [vmem:[%s1509_s23 + $0x20] sm:$0xff]  ;;  %v413_v40 = vld [vmem:[%s1515_s26 + $0x18] sm:$0xff] }
  0x13   : > { %1336 = vmatpush3.bf16.msra.mxu1 %v1333_v20  ;;  %v399_v41 = vld [vmem:[%s1509_s23 + $0x28] sm:$0xff]  ;;  %v414_v42 = vld [vmem:[%s1515_s26 + $0x20] sm:$0xff]  ;;  %v400_v43 = vld [vmem:[%s1509_s23 + $0x30] sm:$0xff] }
  0x14   : > { %1339 = vmatprep.subr.msk.bf16.mxu1 %vm1526_vm3, %v1337_v28  ;;  %v415_v44 = vld [vmem:[%s1515_s26 + $0x28] sm:$0xff]  ;;  %v401_v45 = vld [vmem:[%s1509_s23 + $0x38] sm:$0xff]  ;;  %v416_v46 = vld [vmem:[%s1515_s26 + $0x30] sm:$0xff] }
  0x15   : > { %1360 = vmatpush3.bf16.msk.msra.mxu0 %vm1526_vm3, %v1355_v21  ;;  %v692_v47 = vld [vmem:[%s380_s25] sm:$0xff]  ;;  %v417_v48 = vld [vmem:[%s1515_s26 + $0x38] sm:$0xff]  ;;  %v693_v49 = vld [vmem:[%s380_s25 + $0x8] sm:$0xff] }
  0x16   : > { %1362 = vmatprep.subr.bf16.mxu0 %v1361_v29  ;;  %v694_v50 = vld [vmem:[%s380_s25 + $0x10] sm:$0xff]  ;;  %v695_v51 = vld [vmem:[%s380_s25 + $0x18] sm:$0xff]  ;;  %v696_v52 = vld [vmem:[%s380_s25 + $0x20] sm:$0xff] }
  0x17   : > { %1342 = vmatpush3.bf16.msk.msra.mxu1 %vm1526_vm3, %v1337_v28  ;;  %v697_v53 = vld [vmem:[%s380_s25 + $0x28] sm:$0xff]  ;;  %v698_v54 = vld [vmem:[%s380_s25 + $0x30] sm:$0xff]  ;;  %v699_v55 = vld [vmem:[%s380_s25 + $0x38] sm:$0xff] }
  0x18   : > { %1278 = vmatmul.mubr.msk.f32.vlgmr.msra.gmra.mrb[0].mxu0 %vm426_vm0, %v395_v32  ;;  %1366 = vmatprep.subr.bf16.mxu1 %v1365_v34 }
  0x19   : > { %1364 = vmatpush3.bf16.msra.mxu0 %v1361_v29  ;;  %1280 = vmatprep.mubr.msk.f32.mxu0 %vm426_vm0, %v396_v33 }
  0x1a   : > { %1293 = vmatprep.subr.mxu0 %v702_v35  ;;  %1250 = vmatmul.mubr.msk.f32.vlgmr.msra.gmra.mrb[0].mxu1 %vm426_vm0, %v411_v36 }
  0x1b   : > { %1252 = vmatprep.mubr.msk.f32.mxu1 %vm426_vm0, %v412_v38  ;;  %1368 = vmatpush3.bf16.msra.mxu1 %v1365_v34 }
  0x1c   : > { %1281 = vmatmul.mubr.msk.f32.gmra.mrb[2].mxu0 %vm426_vm0, %v397_v37  ;;  %1311 = vmatprep.subr.mxu1 %v874_v56 }
  0x1d   : > { %1283 = vmatprep.mubr.msk.f32.mxu0 %vm426_vm0, %v398_v39  ;;  %1294 = vmatpush3.msra.mxu0 %v702_v35 }
  0x1e   : > { %1253 = vmatmul.mubr.msk.f32.gmra.mrb[2].mxu1 %vm426_vm0, %v413_v40 }
  0x1f   : > { %1255 = vmatprep.mubr.msk.f32.mxu1 %vm426_vm0, %v414_v42  ;;  %1312 = vmatpush3.msra.mxu1 %v874_v56 }
  0x20   : > { %1284 = vmatmul.mubr.msk.f32.gmra.mrb[4].mxu0 %vm426_vm0, %v399_v41 }
  0x21   : > { %1286 = vmatprep.mubr.msk.f32.mxu0 %vm426_vm0, %v400_v43 }
  0x22   : > { %1256 = vmatmul.mubr.msk.f32.gmra.mrb[4].mxu1 %vm426_vm0, %v415_v44 }
  0x23   : > { %1258 = vmatprep.mubr.msk.f32.mxu1 %vm426_vm0, %v416_v46 }
  0x24   : > { %1287 = vmatmul.mubr.msk.f32.gmra.mrb[6].mxu0 %vm426_vm0, %v401_v45 }
  0x25   : > { %1295 = vmatprep.mubr.msk.f32.mxu0 %vm703_vm4, %v692_v47 }
  0x26   : > { %1259 = vmatmul.mubr.msk.f32.gmra.mrb[6].mxu1 %vm426_vm0, %v417_v48 }
  0x28   : > { %1296 = vmatmul.mubr.msk.f32.vlgmr.msra.gmra.mrb[0].mxu0 %vm703_vm4, %v693_v49 }
  0x29   : > { %1298 = vmatprep.mubr.msk.f32.mxu0 %vm703_vm4, %v694_v50 }
  0x2c   : > { %1299 = vmatmul.mubr.msk.f32.gmra.mrb[2].mxu0 %vm703_vm4, %v695_v51 }
  0x2d   : > { %1301 = vmatprep.mubr.msk.f32.mxu0 %vm703_vm4, %v696_v52 }
  0x30   : > { %1302 = vmatmul.mubr.msk.f32.gmra.mrb[4].mxu0 %vm703_vm4, %v697_v53 }
  0x31   : > { %1304 = vmatprep.mubr.msk.f32.mxu0 %vm703_vm4, %v698_v54 }
  0x34   : > { %1305 = vmatmul.mubr.msk.f32.gmra.mrb[6].mxu0 %vm703_vm4, %v699_v55 }
  0xed   : > { %v1251_v57 = vpop.f32.mrb[0].mxu1 }
  0xee   : > { %v521_v58 = vpop.f32.mrb[1].mxu1 }
  0xf1   : > { %v1254_v59 = vpop.f32.mrb[2].mxu1 }
  0xf2   : > { %v531_v60 = vpop.f32.mrb[3].mxu1 }
  0xf5   : > { %v1257_v61 = vpop.f32.mrb[4].mxu1 }
  0xf6   : > { %v541_v62 = vpop.f32.mrb[5].mxu1 }
  0xf9   : > { %v1260_v63 = vpop.f32.mrb[6].mxu1 }
  0xfa   : > { %v551_v2 = vpop.f32.mrb[7].mxu1 }
  0xfb   : > { %v1297_v0 = vpop.f32.mrb[0].mxu0 }
  0xfc   : > { %v1369_v3 = vadd.f32 %v1297_v0, %v1251_v57  ;;  %v794_v4 = vpop.f32.mrb[1].mxu0 }
  0xfd   : > { %v1370_v5 = vadd.f32 %v794_v4, %v521_v58 }
  0xfe   : > { %v849_v6 = vadd.f32 %v1369_v3, %v1168_v1 }
  0xff   : > { %v848_v7 = vadd.f32 %v1370_v5, %v1168_v1  ;;  %v1300_v8 = vpop.f32.mrb[2].mxu0 }
 0x100   : > { %v857_v9 = vmax.f32 %v849_v6, 0.0  ;;  %v1371_v10 = vadd.f32 %v1300_v8, %v1254_v59  ;;  %v804_v11 = vpop.f32.mrb[3].mxu0 }
 0x101   : > { %v856_v12 = vmax.f32 %v848_v7, 0.0  ;;  %v1372_v13 = vadd.f32 %v804_v11, %v531_v60 }
 0x102   : > { %865 = vst.msk [vmem:[%s1604_s11 + $0x8] sm:$0xff] %vm703_vm4, %v857_v9  ;;  %v851_v14 = vadd.f32 %v1371_v10, %v1168_v1 }
 0x103   : > { %864 = vst.msk [vmem:[%s1604_s11] sm:$0xff] %vm703_vm4, %v856_v12  ;;  %v850_v15 = vadd.f32 %v1372_v13, %v1168_v1  ;;  %v1303_v16 = vpop.f32.mrb[4].mxu0  ;;  %1313 = vmatprep.mubr.msk.f32.mxu1 %vm703_vm4, %v856_v12 }
 0x104   : > { %v859_v17 = vmax.f32 %v851_v14, 0.0  ;;  %v1373_v18 = vadd.f32 %v1303_v16, %v1257_v61  ;;  %v814_v19 = vpop.f32.mrb[5].mxu0  ;;  %1314 = vmatmul.mubr.msk.f32.vlgmr.msra.gmra.mrb[8].mxu1 %vm703_vm4, %v857_v9 }
 0x105   : > { %v858_v20 = vmax.f32 %v850_v15, 0.0  ;;  %v1374_v21 = vadd.f32 %v814_v19, %v541_v62 }
 0x106   : > { %867 = vst.msk [vmem:[%s1604_s11 + $0x18] sm:$0xff] %vm703_vm4, %v859_v17  ;;  %v853_v22 = vadd.f32 %v1373_v18, %v1168_v1 }
 0x107   : > { %866 = vst.msk [vmem:[%s1604_s11 + $0x10] sm:$0xff] %vm703_vm4, %v858_v20  ;;  %v852_v23 = vadd.f32 %v1374_v21, %v1168_v1  ;;  %v1306_v24 = vpop.f32.mrb[6].mxu0  ;;  %1316 = vmatprep.mubr.msk.f32.mxu1 %vm703_vm4, %v858_v20 }
 0x108   : > { %v861_v25 = vmax.f32 %v853_v22, 0.0  ;;  %v1375_v26 = vadd.f32 %v1306_v24, %v1260_v63  ;;  %v824_v27 = vpop.f32.mrb[7].mxu0  ;;  %1317 = vmatmul.mubr.msk.f32.gmra.mrb[10].mxu1 %vm703_vm4, %v859_v17 }
 0x109   : > { %v860_v28 = vmax.f32 %v852_v23, 0.0  ;;  %v1376_v29 = vadd.f32 %v824_v27, %v551_v2 }
 0x10a   : > { %869 = vst.msk [vmem:[%s1604_s11 + $0x28] sm:$0xff] %vm703_vm4, %v861_v25  ;;  %v855_v30 = vadd.f32 %v1375_v26, %v1168_v1 }
 0x10b   : > { %868 = vst.msk [vmem:[%s1604_s11 + $0x20] sm:$0xff] %vm703_vm4, %v860_v28  ;;  %v854_v31 = vadd.f32 %v1376_v29, %v1168_v1  ;;  %1319 = vmatprep.mubr.msk.f32.mxu1 %vm703_vm4, %v860_v28 }
 0x10c   : > { %v863_v32 = vmax.f32 %v855_v30, 0.0  ;;  %1320 = vmatmul.mubr.msk.f32.gmra.mrb[12].mxu1 %vm703_vm4, %v861_v25 }
 0x10d   : > { %v862_v33 = vmax.f32 %v854_v31, 0.0 }
 0x10e   : > { %871 = vst.msk [vmem:[%s1604_s11 + $0x38] sm:$0xff] %vm703_vm4, %v863_v32 }
 0x10f   : > { %870 = vst.msk [vmem:[%s1604_s11 + $0x30] sm:$0xff] %vm703_vm4, %v862_v33  ;;  %1322 = vmatprep.mubr.msk.f32.mxu1 %vm703_vm4, %v862_v33 }
 0x110   : > { %1323 = vmatmul.mubr.msk.f32.gmra.mrb[14].mxu1 %vm703_vm4, %v863_v32 }
 0x1d7   : > { %v1315_v34 = vpop.f32.mrb[8].mxu1 }
 0x1d8   : > { %1006 = vst.msk [vmem:[%s392_s15 + $0x8] sm:$0xff] %vm1004_vm5, %v1315_v34  ;;  %v965_v35 = vpop.f32.mrb[9].mxu1 }
 0x1d9   : > { %1005 = vst.msk [vmem:[%s392_s15] sm:$0xff] %vm1004_vm5, %v965_v35 }
 0x1db   : > { %v1318_v36 = vpop.f32.mrb[10].mxu1 }
 0x1dc   : > { %1008 = vst.msk [vmem:[%s392_s15 + $0x18] sm:$0xff] %vm1004_vm5, %v1318_v36  ;;  %v975_v37 = vpop.f32.mrb[11].mxu1 }
 0x1dd   : > { %1007 = vst.msk [vmem:[%s392_s15 + $0x10] sm:$0xff] %vm1004_vm5, %v975_v37 }
 0x1df   : > { %v1321_v38 = vpop.f32.mrb[12].mxu1 }
 0x1e0   : > { %1010 = vst.msk [vmem:[%s392_s15 + $0x28] sm:$0xff] %vm1004_vm5, %v1321_v38  ;;  %v985_v39 = vpop.f32.mrb[13].mxu1 }
 0x1e1   : > { %1009 = vst.msk [vmem:[%s392_s15 + $0x20] sm:$0xff] %vm1004_vm5, %v985_v39 }
 0x1e3   : > { %v1324_v40 = vpop.f32.mrb[14].mxu1 }
 0x1e4   : > { %1012 = vst.msk [vmem:[%s392_s15 + $0x38] sm:$0xff] %vm1004_vm5, %v1324_v40  ;;  %v995_v41 = vpop.f32.mrb[15].mxu1 }
 0x1e5   : > { %1011 = vst.msk [vmem:[%s392_s15 + $0x30] sm:$0xff] %vm1004_vm5, %v995_v41 }
 0x1e6 PF: > { %s20_s30 = sadd.s32 1, %s1400_s30  }
 0x1e7   : > { %p17_p4 = scmp.ge.s32.totalorder %s20_s30, 4  }
 0x1e9   :  { %19 = sbr.rel (!%p17_p4) target bundleno = 1 (0x1), region = 100 }

// kernel: feature_extraction.21
= control target key start
LH: loop header
LB: loop body
LE: loop exit
PB: predicated region body
PF: predicated region fallthrough
CT: control target
= control target key end

     0   :  { %s1796_s17 = smov 0   ;;  %s2042_s0 = inlined_call_operand.vmem [shape: f32[128,60], index: 0, kind: input, shape index: {}]   ;;  %s2043_s1 = inlined_call_operand.vmem [shape: f32[128,60], index: 1, kind: input, shape index: {}]   ;;  %s2044_s2 = inlined_call_operand.vmem [shape: f32[128,60], index: 2, kind: input, shape index: {}]   ;;  %s2045_s3 = inlined_call_operand.vmem [shape: f32[128,24], index: 3, kind: input, shape index: {}]   ;;  %s2046_s4 = inlined_call_operand.vmem [shape: f32[60,24], index: 4, kind: input, shape index: {}]   ;;  %s2047_s5 = inlined_call_operand.vmem [shape: f32[60,24], index: 5, kind: input, shape index: {}]   ;;  %s2048_s6 = inlined_call_operand.vmem [shape: f32[60,24], index: 6, kind: input, shape index: {}]   ;;  %s2049_s7 = inlined_call_operand.vmem [shape: f32[24,24], index: 7, kind: input, shape index: {}]   ;;  %s2050_s8 = inlined_call_operand.vmem [shape: f32[1,24], index: 8, kind: input, shape index: {}]   ;;  %s2051_s9 = inlined_call_operand.vmem [shape: f32[24,12], index: 9, kind: input, shape index: {}]   ;;  %s2052_s10 = inlined_call_operand.vmem [shape: f32[128,24], index: 10, kind: output, shape index: {0}]   ;;  %s2053_s11 = inlined_call_operand.vmem [shape: f32[128,12], index: 11, kind: output, shape index: {1}]  }
   0x1 LB: > { %s1371_s18 = sadd.s32 4294967295, %s1733_s17   ;;  %p1375_p0 = scmp.ge.s32.totalorder %s1733_s17, 1  ;;  %s1733_s17 = sphi %s1796_s17, %s22_s17  }
   0x2   : > { %p374_p1 = scmp.lt.s32.totalorder %s1733_s17, 3 }
   0x4   : > { %p375_p2 = pnand %p1375_p0, %p374_p1 }
   0x5   : > { %v494_v0 = vld [vmem:[%s2047_s5] sm:$0xff] (!%p375_p2)  ;;  %v495_v1 = vld [vmem:[%s2047_s5 + $0x8] sm:$0xff] (!%p375_p2)  ;;  %s1376_s25 = sshll.u32 (!%p375_p2), %s1371_s18, 3  ;;  %v496_v5 = vld [vmem:[%s2047_s5 + $0x10] sm:$0xff] (!%p375_p2)  ;;  %vm502_vm0 = vcmask (!%p375_p2), 490496   ;;  %vm527_vm1 = vcmask (!%p375_p2), 1043456  }
   0x6   : > { %378 = sbr.rel (%p375_p2) target bundleno = 495 (0x1ef), region = 60  ;;  %v478_v2 = vld [vmem:[%s2046_s4] sm:$0xff] (!%p375_p2)  ;;  %v1624_v3 = vpack.c.bf16 (!%p375_p2), %v495_v1, %v494_v0  ;;  %v479_v4 = vld [vmem:[%s2046_s4 + $0x8] sm:$0xff] (!%p375_p2)  ;;  %v497_v6 = vld [vmem:[%s2047_s5 + $0x18] sm:$0xff] (!%p375_p2)  ;;  %p435_p3 = scmp.lt.s32.totalorder (!%p375_p2), %s1376_s25, 15  ;;  %vm1735_vm2 = vmmov (!%p375_p2), 1  }
   0x7   : > { %v1642_v7 = vpack.c.bf16 (!%p375_p2), %v479_v4, %v478_v2  ;;  %v1628_v8 = vpack.c.bf16 (!%p375_p2), %v497_v6, %v496_v5  ;;  %v480_v9 = vld [vmem:[%s2046_s4 + $0x10] sm:$0xff] (!%p375_p2)  ;;  %v481_v10 = vld [vmem:[%s2046_s4 + $0x18] sm:$0xff] (!%p375_p2)  ;;  %v498_v11 = vld [vmem:[%s2047_s5 + $0x20] sm:$0xff] (!%p375_p2)  ;;  %vm935_vm4 = vcmask (!%p375_p2), 195584   ;;  %vm1236_vm5 = vcmask (!%p375_p2), 97280  }
   0x8   : > { %1625 = vmatprep.subr.bf16.mxu1 (!%p375_p2), %v1624_v3  ;;  %v1646_v12 = vpack.c.bf16 (!%p375_p2), %v481_v10, %v480_v9  ;;  %v499_v13 = vld [vmem:[%s2047_s5 + $0x28] sm:$0xff] (!%p375_p2)  ;;  %v482_v14 = vld [vmem:[%s2046_s4 + $0x20] sm:$0xff] (!%p375_p2)  ;;  %v500_v18 = vld [vmem:[%s2047_s5 + $0x30] sm:$0xff] (!%p375_p2) }
   0x9   : > { %v483_v15 = vld [vmem:[%s2046_s4 + $0x28] sm:$0xff] (!%p375_p2)  ;;  %1643 = vmatprep.subr.bf16.mxu0 (!%p375_p2), %v1642_v7  ;;  %1627 = vmatpush3.bf16.msra.mxu1 (!%p375_p2), %v1624_v3  ;;  %v1632_v16 = vpack.c.bf16 (!%p375_p2), %v499_v13, %v498_v11  ;;  %v501_v19 = vld [vmem:[%s2047_s5 + $0x38] sm:$0xf] (!%p375_p2)  ;;  %v484_v20 = vld [vmem:[%s2046_s4 + $0x30] sm:$0xff] (!%p375_p2) }
   0xa   : > { %1645 = vmatpush3.bf16.msra.mxu0 (!%p375_p2), %v1642_v7  ;;  %1629 = vmatprep.subr.bf16.mxu1 (!%p375_p2), %v1628_v8  ;;  %v1650_v17 = vpack.c.bf16 (!%p375_p2), %v483_v15, %v482_v14  ;;  %v485_v21 = vld [vmem:[%s2046_s4 + $0x38] sm:$0xf] (!%p375_p2)  ;;  %v1636_v24 = vpack.c.bf16 (!%p375_p2), %v501_v19, %v500_v18  ;;  %vm1869_vm3 = vmpackc.low (!%p375_p2), %vm527_vm1, %vm1735_vm2  ;;  %v776_v27 = vld [vmem:[%s2048_s6] sm:$0xff] (!%p375_p2) }
   0xb   : > { %1647 = vmatprep.subr.bf16.mxu0 (!%p375_p2), %v1646_v12  ;;  %v1654_v26 = vpack.c.bf16 (!%p375_p2), %v485_v21, %v484_v20  ;;  %v777_v28 = vld [vmem:[%s2048_s6 + $0x8] sm:$0xff] (!%p375_p2)  ;;  %v778_v30 = vld [vmem:[%s2048_s6 + $0x10] sm:$0xff] (!%p375_p2)  ;;  %v779_v31 = vld [vmem:[%s2048_s6 + $0x18] sm:$0xff] (!%p375_p2) }
   0xc   : > { %v1660_v29 = vpack.c.bf16 (!%p375_p2), %v777_v28, %v776_v27  ;;  %v1664_v35 = vpack.c.bf16 (!%p375_p2), %v779_v31, %v778_v30  ;;  %v780_v37 = vld [vmem:[%s2048_s6 + $0x20] sm:$0xff] (!%p375_p2)  ;;  %v781_v38 = vld [vmem:[%s2048_s6 + $0x28] sm:$0xff] (!%p375_p2)  ;;  %v782_v44 = vld [vmem:[%s2048_s6 + $0x30] sm:$0xff] (!%p375_p2) }
   0xd   : > { %s2057_s25 = smov (!%p435_p3, %s1376_s25), 15  ;;  %1631 = vmatpush3.bf16.msra.mxu1 %v1628_v8  ;;  %v1668_v42 = vpack.c.bf16 %v781_v38, %v780_v37  ;;  %v783_v45 = vld [vmem:[%s2048_s6 + $0x38] sm:$0xf]  ;;  %v932_v51 = vld [vmem:[%s2049_s7] sm:$0xff]  ;;  %v933_v52 = vld [vmem:[%s2049_s7 + $0x8] sm:$0xff] }
   0xe   : > { %s1840_s27 = sshll.u32 %s2057_s25, 3  ;;  %1649 = vmatpush3.bf16.msra.mxu0 %v1646_v12  ;;  %1633 = vmatprep.subr.bf16.mxu1 %v1632_v16  ;;  %v1672_v49 = vpack.c.bf16 %v783_v45, %v782_v44  ;;  %v1678_v56 = vpack.c.bf16 %v933_v52, %v932_v51  ;;  %v934_v62 = vld [vmem:[%s2049_s7 + $0x10] sm:$0xff]  ;;  %v1104_v9 = vld [vmem:[%s2051_s9] sm:$0xff]  ;;  %v1105_v10 = vld [vmem:[%s2051_s9 + $0x8] sm:$0xff] }
   0xf   : > { %s1855_s16 = scalar_lea.vmem %s2043_s1, %s1840_s27  ;;  %s1861_s20 = scalar_lea.vmem %s2042_s0, %s1840_s27  ;;  %1651 = vmatprep.subr.bf16.mxu0 %v1650_v17  ;;  %v1682_v11 = vpack.c.bf16 %v1105_v10, %v1104_v9  ;;  %v1106_v12 = vld [vmem:[%s2051_s9 + $0x10] sm:$0xff]  ;;  %v1423_v38 = vld [vmem:[%s2050_s8] ss:$0 sm:$0xff] }
  0x10   : > { %v486_v22 = vld [vmem:[%s1855_s16] sm:$0xff]  ;;  %v487_v32 = vld [vmem:[%s1855_s16 + $0x8] sm:$0xff]  ;;  %v488_v34 = vld [vmem:[%s1855_s16 + $0x10] sm:$0xff]  ;;  %s1931_s28 = scalar_lea.vmem %s2044_s2, %s1840_s27  ;;  %s456_s25 = scalar_lea.vmem %s2045_s3, %s1840_s27 }
  0x11   : > { %v470_v23 = vld [vmem:[%s1861_s20] sm:$0xff]  ;;  %1520 = vmatprep.mubr.msk.f32.mxu1 %vm502_vm0, %v486_v22  ;;  %1635 = vmatpush3.bf16.msra.mxu1 %v1632_v16  ;;  %v471_v33 = vld [vmem:[%s1861_s20 + $0x8] sm:$0xff]  ;;  %v472_v36 = vld [vmem:[%s1861_s20 + $0x10] sm:$0xff]  ;;  %s2001_s12 = scalar_lea.vmem %s2052_s10, %s1840_s27 }
  0x12   : > { %1548 = vmatprep.mubr.msk.f32.mxu0 %vm502_vm0, %v470_v23  ;;  %1653 = vmatpush3.bf16.msra.mxu0 %v1650_v17  ;;  %v489_v39 = vld [vmem:[%s1855_s16 + $0x18] sm:$0xff]  ;;  %v490_v41 = vld [vmem:[%s1855_s16 + $0x20] sm:$0xff]  ;;  %v491_v46 = vld [vmem:[%s1855_s16 + $0x28] sm:$0xff] }
  0x13   : > { %1638 = vmatprep.subr.msk.bf16.mxu1 %vm1869_vm3, %v1636_v24  ;;  %1656 = vmatprep.subr.msk.bf16.mxu0 %vm1869_vm3, %v1654_v26  ;;  %v473_v40 = vld [vmem:[%s1861_s20 + $0x18] sm:$0xff]  ;;  %v474_v43 = vld [vmem:[%s1861_s20 + $0x20] sm:$0xff]  ;;  %v475_v47 = vld [vmem:[%s1861_s20 + $0x28] sm:$0xff] }
  0x14   : > { %v492_v48 = vld [vmem:[%s1855_s16 + $0x30] sm:$0xff]  ;;  %v493_v53 = vld [vmem:[%s1855_s16 + $0x38] sm:$0xff]  ;;  %v768_v55 = vld [vmem:[%s1931_s28] sm:$0xff] }
  0x15   : > { %1641 = vmatpush3.bf16.msk.msra.mxu1 %vm1869_vm3, %v1636_v24  ;;  %v476_v50 = vld [vmem:[%s1861_s20 + $0x30] sm:$0xff]  ;;  %v477_v54 = vld [vmem:[%s1861_s20 + $0x38] sm:$0xff]  ;;  %v772_v57 = vld [vmem:[%s1931_s28 + $0x20] sm:$0xff]  ;;  %s468_s20 = scalar_lea.vmem %s2053_s11, %s1840_s27 }
  0x16   : > { %1659 = vmatpush3.bf16.msk.msra.mxu0 %vm1869_vm3, %v1654_v26  ;;  %1686 = vmatprep.subr.bf16.mxu1 %v1660_v29  ;;  %v773_v58 = vld [vmem:[%s1931_s28 + $0x28] sm:$0xff]  ;;  %v774_v60 = vld [vmem:[%s1931_s28 + $0x30] sm:$0xff]  ;;  %v775_v63 = vld [vmem:[%s1931_s28 + $0x38] sm:$0xff] }
  0x17   : > { %1661 = vmatprep.subr.bf16.mxu0 %v1660_v29  ;;  %v769_v59 = vld [vmem:[%s1931_s28 + $0x8] sm:$0xff]  ;;  %v770_v61 = vld [vmem:[%s1931_s28 + $0x10] sm:$0xff]  ;;  %v771_v0 = vld [vmem:[%s1931_s28 + $0x18] sm:$0xff] }
  0x18   : > { %1521 = vmatmul.mubr.msk.f32.vlgmr.msra.gmra.mrb[0].mxu1 %vm502_vm0, %v487_v32  ;;  %v924_v1 = vld [vmem:[%s456_s25] sm:$0xff]  ;;  %v925_v2 = vld [vmem:[%s456_s25 + $0x8] sm:$0xff]  ;;  %v926_v3 = vld [vmem:[%s456_s25 + $0x10] sm:$0xff] }
  0x19   : > { %1549 = vmatmul.mubr.msk.f32.vlgmr.msra.gmra.mrb[0].mxu0 %vm502_vm0, %v471_v33  ;;  %1690 = vmatpush3.bf16.msra.mxu1 %v1660_v29  ;;  %v927_v4 = vld [vmem:[%s456_s25 + $0x18] sm:$0xff]  ;;  %v928_v5 = vld [vmem:[%s456_s25 + $0x20] sm:$0xff]  ;;  %v929_v6 = vld [vmem:[%s456_s25 + $0x28] sm:$0xff] }
  0x1a   : > { %1663 = vmatpush3.bf16.msra.mxu0 %v1660_v29  ;;  %1523 = vmatprep.mubr.msk.f32.mxu1 %vm502_vm0, %v488_v34  ;;  %v930_v7 = vld [vmem:[%s456_s25 + $0x30] sm:$0xff]  ;;  %v931_v8 = vld [vmem:[%s456_s25 + $0x38] sm:$0xff] }
  0x1b   : > { %1551 = vmatprep.mubr.msk.f32.mxu0 %vm502_vm0, %v472_v36  ;;  %1665 = vmatprep.subr.bf16.mxu0 %v1664_v35 }
  0x1c   : > { %1524 = vmatmul.mubr.msk.f32.gmra.mrb[2].mxu1 %vm502_vm0, %v489_v39  ;;  %1687 = vmatprep.subr.bf16.mxu1 %v1664_v35 }
  0x1d   : > { %1552 = vmatmul.mubr.msk.f32.gmra.mrb[2].mxu0 %vm502_vm0, %v473_v40  ;;  %1691 = vmatpush3.bf16.msra.mxu1 %v1664_v35 }
  0x1e   : > { %1667 = vmatpush3.bf16.msra.mxu0 %v1664_v35  ;;  %1526 = vmatprep.mubr.msk.f32.mxu1 %vm502_vm0, %v490_v41 }
  0x1f   : > { %1554 = vmatprep.mubr.msk.f32.mxu0 %vm502_vm0, %v474_v43  ;;  %1669 = vmatprep.subr.bf16.mxu0 %v1668_v42 }
  0x20   : > { %1527 = vmatmul.mubr.msk.f32.gmra.mrb[4].mxu1 %vm502_vm0, %v491_v46  ;;  %1688 = vmatprep.subr.bf16.mxu1 %v1668_v42 }
  0x21   : > { %1555 = vmatmul.mubr.msk.f32.gmra.mrb[4].mxu0 %vm502_vm0, %v475_v47  ;;  %1692 = vmatpush3.bf16.msra.mxu1 %v1668_v42 }
  0x22   : > { %1671 = vmatpush3.bf16.msra.mxu0 %v1668_v42  ;;  %1529 = vmatprep.mubr.msk.f32.mxu1 %vm502_vm0, %v492_v48 }
  0x23   : > { %1557 = vmatprep.mubr.msk.f32.mxu0 %vm502_vm0, %v476_v50  ;;  %1674 = vmatprep.subr.msk.bf16.mxu0 %vm1869_vm3, %v1672_v49 }
  0x24   : > { %1530 = vmatmul.mubr.msk.f32.gmra.mrb[6].mxu1 %vm502_vm0, %v493_v53  ;;  %1689 = vmatprep.subr.msk.bf16.mxu1 %vm1869_vm3, %v1672_v49 }
  0x25   : > { %1558 = vmatmul.mubr.msk.f32.gmra.mrb[6].mxu0 %vm502_vm0, %v477_v54  ;;  %1693 = vmatpush3.bf16.msk.msra.mxu1 %vm1869_vm3, %v1672_v49 }
  0x26   : > { %1677 = vmatpush3.bf16.msk.msra.mxu0 %vm1869_vm3, %v1672_v49  ;;  %1576 = vmatprep.mubr.msk.f32.mxu0 %vm502_vm0, %v768_v55 }
  0x27   : > { %1582 = vmatprep.mubr.msk.f32.mxu1 %vm502_vm0, %v772_v57  ;;  %1679 = vmatprep.subr.bf16.mxu0 %v1678_v56 }
  0x28   : > { %1583 = vmatmul.mubr.msk.f32.vlgmr.msra.gmra.mrb[8].mxu1 %vm502_vm0, %v773_v58  ;;  %1683 = vmatprep.subr.bf16.mxu1 %v1682_v11 }
  0x29   : > { %1577 = vmatmul.mubr.msk.f32.vlgmr.msra.gmra.mrb[0].mxu0 %vm502_vm0, %v769_v59  ;;  %1585 = vmatprep.mubr.msk.f32.mxu1 %vm502_vm0, %v774_v60 }
  0x2a   : > { %1681 = vmatpush3.bf16.msra.mxu0 %v1678_v56  ;;  %1579 = vmatprep.mubr.msk.f32.mxu0 %vm502_vm0, %v770_v61 }
  0x2b   : > { %1592 = vmatprep.subr.mxu0 %v934_v62  ;;  %1685 = vmatpush3.bf16.msra.mxu1 %v1682_v11 }
  0x2c   : > { %1586 = vmatmul.mubr.msk.f32.gmra.mrb[10].mxu1 %vm502_vm0, %v775_v63  ;;  %1610 = vmatprep.subr.mxu1 %v1106_v12 }
  0x2d   : > { %1580 = vmatmul.mubr.msk.f32.gmra.mrb[2].mxu0 %vm502_vm0, %v771_v0 }
  0x2e   : > { %1593 = vmatpush3.msra.mxu0 %v934_v62  ;;  %1594 = vmatprep.mubr.msk.f32.mxu0 %vm935_vm4, %v924_v1 }
  0x2f   : > { %1611 = vmatpush3.msra.mxu1 %v1106_v12 }
  0x31   : > { %1595 = vmatmul.mubr.msk.f32.vlgmr.msra.gmra.mrb[0].mxu0 %vm935_vm4, %v925_v2 }
  0x32   : > { %1597 = vmatprep.mubr.msk.f32.mxu0 %vm935_vm4, %v926_v3 }
  0x35   : > { %1598 = vmatmul.mubr.msk.f32.gmra.mrb[2].mxu0 %vm935_vm4, %v927_v4 }
  0x36   : > { %1600 = vmatprep.mubr.msk.f32.mxu0 %vm935_vm4, %v928_v5 }
  0x39   : > { %1601 = vmatmul.mubr.msk.f32.gmra.mrb[8].mxu0 %vm935_vm4, %v929_v6 }
  0x3a   : > { %1603 = vmatprep.mubr.msk.f32.mxu0 %vm935_vm4, %v930_v7 }
  0x3d   : > { %1604 = vmatmul.mubr.msk.f32.gmra.mrb[10].mxu0 %vm935_vm4, %v931_v8 }
  0xeb   : > { %v1522_v13 = vpop.f32.mrb[0].mxu1 }
  0xec   : > { %v597_v14 = vpop.f32.mrb[1].mxu1 }
  0xef   : > { %v1525_v15 = vpop.f32.mrb[2].mxu1 }
  0xf0   : > { %v607_v16 = vpop.f32.mrb[3].mxu1 }
  0xf3   : > { %v1528_v17 = vpop.f32.mrb[4].mxu1 }
  0xf4   : > { %v1556_v18 = vpop.f32.mrb[4].mxu0  ;;  %v617_v19 = vpop.f32.mrb[5].mxu1 }
  0xf5   : > { %v755_v20 = vadd.f32 %v1556_v18, %v1528_v17  ;;  %v749_v21 = vpop.f32.mrb[5].mxu0 }
  0xf6   : > { %v750_v22 = vadd.f32 %v749_v21, %v617_v19 }
  0xf7   : > { %v1531_v23 = vpop.f32.mrb[6].mxu1 }
  0xf8   : > { %v1559_v24 = vpop.f32.mrb[6].mxu0  ;;  %v627_v25 = vpop.f32.mrb[7].mxu1 }
  0xf9   : > { %v765_v26 = vadd.f32 %v1559_v24, %v1531_v23  ;;  %v759_v27 = vpop.f32.mrb[7].mxu0 }
  0xfa   : > { %v760_v28 = vadd.f32 %v759_v27, %v627_v25 }
  0xfb   : > { %v1584_v29 = vpop.f32.mrb[8].mxu1 }
  0xfc   : > { %v921_v30 = vadd.f32 %v1584_v29, %v755_v20  ;;  %v897_v31 = vpop.f32.mrb[9].mxu1 }
  0xfd   : > { %v920_v32 = vadd.f32 %v897_v31, %v750_v22 }
  0xff   : > { %v1587_v33 = vpop.f32.mrb[10].mxu1 }
 0x100   : > { %v923_v34 = vadd.f32 %v1587_v33, %v765_v26  ;;  %v907_v35 = vpop.f32.mrb[11].mxu1 }
 0x101   : > { %v922_v36 = vadd.f32 %v907_v35, %v760_v28 }
 0x104   : > { %v1596_v37 = vpop.f32.mrb[0].mxu0 }
 0x105   : > { %v1694_v39 = vadd.f32 %v1596_v37, %v1522_v13  ;;  %v1026_v40 = vpop.f32.mrb[1].mxu0 }
 0x106   : > { %v1695_v41 = vadd.f32 %v1026_v40, %v597_v14 }
 0x107   : > { %v1081_v42 = vadd.f32 %v1694_v39, %v1423_v38 }
 0x108   : > { %v1080_v43 = vadd.f32 %v1695_v41, %v1423_v38  ;;  %v1599_v44 = vpop.f32.mrb[2].mxu0 }
 0x109   : > { %v1089_v45 = vmax.f32 %v1081_v42, 0.0  ;;  %v1696_v46 = vadd.f32 %v1599_v44, %v1525_v15  ;;  %v1036_v47 = vpop.f32.mrb[3].mxu0 }
 0x10a   : > { %v1088_v48 = vmax.f32 %v1080_v43, 0.0  ;;  %v1697_v49 = vadd.f32 %v1036_v47, %v607_v16 }
 0x10b   : > { %1097 = vst.msk [vmem:[%s2001_s12 + $0x8] sm:$0xff] %vm935_vm4, %v1089_v45  ;;  %v1083_v50 = vadd.f32 %v1696_v46, %v1423_v38 }
 0x10c   : > { %1096 = vst.msk [vmem:[%s2001_s12] sm:$0xff] %vm935_vm4, %v1088_v48  ;;  %v1082_v51 = vadd.f32 %v1697_v49, %v1423_v38  ;;  %v1602_v52 = vpop.f32.mrb[8].mxu0  ;;  %1612 = vmatprep.mubr.msk.f32.mxu1 %vm935_vm4, %v1088_v48 }
 0x10d   : > { %v1091_v53 = vmax.f32 %v1083_v50, 0.0  ;;  %v1070_v54 = vadd.f32 %v1602_v52, %v921_v30  ;;  %v1046_v55 = vpop.f32.mrb[9].mxu0  ;;  %1613 = vmatmul.mubr.msk.f32.vlgmr.msra.gmra.mrb[12].mxu1 %vm935_vm4, %v1089_v45 }
 0x10e   : > { %v1090_v56 = vmax.f32 %v1082_v51, 0.0  ;;  %v1069_v57 = vadd.f32 %v1046_v55, %v920_v32 }
 0x10f   : > { %1099 = vst.msk [vmem:[%s2001_s12 + $0x18] sm:$0xff] %vm935_vm4, %v1091_v53  ;;  %v1085_v58 = vadd.f32 %v1423_v38, %v1070_v54 }
 0x110   : > { %1098 = vst.msk [vmem:[%s2001_s12 + $0x10] sm:$0xff] %vm935_vm4, %v1090_v56  ;;  %v1084_v59 = vadd.f32 %v1423_v38, %v1069_v57  ;;  %v1605_v60 = vpop.f32.mrb[10].mxu0  ;;  %1615 = vmatprep.mubr.msk.f32.mxu1 %vm935_vm4, %v1090_v56 }
 0x111   : > { %v1093_v61 = vmax.f32 %v1085_v58, 0.0  ;;  %v1072_v62 = vadd.f32 %v1605_v60, %v923_v34  ;;  %v1056_v63 = vpop.f32.mrb[11].mxu0  ;;  %1616 = vmatmul.mubr.msk.f32.gmra.mrb[14].mxu1 %vm935_vm4, %v1091_v53 }
 0x112   : > { %v1092_v0 = vmax.f32 %v1084_v59, 0.0  ;;  %v1071_v1 = vadd.f32 %v1056_v63, %v922_v36 }
 0x113   : > { %1101 = vst.msk [vmem:[%s2001_s12 + $0x28] sm:$0xff] %vm935_vm4, %v1093_v61  ;;  %v1087_v2 = vadd.f32 %v1423_v38, %v1072_v62 }
 0x114   : > { %1100 = vst.msk [vmem:[%s2001_s12 + $0x20] sm:$0xff] %vm935_vm4, %v1092_v0  ;;  %v1086_v3 = vadd.f32 %v1423_v38, %v1071_v1  ;;  %1618 = vmatprep.mubr.msk.f32.mxu1 %vm935_vm4, %v1092_v0 }
 0x115   : > { %v1095_v4 = vmax.f32 %v1087_v2, 0.0  ;;  %1619 = vmatmul.mubr.msk.f32.gmra.mrb[16].mxu1 %vm935_vm4, %v1093_v61 }
 0x116   : > { %v1094_v5 = vmax.f32 %v1086_v3, 0.0 }
 0x117   : > { %1103 = vst.msk [vmem:[%s2001_s12 + $0x38] sm:$0xff] %vm935_vm4, %v1095_v4 }
 0x118   : > { %1102 = vst.msk [vmem:[%s2001_s12 + $0x30] sm:$0xff] %vm935_vm4, %v1094_v5  ;;  %1621 = vmatprep.mubr.msk.f32.mxu1 %vm935_vm4, %v1094_v5 }
 0x119   : > { %1622 = vmatmul.mubr.msk.f32.gmra.mrb[18].mxu1 %vm935_vm4, %v1095_v4 }
 0x1e0   : > { %v1614_v6 = vpop.f32.mrb[12].mxu1 }
 0x1e1   : > { %1238 = vst.msk [vmem:[%s468_s20 + $0x8] sm:$0xff] %vm1236_vm5, %v1614_v6  ;;  %v1197_v7 = vpop.f32.mrb[13].mxu1 }
 0x1e2   : > { %1237 = vst.msk [vmem:[%s468_s20] sm:$0xff] %vm1236_vm5, %v1197_v7 }
 0x1e4   : > { %v1617_v8 = vpop.f32.mrb[14].mxu1 }
 0x1e5   : > { %1240 = vst.msk [vmem:[%s468_s20 + $0x18] sm:$0xff] %vm1236_vm5, %v1617_v8  ;;  %v1207_v9 = vpop.f32.mrb[15].mxu1 }
 0x1e6   : > { %1239 = vst.msk [vmem:[%s468_s20 + $0x10] sm:$0xff] %vm1236_vm5, %v1207_v9 }
 0x1e8   : > { %v1620_v10 = vpop.f32.mrb[16].mxu1 }
 0x1e9   : > { %1242 = vst.msk [vmem:[%s468_s20 + $0x28] sm:$0xff] %vm1236_vm5, %v1620_v10  ;;  %v1217_v11 = vpop.f32.mrb[17].mxu1 }
 0x1ea   : > { %1241 = vst.msk [vmem:[%s468_s20 + $0x20] sm:$0xff] %vm1236_vm5, %v1217_v11 }
 0x1ec   : > { %v1623_v12 = vpop.f32.mrb[18].mxu1 }
 0x1ed   : > { %1244 = vst.msk [vmem:[%s468_s20 + $0x38] sm:$0xff] %vm1236_vm5, %v1623_v12  ;;  %v1227_v13 = vpop.f32.mrb[19].mxu1 }
 0x1ee   : > { %1243 = vst.msk [vmem:[%s468_s20 + $0x30] sm:$0xff] %vm1236_vm5, %v1227_v13 }
 0x1ef PF: > { %s22_s17 = sadd.s32 1, %s1733_s17  }
 0x1f0   : > { %p19_p4 = scmp.ge.s32.totalorder %s22_s17, 4  }
 0x1f2   :  { %21 = sbr.rel (!%p19_p4) target bundleno = 1 (0x1), region = 111 }

// kernel: feature_extraction.14
= control target key start
LH: loop header
LB: loop body
LE: loop exit
PB: predicated region body
PF: predicated region fallthrough
CT: control target
= control target key end

     0   :  { %s8464_s21 = smov 0   ;;  %s13456_s0 = inlined_call_operand.vmem [shape: f32[128,24], index: 0, kind: input, shape index: {}]   ;;  %s13457_s1 = inlined_call_operand.vmem [shape: f32[128,16,12], index: 1, kind: input, shape index: {}]   ;;  %s13458_s2 = inlined_call_operand.vmem [shape: f32[24,36], index: 2, kind: input, shape index: {}]   ;;  %s13459_s3 = inlined_call_operand.vmem [shape: f32[1,36], index: 3, kind: input, shape index: {}]   ;;  %s13460_s4 = inlined_call_operand.vmem [shape: f32[12,24], index: 4, kind: input, shape index: {}]   ;;  %s13461_s5 = inlined_call_operand.vmem [shape: f32[12,12], index: 5, kind: input, shape index: {}]   ;;  %s13462_s6 = inlined_call_operand.vmem [shape: f32[128,60], index: 6, kind: output, shape index: {}]  }
   0x1 LB: > { %s7407_s22 = sadd.s32 4294967295, %s8420_s21   ;;  %p7411_p0 = scmp.ge.s32.totalorder %s8420_s21, 1  ;;  %s8420_s21 = sphi %s8464_s21, %s16_s21  }
   0x2   : > { %p225_p1 = scmp.lt.s32.totalorder %s8420_s21, 3 }
   0x4   : > { %p226_p2 = pnand %p7411_p0, %p225_p1 }
   0x6   : > { %229 = sbr.rel (%p226_p2) target bundleno = 1012 (0x3f4), region = 44 }
   0xd   : > { %v288_v0 = vld [vmem:[%s13458_s2] sm:$0xff]  ;;  %v289_v1 = vld [vmem:[%s13458_s2 + $0x8] sm:$0xff]  ;;  %s7412_s27 = sshll.u32 %s7407_s22, 3  ;;  %v290_v3 = vld [vmem:[%s13458_s2 + $0x10] sm:$0xff]  ;;  %vm298_vm0 = vcmask 195584   ;;  %vm1919_vm1 = vcmask 1043456   ;;  %v440_v18 = vlaneseq }
   0xe   : > { %v8370_v2 = vpack.c.bf16 %v289_v1, %v288_v0  ;;  %p262_p3 = scmp.lt.s32.totalorder %s7412_s27, 15  ;;  %v1532_v12 = vld [vmem:[%s13460_s4] sm:$0xff]  ;;  %v1533_v13 = vld [vmem:[%s13460_s4 + $0x8] sm:$0xf]  ;;  %vm8422_vm2 = vmmov 1   ;;  %v13761_v15 = vmov 0 }
   0xf   : > { %v8374_v14 = vpack.c.bf16 %v1533_v13, %v1532_v12  ;;  %vm8515_vm3 = vmpackc.low %vm1919_vm1, %vm8422_vm2  ;;  %v8423_v16 = vmov 1966171168   ;;  %s7414_s14 = sshll.u32 %s7407_s22, 6  ;;  %v441_v20 = vshrl.u32 %v440_v18, 7  ;;  %v8528_v21 = vld [vmem:[%s13459_s3] ss:$0 sm:$0xff] }
  0x10   : > { %8371 = vmatprep.subr.bf16.mxu0 %v8370_v2  ;;  %8386 = vmatprep.subr.bf16.mxu1 %v8370_v2  ;;  %s14541_s27 = smov (!%p262_p3, %s7412_s27), 15  ;;  %v13762_v15 = vsel %vm8515_vm3, 4294967295, %v13761_v15  ;;  %v438_v17 = vunpack.c.l.s4 %v8423_v16  ;;  %p268_p4 = scmp.lt.s32.totalorder %s7414_s14, 127  ;;  %vm1534_vm4 = vcmask 97280   ;;  %vm6922_vm5 = vcmask 1041409  }
  0x11   : > { %8373 = vmatpush3.bf16.msra.mxu0 %v8370_v2  ;;  %8388 = vmatpush3.bf16.msra.mxu1 %v8370_v2  ;;  %s7413_s30 = sshll.u32 %s14541_s27, 3  ;;  %13763 = vst [vmem:[#allocation2_spill] sm:$0xff] %v13762_v15  ;;  %v8537_v31 = vsub.s32 0, %v441_v20  ;;  %s8424_s22 = smov 116   ;;  %vm6924_vm6 = vcmask 1042434   ;;  %vm6926_vm7 = vcmask 1043459  }
  0x12   : > { %7964 = vmatprep.subr.mxu0 %v290_v3  ;;  %8387 = vmatprep.subr.mxu1 %v290_v3  ;;  %s8491_s9 = scalar_lea.vmem %s13456_s0, %s7413_s30  ;;  %v439_v19 = vunpack.c.0.s8 %v438_v17  ;;  %s14543_s14 = smov (!%p268_p4, %s7414_s14), 127  ;;  %vm6928_vm8 = vcmask 1044484   ;;  %vm6930_vm9 = vcmask 1045509   ;;  %vm6932_vm10 = vcmask 1046534  }
  0x13   : > { %v280_v4 = vld [vmem:[%s8491_s9] sm:$0xff]  ;;  %v281_v5 = vld [vmem:[%s8491_s9 + $0x8] sm:$0xff]  ;;  %v282_v8 = vld [vmem:[%s8491_s9 + $0x10] sm:$0xff]  ;;  %s7688_s17 = sshll.u32 %s14543_s14, 4  ;;  %s8425_s23 = smov 104   ;;  %vm6934_vm11 = vcmask 1047559  }
  0x14   : > { %v284_v6 = vld [vmem:[%s8491_s9 + $0x20] sm:$0xff]  ;;  %7966 = vmatprep.mubr.msk.f32.mxu0 %vm298_vm0, %v280_v4  ;;  %v285_v7 = vld [vmem:[%s8491_s9 + $0x28] sm:$0xff]  ;;  %v286_v9 = vld [vmem:[%s8491_s9 + $0x30] sm:$0xff]  ;;  %v8530_v22 = vsub.s32 %v439_v19, %v441_v20  ;;  %s8571_s20 = scalar_lea.vmem %s13457_s1, %s7688_s17  ;;  %s8426_s8 = smov 24   ;;  %vm7321_vm12 = vcmask 293888   ;;  %vm7330_vm13 = vcmask 490496  }
  0x15   : > { %7965 = vmatpush3.msra.mxu0 %v290_v3  ;;  %8389 = vmatpush3.msra.mxu1 %v290_v3  ;;  %v283_v10 = vld [vmem:[%s8491_s9 + $0x18] sm:$0xff]  ;;  %v828_v61 = vld [vmem:[%s8571_s20] sm:$0xff]  ;;  %v829_v3 = vld [vmem:[%s8571_s20 + $0x8] sm:$0xff]  ;;  %s8427_s10 = smov 12   ;;  %s8428_s11 = smov 36  }
  0x16   : > { %7967 = vmatmul.mubr.msk.f32.vlgmr.msra.gmra.mrb[0].mxu0 %vm298_vm0, %v281_v5  ;;  %7972 = vmatprep.mubr.msk.f32.mxu1 %vm298_vm0, %v284_v6  ;;  %v287_v11 = vld [vmem:[%s8491_s9 + $0x38] sm:$0xff]  ;;  %s13301_s13 = scalar_lea.vmem %s13462_s6, %s7413_s30 }
  0x17   : > { %7969 = vmatprep.mubr.msk.f32.mxu0 %vm298_vm0, %v282_v8  ;;  %7973 = vmatmul.mubr.msk.f32.vlgmr.msra.gmra.mrb[0].mxu1 %vm298_vm0, %v285_v7 }
  0x18   : > { %7975 = vmatprep.mubr.msk.f32.mxu1 %vm298_vm0, %v286_v9  ;;  %8376 = vmatprep.subr.msk.bf16.mxu1 %vm8515_vm3, %v8374_v14 }
  0x19   : > { %8379 = vmatpush3.bf16.msk.msra.mxu1 %vm8515_vm3, %v8374_v14 }
  0x1a   : > { %7970 = vmatmul.mubr.msk.f32.gmra.mrb[2].mxu0 %vm298_vm0, %v283_v10 }
  0x1b   : > { %7976 = vmatmul.mubr.msk.f32.gmra.mrb[2].mxu1 %vm298_vm0, %v287_v11 }
  0xe9   : > { %v7968_v23 = vpop.f32.mrb[0].mxu0 }
  0xea   : > { %v395_v24 = vadd.f32 %v7968_v23, %v8528_v21  ;;  %v389_v25 = vpop.f32.mrb[1].mxu0  ;;  %v7974_v27 = vpop.f32.mrb[0].mxu1  ;;  %v830_v23 = vld [vmem:[%s8571_s20 + $0x10] sm:$0xff] }
  0xeb   : > { %v390_v26 = vadd.f32 %v8528_v21, %v389_v25  ;;  %v409_v30 = vpop.f32.mrb[1].mxu1  ;;  %v415_v38 = vadd.f32 %v7974_v27, %v8528_v21  ;;  %v832_v25 = vld [vmem:[%s8571_s20 + $0x20] sm:$0xff] }
  0xec   : > { %v485_v28 = vcombine.high %v395_v24, %v395_v24  ;;  %v492_v29 = vrot.slane %v395_v24, %v8530_v22  ;;  %v410_v62 = vadd.f32 %v8528_v21, %v409_v30  ;;  %v831_v24 = vld [vmem:[%s8571_s20 + $0x18] sm:$0xff] }
  0xed   : > { %v436_v32 = vcombine.high %v390_v26, %v390_v26  ;;  %v443_v33 = vrot.slane %v390_v26, %v8530_v22  ;;  %v8540_v34 = vpop.f32.mrb[2].mxu0  ;;  %v681_v47 = vcombine.high %v415_v38, %v415_v38  ;;  %v688_v56 = vrot.slane %v415_v38, %v8530_v22 }
  0xee   : > { %v499_v35 = vrot.slane %v485_v28, %v8530_v22  ;;  %v500_v36 = vcombine.high %v492_v29, %v492_v29  ;;  %v8544_v37 = vrot.slane %v492_v29, %v8530_v22  ;;  %v8548_v39 = vpop.f32.mrb[3].mxu0  ;;  %v8552_v43 = vpop.f32.mrb[2].mxu1  ;;  %v632_v20 = vcombine.high %v410_v62, %v410_v62 }
  0xef   : > { %v450_v40 = vrot.slane %v436_v32, %v8530_v22  ;;  %v451_v41 = vcombine.high %v443_v33, %v443_v33  ;;  %v459_v42 = vrot.slane %v443_v33, %v8530_v22  ;;  %v8560_v48 = vpop.f32.mrb[3].mxu1  ;;  %v695_v6 = vrot.slane %v681_v47, %v8530_v22 }
  0xf0   : > { %v501_v44 = vcombine.high %v499_v35, %v499_v35  ;;  %v8555_v45 = vrot.slane %v499_v35, %v8530_v22  ;;  %v8558_v46 = vrot.slane %v500_v36, %v8530_v22  ;;  %v8564_v49 = vrot.slane %v8544_v37, %v8537_v31 }
  0xf1   : > { %v452_v50 = vcombine.high %v450_v40, %v450_v40  ;;  %v466_v51 = vrot.slane %v450_v40, %v8530_v22  ;;  %v473_v52 = vrot.slane %v451_v41, %v8530_v22  ;;  %v481_v55 = vcombine.high %v459_v42, %v459_v42 }
  0xf2   : > { %v8574_v53 = vrot.slane %v501_v44, %v8530_v22  ;;  %v531_v54 = vcombine.high %v8555_v45, %v8555_v45  ;;  %v8581_v58 = vrot.slane %v459_v42, %v8537_v31  ;;  %2644 = vrot.lane.b32.xlu0 %v8564_v49, %s8424_s22  ;;  %v530_v59 = vcombine.high %v8544_v37, %v8544_v37 }
  0xf3   : > { %v480_v57 = vrot.slane %v452_v50, %v8530_v22  ;;  %v483_v60 = vcombine.high %v473_v52, %v473_v52  ;;  %v532_v63 = vcombine.high %v8558_v46, %v8558_v46  ;;  %v482_v2 = vcombine.high %v466_v51, %v466_v51 }
  0xf4   : > { %v533_v0 = vcombine.high %v8574_v53, %v8574_v53  ;;  %v8594_v1 = vrot.slane %v531_v54, %v8537_v31  ;;  %v8598_v4 = vrot.slane %v473_v52, %v8537_v31  ;;  %v8601_v5 = vrot.slane %v481_v55, %v8537_v31 }
  0xf5   : > { %v696_v7 = vcombine.high %v688_v56, %v688_v56  ;;  %v484_v8 = vcombine.high %v480_v57, %v480_v57  ;;  %v8605_v9 = vrot.slane %v688_v56, %v8530_v22  ;;  %v8609_v10 = vrot.slane %v8558_v46, %v8537_v31 }
  0xf6   : > { %v1276_v11 = vadd.f32 %v8581_v58, %v828_v61  ;;  %v8613_v12 = vrot.slane %v483_v60, %v8537_v31  ;;  %v8616_v13 = vrot.slane %v466_v51, %v8537_v31  ;;  %v1277_v16 = vadd.f32 %v8581_v58, %v829_v3 }
  0xf7   : > { %v8619_v14 = vrot.slane %v696_v7, %v8530_v22  ;;  %v8623_v17 = vrot.slane %v480_v57, %v8537_v31  ;;  %v8627_v18 = vrot.slane %v8605_v9, %v8537_v31  ;;  %2646 = vrot.lane.b32.xlu1 %v8609_v10, %s8424_s22  ;;  %v8635_v26 = vrot.slane %v533_v0, %v8537_v31  ;;  %v834_v0 = vld [vmem:[%s8571_s20 + $0x30] sm:$0xff] }
  0xf8   : > { %v1404_v19 = vmax.f32 %v1276_v11, 0.0  ;;  %v8638_v27 = vrot.slane %v482_v2, %v8537_v31  ;;  %v697_v28 = vcombine.high %v695_v6, %v695_v6  ;;  %v1405_v29 = vmax.f32 %v1277_v16, 0.0  ;;  %v835_v2 = vld [vmem:[%s8571_s20 + $0x38] sm:$0xff]  ;;  %v836_v11 = vld [vmem:[%s8571_s20 + $0x40] sm:$0xff]  ;;  %v837_v16 = vld [vmem:[%s8571_s20 + $0x48] sm:$0xff] }
  0xf9   : > { %13764 = vst [vmem:[#allocation3_spill] sm:$0xff] %v8627_v18  ;;  %2708 = vrot.lane.b32.xlu0 %v8627_v18, %s8424_s22  ;;  %v8646_v32 = vrot.slane %v8619_v14, %v8537_v31  ;;  %v639_v33 = vrot.slane %v410_v62, %v8530_v22  ;;  %v8650_v35 = vrot.slane %v632_v20, %v8530_v22  ;;  %v833_v62 = vld [vmem:[%s8571_s20 + $0x28] sm:$0xff] }
  0xfa   : > { %7982 = vmatprep.mubr.msk.f32.mxu1 %vm1534_vm4, %v1404_v19  ;;  %v6282_v30 = vsel %vm1534_vm4, %v1404_v19, -inf  ;;  %v6283_v36 = vsel %vm1534_vm4, %v1405_v29, -inf  ;;  %v1278_v38 = vadd.f32 %v8598_v4, %v830_v23  ;;  %v1279_v40 = vadd.f32 %v8598_v4, %v831_v24  ;;  %v838_v24 = vld [vmem:[%s8571_s20 + $0x50] sm:$0xff] }
  0xfb   : > { %13765 = vst [vmem:[#allocation4_spill] sm:$0xff] %v8646_v32  ;;  %7983 = vmatmul.mubr.msk.f32.vlgmr.msra.gmra.mrb[4].mxu1 %vm1534_vm4, %v1405_v29  ;;  %v1280_v41 = vadd.f32 %v8601_v5, %v832_v25  ;;  %v8658_v42 = vrot.slane %v695_v6, %v8530_v22  ;;  %v6284_v44 = vmax.f32 %v6282_v30, %v6283_v36 }
  0xfc   : > { %2710 = vrot.lane.b32.xlu1 %v8646_v32, %s8424_s22  ;;  %v647_v47 = vcombine.high %v639_v33, %v639_v33  ;;  %v8663_v50 = vrot.slane %v639_v33, %v8530_v22  ;;  %v8666_v51 = vrot.slane %v484_v8, %v8537_v31  ;;  %v1406_v52 = vmax.f32 %v1278_v38, 0.0 }
  0xfd   : > { %v1407_v54 = vmax.f32 %v1279_v40, 0.0  ;;  %v1408_v55 = vmax.f32 %v1280_v41, 0.0  ;;  %v8669_v56 = vrot.slane %v697_v28, %v8530_v22  ;;  %v726_v57 = vcombine.high %v8605_v9, %v8605_v9  ;;  %4826 = vrot.lane.b32.xlu0 %v8564_v49, %s8425_s23 }
  0xfe   : > { %v6285_v61 = vrot.slane %v6284_v44, 4  ;;  %v648_v3 = vcombine.high %v8650_v35, %v8650_v35  ;;  %v8683_v6 = vrot.slane %v647_v47, %v8530_v22  ;;  %7985 = vmatprep.mubr.msk.f32.mxu1 %vm1534_vm4, %v1406_v52  ;;  %v6291_v7 = vsel %vm1534_vm4, %v1406_v52, -inf }
  0xff   : > { %v6292_v8 = vsel %vm1534_vm4, %v1407_v54, -inf  ;;  %v8692_v20 = vrot.slane %v8663_v50, %v8537_v31  ;;  %7986 = vmatmul.mubr.msk.f32.gmra.mrb[6].mxu1 %vm1534_vm4, %v1407_v54  ;;  %v6300_v25 = vsel %vm1534_vm4, %v1408_v55, -inf  ;;  %v1281_v28 = vadd.f32 %v8601_v5, %v833_v62 }
 0x100   : > { %v6286_v19 = vmax.f32 %v6284_v44, %v6285_v61  ;;  %4828 = vrot.lane.b32.xlu1 %v8609_v10, %s8425_s23  ;;  %v6293_v23 = vmax.f32 %v6291_v7, %v6292_v8  ;;  %7988 = vmatprep.mubr.msk.f32.mxu1 %vm1534_vm4, %v1408_v55  ;;  %v1282_v29 = vadd.f32 %v8613_v12, %v834_v0 }
 0x101   : > { %13766 = vst [vmem:[#allocation5_spill] sm:$0xff] %v8692_v20  ;;  %v1283_v30 = vadd.f32 %v8613_v12, %v835_v2  ;;  %2628 = vrot.lane.b32.xlu0 %v8581_v58, %s8424_s22  ;;  %v1284_v38 = vadd.f32 %v8616_v13, %v836_v11  ;;  %v1285_v40 = vadd.f32 %v8616_v13, %v837_v16  ;;  %v1409_v41 = vmax.f32 %v1281_v28, 0.0  ;;  %v839_v28 = vld [vmem:[%s8571_s20 + $0x58] sm:$0xff] }
 0x102   : > { %v6287_v33 = vrot.slane %v6286_v19, 2  ;;  %v6294_v36 = vrot.slane %v6293_v23, 4  ;;  %v1410_v44 = vmax.f32 %v1282_v29, 0.0  ;;  %v1286_v52 = vadd.f32 %v8623_v17, %v838_v24 }
 0x103   : > { %v1411_v47 = vmax.f32 %v1283_v30, 0.0  ;;  %v8712_v55 = vrot.slane %v8683_v6, %v8537_v31  ;;  %v1412_v61 = vmax.f32 %v1284_v38, 0.0  ;;  %v1413_v62 = vmax.f32 %v1285_v40, 0.0  ;;  %7989 = vmatmul.mubr.msk.f32.gmra.mrb[8].mxu1 %vm1534_vm4, %v1409_v41 }
 0x104   : > { %v6295_v54 = vmax.f32 %v6293_v23, %v6294_v36  ;;  %2632 = vrot.lane.b32.xlu1 %v8601_v5, %s8424_s22  ;;  %v8714_v0 = vmax.f32 %v6286_v19, %v6287_v33  ;;  %v6301_v2 = vsel %vm1534_vm4, %v1409_v41, -inf  ;;  %v6309_v7 = vsel %vm1534_vm4, %v1410_v44, -inf  ;;  %7991 = vmatprep.mubr.msk.f32.mxu1 %vm1534_vm4, %v1410_v44  ;;  %v840_v19 = vld [vmem:[%s8571_s20 + $0x60] sm:$0xff] }
 0x105   : > { %v6310_v8 = vsel %vm1534_vm4, %v1411_v47, -inf  ;;  %v6302_v16 = vmax.f32 %v6300_v25, %v6301_v2  ;;  %2692 = vrot.lane.b32.xlu0 %v8692_v20, %s8424_s22  ;;  %v1414_v24 = vmax.f32 %v1286_v52, 0.0  ;;  %v728_v29 = vcombine.high %v8619_v14, %v8619_v14 }
 0x106   : > { %v6296_v11 = vrot.slane %v6295_v54, 2  ;;  %v6311_v23 = vmax.f32 %v6309_v7, %v6310_v8  ;;  %v8729_v30 = vrot.slane %v8650_v35, %v8530_v22  ;;  %v6318_v33 = vsel %vm1534_vm4, %v1412_v61, -inf  ;;  %v841_v7 = vld [vmem:[%s8571_s20 + $0x68] sm:$0xff] }
 0x107   : > { %v6319_v25 = vsel %vm1534_vm4, %v1413_v62, -inf  ;;  %v8734_v36 = vrot.slane %v648_v3, %v8530_v22  ;;  %v6303_v40 = vrot.slane %v6302_v16, 4  ;;  %7992 = vmatmul.mubr.msk.f32.gmra.mrb[10].mxu1 %vm1534_vm4, %v1411_v47  ;;  %v1287_v52 = vadd.f32 %v8623_v17, %v839_v28 }
 0x108   : > { %2694 = vrot.lane.b32.xlu1 %v8712_v55, %s8424_s22  ;;  %v6312_v41 = vrot.slane %v6311_v23, 4  ;;  %v6297_v44 = vmax.f32 %v6295_v54, %v6296_v11  ;;  %v6320_v35 = vmax.f32 %v6318_v33, %v6319_v25  ;;  %v1288_v2 = vadd.f32 %v8638_v27, %v840_v19  ;;  %7994 = vmatprep.mubr.msk.f32.mxu1 %vm1534_vm4, %v1412_v61  ;;  %v842_v54 = vld [vmem:[%s8571_s20 + $0x70] sm:$0xff] }
 0x109   : > { %v6289_v3 = vrot.slane %v8714_v0, 1  ;;  %v6304_v8 = vmax.f32 %v6302_v16, %v6303_v40  ;;  %4810 = vrot.lane.b32.xlu0 %v8581_v58, %s8425_s23  ;;  %v6327_v38 = vsel %vm1534_vm4, %v1414_v24, -inf  ;;  %v8754_v47 = vrot.slane %v530_v59, %v8537_v31 }
 0x10a   : > { %v6313_v60 = vmax.f32 %v6311_v23, %v6312_v41  ;;  %v6321_v11 = vrot.slane %v6320_v35, 4  ;;  %v1415_v28 = vmax.f32 %v1287_v52, 0.0  ;;  %v1416_v19 = vmax.f32 %v1288_v2, 0.0  ;;  %v843_v52 = vld [vmem:[%s8571_s20 + $0x78] sm:$0xff] }
 0x10b   : > { %v6305_v33 = vrot.slane %v6304_v8, 2  ;;  %v8762_v58 = vrot.slane %v532_v63, %v8537_v31  ;;  %v1289_v61 = vadd.f32 %v8638_v27, %v841_v7  ;;  %v6298_v23 = vrot.slane %v6297_v44, 1  ;;  %7995 = vmatmul.mubr.msk.f32.gmra.mrb[12].mxu1 %vm1534_vm4, %v1413_v62 }
 0x10c   : > { %v6314_v16 = vrot.slane %v6313_v60, 2  ;;  %4812 = vrot.lane.b32.xlu1 %v8598_v4, %s8425_s23  ;;  %v6322_v37 = vmax.f32 %v6320_v35, %v6321_v11  ;;  %v6328_v59 = vsel %vm1534_vm4, %v1415_v28, -inf  ;;  %v1290_v25 = vadd.f32 %v8666_v51, %v842_v54  ;;  %7997 = vmatprep.mubr.msk.f32.mxu1 %vm1534_vm4, %v1414_v24  ;;  %v844_v11 = vld [vmem:[%s8571_s20 + $0x80] sm:$0xff] }
 0x10d   : > { %v6306_v40 = vmax.f32 %v6304_v8, %v6305_v33  ;;  %2648 = vrot.lane.b32.xlu0 %v8754_v47, %s8424_s22  ;;  %v6329_v46 = vmax.f32 %v6327_v38, %v6328_v59  ;;  %v6336_v63 = vsel %vm1534_vm4, %v1416_v19, -inf  ;;  %v1417_v41 = vmax.f32 %v1289_v61, 0.0 }
 0x10e   : > { %v8779_v2 = vrot.slane %v8555_v45, %v8537_v31  ;;  %v1418_v24 = vmax.f32 %v1290_v25, 0.0  ;;  %v8781_v8 = vmax.f32 %v6313_v60, %v6314_v16  ;;  %v6323_v38 = vrot.slane %v6322_v37, 2  ;;  %v845_v16 = vld [vmem:[%s8571_s20 + $0x88] sm:$0xff] }
 0x10f   : > { %v6307_v7 = vrot.slane %v6306_v40, 1  ;;  %v6337_v54 = vsel %vm1534_vm4, %v1417_v41, -inf  ;;  %v8788_v33 = vmax.f32 %v8714_v0, %v6289_v3  ;;  %7998 = vmatmul.mubr.msk.f32.gmra.mrb[14].mxu1 %vm1534_vm4, %v1415_v28  ;;  %v6330_v45 = vrot.slane %v6329_v46, 4  ;;  %v846_v28 = vld [vmem:[%s8571_s20 + $0x90] sm:$0xff] }
 0x110   : > { %2650 = vrot.lane.b32.xlu1 %v8762_v58, %s8424_s22  ;;  %v8791_v61 = vmax.f32 %v6336_v63, %v6337_v54  ;;  %v1291_v60 = vadd.f32 %v8666_v51, %v843_v52  ;;  %v8795_v59 = vmax.f32 %v6297_v44, %v6298_v23  ;;  %8000 = vmatprep.mubr.msk.f32.mxu1 %vm1534_vm4, %v1416_v19  ;;  %v6345_v25 = vsel %vm1534_vm4, %v1418_v24, -inf }
 0x111   : > { %13767 = vst [vmem:[#allocation6_spill] sm:$0xff] %v8788_v33  ;;  %2652 = vrot.lane.b32.xlu0 %v8779_v2, %s8424_s22  ;;  %v8802_v0 = vrot.slane %v8574_v53, %v8537_v31  ;;  %v8808_v3 = vrot.slane %v726_v57, %v8537_v31  ;;  %v8816_v44 = vrot.slane %v728_v29, %v8537_v31  ;;  %v847_v53 = vld [vmem:[%s8571_s20 + $0x98] sm:$0xff]  ;;  %v6316_v52 = vrot.slane %v8781_v8, 1  ;;  %v853_v33 = vld [vmem:[%s8571_s20 + $0xc8] sm:$0xff] }
 0x112   : > { %13768 = vst [vmem:[#allocation7_spill] sm:$0xff] %v8795_v59  ;;  %v1419_v19 = vmax.f32 %v1291_v60, 0.0  ;;  %v1292_v23 = vadd.f32 %v8564_v49, %v844_v11  ;;  %v8820_v63 = vmax.f32 %v6306_v40, %v6307_v7  ;;  %v8823_v9 = vmax.f32 %v6322_v37, %v6323_v38  ;;  %v848_v11 = vld [vmem:[%s8571_s20 + $0xa0] sm:$0xff]  ;;  %v851_v59 = vld [vmem:[%s8571_s20 + $0xb8] sm:$0xff] }
 0x113   : > { %13769 = vst [vmem:[#allocation8_spill] sm:$0xff] %v8808_v3  ;;  %13770 = vst [vmem:[#allocation9_spill] sm:$0xff] %v8816_v44  ;;  %v1293_v57 = vadd.f32 %v8564_v49, %v845_v16  ;;  %v8828_v54 = vmax.f32 %v6329_v46, %v6330_v45  ;;  %8001 = vmatmul.mubr.msk.f32.gmra.mrb[16].mxu1 %vm1534_vm4, %v1417_v41  ;;  %v1294_v40 = vadd.f32 %v8609_v10, %v846_v28 }
 0x114   : > { %13771 = vst [vmem:[#allocation10_spill] sm:$0xff] %v8820_v63  ;;  %13772 = vst [vmem:[#allocation11_spill] sm:$0xff] %v8823_v9  ;;  %2654 = vrot.lane.b32.xlu1 %v8802_v0, %s8424_s22  ;;  %v6346_v14 = vsel %vm1534_vm4, %v1419_v19, -inf  ;;  %v1420_v29 = vmax.f32 %v1292_v23, 0.0  ;;  %8003 = vmatprep.mubr.msk.f32.mxu1 %vm1534_vm4, %v1418_v24  ;;  %v8840_v7 = vrot.slane %v8658_v42, %v8537_v31  ;;  %v6339_v60 = vrot.slane %v8791_v61, 4  ;;  %v850_v63 = vld [vmem:[%s8571_s20 + $0xb0] sm:$0xff] }
 0x115   : > { %13773 = vst [vmem:[#allocation12_spill] sm:$0xff] %v8828_v54  ;;  %2712 = vrot.lane.b32.xlu0 %v8808_v3, %s8424_s22  ;;  %v8836_v37 = vmax.f32 %v6345_v25, %v6346_v14  ;;  %v1421_v49 = vmax.f32 %v1293_v57, 0.0  ;;  %v1295_v46 = vadd.f32 %v8609_v10, %v847_v53  ;;  %v1422_v38 = vmax.f32 %v1294_v40, 0.0  ;;  %v855_v9 = vld [vmem:[%s8571_s20 + $0xd8] sm:$0xff] }
 0x116   : > { %13775 = vst [vmem:[#allocation14_spill] sm:$0xff] %v8840_v7  ;;  %v6354_v41 = vsel %vm1534_vm4, %v1420_v29, -inf  ;;  %v405_v45 = vadd.f32 %v8540_v34, %v8528_v21  ;;  %v400_v24 = vadd.f32 %v8528_v21, %v8548_v39  ;;  %v8854_v16 = vrot.slane %v8669_v56, %v8537_v31 }
 0x117   : > { %13774 = vst [vmem:[#allocation13_spill] sm:$0xff] %v8836_v37  ;;  %v6355_v10 = vsel %vm1534_vm4, %v1421_v49, -inf  ;;  %v1423_v28 = vmax.f32 %v1295_v46, 0.0  ;;  %8004 = vmatmul.mubr.msk.f32.gmra.mrb[18].mxu1 %vm1534_vm4, %v1419_v19  ;;  %v6363_v34 = vsel %vm1534_vm4, %v1422_v38, -inf  ;;  %v1296_v57 = vadd.f32 %v8754_v47, %v848_v11 }
 0x118   : > { %2714 = vrot.lane.b32.xlu1 %v8816_v44, %s8424_s22  ;;  %13776 = vst [vmem:[#allocation15_spill] sm:$0xff] %v8854_v16  ;;  %v6356_v25 = vmax.f32 %v6354_v41, %v6355_v10  ;;  %v583_v23 = vcombine.high %v405_v45, %v405_v45  ;;  %v590_v39 = vrot.slane %v405_v45, %v8530_v22 }
 0x119   : > { %8006 = vmatprep.mubr.msk.f32.mxu1 %vm1534_vm4, %v1420_v29  ;;  %2716 = vrot.lane.b32.xlu0 %v8840_v7, %s8424_s22  ;;  %v6364_v53 = vsel %vm1534_vm4, %v1423_v28, -inf  ;;  %v534_v14 = vcombine.high %v400_v24, %v400_v24  ;;  %v541_v40 = vrot.slane %v400_v24, %v8530_v22  ;;  %v8868_v62 = vmax.f32 %v8781_v8, %v6316_v52 }
 0x11a   : > { %v6357_v46 = vrot.slane %v6356_v25, 4  ;;  %v6365_v19 = vmax.f32 %v6363_v34, %v6364_v53  ;;  %v597_v41 = vrot.slane %v583_v23, %v8530_v22  ;;  %v598_v10 = vcombine.high %v590_v39, %v590_v39 }
 0x11b   : > { %13777 = vst [vmem:[#allocation16_spill] sm:$0xff] %v8868_v62  ;;  %v606_v45 = vrot.slane %v590_v39, %v8530_v22  ;;  %v548_v11 = vrot.slane %v534_v14, %v8530_v22  ;;  %8007 = vmatmul.mubr.msk.f32.gmra.mrb[20].mxu1 %vm1534_vm4, %v1421_v49  ;;  %v1424_v8 = vmax.f32 %v1296_v57, 0.0  ;;  %v549_v39 = vcombine.high %v541_v40, %v541_v40 }
 0x11c   : > { %2718 = vrot.lane.b32.xlu1 %v8854_v16, %s8424_s22  ;;  %v6358_v24 = vmax.f32 %v6356_v25, %v6357_v46  ;;  %v6366_v35 = vrot.slane %v6365_v19, 4  ;;  %v599_v34 = vcombine.high %v597_v41, %v597_v41  ;;  %v613_v23 = vrot.slane %v597_v41, %v8530_v22  ;;  %8009 = vmatprep.mubr.msk.f32.mxu1 %vm1534_vm4, %v1422_v38 }
 0x11d   : > { %4830 = vrot.lane.b32.xlu0 %v8754_v47, %s8425_s23  ;;  %v8882_v52 = vrot.slane %v598_v10, %v8530_v22  ;;  %v8885_v14 = vmax.f32 %v8791_v61, %v6339_v60  ;;  %v628_v38 = vcombine.high %v606_v45, %v606_v45  ;;  %v550_v29 = vcombine.high %v548_v11, %v548_v11 }
 0x11e   : > { %v6359_v49 = vrot.slane %v6358_v24, 2  ;;  %v6367_v25 = vmax.f32 %v6365_v19, %v6366_v35  ;;  %v8888_v46 = vrot.slane %v599_v34, %v8530_v22  ;;  %v629_v41 = vcombine.high %v613_v23, %v613_v23 }
 0x11f   : > { %13778 = vst [vmem:[#allocation17_spill] sm:$0xff] %v8885_v14  ;;  %v557_v57 = vrot.slane %v541_v40, %v8530_v22  ;;  %8010 = vmatmul.mubr.msk.f32.gmra.mrb[22].mxu1 %vm1534_vm4, %v1423_v28  ;;  %v630_v61 = vcombine.high %v8882_v52, %v8882_v52  ;;  %v6372_v19 = vsel %vm1534_vm4, %v1424_v8, -inf  ;;  %v8904_v28 = vrot.slane %v548_v11, %v8530_v22 }
 0x120   : > { %4832 = vrot.lane.b32.xlu1 %v8762_v58, %s8425_s23  ;;  %v6360_v53 = vmax.f32 %v6358_v24, %v6359_v49  ;;  %v6368_v10 = vrot.slane %v6367_v25, 2  ;;  %v631_v35 = vcombine.high %v8888_v46, %v8888_v46  ;;  %8012 = vmatprep.mubr.msk.f32.mxu1 %vm1534_vm4, %v1424_v8  ;;  %v571_v40 = vrot.slane %v549_v39, %v8530_v22 }
 0x121   : > { %4834 = vrot.lane.b32.xlu0 %v8779_v2, %s8425_s23  ;;  %v8910_v49 = vrot.slane %v606_v45, %v8537_v31  ;;  %v8913_v60 = vrot.slane %v550_v29, %v8530_v22  ;;  %v8916_v8 = vrot.slane %v628_v38, %v8537_v31  ;;  %v8919_v11 = vrot.slane %v613_v23, %v8537_v31 }
 0x122   : > { %v6361_v24 = vrot.slane %v6360_v53, 1  ;;  %v8907_v34 = vmax.f32 %v6367_v25, %v6368_v10  ;;  %v579_v62 = vcombine.high %v557_v57, %v557_v57  ;;  %v581_v39 = vcombine.high %v571_v40, %v571_v40  ;;  %v849_v25 = vld [vmem:[%s8571_s20 + $0xa8] sm:$0xff]  ;;  %v852_v10 = vld [vmem:[%s8571_s20 + $0xc0] sm:$0xff] }
 0x123   : > { %13779 = vst [vmem:[#allocation18_spill] sm:$0xff] %v8910_v49  ;;  %13780 = vst [vmem:[#allocation19_spill] sm:$0xff] %v8916_v8  ;;  %v8926_v45 = vrot.slane %v630_v61, %v8537_v31  ;;  %v8929_v29 = vrot.slane %v629_v41, %v8537_v31  ;;  %v8932_v38 = vrot.slane %v631_v35, %v8537_v31  ;;  %v854_v35 = vld [vmem:[%s8571_s20 + $0xd0] sm:$0xff] }
 0x124   : > { %13781 = vst [vmem:[#allocation20_spill] sm:$0xff] %v8919_v11  ;;  %4836 = vrot.lane.b32.xlu1 %v8802_v0, %s8425_s23  ;;  %v8939_v37 = vmax.f32 %v6360_v53, %v6361_v24  ;;  %v8945_v41 = vrot.slane %v557_v57, %v8537_v31  ;;  %v8951_v23 = vrot.slane %v571_v40, %v8537_v31 }
 0x125   : > { %2630 = vrot.lane.b32.xlu0 %v8598_v4, %s8424_s22  ;;  %v8954_v54 = vrot.slane %v579_v62, %v8537_v31  ;;  %v8957_v53 = vrot.slane %v581_v39, %v8537_v31  ;;  %v1297_v24 = vadd.f32 %v8754_v47, %v849_v25  ;;  %v1298_v61 = vadd.f32 %v8762_v58, %v850_v63 }
 0x126   : > { %13782 = vst [vmem:[#allocation21_spill] sm:$0xff] %v8939_v37  ;;  %v1299_v57 = vadd.f32 %v8762_v58, %v851_v59  ;;  %v1300_v4 = vadd.f32 %v8779_v2, %v852_v10  ;;  %v1301_v40 = vadd.f32 %v8779_v2, %v853_v33  ;;  %v856_v37 = vld [vmem:[%s8571_s20 + $0xe0] sm:$0xff]  ;;  %v1302_v15 = vadd.f32 %v8802_v0, %v854_v35 }
 0x127   : > { %v1425_v62 = vmax.f32 %v1297_v24, 0.0  ;;  %v13783_v47 = vcombine.high %v8663_v50, %v8663_v50  ;;  %v13784_v63 = vcombine.high %v8683_v6, %v8683_v6  ;;  %v1426_v59 = vmax.f32 %v1298_v61, 0.0 }
 0x128   : > { %2634 = vrot.lane.b32.xlu1 %v8613_v12, %s8424_s22  ;;  %v1427_v2 = vmax.f32 %v1299_v57, 0.0  ;;  %v1428_v33 = vmax.f32 %v1300_v4, 0.0  ;;  %v1429_v25 = vmax.f32 %v1301_v40, 0.0  ;;  %v1430_v10 = vmax.f32 %v1302_v15, 0.0  ;;  %v857_v15 = vld [vmem:[%s8571_s20 + $0xe8] sm:$0xff] }
 0x129   : > { %v8973_v39 = vrot.slane %v13783_v47, %v8537_v31  ;;  %v8979_v58 = vrot.slane %v13784_v63, %v8537_v31  ;;  %2636 = vrot.lane.b32.xlu0 %v8616_v13, %s8424_s22  ;;  %8013 = vmatmul.mubr.msk.f32.gmra.mrb[24].mxu1 %vm1534_vm4, %v1425_v62  ;;  %v6373_v50 = vsel %vm1534_vm4, %v1425_v62, -inf  ;;  %v8986_v35 = vadd.f32 %v8802_v0, %v855_v9 }
 0x12a   : > { %v8989_v6 = vadd.f32 %v8594_v1, %v856_v37  ;;  %v6374_v24 = vmax.f32 %v6372_v19, %v6373_v50  ;;  %8015 = vmatprep.mubr.msk.f32.mxu1 %vm1534_vm4, %v1426_v59  ;;  %v6381_v61 = vsel %vm1534_vm4, %v1426_v59, -inf  ;;  %v6382_v57 = vsel %vm1534_vm4, %v1427_v2, -inf  ;;  %v858_v59 = vld [vmem:[%s8571_s20 + $0xf0] sm:$0xff]  ;;  %v859_v50 = vld [vmem:[%s8571_s20 + $0xf8] sm:$0xff] }
 0x12b   : > { %v6390_v4 = vsel %vm1534_vm4, %v1428_v33, -inf  ;;  %v6383_v0 = vmax.f32 %v6381_v61, %v6382_v57  ;;  %v6391_v9 = vsel %vm1534_vm4, %v1429_v25, -inf  ;;  %v6399_v37 = vsel %vm1534_vm4, %v1430_v10, -inf }
 0x12c   : > { %2638 = vrot.lane.b32.xlu1 %v8623_v17, %s8424_s22  ;;  %v1431_v19 = vmax.f32 %v8986_v35, 0.0  ;;  %v6375_v40 = vrot.slane %v6374_v24, 4  ;;  %v6392_v62 = vmax.f32 %v6390_v4, %v6391_v9  ;;  %v1432_v47 = vmax.f32 %v8989_v6, 0.0  ;;  %v860_v9 = vld [vmem:[%s8571_s20 + $0x100] sm:$0xff] }
 0x12d   : > { %2696 = vrot.lane.b32.xlu0 %v8973_v39, %s8424_s22  ;;  %v9006_v63 = vrot.slane %v8729_v30, %v8537_v31  ;;  %8016 = vmatmul.mubr.msk.f32.gmra.mrb[26].mxu1 %vm1534_vm4, %v1427_v2  ;;  %v6384_v61 = vrot.slane %v6383_v0, 4  ;;  %v9014_v35 = vrot.slane %v8734_v36, %v8537_v31  ;;  %v9017_v4 = vadd.f32 %v8594_v1, %v857_v15 }
 0x12e   : > { %v6400_v57 = vsel %vm1534_vm4, %v1431_v19, -inf  ;;  %v6376_v6 = vmax.f32 %v6374_v24, %v6375_v40  ;;  %8018 = vmatprep.mubr.msk.f32.mxu1 %vm1534_vm4, %v1428_v33  ;;  %v6393_v14 = vrot.slane %v6392_v62, 4  ;;  %v6408_v2 = vsel %vm1534_vm4, %v1432_v47, -inf }
 0x12f   : > { %13785 = vst [vmem:[#allocation22_spill] sm:$0xff] %v9006_v63  ;;  %v6401_v16 = vmax.f32 %v6399_v37, %v6400_v57  ;;  %v6385_v7 = vmax.f32 %v6383_v0, %v6384_v61  ;;  %v1433_v44 = vmax.f32 %v9017_v4, 0.0  ;;  %v1306_v3 = vadd.f32 %v8635_v26, %v858_v59  ;;  %v861_v4 = vld [vmem:[%s8571_s20 + $0x108] sm:$0xff] }
 0x130   : > { %2698 = vrot.lane.b32.xlu1 %v8979_v58, %s8424_s22  ;;  %v9027_v32 = vadd.f32 %v8635_v26, %v859_v50  ;;  %v6377_v15 = vrot.slane %v6376_v6, 2  ;;  %v6394_v24 = vmax.f32 %v6392_v62, %v6393_v14  ;;  %v9032_v33 = vadd.f32 %v8945_v41, %v860_v9 }
 0x131   : > { %v6402_v40 = vrot.slane %v6401_v16, 4  ;;  %2700 = vrot.lane.b32.xlu0 %v9006_v63, %s8424_s22  ;;  %v6386_v37 = vrot.slane %v6385_v7, 2  ;;  %8019 = vmatmul.mubr.msk.f32.gmra.mrb[28].mxu1 %vm1534_vm4, %v1429_v25  ;;  %v6409_v0 = vsel %vm1534_vm4, %v1433_v44, -inf  ;;  %v1434_v59 = vmax.f32 %v1306_v3, 0.0 }
 0x132   : > { %v13482_v50 = vmax.f32 %v9027_v32, 0.0  ;;  %v6378_v61 = vmax.f32 %v6376_v6, %v6377_v15  ;;  %v6395_v57 = vrot.slane %v6394_v24, 2  ;;  %8021 = vmatprep.mubr.msk.f32.mxu1 %vm1534_vm4, %v1430_v10  ;;  %v6410_v62 = vmax.f32 %v6408_v2, %v6409_v0  ;;  %v862_v15 = vld [vmem:[%s8571_s20 + $0x110] sm:$0xff] }
 0x133   : > { %v9038_v14 = vmax.f32 %v6401_v16, %v6402_v40  ;;  %v6387_v9 = vmax.f32 %v6385_v7, %v6386_v37  ;;  %v6417_v25 = vsel %vm1534_vm4, %v1434_v59, -inf  ;;  %v1436_v6 = vmax.f32 %v9032_v33, 0.0  ;;  %v863_v33 = vld [vmem:[%s8571_s20 + $0x118] sm:$0xff] }
 0x134   : > { %2702 = vrot.lane.b32.xlu1 %v9014_v35, %s8424_s22  ;;  %v6418_v3 = vsel %vm1534_vm4, %v13482_v50, -inf  ;;  %v13787_v10 = vrot.slane %v8907_v34, 1  ;;  %v9056_v2 = vrot.slane %v8904_v28, %v8537_v31  ;;  %v9060_v7 = vrot.slane %v8913_v60, %v8537_v31 }
 0x135   : > { %13786 = vst [vmem:[#allocation23_spill] sm:$0xff] %v9038_v14  ;;  %v6379_v40 = vrot.slane %v6378_v61, 1  ;;  %4814 = vrot.lane.b32.xlu0 %v8601_v5, %s8425_s23  ;;  %v13791_v0 = vcombine.high %v8913_v60, %v8913_v60  ;;  %8022 = vmatmul.mubr.msk.f32.gmra.mrb[30].mxu1 %vm1534_vm4, %v1431_v19  ;;  %v9078_v50 = vmax.f32 %v6417_v25, %v6418_v3  ;;  %v864_v5 = vld [vmem:[%s8571_s20 + $0x120] sm:$0xff]  ;;  %v866_v19 = vld [vmem:[%s8571_s20 + $0x130] sm:$0xff]  ;;  %v6388_v25 = vrot.slane %v6387_v9, 1 }
 0x136   : > { %v9052_v16 = vmax.f32 %v8907_v34, %v13787_v10  ;;  %v13789_v34 = vcombine.high %v8904_v28, %v8904_v28  ;;  %v9084_v18 = vmax.f32 %v6394_v24, %v6395_v57  ;;  %8024 = vmatprep.mubr.msk.f32.mxu1 %vm1534_vm4, %v1432_v47  ;;  %v1310_v60 = vadd.f32 %v8951_v23, %v862_v15 }
 0x137   : > { %v9075_v10 = vrot.slane %v13791_v0, %v8537_v31  ;;  %13793 = vst [vmem:[#allocation27_spill] sm:$0xff] %v9078_v50  ;;  %v865_v0 = vld [vmem:[%s8571_s20 + $0x128] sm:$0xff]  ;;  %v6426_v3 = vsel %vm1534_vm4, %v1436_v6, -inf  ;;  %v9096_v24 = vadd.f32 %v8951_v23, %v863_v33  ;;  %v9098_v57 = vmax.f32 %v6378_v61, %v6379_v40 }
 0x138   : > { %13788 = vst [vmem:[#allocation24_spill] sm:$0xff] %v9052_v16  ;;  %v9069_v37 = vrot.slane %v13789_v34, %v8537_v31  ;;  %v9081_v16 = vadd.f32 %v8945_v41, %v861_v4  ;;  %13794 = vst [vmem:[#allocation28_spill] sm:$0xff] %v9084_v18  ;;  %v6411_v34 = vrot.slane %v6410_v62, 4  ;;  %4816 = vrot.lane.b32.xlu1 %v8613_v12, %s8425_s23  ;;  %v1438_v47 = vmax.f32 %v1310_v60, 0.0 }
 0x139   : > { %13792 = vst [vmem:[#allocation26_spill] sm:$0xff] %v9075_v10  ;;  %13795 = vst [vmem:[#allocation29_spill] sm:$0xff] %v9098_v57  ;;  %4818 = vrot.lane.b32.xlu0 %v8616_v13, %s8425_s23  ;;  %v425_v12 = vadd.f32 %v8552_v43, %v8528_v21  ;;  %v9105_v15 = vadd.f32 %v8954_v54, %v864_v5  ;;  %8025 = vmatmul.mubr.msk.f32.gmra.mrb[32].mxu1 %vm1534_vm4, %v1433_v44 }
 0x13a   : > { %13790 = vst [vmem:[#allocation25_spill] sm:$0xff] %v9069_v37  ;;  %v1437_v4 = vmax.f32 %v9081_v16, 0.0  ;;  %v13485_v16 = vmax.f32 %v9096_v24, 0.0  ;;  %v9111_v33 = vadd.f32 %v8954_v54, %v865_v0  ;;  %v9114_v61 = vadd.f32 %v8957_v53, %v866_v19  ;;  %8027 = vmatprep.mubr.msk.f32.mxu1 %vm1534_vm4, %v1434_v59 }
 0x13b   : > { %v6435_v43 = vsel %vm1534_vm4, %v1438_v47, -inf  ;;  %v779_v13 = vcombine.high %v425_v12, %v425_v12  ;;  %v786_v44 = vrot.slane %v425_v12, %v8530_v22  ;;  %v1440_v5 = vmax.f32 %v9105_v15, 0.0 }
 0x13c   : > { %v6427_v28 = vsel %vm1534_vm4, %v1437_v4, -inf  ;;  %4820 = vrot.lane.b32.xlu1 %v8623_v17, %s8425_s23  ;;  %v6436_v40 = vsel %vm1534_vm4, %v13485_v16, -inf  ;;  %v13486_v60 = vmax.f32 %v9111_v33, 0.0  ;;  %v13797_v12 = vmax.f32 %v9027_v32, 0.0 }
 0x13d   : > { %v6428_v21 = vmax.f32 %v6426_v3, %v6427_v28  ;;  %2656 = vrot.lane.b32.xlu0 %v8594_v1, %s8424_s22  ;;  %v6437_v17 = vmax.f32 %v6435_v43, %v6436_v40  ;;  %v793_v28 = vrot.slane %v779_v13, %v8530_v22  ;;  %v9131_v3 = vmax.f32 %v6410_v62, %v6411_v34  ;;  %v868_v43 = vld [vmem:[%s8571_s20 + $0x140] sm:$0xff] }
 0x13e   : > { %8028 = vmatmul.mubr.msk.f32.gmra.mrb[34].mxu1 %vm1534_vm4, %v13797_v12  ;;  %v794_v15 = vcombine.high %v786_v44, %v786_v44  ;;  %v6444_v16 = vsel %vm1534_vm4, %v1440_v5, -inf  ;;  %v6445_v59 = vsel %vm1534_vm4, %v13486_v60, -inf  ;;  %v9140_v0 = vmax.f32 %v6387_v9, %v6388_v25  ;;  %v867_v12 = vld [vmem:[%s8571_s20 + $0x138] sm:$0xff] }
 0x13f   : > { %v6429_v19 = vrot.slane %v6428_v21, 4  ;;  %13796 = vst [vmem:[#allocation30_spill] sm:$0xff] %v9131_v3  ;;  %8030 = vmatprep.mubr.msk.f32.mxu1 %vm1534_vm4, %v1436_v6  ;;  %v6438_v32 = vrot.slane %v6437_v17, 4  ;;  %v9147_v34 = vrot.slane %v786_v44, %v8530_v22  ;;  %v9151_v13 = vrot.slane %v8882_v52, %v8537_v31  ;;  %v869_v52 = vld [vmem:[%s8571_s20 + $0x148] sm:$0xff]  ;;  %v870_v44 = vld [vmem:[%s8571_s20 + $0x150] sm:$0xff] }
 0x140   : > { %13798 = vst [vmem:[#allocation31_spill] sm:$0xff] %v9140_v0  ;;  %2658 = vrot.lane.b32.xlu1 %v8635_v26, %s8424_s22  ;;  %v6446_v40 = vmax.f32 %v6444_v16, %v6445_v59  ;;  %v13799_v9 = vmax.f32 %v9114_v61, 0.0  ;;  %v9159_v60 = vrot.slane %v793_v28, %v8530_v22  ;;  %v9166_v16 = vrot.slane %v794_v15, %v8530_v22  ;;  %v871_v0 = vld [vmem:[%s8571_s20 + $0x158] sm:$0xff] }
 0x141   : > { %v6430_v62 = vmax.f32 %v6428_v21, %v6429_v19  ;;  %v6439_v21 = vmax.f32 %v6437_v17, %v6438_v32  ;;  %v795_v19 = vcombine.high %v793_v28, %v793_v28  ;;  %2676 = vrot.lane.b32.xlu0 %v8910_v49, %s8424_s22  ;;  %v729_v17 = vcombine.high %v8669_v56, %v8669_v56 }
 0x142   : > { %v6453_v25 = vsel %vm1534_vm4, %v13799_v9, -inf  ;;  %8031 = vmatmul.mubr.msk.f32.gmra.mrb[36].mxu1 %vm1534_vm4, %v1437_v4  ;;  %v6447_v59 = vrot.slane %v6446_v40, 4  ;;  %v13800_v4 = vcombine.high %v8658_v42, %v8658_v42  ;;  %v1315_v15 = vadd.f32 %v8957_v53, %v867_v12 }
 0x143   : > { %v6431_v6 = vrot.slane %v6430_v62, 2  ;;  %8033 = vmatprep.mubr.msk.f32.mxu1 %vm1534_vm4, %v1438_v47  ;;  %v6440_v28 = vrot.slane %v6439_v21, 2  ;;  %v1316_v9 = vadd.f32 %v9056_v2, %v868_v43  ;;  %v9189_v47 = vrot.slane %v9147_v34, %v8537_v31 }
 0x144   : > { %2678 = vrot.lane.b32.xlu1 %v9151_v13, %s8424_s22  ;;  %v9179_v32 = vrot.slane %v13800_v4, %v8537_v31  ;;  %v6448_v57 = vmax.f32 %v6446_v40, %v6447_v59  ;;  %v9192_v50 = vadd.f32 %v9056_v2, %v869_v52  ;;  %v9199_v43 = vrot.slane %v729_v17, %v8537_v31  ;;  %v872_v59 = vld [vmem:[%s8571_s20 + $0x160] sm:$0xff] }
 0x145   : > { %v9185_v56 = vmax.f32 %v6430_v62, %v6431_v6  ;;  %13802 = vst [vmem:[#allocation33_spill] sm:$0xff] %v9189_v47  ;;  %v9194_v42 = vmax.f32 %v6439_v21, %v6440_v28  ;;  %v1443_v12 = vmax.f32 %v1315_v15, 0.0  ;;  %v1444_v62 = vmax.f32 %v1316_v9, 0.0  ;;  %v873_v15 = vld [vmem:[%s8571_s20 + $0x168] sm:$0xff] }
 0x146   : > { %13801 = vst [vmem:[#allocation32_spill] sm:$0xff] %v9179_v32  ;;  %2720 = vrot.lane.b32.xlu0 %v9179_v32, %s8424_s22  ;;  %13803 = vst [vmem:[#allocation34_spill] sm:$0xff] %v9199_v43  ;;  %v13804_v6 = vmax.f32 %v9096_v24, 0.0  ;;  %v6449_v4 = vrot.slane %v6448_v57, 2  ;;  %v13494_v40 = vmax.f32 %v9192_v50, 0.0  ;;  %v9206_v52 = vadd.f32 %v9060_v7, %v870_v44 }
 0x147   : > { %v9209_v21 = vadd.f32 %v9060_v7, %v871_v0  ;;  %v9213_v28 = vrot.slane %v795_v19, %v8530_v22  ;;  %v6454_v24 = vsel %vm1534_vm4, %v1443_v12, -inf  ;;  %v6462_v17 = vsel %vm1534_vm4, %v1444_v62, -inf }
 0x148   : > { %8034 = vmatmul.mubr.msk.f32.gmra.mrb[38].mxu1 %vm1534_vm4, %v13804_v6  ;;  %2722 = vrot.lane.b32.xlu1 %v9199_v43, %s8424_s22  ;;  %v9222_v44 = vrot.slane %v9166_v16, %v8537_v31  ;;  %v6450_v0 = vmax.f32 %v6448_v57, %v6449_v4  ;;  %v6455_v9 = vmax.f32 %v6453_v25, %v6454_v24  ;;  %v6463_v19 = vsel %vm1534_vm4, %v13494_v40, -inf }
 0x149   : > { %8036 = vmatprep.mubr.msk.f32.mxu1 %vm1534_vm4, %v1440_v5  ;;  %v1446_v5 = vmax.f32 %v9206_v52, 0.0  ;;  %v6433_v6 = vrot.slane %v9185_v56, 1  ;;  %v6464_v18 = vmax.f32 %v6462_v17, %v6463_v19  ;;  %v13501_v3 = vmax.f32 %v9209_v21, 0.0  ;;  %v8405_v19 = vld [vmem:[%s13459_s3] ss:$0 sm:$0xff] }
 0x14a   : > { %13805 = vst [vmem:[#allocation35_spill] sm:$0xff] %v9222_v44  ;;  %2740 = vrot.lane.b32.xlu0 %v9189_v47, %s8424_s22  ;;  %v9234_v14 = vadd.f32 %v9069_v37, %v872_v59  ;;  %v6442_v57 = vrot.slane %v9194_v42, 1  ;;  %v13806_v25 = vmax.f32 %v9111_v33, 0.0  ;;  %v6456_v4 = vrot.slane %v6455_v9, 4 }
 0x14b   : > { %v6471_v52 = vsel %vm1534_vm4, %v1446_v5, -inf  ;;  %v9242_v24 = vadd.f32 %v9069_v37, %v873_v15  ;;  %v13807_v40 = vmax.f32 %v9114_v61, 0.0  ;;  %v6465_v59 = vrot.slane %v6464_v18, 4 }
 0x14c   : > { %8037 = vmatmul.mubr.msk.f32.gmra.mrb[40].mxu1 %vm1534_vm4, %v13806_v25  ;;  %2742 = vrot.lane.b32.xlu1 %v9222_v44, %s8424_s22  ;;  %v6472_v33 = vsel %vm1534_vm4, %v13501_v3, -inf  ;;  %v1448_v17 = vmax.f32 %v9234_v14, 0.0  ;;  %v420_v15 = vadd.f32 %v8405_v19, %v8560_v48  ;;  %v874_v25 = vld [vmem:[%s8571_s20 + $0x170] sm:$0xff]  ;;  %v6451_v61 = vrot.slane %v6450_v0, 1 }
 0x14d   : > { %8039 = vmatprep.mubr.msk.f32.mxu1 %vm1534_vm4, %v13807_v40  ;;  %v6457_v47 = vmax.f32 %v6455_v9, %v6456_v4  ;;  %v6473_v40 = vmax.f32 %v6471_v52, %v6472_v33  ;;  %v13506_v43 = vmax.f32 %v9242_v24, 0.0  ;;  %v6466_v44 = vmax.f32 %v6464_v18, %v6465_v59 }
 0x14e   : > { %2640 = vrot.lane.b32.xlu0 %v8638_v27, %s8424_s22  ;;  %v6480_v3 = vsel %vm1534_vm4, %v1448_v17, -inf  ;;  %v730_v32 = vcombine.high %v420_v15, %v420_v15  ;;  %v737_v37 = vrot.slane %v420_v15, %v8530_v22  ;;  %v9270_v18 = vadd.f32 %v9075_v10, %v874_v25 }
 0x14f   : > { %v6458_v48 = vrot.slane %v6457_v47, 2  ;;  %v6474_v19 = vrot.slane %v6473_v40, 4  ;;  %v6481_v9 = vsel %vm1534_vm4, %v13506_v43, -inf  ;;  %v6467_v4 = vrot.slane %v6466_v44, 2 }
 0x150   : > { %8040 = vmatmul.mubr.msk.f32.gmra.mrb[42].mxu1 %vm1534_vm4, %v1443_v12  ;;  %4840 = vrot.lane.b32.xlu1 %v8635_v26, %s8425_s23  ;;  %v6482_v52 = vmax.f32 %v6480_v3, %v6481_v9  ;;  %v744_v59 = vrot.slane %v730_v32, %v8530_v22  ;;  %v745_v12 = vcombine.high %v737_v37, %v737_v37  ;;  %v1450_v32 = vmax.f32 %v9270_v18, 0.0  ;;  %v883_v18 = vld [vmem:[%s8571_s20 + $0x1b8] sm:$0xff] }
 0x151   : > { %8042 = vmatprep.mubr.msk.f32.mxu1 %vm1534_vm4, %v1444_v62  ;;  %v9278_v15 = vmax.f32 %v6457_v47, %v6458_v48  ;;  %v9280_v43 = vmax.f32 %v6473_v40, %v6474_v19  ;;  %v9283_v25 = vrot.slane %v737_v37, %v8530_v22  ;;  %v9285_v62 = vmax.f32 %v6466_v44, %v6467_v4  ;;  %v876_v48 = vld [vmem:[%s8571_s20 + $0x180] sm:$0xff]  ;;  %v879_v4 = vld [vmem:[%s8571_s20 + $0x198] sm:$0xff] }
 0x152   : > { %4838 = vrot.lane.b32.xlu0 %v8594_v1, %s8425_s23  ;;  %v6483_v26 = vrot.slane %v6482_v52, 4  ;;  %v746_v3 = vcombine.high %v744_v59, %v744_v59  ;;  %v9291_v9 = vmax.f32 %v9185_v56, %v6433_v6  ;;  %v9294_v47 = vmax.f32 %v9194_v42, %v6442_v57  ;;  %v875_v1 = vld [vmem:[%s8571_s20 + $0x178] sm:$0xff]  ;;  %v878_v6 = vld [vmem:[%s8571_s20 + $0x190] sm:$0xff] }
 0x153   : > { %13808 = vst [vmem:[#allocation36_spill] sm:$0xff] %v9280_v43  ;;  %13809 = vst [vmem:[#allocation37_spill] sm:$0xff] %v9285_v62  ;;  %v9298_v44 = vmax.f32 %v6450_v0, %v6451_v61  ;;  %v13813_v40 = vmax.f32 %v9192_v50, 0.0  ;;  %v9311_v42 = vrot.slane %v744_v59, %v8530_v22  ;;  %v9314_v50 = vrot.slane %v745_v12, %v8530_v22  ;;  %v877_v0 = vld [vmem:[%s8571_s20 + $0x188] sm:$0xff] }
 0x154   : > { %13810 = vst [vmem:[#allocation38_spill] sm:$0xff] %v9291_v9  ;;  %13811 = vst [vmem:[#allocation39_spill] sm:$0xff] %v9294_v47  ;;  %2642 = vrot.lane.b32.xlu1 %v8666_v51, %s8424_s22  ;;  %v9319_v61 = vmax.f32 %v6482_v52, %v6483_v26  ;;  %v9329_v59 = vrot.slane %v9283_v25, %v8537_v31  ;;  %v6489_v12 = vsel %vm1534_vm4, %v1450_v32, -inf  ;;  %v880_v26 = vld [vmem:[%s8571_s20 + $0x1a0] sm:$0xff] }
 0x155   : > { %13812 = vst [vmem:[#allocation40_spill] sm:$0xff] %v9298_v44  ;;  %8043 = vmatmul.mubr.msk.f32.gmra.mrb[44].mxu1 %vm1534_vm4, %v13813_v40  ;;  %v1323_v40 = vadd.f32 %v9075_v10, %v875_v1  ;;  %v1324_v52 = vadd.f32 %v8910_v49, %v876_v48  ;;  %v680_v56 = vcombine.high %v8734_v36, %v8734_v36  ;;  %v881_v48 = vld [vmem:[%s8571_s20 + $0x1a8] sm:$0xff]  ;;  %v884_v44 = vld [vmem:[%s8571_s20 + $0x1c0] sm:$0xff] }
 0x156   : > { %8045 = vmatprep.mubr.msk.f32.mxu1 %vm1534_vm4, %v1446_v5  ;;  %13814 = vst [vmem:[#allocation41_spill] sm:$0xff] %v9319_v61  ;;  %v9322_v5 = vrot.slane %v746_v3, %v8530_v22  ;;  %2660 = vrot.lane.b32.xlu0 %v8945_v41, %s8424_s22  ;;  %v13815_v22 = vmax.f32 %v9209_v21, 0.0  ;;  %v13816_v3 = vcombine.high %v8729_v30, %v8729_v30 }
 0x157   : > { %v9349_v33 = vadd.f32 %v8910_v49, %v877_v0  ;;  %v9352_v1 = vadd.f32 %v9151_v13, %v878_v6  ;;  %v1451_v30 = vmax.f32 %v1323_v40, 0.0  ;;  %v1452_v21 = vmax.f32 %v1324_v52, 0.0  ;;  %v882_v40 = vld [vmem:[%s8571_s20 + $0x1b0] sm:$0xff] }
 0x158   : > { %v9344_v57 = vrot.slane %v13816_v3, %v8537_v31  ;;  %2662 = vrot.lane.b32.xlu1 %v8951_v23, %s8424_s22  ;;  %v9362_v36 = vrot.slane %v9314_v50, %v8537_v31  ;;  %v9365_v0 = vadd.f32 %v9151_v13, %v879_v4  ;;  %v9368_v6 = vrot.slane %v680_v56, %v8537_v31 }
 0x159   : > { %8046 = vmatmul.mubr.msk.f32.gmra.mrb[46].mxu1 %vm1534_vm4, %v13815_v22  ;;  %v1453_v14 = vmax.f32 %v9349_v33, 0.0  ;;  %v9373_v22 = vadd.f32 %v8916_v8, %v880_v26  ;;  %v6490_v52 = vsel %vm1534_vm4, %v1451_v30, -inf  ;;  %v6498_v3 = vsel %vm1534_vm4, %v1452_v21, -inf }
 0x15a   : > { %13817 = vst [vmem:[#allocation42_spill] sm:$0xff] %v9344_v57  ;;  %8048 = vmatprep.mubr.msk.f32.mxu1 %vm1534_vm4, %v1448_v17  ;;  %13818 = vst [vmem:[#allocation43_spill] sm:$0xff] %v9368_v6  ;;  %v1454_v17 = vmax.f32 %v9352_v1, 0.0  ;;  %2704 = vrot.lane.b32.xlu0 %v9344_v57, %s8424_s22  ;;  %v13507_v4 = vmax.f32 %v9365_v0, 0.0  ;;  %v9382_v56 = vadd.f32 %v8916_v8, %v881_v48  ;;  %v13819_v33 = vmax.f32 %v9242_v24, 0.0 }
 0x15b   : > { %v9388_v26 = vmax.f32 %v6489_v12, %v6490_v52  ;;  %v6499_v1 = vsel %vm1534_vm4, %v1453_v14, -inf  ;;  %v9402_v52 = vadd.f32 %v8926_v45, %v882_v40  ;;  %v9410_v9 = vadd.f32 %v8926_v45, %v883_v18 }
 0x15c   : > { %v6507_v37 = vsel %vm1534_vm4, %v1454_v17, -inf  ;;  %2706 = vrot.lane.b32.xlu1 %v9368_v6, %s8424_s22  ;;  %v6500_v48 = vmax.f32 %v6498_v3, %v6499_v1  ;;  %v6508_v24 = vsel %vm1534_vm4, %v13507_v4, -inf  ;;  %v13514_v12 = vmax.f32 %v9382_v56, 0.0  ;;  %v885_v3 = vld [vmem:[%s8571_s20 + $0x1c8] sm:$0xff] }
 0x15d   : > { %8049 = vmatmul.mubr.msk.f32.gmra.mrb[48].mxu1 %vm1534_vm4, %v13819_v33  ;;  %13820 = vst [vmem:[#allocation44_spill] sm:$0xff] %v9388_v26  ;;  %v778_v33 = vcombine.high %v9322_v5, %v9322_v5  ;;  %v6509_v19 = vmax.f32 %v6507_v37, %v6508_v24  ;;  %v13513_v4 = vmax.f32 %v9402_v52, 0.0  ;;  %v9420_v37 = vadd.f32 %v8919_v11, %v884_v44  ;;  %v886_v24 = vld [vmem:[%s8571_s20 + $0x1d0] sm:$0xff]  ;;  %v892_v26 = vld [vmem:[%s8571_s20 + $0x200] sm:$0xff] }
 0x15e   : > { %8051 = vmatprep.mubr.msk.f32.mxu1 %vm1534_vm4, %v1450_v32  ;;  %v13821_v32 = vmax.f32 %v9373_v22, 0.0  ;;  %v6501_v1 = vrot.slane %v6500_v48, 4  ;;  %2724 = vrot.lane.b32.xlu0 %v9329_v59, %s8424_s22  ;;  %v6517_v40 = vsel %vm1534_vm4, %v13514_v12, -inf  ;;  %v13515_v62 = vmax.f32 %v9410_v9, 0.0 }
 0x15f   : > { %v9427_v61 = vrot.slane %v8888_v46, %v8537_v31  ;;  %v6525_v44 = vsel %vm1534_vm4, %v13513_v4, -inf }
 0x160   : > { %v6516_v47 = vsel %vm1534_vm4, %v13821_v32, -inf  ;;  %v6510_v32 = vrot.slane %v6509_v19, 4  ;;  %v6502_v43 = vmax.f32 %v6500_v48, %v6501_v1  ;;  %2726 = vrot.lane.b32.xlu1 %v9362_v36, %s8424_s22 }
 0x161   : > { %8052 = vmatmul.mubr.msk.f32.gmra.mrb[50].mxu1 %vm1534_vm4, %v1451_v30  ;;  %v6518_v18 = vmax.f32 %v6516_v47, %v6517_v40  ;;  %13822 = vst [vmem:[#allocation45_spill] sm:$0xff] %v9427_v61  ;;  %v13517_v30 = vmax.f32 %v9420_v37, 0.0  ;;  %v9437_v47 = vadd.f32 %v8919_v11, %v885_v3  ;;  %v9443_v48 = vadd.f32 %v9427_v61, %v886_v24 }
 0x162   : > { %8054 = vmatprep.mubr.msk.f32.mxu1 %vm1534_vm4, %v1452_v21  ;;  %v6511_v40 = vmax.f32 %v6509_v19, %v6510_v32  ;;  %v6526_v21 = vsel %vm1534_vm4, %v13515_v62, -inf  ;;  %v6503_v1 = vrot.slane %v6502_v43, 2  ;;  %4822 = vrot.lane.b32.xlu0 %v8638_v27, %s8425_s23  ;;  %v13823_v19 = vrot.slane %v9278_v15, 1  ;;  %v887_v27 = vld [vmem:[%s8571_s20 + $0x1d8] sm:$0xff] }
 0x163   : > { %v6519_v46 = vrot.slane %v6518_v18, 4  ;;  %v6527_v4 = vmax.f32 %v6525_v44, %v6526_v21  ;;  %v6534_v3 = vsel %vm1534_vm4, %v13517_v30, -inf  ;;  %v13518_v12 = vmax.f32 %v9437_v47, 0.0  ;;  %v888_v44 = vld [vmem:[%s8571_s20 + $0x1e0] sm:$0xff] }
 0x164   : > { %v9454_v32 = vmax.f32 %v9278_v15, %v13823_v19  ;;  %v6512_v62 = vrot.slane %v6511_v40, 2  ;;  %v6504_v21 = vmax.f32 %v6502_v43, %v6503_v1  ;;  %4824 = vrot.lane.b32.xlu1 %v8666_v51, %s8425_s23  ;;  %v13523_v19 = vmax.f32 %v9443_v48, 0.0  ;;  %v9477_v51 = vpop.permute.xlu0 %2644 }
 0x165   : > { %8055 = vmatmul.mubr.msk.f32.gmra.mrb[52].mxu1 %vm1534_vm4, %v1453_v14  ;;  %v6520_v49 = vmax.f32 %v6518_v18, %v6519_v46  ;;  %v6528_v30 = vrot.slane %v6527_v4, 4  ;;  %v6535_v15 = vsel %vm1534_vm4, %v13518_v12, -inf  ;;  %13826 = vst [vmem:[#allocation48_spill] sm:$0xff] %v9477_v51  ;;  %v9480_v24 = vadd.f32 %v9427_v61, %v887_v27  ;;  %v889_v27 = vld [vmem:[%s8571_s20 + $0x1e8] sm:$0xff]  ;;  %v891_v51 = vld [vmem:[%s8571_s20 + $0x1f8] sm:$0xff] }
 0x166   : > { %13824 = vst [vmem:[#allocation46_spill] sm:$0xff] %v9454_v32  ;;  %8057 = vmatprep.mubr.msk.f32.mxu1 %vm1534_vm4, %v1454_v17  ;;  %v9470_v18 = vmax.f32 %v6511_v40, %v6512_v62  ;;  %v6536_v43 = vmax.f32 %v6534_v3, %v6535_v15  ;;  %v9473_v17 = vrot.slane %v778_v33, %v8537_v31  ;;  %v6505_v40 = vrot.slane %v6504_v21, 1 }
 0x167   : > { %v6521_v46 = vrot.slane %v6520_v49, 2  ;;  %2680 = vrot.lane.b32.xlu0 %v8916_v8, %s8424_s22  ;;  %v6529_v1 = vmax.f32 %v6527_v4, %v6528_v30  ;;  %v9483_v12 = vadd.f32 %v8929_v29, %v888_v44  ;;  %v13827_v3 = vmax.f32 %v9365_v0, 0.0  ;;  %v895_v8 = vld [vmem:[%s8571_s20 + $0x218] sm:$0xff] }
 0x168   : > { %13825 = vst [vmem:[#allocation47_spill] sm:$0xff] %v9473_v17  ;;  %v6537_v33 = vrot.slane %v6536_v43, 4  ;;  %v13828_v4 = vcombine.high %v9147_v34, %v9147_v34  ;;  %v13830_v44 = vmax.f32 %v9373_v22, 0.0  ;;  %2682 = vrot.lane.b32.xlu1 %v8926_v45, %s8424_s22  ;;  %v6543_v15 = vsel %vm1534_vm4, %v13523_v19, -inf }
 0x169   : > { %8058 = vmatmul.mubr.msk.f32.gmra.mrb[54].mxu1 %vm1534_vm4, %v13827_v3  ;;  %v6530_v0 = vrot.slane %v6529_v1, 2  ;;  %v13524_v3 = vmax.f32 %v9480_v24, 0.0  ;;  %v6514_v62 = vrot.slane %v9470_v18, 1  ;;  %v6522_v14 = vmax.f32 %v6520_v49, %v6521_v46  ;;  %v9516_v19 = vpop.permute.xlu1 %2646  ;;  %v893_v46 = vld [vmem:[%s8571_s20 + $0x208] sm:$0xff] }
 0x16a   : > { %v9493_v30 = vrot.slane %v13828_v4, %v8537_v31  ;;  %8060 = vmatprep.mubr.msk.f32.mxu1 %vm1534_vm4, %v13830_v44  ;;  %v890_v4 = vld [vmem:[%s8571_s20 + $0x1f0] sm:$0xff]  ;;  %v6538_v22 = vmax.f32 %v6536_v43, %v6537_v33  ;;  %v13831_v44 = vcombine.high %v9166_v16, %v9166_v16  ;;  %13832 = vst [vmem:[#allocation50_spill] sm:$0xff] %v9516_v19 }
 0x16b   : > { %v6531_v17 = vmax.f32 %v6529_v1, %v6530_v0  ;;  %2684 = vrot.lane.b32.xlu0 %v8919_v11, %s8424_s22  ;;  %v6544_v34 = vsel %vm1534_vm4, %v13524_v3, -inf  ;;  %v9525_v49 = vrot.slane %v9159_v60, %v8537_v31  ;;  %v9528_v16 = vadd.f32 %v8929_v29, %v889_v27  ;;  %v9542_v19 = vpop.permute.xlu0 %2708 }
 0x16c   : > { %13829 = vst [vmem:[#allocation49_spill] sm:$0xff] %v9493_v30  ;;  %v9512_v32 = vrot.slane %v13831_v44, %v8537_v31  ;;  %v9531_v43 = vmax.f32 %v6504_v21, %v6505_v40  ;;  %v13835_v1 = vmax.f32 %v9382_v56, 0.0  ;;  %v6539_v33 = vrot.slane %v6538_v22, 2  ;;  %13837 = vst [vmem:[#allocation53_spill] sm:$0xff] %v9542_v19  ;;  %2686 = vrot.lane.b32.xlu1 %v9427_v61, %s8424_s22  ;;  %v896_v61 = vld [vmem:[%s8571_s20 + $0x220] sm:$0xff] }
 0x16d   : > { %13833 = vst [vmem:[#allocation51_spill] sm:$0xff] %v9525_v49  ;;  %v6545_v0 = vmax.f32 %v6543_v15, %v6544_v34  ;;  %v9537_v44 = vadd.f32 %v8932_v38, %v890_v4  ;;  %v13836_v3 = vmax.f32 %v9402_v52, 0.0  ;;  %v13838_v21 = vmax.f32 %v9483_v12, 0.0 }
 0x16e   : > { %13834 = vst [vmem:[#allocation52_spill] sm:$0xff] %v9531_v43  ;;  %8061 = vmatmul.mubr.msk.f32.gmra.mrb[56].mxu1 %vm1534_vm4, %v13835_v1  ;;  %v13534_v40 = vmax.f32 %v9528_v16, 0.0  ;;  %v9551_v27 = vadd.f32 %v8932_v38, %v891_v51  ;;  %v9554_v15 = vadd.f32 %v8692_v20, %v892_v26  ;;  %v6523_v52 = vrot.slane %v6522_v14, 1  ;;  %v894_v1 = vld [vmem:[%s8571_s20 + $0x210] sm:$0xff] }
 0x16f   : > { %8063 = vmatprep.mubr.msk.f32.mxu1 %vm1534_vm4, %v13836_v3  ;;  %v6552_v56 = vsel %vm1534_vm4, %v13838_v21, -inf  ;;  %v6546_v3 = vrot.slane %v6545_v0, 4  ;;  %v9558_v4 = vadd.f32 %v8692_v20, %v893_v46  ;;  %v6532_v19 = vrot.slane %v6531_v17, 1  ;;  %v9561_v21 = vpop.permute.xlu1 %2710  ;;  %2744 = vrot.lane.b32.xlu0 %v9493_v30, %s8424_s22  ;;  %v9585_v43 = vpop.permute.xlu0 %4826 }
 0x170   : > { %13839 = vst [vmem:[#allocation54_spill] sm:$0xff] %v9561_v21  ;;  %v6553_v26 = vsel %vm1534_vm4, %v13534_v40, -inf  ;;  %v13536_v51 = vmax.f32 %v9551_v27, 0.0  ;;  %v13840_v34 = vmax.f32 %v9410_v9, 0.0  ;;  %v9573_v46 = vmax.f32 %v6538_v22, %v6539_v33  ;;  %13845 = vst [vmem:[#allocation57_spill] sm:$0xff] %v9585_v43  ;;  %2746 = vrot.lane.b32.xlu1 %v9512_v32, %s8424_s22  ;;  %v901_v43 = vld [vmem:[%s8571_s20 + $0x248] sm:$0xff] }
 0x171   : > { %v9575_v20 = vmax.f32 %v6545_v0, %v6546_v3  ;;  %v6554_v21 = vmax.f32 %v6552_v56, %v6553_v26  ;;  %v13843_v11 = vmax.f32 %v9537_v44, 0.0  ;;  %v13844_v40 = vmax.f32 %v9420_v37, 0.0 }
 0x172   : > { %8064 = vmatmul.mubr.msk.f32.gmra.mrb[58].mxu1 %vm1534_vm4, %v13840_v34  ;;  %13841 = vst [vmem:[#allocation55_spill] sm:$0xff] %v9573_v46  ;;  %v6562_v9 = vsel %vm1534_vm4, %v13536_v51, -inf  ;;  %v13846_v22 = vmax.f32 %v9554_v15, 0.0  ;;  %v13535_v33 = vmax.f32 %v9558_v4, 0.0  ;;  %v9597_v37 = vadd.f32 %v8712_v55, %v894_v1  ;;  %v897_v1 = vld [vmem:[%s8571_s20 + $0x228] sm:$0xff] }
 0x173   : > { %13842 = vst [vmem:[#allocation56_spill] sm:$0xff] %v9575_v20  ;;  %v6561_v30 = vsel %vm1534_vm4, %v13843_v11, -inf  ;;  %8066 = vmatprep.mubr.msk.f32.mxu1 %vm1534_vm4, %v13844_v40  ;;  %v9600_v0 = vmax.f32 %v9470_v18, %v6514_v62  ;;  %v9602_v56 = vmax.f32 %v6522_v14, %v6523_v52  ;;  %v9606_v40 = vrot.slane %v9213_v28, %v8537_v31  ;;  %v9610_v34 = vpop.permute.xlu1 %4828  ;;  %v899_v14 = vld [vmem:[%s8571_s20 + $0x238] sm:$0xff] }
 0x174   : > { %v6570_v11 = vsel %vm1534_vm4, %v13846_v22, -inf  ;;  %v9608_v3 = vmax.f32 %v6561_v30, %v6562_v9  ;;  %13851 = vst [vmem:[#allocation62_spill] sm:$0xff] %v9610_v34  ;;  %2748 = vrot.lane.b32.xlu0 %v9525_v49, %s8424_s22  ;;  %v6571_v18 = vsel %vm1534_vm4, %v13535_v33, -inf  ;;  %v9619_v62 = vadd.f32 %v8712_v55, %v895_v8  ;;  %v898_v30 = vld [vmem:[%s8571_s20 + $0x230] sm:$0xff]  ;;  %v900_v8 = vld [vmem:[%s8571_s20 + $0x240] sm:$0xff]  ;;  %v919_v49 = vld [vmem:[%s8571_s20 + $0x2d8] sm:$0xff] }
 0x175   : > { %13847 = vst [vmem:[#allocation58_spill] sm:$0xff] %v9600_v0  ;;  %13848 = vst [vmem:[#allocation59_spill] sm:$0xff] %v9602_v56  ;;  %v9622_v52 = vadd.f32 %v8973_v39, %v896_v61  ;;  %v9626_v26 = vmax.f32 %v6531_v17, %v6532_v19  ;;  %v13853_v9 = vmax.f32 %v9437_v47, 0.0  ;;  %v6572_v51 = vmax.f32 %v6570_v11, %v6571_v18  ;;  %v9638_v61 = vpop.permute.xlu0 %2628 }
 0x176   : > { %13849 = vst [vmem:[#allocation60_spill] sm:$0xff] %v9606_v40  ;;  %13850 = vst [vmem:[#allocation61_spill] sm:$0xff] %v9608_v3  ;;  %v13854_v34 = vmax.f32 %v9443_v48, 0.0  ;;  %2750 = vrot.lane.b32.xlu1 %v9606_v40, %s8424_s22  ;;  %v6555_v47 = vrot.slane %v6554_v21, 4  ;;  %v13856_v19 = vmax.f32 %v9597_v37, 0.0  ;;  %v13857_v48 = vcombine.high %v9283_v25, %v9283_v25  ;;  %v906_v40 = vld [vmem:[%s8571_s20 + $0x270] sm:$0xff] }
 0x177   : > { %13852 = vst [vmem:[#allocation63_spill] sm:$0xff] %v9626_v26  ;;  %8067 = vmatmul.mubr.msk.f32.gmra.mrb[60].mxu1 %vm1534_vm4, %v13853_v9  ;;  %13855 = vst [vmem:[#allocation64_spill] sm:$0xff] %v9638_v61  ;;  %v13539_v9 = vmax.f32 %v9619_v62, 0.0  ;;  %v13544_v11 = vmax.f32 %v9622_v52, 0.0  ;;  %v6573_v18 = vrot.slane %v6572_v51, 4  ;;  %v9654_v33 = vadd.f32 %v8973_v39, %v897_v1  ;;  %v9660_v26 = vpop.permute.xlu1 %2632  ;;  %v905_v61 = vld [vmem:[%s8571_s20 + $0x268] sm:$0xff] }
 0x178   : > { %8069 = vmatprep.mubr.msk.f32.mxu1 %vm1534_vm4, %v13854_v34  ;;  %v6579_v17 = vsel %vm1534_vm4, %v13856_v19, -inf  ;;  %v9651_v34 = vrot.slane %v13857_v48, %v8537_v31  ;;  %v9657_v22 = vadd.f32 %v8979_v58, %v898_v30  ;;  %13858 = vst [vmem:[#allocation65_spill] sm:$0xff] %v9660_v26  ;;  %2664 = vrot.lane.b32.xlu0 %v8954_v54, %s8424_s22  ;;  %v13859_v48 = vmax.f32 %v9480_v24, 0.0  ;;  %v911_v3 = vld [vmem:[%s8571_s20 + $0x298] sm:$0xff] }
 0x179   : > { %v6580_v19 = vsel %vm1534_vm4, %v13539_v9, -inf  ;;  %v6588_v25 = vsel %vm1534_vm4, %v13544_v11, -inf  ;;  %v9671_v1 = vadd.f32 %v8979_v58, %v899_v14  ;;  %v9674_v30 = vadd.f32 %v9006_v63, %v900_v8  ;;  %v9686_v11 = vpop.permute.xlu0 %2692 }
 0x17a   : > { %v6574_v56 = vmax.f32 %v6572_v51, %v6573_v18  ;;  %v6581_v0 = vmax.f32 %v6579_v17, %v6580_v19  ;;  %v13546_v9 = vmax.f32 %v9654_v33, 0.0  ;;  %v13548_v20 = vmax.f32 %v9657_v22, 0.0  ;;  %13862 = vst [vmem:[#allocation67_spill] sm:$0xff] %v9686_v11  ;;  %2666 = vrot.lane.b32.xlu1 %v8957_v53, %s8424_s22  ;;  %v902_v17 = vld [vmem:[%s8571_s20 + $0x250] sm:$0xff] }
 0x17b   : > { %8070 = vmatmul.mubr.msk.f32.gmra.mrb[62].mxu1 %vm1534_vm4, %v13859_v48  ;;  %v13860_v46 = vmax.f32 %v9483_v12, 0.0  ;;  %v9684_v14 = vmax.f32 %v6554_v21, %v6555_v47  ;;  %v13551_v24 = vmax.f32 %v9671_v1, 0.0  ;;  %v13553_v51 = vmax.f32 %v9674_v30, 0.0  ;;  %v9703_v47 = vpop.permute.xlu1 %2694 }
 0x17c   : > { %v9693_v8 = vadd.f32 %v9006_v63, %v901_v43  ;;  %v6575_v18 = vrot.slane %v6574_v56, 2  ;;  %v6582_v19 = vrot.slane %v6581_v0, 4  ;;  %v6589_v12 = vsel %vm1534_vm4, %v13546_v9, -inf  ;;  %13863 = vst [vmem:[#allocation68_spill] sm:$0xff] %v9703_v47  ;;  %2668 = vrot.lane.b32.xlu0 %v9056_v2, %s8424_s22 }
 0x17d   : > { %8072 = vmatprep.mubr.msk.f32.mxu1 %vm1534_vm4, %v13860_v46  ;;  %13861 = vst [vmem:[#allocation66_spill] sm:$0xff] %v9684_v14  ;;  %v6597_v21 = vsel %vm1534_vm4, %v13548_v20, -inf  ;;  %v903_v46 = vld [vmem:[%s8571_s20 + $0x258] sm:$0xff]  ;;  %v6590_v48 = vmax.f32 %v6588_v25, %v6589_v12  ;;  %v6598_v43 = vsel %vm1534_vm4, %v13551_v24, -inf  ;;  %v6606_v11 = vsel %vm1534_vm4, %v13553_v51, -inf  ;;  %v9725_v24 = vpop.permute.xlu0 %4810 }
 0x17e   : > { %v13552_v9 = vmax.f32 %v9693_v8, 0.0  ;;  %v13864_v14 = vmax.f32 %v9528_v16, 0.0  ;;  %v9717_v20 = vmax.f32 %v6574_v56, %v6575_v18  ;;  %v6583_v47 = vmax.f32 %v6581_v0, %v6582_v19  ;;  %13866 = vst [vmem:[#allocation69_spill] sm:$0xff] %v9725_v24  ;;  %2670 = vrot.lane.b32.xlu1 %v9060_v7, %s8424_s22 }
 0x17f   : > { %v6599_v26 = vmax.f32 %v6597_v21, %v6598_v43  ;;  %v9720_v25 = vadd.f32 %v9014_v35, %v902_v17  ;;  %v13865_v12 = vmax.f32 %v9537_v44, 0.0  ;;  %v9731_v16 = vrot.slane %v9311_v42, %v8537_v31  ;;  %v904_v43 = vld [vmem:[%s8571_s20 + $0x260] sm:$0xff] }
 0x180   : > { %8073 = vmatmul.mubr.msk.f32.gmra.mrb[64].mxu1 %vm1534_vm4, %v13864_v14  ;;  %v6591_v56 = vrot.slane %v6590_v48, 4  ;;  %v6607_v0 = vsel %vm1534_vm4, %v13552_v9, -inf  ;;  %v9737_v14 = vadd.f32 %v9014_v35, %v903_v46  ;;  %v6584_v44 = vrot.slane %v6583_v47, 2  ;;  %2728 = vrot.lane.b32.xlu0 %v9651_v34, %s8424_s22 }
 0x181   : > { %8075 = vmatprep.mubr.msk.f32.mxu1 %vm1534_vm4, %v13865_v12  ;;  %v13867_v17 = vcombine.high %v9314_v50, %v9314_v50  ;;  %v6600_v19 = vrot.slane %v6599_v26, 4  ;;  %v6608_v21 = vmax.f32 %v6606_v11, %v6607_v0  ;;  %v9746_v12 = vpop.permute.xlu1 %4812  ;;  %v13559_v46 = vmax.f32 %v9720_v25, 0.0 }
 0x182   : > { %13868 = vst [vmem:[#allocation70_spill] sm:$0xff] %v9746_v12  ;;  %v6592_v9 = vmax.f32 %v6590_v48, %v6591_v56  ;;  %v827_v51 = vcombine.high %v9213_v28, %v9213_v28  ;;  %v13561_v50 = vmax.f32 %v9737_v14, 0.0  ;;  %v6577_v11 = vrot.slane %v9717_v20, 1  ;;  %v9763_v56 = vpop.permute.xlu0 %2648  ;;  %4844 = vrot.lane.b32.xlu1 %v8951_v23, %s8425_s23 }
 0x183   : > { %v9743_v18 = vrot.slane %v13867_v17, %v8537_v31  ;;  %v13869_v17 = vmax.f32 %v9551_v27, 0.0  ;;  %v6585_v0 = vmax.f32 %v6583_v47, %v6584_v44  ;;  %v6601_v24 = vmax.f32 %v6599_v26, %v6600_v19  ;;  %13871 = vst [vmem:[#allocation71_spill] sm:$0xff] %v9763_v56 }
 0x184   : > { %v6609_v12 = vrot.slane %v6608_v21, 4  ;;  %v13870_v48 = vmax.f32 %v9554_v15, 0.0  ;;  %v6593_v28 = vrot.slane %v6592_v9, 2  ;;  %v6615_v27 = vsel %vm1534_vm4, %v13559_v46, -inf  ;;  %2732 = vrot.lane.b32.xlu0 %v9731_v16, %s8424_s22 }
 0x185   : > { %8076 = vmatmul.mubr.msk.f32.gmra.mrb[66].mxu1 %vm1534_vm4, %v13869_v17  ;;  %v6616_v26 = vsel %vm1534_vm4, %v13561_v50, -inf  ;;  %v9774_v47 = vadd.f32 %v9344_v57, %v904_v43  ;;  %v6586_v15 = vrot.slane %v6585_v0, 1  ;;  %v6602_v44 = vrot.slane %v6601_v24, 2  ;;  %v907_v43 = vld [vmem:[%s8571_s20 + $0x278] sm:$0xff] }
 0x186   : > { %8078 = vmatprep.mubr.msk.f32.mxu1 %vm1534_vm4, %v13870_v48  ;;  %v6610_v19 = vmax.f32 %v6608_v21, %v6609_v12  ;;  %v6617_v17 = vmax.f32 %v6615_v27, %v6616_v26  ;;  %v9776_v48 = vpop.permute.xlu1 %2650  ;;  %v6594_v23 = vmax.f32 %v6592_v9, %v6593_v28  ;;  %v9782_v56 = vadd.f32 %v9344_v57, %v905_v61  ;;  %v908_v9 = vld [vmem:[%s8571_s20 + $0x280] sm:$0xff]  ;;  %v9796_v61 = vpop.permute.xlu0 %2652 }
 0x187   : > { %13872 = vst [vmem:[#allocation72_spill] sm:$0xff] %v9776_v48  ;;  %v13563_v46 = vmax.f32 %v9774_v47, 0.0  ;;  %v9785_v50 = vadd.f32 %v9368_v6, %v906_v40  ;;  %v13873_v21 = vmax.f32 %v9558_v4, 0.0  ;;  %v6603_v12 = vmax.f32 %v6601_v24, %v6602_v44  ;;  %13875 = vst [vmem:[#allocation73_spill] sm:$0xff] %v9796_v61  ;;  %2730 = vrot.lane.b32.xlu1 %v9743_v18, %s8424_s22  ;;  %v912_v57 = vld [vmem:[%s8571_s20 + $0x2a0] sm:$0xff] }
 0x188   : > { %v6611_v27 = vrot.slane %v6610_v19, 2  ;;  %v6618_v26 = vrot.slane %v6617_v17, 4  ;;  %v13874_v28 = vmax.f32 %v9597_v37, 0.0  ;;  %v9802_v4 = vrot.slane %v9322_v5, %v8537_v31  ;;  %2688 = vrot.lane.b32.xlu0 %v8929_v29, %s8424_s22 }
 0x189   : > { %8079 = vmatmul.mubr.msk.f32.gmra.mrb[68].mxu1 %vm1534_vm4, %v13873_v21  ;;  %v6624_v40 = vsel %vm1534_vm4, %v13563_v46, -inf  ;;  %v6595_v44 = vrot.slane %v6594_v23, 1  ;;  %v13876_v21 = vcombine.high %v9159_v60, %v9159_v60  ;;  %v9816_v5 = vrot.slane %v827_v51, %v8537_v31  ;;  %v909_v46 = vld [vmem:[%s8571_s20 + $0x288] sm:$0xff] }
 0x18a   : > { %8081 = vmatprep.mubr.msk.f32.mxu1 %vm1534_vm4, %v13874_v28  ;;  %v9819_v63 = vadd.f32 %v9368_v6, %v907_v43  ;;  %v9823_v61 = vmax.f32 %v9717_v20, %v6577_v11  ;;  %v9825_v37 = vmax.f32 %v6585_v0, %v6586_v15  ;;  %v9827_v24 = vpop.permute.xlu1 %2654  ;;  %v13882_v60 = vmax.f32 %v9782_v56, 0.0  ;;  %v910_v43 = vld [vmem:[%s8571_s20 + $0x290] sm:$0xff] }
 0x18b   : > { %v9813_v28 = vrot.slane %v13876_v21, %v8537_v31  ;;  %13878 = vst [vmem:[#allocation75_spill] sm:$0xff] %v9816_v5  ;;  %13881 = vst [vmem:[#allocation78_spill] sm:$0xff] %v9827_v24  ;;  %v13883_v21 = vld [vmem:[#allocation3_spill] sm:$0xff]  ;;  %v13884_v20 = vmax.f32 %v9619_v62, 0.0  ;;  %v6604_v11 = vrot.slane %v6603_v12, 1  ;;  %v9843_v0 = vmax.f32 %v6610_v19, %v6611_v27  ;;  %2734 = vrot.lane.b32.xlu1 %v9802_v4, %s8424_s22  ;;  %v914_v24 = vld [vmem:[%s8571_s20 + $0x2b0] sm:$0xff] }
 0x18c   : > { %13879 = vst [vmem:[#allocation76_spill] sm:$0xff] %v9823_v61  ;;  %13880 = vst [vmem:[#allocation77_spill] sm:$0xff] %v9825_v37  ;;  %v6625_v51 = vsel %vm1534_vm4, %v13882_v60, -inf  ;;  %v9835_v48 = vadd.f32 %v13883_v21, %v908_v9  ;;  %v9845_v15 = vmax.f32 %v6617_v17, %v6618_v26  ;;  %v913_v61 = vld [vmem:[%s8571_s20 + $0x2a8] sm:$0xff]  ;;  %v13887_v60 = vmax.f32 %v9622_v52, 0.0  ;;  %v9853_v9 = vpop.permute.xlu0 %2712  ;;  %v13891_v52 = vld [vmem:[#allocation4_spill] sm:$0xff] }
 0x18d   : > { %13877 = vst [vmem:[#allocation74_spill] sm:$0xff] %v9813_v28  ;;  %8082 = vmatmul.mubr.msk.f32.gmra.mrb[70].mxu1 %vm1534_vm4, %v13884_v20  ;;  %13885 = vst [vmem:[#allocation79_spill] sm:$0xff] %v9843_v0  ;;  %v9847_v37 = vmax.f32 %v6624_v40, %v6625_v51  ;;  %v13889_v62 = vmax.f32 %v9785_v50, 0.0  ;;  %v13572_v19 = vmax.f32 %v9819_v63, 0.0  ;;  %v9863_v27 = vadd.f32 %v13883_v21, %v909_v46 }
 0x18e   : > { %13886 = vst [vmem:[#allocation80_spill] sm:$0xff] %v9845_v15  ;;  %8084 = vmatprep.mubr.msk.f32.mxu1 %vm1534_vm4, %v13887_v60  ;;  %13888 = vst [vmem:[#allocation81_spill] sm:$0xff] %v9853_v9  ;;  %v13573_v17 = vmax.f32 %v9835_v48, 0.0  ;;  %v9865_v26 = vmax.f32 %v6594_v23, %v6595_v44  ;;  %v9868_v40 = vadd.f32 %v13891_v52, %v910_v43  ;;  %v13892_v60 = vld [vmem:[#allocation8_spill] sm:$0xff]  ;;  %2752 = vrot.lane.b32.xlu0 %v9813_v28, %s8424_s22 }
 0x18f   : > { %v6633_v20 = vsel %vm1534_vm4, %v13889_v62, -inf  ;;  %v9871_v51 = vadd.f32 %v13891_v52, %v911_v3  ;;  %v9874_v9 = vadd.f32 %v13892_v60, %v912_v57  ;;  %v9877_v62 = vpop.permute.xlu1 %2714  ;;  %v6634_v46 = vsel %vm1534_vm4, %v13572_v19, -inf  ;;  %2690 = vrot.lane.b32.xlu1 %v8932_v38, %s8424_s22 }
 0x190   : > { %13890 = vst [vmem:[#allocation82_spill] sm:$0xff] %v9865_v26  ;;  %13893 = vst [vmem:[#allocation83_spill] sm:$0xff] %v9877_v62  ;;  %v6642_v23 = vsel %vm1534_vm4, %v13573_v17, -inf  ;;  %v13575_v3 = vmax.f32 %v9863_v27, 0.0  ;;  %v9889_v57 = vadd.f32 %v13892_v60, %v913_v61  ;;  %v13894_v44 = vmax.f32 %v9654_v33, 0.0  ;;  %v9903_v61 = vpop.permute.xlu0 %2716  ;;  %v918_v60 = vld [vmem:[%s8571_s20 + $0x2d0] sm:$0xff] }
 0x191   : > { %v9894_v43 = vmax.f32 %v6603_v12, %v6604_v11  ;;  %v9896_v62 = vmax.f32 %v6633_v20, %v6634_v46  ;;  %v13578_v19 = vmax.f32 %v9868_v40, 0.0  ;;  %v13897_v26 = vmax.f32 %v9657_v22, 0.0  ;;  %13898 = vst [vmem:[#allocation86_spill] sm:$0xff] %v9903_v61  ;;  %v13899_v20 = vld [vmem:[#allocation9_spill] sm:$0xff]  ;;  %v916_v22 = vld [vmem:[%s8571_s20 + $0x2c0] sm:$0xff]  ;;  %v917_v12 = vld [vmem:[%s8571_s20 + $0x2c8] sm:$0xff] }
 0x192   : > { %8085 = vmatmul.mubr.msk.f32.gmra.mrb[72].mxu1 %vm1534_vm4, %v13894_v44  ;;  %v6643_v33 = vsel %vm1534_vm4, %v13575_v3, -inf  ;;  %v9913_v46 = vadd.f32 %v13899_v20, %v914_v24  ;;  %v915_v44 = vld [vmem:[%s8571_s20 + $0x2b8] sm:$0xff] }
 0x193   : > { %13895 = vst [vmem:[#allocation84_spill] sm:$0xff] %v9894_v43  ;;  %13896 = vst [vmem:[#allocation85_spill] sm:$0xff] %v9896_v62  ;;  %8087 = vmatprep.mubr.msk.f32.mxu1 %vm1534_vm4, %v13897_v26  ;;  %v6644_v17 = vmax.f32 %v6642_v23, %v6643_v33  ;;  %v6651_v61 = vsel %vm1534_vm4, %v13578_v19, -inf  ;;  %v13900_v43 = vmax.f32 %v9871_v51, 0.0  ;;  %v9926_v11 = vpop.permute.xlu1 %2718  ;;  %v13902_v24 = vld [vmem:[#allocation25_spill] sm:$0xff]  ;;  %v13903_v26 = vmax.f32 %v9874_v9, 0.0  ;;  %2754 = vrot.lane.b32.xlu1 %v9816_v5, %s8424_s22 }
 0x194   : > { %13901 = vst [vmem:[#allocation87_spill] sm:$0xff] %v9926_v11  ;;  %2672 = vrot.lane.b32.xlu0 %v13902_v24, %s8424_s22  ;;  %v13904_v33 = vmax.f32 %v9889_v57, 0.0  ;;  %v13590_v0 = vmax.f32 %v9913_v46, 0.0  ;;  %v9941_v52 = vadd.f32 %v13899_v20, %v915_v44 }
 0x195   : > { %v6652_v3 = vsel %vm1534_vm4, %v13900_v43, -inf  ;;  %v6660_v23 = vsel %vm1534_vm4, %v13903_v26, -inf  ;;  %v13905_v43 = vmax.f32 %v9671_v1, 0.0  ;;  %v6645_v28 = vrot.slane %v6644_v17, 4 }
 0x196   : > { %v6653_v21 = vmax.f32 %v6651_v61, %v6652_v3  ;;  %v6661_v19 = vsel %vm1534_vm4, %v13904_v33, -inf  ;;  %v13906_v3 = vld [vmem:[#allocation14_spill] sm:$0xff]  ;;  %v13907_v26 = vmax.f32 %v9674_v30, 0.0  ;;  %v9950_v33 = vpop.permute.xlu0 %4830 }
 0x197   : > { %8088 = vmatmul.mubr.msk.f32.gmra.mrb[74].mxu1 %vm1534_vm4, %v13905_v43  ;;  %v6662_v11 = vmax.f32 %v6660_v23, %v6661_v19  ;;  %v9944_v61 = vadd.f32 %v13906_v3, %v916_v22  ;;  %13908 = vst [vmem:[#allocation25_spill] sm:$0xff] %v9950_v33  ;;  %v6669_v19 = vsel %vm1534_vm4, %v13590_v0, -inf  ;;  %v9958_v44 = vadd.f32 %v13906_v3, %v917_v12  ;;  %v13909_v22 = vld [vmem:[#allocation15_spill] sm:$0xff]  ;;  %v9965_v5 = vpop.permute.xlu1 %4832 }
 0x198   : > { %8090 = vmatprep.mubr.msk.f32.mxu1 %vm1534_vm4, %v13907_v26  ;;  %v6654_v1 = vrot.slane %v6653_v21, 4  ;;  %v9961_v23 = vadd.f32 %v13909_v22, %v918_v60  ;;  %v6646_v30 = vmax.f32 %v6644_v17, %v6645_v28  ;;  %13910 = vst [vmem:[#allocation88_spill] sm:$0xff] %v9965_v5  ;;  %4842 = vrot.lane.b32.xlu0 %v8945_v41, %s8425_s23  ;;  %v13911_v28 = vmax.f32 %v9693_v8, 0.0  ;;  %v921_v12 = vld [vmem:[%s8571_s20 + $0x2e8] sm:$0xff] }
 0x199   : > { %v6663_v43 = vrot.slane %v6662_v11, 4  ;;  %v9972_v60 = vadd.f32 %v13909_v22, %v919_v49  ;;  %v13912_v33 = vmax.f32 %v9941_v52, 0.0  ;;  %v13913_v41 = vmax.f32 %v9944_v61, 0.0  ;;  %2674 = vrot.lane.b32.xlu1 %v9075_v10, %s8424_s22 }
 0x19a   : > { %v6655_v0 = vmax.f32 %v6653_v21, %v6654_v1  ;;  %v6647_v17 = vrot.slane %v6646_v30, 2  ;;  %v920_v1 = vld [vmem:[%s8571_s20 + $0x2e0] sm:$0xff]  ;;  %v13914_v3 = vmax.f32 %v9720_v25, 0.0  ;;  %v9988_v49 = vpop.permute.xlu0 %4834 }
 0x19b   : > { %8091 = vmatmul.mubr.msk.f32.gmra.mrb[76].mxu1 %vm1534_vm4, %v13911_v28  ;;  %v6664_v26 = vmax.f32 %v6662_v11, %v6663_v43  ;;  %v6670_v5 = vsel %vm1534_vm4, %v13912_v33, -inf  ;;  %v6678_v21 = vsel %vm1534_vm4, %v13913_v41, -inf  ;;  %13915 = vst [vmem:[#allocation89_spill] sm:$0xff] %v9988_v49  ;;  %v13916_v43 = vmax.f32 %v9958_v44, 0.0  ;;  %v9999_v6 = vpop.permute.xlu1 %4836 }
 0x19c   : > { %8093 = vmatprep.mubr.msk.f32.mxu1 %vm1534_vm4, %v13914_v3  ;;  %v6656_v8 = vrot.slane %v6655_v0, 2  ;;  %v6671_v11 = vmax.f32 %v6669_v19, %v6670_v5  ;;  %v13917_v28 = vmax.f32 %v9961_v23, 0.0  ;;  %v6648_v22 = vmax.f32 %v6646_v30, %v6647_v17  ;;  %13918 = vst [vmem:[#allocation90_spill] sm:$0xff] %v9999_v6  ;;  %4846 = vrot.lane.b32.xlu0 %v8954_v54, %s8425_s23  ;;  %v13919_v19 = vld [vmem:[#allocation32_spill] sm:$0xff] }
 0x19d   : > { %v6679_v33 = vsel %vm1534_vm4, %v13916_v43, -inf  ;;  %v6665_v20 = vrot.slane %v6664_v26, 2  ;;  %v13598_v3 = vmax.f32 %v9972_v60, 0.0  ;;  %v10004_v10 = vadd.f32 %v13919_v19, %v920_v1  ;;  %4848 = vrot.lane.b32.xlu1 %v8957_v53, %s8425_s23 }
 0x19e   : > { %v6687_v41 = vsel %vm1534_vm4, %v13917_v28, -inf  ;;  %v6680_v25 = vmax.f32 %v6678_v21, %v6679_v33  ;;  %v6657_v49 = vmax.f32 %v6655_v0, %v6656_v8  ;;  %v6672_v5 = vrot.slane %v6671_v11, 4  ;;  %v10019_v1 = vpop.permute.xlu0 %2630 }
 0x19f   : > { %v10007_v43 = vadd.f32 %v13919_v19, %v921_v12  ;;  %v13920_v30 = vmax.f32 %v9737_v14, 0.0  ;;  %v6627_v17 = vrot.slane %v9847_v37, 4  ;;  %v6666_v21 = vmax.f32 %v6664_v26, %v6665_v20  ;;  %13922 = vst [vmem:[#allocation91_spill] sm:$0xff] %v10019_v1  ;;  %v10032_v53 = vpop.permute.xlu1 %2634  ;;  %v13928_v19 = vld [vmem:[#allocation34_spill] sm:$0xff] }
 0x1a0   : > { %v6681_v33 = vrot.slane %v6680_v25, 4  ;;  %v6688_v54 = vsel %vm1534_vm4, %v13598_v3, -inf  ;;  %v13921_v0 = vmax.f32 %v9774_v47, 0.0  ;;  %v13923_v14 = vcombine.high %v9311_v42, %v9311_v42  ;;  %v922_v47 = vld [vmem:[%s8571_s20 + $0x2f0] sm:$0xff]  ;;  %13925 = vst [vmem:[#allocation93_spill] sm:$0xff] %v10032_v53 }
 0x1a1   : > { %8094 = vmatmul.mubr.msk.f32.gmra.mrb[78].mxu1 %vm1534_vm4, %v13920_v30  ;;  %v6673_v26 = vmax.f32 %v6671_v11, %v6672_v5  ;;  %v6689_v12 = vmax.f32 %v6687_v41, %v6688_v54  ;;  %v13602_v8 = vmax.f32 %v10004_v10, 0.0  ;;  %v6649_v28 = vrot.slane %v6648_v22, 1  ;;  %v923_v41 = vld [vmem:[%s8571_s20 + $0x2f8] sm:$0xff]  ;;  %v924_v5 = vld [vmem:[%s8571_s20 + $0x300] sm:$0xff]  ;;  %4852 = vrot.lane.b32.xlu1 %v9060_v7, %s8425_s23 }
 0x1a2   : > { %8096 = vmatprep.mubr.msk.f32.mxu1 %vm1534_vm4, %v13921_v0  ;;  %v10027_v20 = vrot.slane %v13923_v14, %v8537_v31  ;;  %v6658_v30 = vrot.slane %v6657_v49, 1  ;;  %v6682_v0 = vmax.f32 %v6680_v25, %v6681_v33  ;;  %v13604_v3 = vmax.f32 %v10007_v43, 0.0  ;;  %v10059_v54 = vpop.permute.xlu0 %2636 }
 0x1a3   : > { %v6667_v42 = vrot.slane %v6666_v21, 1  ;;  %v6674_v31 = vrot.slane %v6673_v26, 2  ;;  %v6690_v14 = vrot.slane %v6689_v12, 4  ;;  %v6696_v11 = vsel %vm1534_vm4, %v13602_v8, -inf  ;;  %v925_v8 = vld [vmem:[%s8571_s20 + $0x308] sm:$0xff]  ;;  %v10079_v7 = vpop.permute.xlu1 %2638 }
 0x1a4   : > { %13924 = vst [vmem:[#allocation92_spill] sm:$0xff] %v10027_v20  ;;  %2736 = vrot.lane.b32.xlu0 %v10027_v20, %s8424_s22  ;;  %v13926_v25 = vmax.f32 %v9782_v56, 0.0  ;;  %v10046_v33 = vmax.f32 %v9847_v37, %v6627_v17  ;;  %v6697_v6 = vsel %vm1534_vm4, %v13604_v3, -inf  ;;  %v10052_v53 = vadd.f32 %v13928_v19, %v922_v47  ;;  %v926_v3 = vld [vmem:[%s8571_s20 + $0x310] sm:$0xff]  ;;  %13931 = vst [vmem:[#allocation96_spill] sm:$0xff] %v10079_v7 }
 0x1a5   : > { %v13929_v1 = vmax.f32 %v9785_v50, 0.0  ;;  %v10063_v37 = vmax.f32 %v6673_v26, %v6674_v31  ;;  %v6683_v17 = vrot.slane %v6682_v0, 2  ;;  %v10067_v47 = vmax.f32 %v6648_v22, %v6649_v28  ;;  %v927_v31 = vld [vmem:[%s8571_s20 + $0x318] sm:$0xff]  ;;  %4860 = vrot.lane.b32.xlu1 %v9151_v13, %s8425_s23 }
 0x1a6   : > { %8097 = vmatmul.mubr.msk.f32.gmra.mrb[80].mxu1 %vm1534_vm4, %v13926_v25  ;;  %13927 = vst [vmem:[#allocation94_spill] sm:$0xff] %v10046_v33  ;;  %v10065_v25 = vmax.f32 %v6696_v11, %v6697_v6  ;;  %v13605_v50 = vmax.f32 %v10052_v53, 0.0  ;;  %v10074_v56 = vadd.f32 %v9329_v59, %v924_v5  ;;  %v10081_v26 = vmax.f32 %v6657_v49, %v6658_v30  ;;  %v928_v11 = vld [vmem:[%s8571_s20 + $0x320] sm:$0xff]  ;;  %v13936_v30 = vld [vmem:[#allocation17_spill] sm:$0xff] }
 0x1a7   : > { %8099 = vmatprep.mubr.msk.f32.mxu1 %vm1534_vm4, %v13929_v1  ;;  %13930 = vst [vmem:[#allocation95_spill] sm:$0xff] %v10067_v47  ;;  %v10071_v1 = vadd.f32 %v13928_v19, %v923_v41  ;;  %v10083_v6 = vmax.f32 %v6666_v21, %v6667_v42  ;;  %v10085_v22 = vmax.f32 %v6689_v12, %v6690_v14  ;;  %v13935_v41 = vmax.f32 %v9819_v63, 0.0  ;;  %v929_v12 = vld [vmem:[%s8571_s20 + $0x328] sm:$0xff]  ;;  %v10105_v14 = vpop.permute.xlu0 %2696  ;;  %v930_v21 = vld [vmem:[%s8571_s20 + $0x330] sm:$0xff]  ;;  %v936_v19 = vld [vmem:[%s8571_s20 + $0x360] sm:$0xff] }
 0x1a8   : > { %4850 = vrot.lane.b32.xlu0 %v9056_v2, %s8425_s23  ;;  %13932 = vst [vmem:[#allocation97_spill] sm:$0xff] %v10081_v26  ;;  %v10088_v28 = vadd.f32 %v9329_v59, %v925_v8  ;;  %v6705_v2 = vsel %vm1534_vm4, %v13605_v50, -inf  ;;  %v13937_v42 = vmax.f32 %v9835_v48, 0.0  ;;  %13938 = vst [vmem:[#allocation17_spill] sm:$0xff] %v10105_v14  ;;  %v10110_v5 = vmax.f32 %v6682_v0, %v6683_v17  ;;  %v931_v17 = vld [vmem:[%s8571_s20 + $0x338] sm:$0xff] }
 0x1a9   : > { %13933 = vst [vmem:[#allocation98_spill] sm:$0xff] %v10083_v6  ;;  %13934 = vst [vmem:[#allocation99_spill] sm:$0xff] %v10085_v22  ;;  %v13606_v49 = vmax.f32 %v10071_v1, 0.0  ;;  %v10114_v50 = vadd.f32 %v9362_v36, %v926_v3  ;;  %v10124_v13 = vadd.f32 %v9362_v36, %v927_v31  ;;  %v10127_v0 = vadd.f32 %v9651_v34, %v928_v11  ;;  %v10132_v3 = vpop.permute.xlu1 %2698 }
 0x1aa   : > { %8100 = vmatmul.mubr.msk.f32.gmra.mrb[82].mxu1 %vm1534_vm4, %v13935_v41  ;;  %13939 = vst [vmem:[#allocation100_spill] sm:$0xff] %v10110_v5  ;;  %v13608_v41 = vmax.f32 %v10088_v28, 0.0  ;;  %13941 = vst [vmem:[#allocation101_spill] sm:$0xff] %v10132_v3  ;;  %v10141_v31 = vadd.f32 %v9651_v34, %v929_v12  ;;  %v13943_v11 = vmax.f32 %v9863_v27, 0.0  ;;  %v13944_v3 = vmax.f32 %v9868_v40, 0.0  ;;  %4864 = vrot.lane.b32.xlu1 %v8926_v45, %s8425_s23  ;;  %v952_v5 = vld [vmem:[%s8571_s20 + $0x3e0] sm:$0xff] }
 0x1ab   : > { %8102 = vmatprep.mubr.msk.f32.mxu1 %vm1534_vm4, %v13937_v42  ;;  %v6706_v48 = vsel %vm1534_vm4, %v13606_v49, -inf  ;;  %v13940_v42 = vmax.f32 %v10074_v56, 0.0  ;;  %v10155_v12 = vpop.permute.xlu0 %2700  ;;  %v13956_v7 = vmax.f32 %v9889_v57, 0.0  ;;  %v6699_v57 = vrot.slane %v10065_v25, 4 }
 0x1ac   : > { %4854 = vrot.lane.b32.xlu0 %v13902_v24, %s8425_s23  ;;  %v10134_v63 = vmax.f32 %v6705_v2, %v6706_v48  ;;  %v6715_v49 = vsel %vm1534_vm4, %v13608_v41, -inf  ;;  %v13617_v24 = vmax.f32 %v10124_v13, 0.0  ;;  %v13618_v2 = vmax.f32 %v10127_v0, 0.0  ;;  %v932_v41 = vld [vmem:[%s8571_s20 + $0x340] sm:$0xff]  ;;  %13945 = vst [vmem:[#allocation103_spill] sm:$0xff] %v10155_v12  ;;  %v934_v12 = vld [vmem:[%s8571_s20 + $0x350] sm:$0xff] }
 0x1ad   : > { %v6714_v8 = vsel %vm1534_vm4, %v13940_v42, -inf  ;;  %v13611_v42 = vmax.f32 %v10114_v50, 0.0  ;;  %v10149_v48 = vadd.f32 %v9743_v18, %v930_v21  ;;  %v10165_v21 = vadd.f32 %v9743_v18, %v931_v17 }
 0x1ae   : > { %13942 = vst [vmem:[#allocation102_spill] sm:$0xff] %v10134_v63  ;;  %8103 = vmatmul.mubr.msk.f32.gmra.mrb[84].mxu1 %vm1534_vm4, %v13943_v11  ;;  %v6716_v14 = vmax.f32 %v6714_v8, %v6715_v49  ;;  %v933_v11 = vld [vmem:[%s8571_s20 + $0x348] sm:$0xff]  ;;  %v6732_v45 = vsel %vm1534_vm4, %v13618_v2, -inf  ;;  %v10178_v8 = vpop.permute.xlu1 %2702  ;;  %v13948_v62 = vmax.f32 %v10141_v31, 0.0  ;;  %v13949_v2 = vmax.f32 %v9871_v51, 0.0  ;;  %v14005_v63 = vld [vmem:[#allocation22_spill] sm:$0xff] }
 0x1af   : > { %8105 = vmatprep.mubr.msk.f32.mxu1 %vm1534_vm4, %v13944_v3  ;;  %v6723_v49 = vsel %vm1534_vm4, %v13611_v42, -inf  ;;  %v6724_v3 = vsel %vm1534_vm4, %v13617_v24, -inf  ;;  %v13946_v42 = vld [vmem:[#allocation18_spill] sm:$0xff]  ;;  %v13621_v15 = vmax.f32 %v10165_v21, 0.0  ;;  %v10185_v24 = vadd.f32 %v9731_v16, %v932_v41  ;;  %v3077_v51 = vld [vmem:[%s13461_s5 + $0x8] sm:$0xf] }
 0x1b0   : > { %v6717_v40 = vrot.slane %v6716_v14, 4  ;;  %4858 = vrot.lane.b32.xlu0 %v13946_v42, %s8425_s23  ;;  %13947 = vst [vmem:[#allocation18_spill] sm:$0xff] %v10178_v8  ;;  %v6725_v17 = vmax.f32 %v6723_v49, %v6724_v3  ;;  %v6733_v33 = vsel %vm1534_vm4, %v13948_v62, -inf  ;;  %v13950_v42 = vmax.f32 %v10149_v48, 0.0  ;;  %v3076_v62 = vld [vmem:[%s13461_s5] sm:$0xff]  ;;  %v935_v8 = vld [vmem:[%s8571_s20 + $0x358] sm:$0xff] }
 0x1b1   : > { %v6734_v6 = vmax.f32 %v6732_v45, %v6733_v33  ;;  %v10194_v3 = vadd.f32 %v9731_v16, %v933_v11  ;;  %v13951_v41 = vmax.f32 %v9874_v9, 0.0  ;;  %v10205_v33 = vpop.permute.xlu0 %4814  ;;  %v6742_v11 = vsel %vm1534_vm4, %v13621_v15, -inf }
 0x1b2   : > { %8106 = vmatmul.mubr.msk.f32.gmra.mrb[86].mxu1 %vm1534_vm4, %v13949_v2  ;;  %v6718_v27 = vmax.f32 %v6716_v14, %v6717_v40  ;;  %v6741_v49 = vsel %vm1534_vm4, %v13950_v42, -inf  ;;  %13952 = vst [vmem:[#allocation104_spill] sm:$0xff] %v10205_v33  ;;  %v13953_v14 = vld [vmem:[#allocation45_spill] sm:$0xff]  ;;  %v6726_v2 = vrot.slane %v6725_v17, 4  ;;  %v13627_v40 = vmax.f32 %v10185_v24, 0.0  ;;  %v10220_v26 = vpop.permute.xlu1 %4816 }
 0x1b3   : > { %8108 = vmatprep.mubr.msk.f32.mxu1 %vm1534_vm4, %v13951_v41  ;;  %4868 = vrot.lane.b32.xlu1 %v13953_v14, %s8425_s23  ;;  %v10214_v45 = vadd.f32 %v9802_v4, %v934_v12  ;;  %v6735_v9 = vrot.slane %v6734_v6, 4  ;;  %v6743_v41 = vmax.f32 %v6741_v49, %v6742_v11  ;;  %v13954_v14 = vld [vmem:[#allocation19_spill] sm:$0xff]  ;;  %13955 = vst [vmem:[#allocation45_spill] sm:$0xff] %v10220_v26  ;;  %v13958_v26 = vmax.f32 %v9913_v46, 0.0 }
 0x1b4   : > { %v6719_v42 = vrot.slane %v6718_v27, 2  ;;  %4862 = vrot.lane.b32.xlu0 %v13954_v14, %s8425_s23  ;;  %v6727_v47 = vmax.f32 %v6725_v17, %v6726_v2  ;;  %v6750_v15 = vsel %vm1534_vm4, %v13627_v40, -inf  ;;  %v8380_v22 = vpack.c.bf16 %v3077_v51, %v3076_v62  ;;  %v937_v2 = vld [vmem:[%s8571_s20 + $0x368] sm:$0xff] }
 0x1b5   : > { %v13628_v12 = vmax.f32 %v10214_v45, 0.0  ;;  %v6736_v11 = vmax.f32 %v6734_v6, %v6735_v9  ;;  %v6744_v33 = vrot.slane %v6743_v41, 4  ;;  %v13957_v14 = vmax.f32 %v10194_v3, 0.0  ;;  %v10239_v40 = vpop.permute.xlu0 %4818 }
 0x1b6   : > { %8109 = vmatmul.mubr.msk.f32.gmra.mrb[88].mxu1 %vm1534_vm4, %v13956_v7  ;;  %v10230_v49 = vmax.f32 %v6718_v27, %v6719_v42  ;;  %13959 = vst [vmem:[#allocation19_spill] sm:$0xff] %v10239_v40  ;;  %v6728_v7 = vrot.slane %v6727_v47, 2  ;;  %v10245_v6 = vadd.f32 %v9802_v4, %v935_v8  ;;  %8382 = vmatprep.subr.msk.bf16.mxu0 %vm8515_vm3, %v8380_v22  ;;  %v940_v40 = vld [vmem:[%s8571_s20 + $0x380] sm:$0xff] }
 0x1b7   : > { %v6751_v17 = vsel %vm1534_vm4, %v13957_v14, -inf  ;;  %8111 = vmatprep.mubr.msk.f32.mxu1 %vm1534_vm4, %v13958_v26  ;;  %4872 = vrot.lane.b32.xlu1 %v8932_v38, %s8425_s23  ;;  %v6737_v62 = vrot.slane %v6736_v11, 2  ;;  %v6745_v51 = vmax.f32 %v6743_v41, %v6744_v33  ;;  %v6759_v46 = vsel %vm1534_vm4, %v13628_v12, -inf  ;;  %v13961_v38 = vld [vmem:[#allocation20_spill] sm:$0xff] }
 0x1b8   : > { %v6752_v27 = vmax.f32 %v6750_v15, %v6751_v17  ;;  %v10253_v42 = vadd.f32 %v10027_v20, %v936_v19  ;;  %4866 = vrot.lane.b32.xlu0 %v13961_v38, %s8425_s23  ;;  %v10257_v15 = vpop.permute.xlu1 %4820  ;;  %v6729_v8 = vmax.f32 %v6727_v47, %v6728_v7  ;;  %8385 = vmatpush3.bf16.msk.msra.mxu0 %vm8515_vm3, %v8380_v22  ;;  %v13631_v33 = vmax.f32 %v10245_v6, 0.0  ;;  %v938_v7 = vld [vmem:[%s8571_s20 + $0x370] sm:$0xff] }
 0x1b9   : > { %13962 = vst [vmem:[#allocation2_spill] sm:$0xff] %v10257_v15  ;;  %v10263_v41 = vadd.f32 %v10027_v20, %v937_v2  ;;  %v13963_v14 = vmax.f32 %v9941_v52, 0.0  ;;  %v6721_v19 = vrot.slane %v10230_v49, 1  ;;  %v6738_v17 = vmax.f32 %v6736_v11, %v6737_v62  ;;  %v10274_v26 = vpop.permute.xlu0 %2656  ;;  %v939_v15 = vld [vmem:[%s8571_s20 + $0x378] sm:$0xff] }
 0x1ba   : > { %v6753_v9 = vrot.slane %v6752_v27, 4  ;;  %v6746_v38 = vrot.slane %v6745_v51, 2  ;;  %v13964_v22 = vmax.f32 %v9944_v61, 0.0  ;;  %13965 = vst [vmem:[#allocation20_spill] sm:$0xff] %v10274_v26  ;;  %v6730_v52 = vrot.slane %v6729_v8, 1 }
 0x1bb   : > { %8112 = vmatmul.mubr.msk.f32.gmra.mrb[90].mxu1 %vm1534_vm4, %v13963_v14  ;;  %4876 = vrot.lane.b32.xlu1 %v8712_v55, %s8425_s23  ;;  %v6760_v11 = vsel %vm1534_vm4, %v13631_v33, -inf  ;;  %v13632_v62 = vmax.f32 %v10263_v41, 0.0  ;;  %v6739_v14 = vrot.slane %v6738_v17, 1  ;;  %v13966_v61 = vmax.f32 %v10253_v42, 0.0 }
 0x1bc   : > { %8114 = vmatprep.mubr.msk.f32.mxu1 %vm1534_vm4, %v13964_v22  ;;  %v6754_v2 = vmax.f32 %v6752_v27, %v6753_v9  ;;  %v6747_v12 = vmax.f32 %v6745_v51, %v6746_v38  ;;  %v10282_v47 = vmax.f32 %v6759_v46, %v6760_v11  ;;  %v13967_v55 = vrot.slane %v10063_v37, 1  ;;  %4870 = vrot.lane.b32.xlu0 %v8929_v29, %s8425_s23  ;;  %v10297_v33 = vpop.permute.xlu1 %2658  ;;  %v13970_v46 = vld [vmem:[#allocation47_spill] sm:$0xff] }
 0x1bd   : > { %v6768_v22 = vsel %vm1534_vm4, %v13966_v61, -inf  ;;  %13969 = vst [vmem:[#allocation106_spill] sm:$0xff] %v10297_v33  ;;  %v6769_v51 = vsel %vm1534_vm4, %v13632_v62, -inf  ;;  %v10303_v38 = vadd.f32 %v13970_v46, %v938_v7  ;;  %v941_v11 = vld [vmem:[%s8571_s20 + $0x388] sm:$0xff]  ;;  %v13971_v61 = vmax.f32 %v9958_v44, 0.0  ;;  %v10317_v7 = vpop.permute.xlu0 %2676  ;;  %v943_v44 = vld [vmem:[%s8571_s20 + $0x398] sm:$0xff] }
 0x1be   : > { %v10292_v27 = vmax.f32 %v10063_v37, %v13967_v55  ;;  %v10310_v37 = vmax.f32 %v10065_v25, %v6699_v57  ;;  %v6748_v29 = vrot.slane %v6747_v12, 1  ;;  %v6755_v55 = vrot.slane %v6754_v2, 2  ;;  %13974 = vst [vmem:[#allocation107_spill] sm:$0xff] %v10317_v7  ;;  %v944_v25 = vld [vmem:[%s8571_s20 + $0x3a0] sm:$0xff] }
 0x1bf   : > { %8115 = vmatmul.mubr.msk.f32.gmra.mrb[92].mxu1 %vm1534_vm4, %v13971_v61  ;;  %v10312_v9 = vmax.f32 %v6768_v22, %v6769_v51  ;;  %4880 = vrot.lane.b32.xlu1 %v8979_v58, %s8425_s23  ;;  %v10324_v57 = vadd.f32 %v13970_v46, %v939_v15  ;;  %v13975_v61 = vld [vmem:[#allocation33_spill] sm:$0xff]  ;;  %v942_v51 = vld [vmem:[%s8571_s20 + $0x390] sm:$0xff]  ;;  %v10335_v62 = vmax.f32 %v6738_v17, %v6739_v14  ;;  %v13982_v14 = vmax.f32 %v9972_v60, 0.0 }
 0x1c0   : > { %13968 = vst [vmem:[#allocation105_spill] sm:$0xff] %v10292_v27  ;;  %13972 = vst [vmem:[#allocation47_spill] sm:$0xff] %v10310_v37  ;;  %v13973_v27 = vmax.f32 %v9961_v23, 0.0  ;;  %v10327_v22 = vadd.f32 %v13975_v61, %v940_v40  ;;  %v10331_v23 = vmax.f32 %v10230_v49, %v6721_v19  ;;  %v10338_v58 = vadd.f32 %v13975_v61, %v941_v11  ;;  %v13979_v15 = vld [vmem:[#allocation5_spill] sm:$0xff]  ;;  %v10344_v7 = vpop.permute.xlu1 %2678 }
 0x1c1   : > { %13978 = vst [vmem:[#allocation109_spill] sm:$0xff] %v10335_v62  ;;  %4874 = vrot.lane.b32.xlu0 %v13979_v15, %s8425_s23  ;;  %13980 = vst [vmem:[#allocation5_spill] sm:$0xff] %v10344_v7  ;;  %v6762_v40 = vrot.slane %v10282_v47, 4  ;;  %v13981_v49 = vmax.f32 %v10303_v38, 0.0  ;;  %v10356_v11 = vmax.f32 %v6747_v12, %v6748_v29  ;;  %v10358_v15 = vmax.f32 %v6754_v2, %v6755_v55  ;;  %v10368_v17 = vpop.permute.xlu0 %2720 }
 0x1c2   : > { %8117 = vmatprep.mubr.msk.f32.mxu1 %vm1534_vm4, %v13973_v27  ;;  %13976 = vst [vmem:[#allocation33_spill] sm:$0xff] %v10331_v23  ;;  %v10333_v27 = vmax.f32 %v6729_v8, %v6730_v52  ;;  %v945_v52 = vld [vmem:[%s8571_s20 + $0x3a8] sm:$0xff]  ;;  %v13634_v62 = vmax.f32 %v10338_v58, 0.0  ;;  %v13986_v19 = vmax.f32 %v10004_v10, 0.0  ;;  %v13988_v60 = vmax.f32 %v10324_v57, 0.0  ;;  %v13990_v10 = vld [vmem:[#allocation49_spill] sm:$0xff] }
 0x1c3   : > { %v6777_v8 = vsel %vm1534_vm4, %v13981_v49, -inf  ;;  %8118 = vmatmul.mubr.msk.f32.gmra.mrb[94].mxu1 %vm1534_vm4, %v13982_v14  ;;  %13983 = vst [vmem:[#allocation110_spill] sm:$0xff] %v10356_v11  ;;  %13984 = vst [vmem:[#allocation111_spill] sm:$0xff] %v10358_v15  ;;  %v946_v49 = vld [vmem:[%s8571_s20 + $0x3b0] sm:$0xff]  ;;  %4884 = vrot.lane.b32.xlu1 %v9014_v35, %s8425_s23  ;;  %v13989_v2 = vmax.f32 %v10327_v22, 0.0  ;;  %v10392_v11 = vadd.f32 %v13990_v10, %v945_v52  ;;  %v14034_v15 = vmax.f32 %v10141_v31, 0.0 }
 0x1c4   : > { %13977 = vst [vmem:[#allocation108_spill] sm:$0xff] %v10333_v27  ;;  %v13985_v27 = vld [vmem:[#allocation35_spill] sm:$0xff]  ;;  %8120 = vmatprep.mubr.msk.f32.mxu1 %vm1534_vm4, %v13986_v19  ;;  %v6778_v12 = vsel %vm1534_vm4, %v13988_v60, -inf  ;;  %v947_v19 = vld [vmem:[%s8571_s20 + $0x3b8] sm:$0xff]  ;;  %v6787_v35 = vsel %vm1534_vm4, %v13634_v62, -inf  ;;  %v948_v62 = vld [vmem:[%s8571_s20 + $0x3c0] sm:$0xff]  ;;  %v10408_v52 = vmax.f32 %v10282_v47, %v6762_v40 }
 0x1c5   : > { %v10362_v23 = vadd.f32 %v13985_v27, %v942_v51  ;;  %13987 = vst [vmem:[#allocation35_spill] sm:$0xff] %v10368_v17  ;;  %v6786_v29 = vsel %vm1534_vm4, %v13989_v2, -inf  ;;  %v10379_v55 = vadd.f32 %v13985_v27, %v943_v44  ;;  %v10382_v51 = vadd.f32 %v13990_v10, %v944_v25  ;;  %4878 = vrot.lane.b32.xlu0 %v8973_v39, %s8425_s23  ;;  %v10396_v44 = vpop.permute.xlu1 %2722  ;;  %v949_v2 = vld [vmem:[%s8571_s20 + $0x3c8] sm:$0xff] }
 0x1c6   : > { %v10385_v14 = vmax.f32 %v6777_v8, %v6778_v12  ;;  %13992 = vst [vmem:[#allocation112_spill] sm:$0xff] %v10396_v44  ;;  %v6788_v25 = vmax.f32 %v6786_v29, %v6787_v35  ;;  %v10401_v12 = vadd.f32 %v9512_v32, %v946_v49  ;;  %v13993_v60 = vmax.f32 %v10007_v43, 0.0  ;;  %13994 = vst [vmem:[#allocation113_spill] sm:$0xff] %v10408_v52  ;;  %v10421_v43 = vpop.permute.xlu0 %2740 }
 0x1c7   : > { %v13995_v39 = vmax.f32 %v10362_v23, 0.0  ;;  %v10415_v8 = vadd.f32 %v9512_v32, %v947_v19  ;;  %v13997_v49 = vmax.f32 %v10052_v53, 0.0  ;;  %13998 = vst [vmem:[#allocation115_spill] sm:$0xff] %v10421_v43  ;;  %v14000_v40 = vmax.f32 %v10379_v55, 0.0  ;;  %v950_v53 = vld [vmem:[%s8571_s20 + $0x3d0] sm:$0xff] }
 0x1c8   : > { %13991 = vst [vmem:[#allocation49_spill] sm:$0xff] %v10385_v14  ;;  %8121 = vmatmul.mubr.msk.f32.gmra.mrb[96].mxu1 %vm1534_vm4, %v13993_v60  ;;  %v13999_v60 = vld [vmem:[#allocation43_spill] sm:$0xff]  ;;  %v6789_v47 = vrot.slane %v6788_v25, 4  ;;  %v14001_v35 = vmax.f32 %v10382_v51, 0.0  ;;  %v13644_v44 = vmax.f32 %v10401_v12, 0.0 }
 0x1c9   : > { %v6795_v29 = vsel %vm1534_vm4, %v13995_v39, -inf  ;;  %13996 = vst [vmem:[#allocation114_spill] sm:$0xff] %v10415_v8  ;;  %8123 = vmatprep.mubr.msk.f32.mxu1 %vm1534_vm4, %v13997_v49  ;;  %4888 = vrot.lane.b32.xlu1 %v13999_v60, %s8425_s23  ;;  %v6796_v39 = vsel %vm1534_vm4, %v14000_v40, -inf  ;;  %v14002_v49 = vmax.f32 %v10392_v11, 0.0  ;;  %v14003_v14 = vld [vmem:[#allocation51_spill] sm:$0xff]  ;;  %v10442_v40 = vpop.permute.xlu1 %2742  ;;  %v14008_v60 = vmax.f32 %v10071_v1, 0.0 }
 0x1ca   : > { %v6804_v19 = vsel %vm1534_vm4, %v14001_v35, -inf  ;;  %v6797_v17 = vmax.f32 %v6795_v29, %v6796_v39  ;;  %v10438_v7 = vadd.f32 %v14003_v14, %v948_v62  ;;  %4882 = vrot.lane.b32.xlu0 %v14005_v63, %s8425_s23  ;;  %14006 = vst [vmem:[#allocation51_spill] sm:$0xff] %v10442_v40  ;;  %v6790_v33 = vmax.f32 %v6788_v25, %v6789_v47  ;;  %v14013_v1 = vld [vmem:[#allocation4_spill] sm:$0xff] }
 0x1cb   : > { %v6805_v43 = vsel %vm1534_vm4, %v14002_v49, -inf  ;;  %v6813_v29 = vsel %vm1534_vm4, %v13644_v44, -inf  ;;  %v10448_v39 = vadd.f32 %v14003_v14, %v949_v2  ;;  %v951_v49 = vld [vmem:[%s8571_s20 + $0x3d8] sm:$0xff]  ;;  %v14009_v63 = vmax.f32 %v10415_v8, 0.0  ;;  %v10464_v2 = vpop.permute.xlu0 %2640  ;;  %v14015_v8 = vld [vmem:[#allocation42_spill] sm:$0xff] }
 0x1cc   : > { %14004 = vst [vmem:[#allocation43_spill] sm:$0xff] %v10438_v7  ;;  %v6806_v35 = vmax.f32 %v6804_v19, %v6805_v43  ;;  %8124 = vmatmul.mubr.msk.f32.gmra.mrb[98].mxu1 %vm1534_vm4, %v14008_v60  ;;  %v6798_v62 = vrot.slane %v6797_v17, 4  ;;  %v13651_v25 = vmax.f32 %v10438_v7, 0.0  ;;  %v14010_v43 = vld [vmem:[#allocation60_spill] sm:$0xff]  ;;  %v14012_v19 = vmax.f32 %v10074_v56, 0.0 }
 0x1cd   : > { %14007 = vst [vmem:[#allocation22_spill] sm:$0xff] %v10448_v39  ;;  %v6814_v40 = vsel %vm1534_vm4, %v14009_v63, -inf  ;;  %v10459_v47 = vadd.f32 %v14010_v43, %v950_v53  ;;  %4892 = vrot.lane.b32.xlu1 %v14013_v1, %s8425_s23  ;;  %v6791_v60 = vrot.slane %v6790_v33, 2  ;;  %v13653_v63 = vmax.f32 %v10448_v39, 0.0  ;;  %v10479_v1 = vpop.permute.xlu1 %4840 }
 0x1ce   : > { %8126 = vmatprep.mubr.msk.f32.mxu1 %vm1534_vm4, %v14012_v19  ;;  %v6807_v44 = vrot.slane %v6806_v35, 4  ;;  %v6815_v26 = vmax.f32 %v6813_v29, %v6814_v40  ;;  %v6799_v37 = vmax.f32 %v6797_v17, %v6798_v62  ;;  %v6822_v53 = vsel %vm1534_vm4, %v13651_v25, -inf  ;;  %4886 = vrot.lane.b32.xlu0 %v14015_v8, %s8425_s23  ;;  %14016 = vst [vmem:[#allocation42_spill] sm:$0xff] %v10479_v1  ;;  %v953_v62 = vld [vmem:[%s8571_s20 + $0x3e8] sm:$0xff] }
 0x1cf   : > { %14011 = vst [vmem:[#allocation60_spill] sm:$0xff] %v10459_v47  ;;  %v10474_v19 = vadd.f32 %v14010_v43, %v951_v49  ;;  %v6792_v20 = vmax.f32 %v6790_v33, %v6791_v60  ;;  %v6823_v17 = vsel %vm1534_vm4, %v13653_v63, -inf  ;;  %v14017_v25 = vmax.f32 %v10088_v28, 0.0  ;;  %v14021_v60 = vld [vmem:[#allocation9_spill] sm:$0xff] }
 0x1d0   : > { %v6808_v40 = vmax.f32 %v6806_v35, %v6807_v44  ;;  %v6816_v29 = vrot.slane %v6815_v26, 4  ;;  %v6800_v49 = vrot.slane %v6799_v37, 2  ;;  %v6824_v56 = vmax.f32 %v6822_v53, %v6823_v17  ;;  %v10495_v35 = vpop.permute.xlu0 %4838  ;;  %v14022_v53 = vld [vmem:[#allocation74_spill] sm:$0xff] }
 0x1d1   : > { %14014 = vst [vmem:[#allocation4_spill] sm:$0xff] %v10474_v19  ;;  %8127 = vmatmul.mubr.msk.f32.gmra.mrb[100].mxu1 %vm1534_vm4, %v14017_v25  ;;  %v14018_v7 = vmax.f32 %v10459_v47, 0.0  ;;  %v13658_v33 = vmax.f32 %v10474_v19, 0.0  ;;  %v14019_v44 = vmax.f32 %v10114_v50, 0.0  ;;  %14020 = vst [vmem:[#allocation116_spill] sm:$0xff] %v10495_v35  ;;  %4896 = vrot.lane.b32.xlu1 %v14021_v60, %s8425_s23  ;;  %v6771_v28 = vrot.slane %v10312_v9, 4  ;;  %v10512_v60 = vpop.permute.xlu1 %2642 }
 0x1d2   : > { %v6809_v25 = vrot.slane %v6808_v40, 2  ;;  %v6817_v63 = vmax.f32 %v6815_v26, %v6816_v29  ;;  %v10501_v17 = vadd.f32 %v14022_v53, %v952_v5  ;;  %v6801_v1 = vmax.f32 %v6799_v37, %v6800_v49  ;;  %v954_v35 = vld [vmem:[%s8571_s20 + $0x3f0] sm:$0xff]  ;;  %v14024_v47 = vld [vmem:[#allocation3_spill] sm:$0xff] }
 0x1d3   : > { %v6831_v8 = vsel %vm1534_vm4, %v14018_v7, -inf  ;;  %8129 = vmatprep.mubr.msk.f32.mxu1 %vm1534_vm4, %v14019_v44  ;;  %v6825_v7 = vrot.slane %v6824_v56, 4  ;;  %v6832_v50 = vsel %vm1534_vm4, %v13658_v33, -inf  ;;  %v10507_v44 = vadd.f32 %v14022_v53, %v953_v62  ;;  %4890 = vrot.lane.b32.xlu0 %v14024_v47, %s8425_s23 }
 0x1d4   : > { %v6793_v26 = vrot.slane %v6792_v20, 1  ;;  %v6810_v29 = vmax.f32 %v6808_v40, %v6809_v25  ;;  %v6818_v5 = vrot.slane %v6817_v63, 2  ;;  %v6833_v39 = vmax.f32 %v6831_v8, %v6832_v50  ;;  %v10522_v47 = vpop.permute.xlu0 %2660  ;;  %v14028_v40 = vld [vmem:[#allocation15_spill] sm:$0xff] }
 0x1d5   : > { %14023 = vst [vmem:[#allocation9_spill] sm:$0xff] %v10507_v44  ;;  %v14025_v37 = vmax.f32 %v10124_v13, 0.0  ;;  %v6802_v49 = vrot.slane %v6801_v1, 1  ;;  %v6826_v33 = vmax.f32 %v6824_v56, %v6825_v7  ;;  %v13664_v62 = vmax.f32 %v10501_v17, 0.0  ;;  %14027 = vst [vmem:[#allocation3_spill] sm:$0xff] %v10522_v47  ;;  %4900 = vrot.lane.b32.xlu1 %v14028_v40, %s8425_s23  ;;  %v14029_v50 = vld [vmem:[#allocation75_spill] sm:$0xff]  ;;  %v10538_v40 = vpop.permute.xlu1 %2662 }
 0x1d6   : > { %v13665_v19 = vmax.f32 %v10507_v44, 0.0  ;;  %v14026_v53 = vmax.f32 %v10127_v0, 0.0  ;;  %v6811_v8 = vrot.slane %v6810_v29, 1  ;;  %v6819_v25 = vmax.f32 %v6817_v63, %v6818_v5  ;;  %v14030_v47 = vld [vmem:[#allocation8_spill] sm:$0xff]  ;;  %14031 = vst [vmem:[#allocation15_spill] sm:$0xff] %v10538_v40 }
 0x1d7   : > { %8130 = vmatmul.mubr.msk.f32.gmra.mrb[102].mxu1 %vm1534_vm4, %v14025_v37  ;;  %v6834_v13 = vrot.slane %v6833_v39, 4  ;;  %v10527_v37 = vadd.f32 %v14029_v50, %v954_v35  ;;  %v6827_v7 = vrot.slane %v6826_v33, 2  ;;  %v6840_v0 = vsel %vm1534_vm4, %v13664_v62, -inf  ;;  %4894 = vrot.lane.b32.xlu0 %v14030_v47, %s8425_s23  ;;  %v14037_v44 = vld [vmem:[#allocation12_spill] sm:$0xff] }
 0x1d8   : > { %8132 = vmatprep.mubr.msk.f32.mxu1 %vm1534_vm4, %v14026_v53  ;;  %v6841_v53 = vsel %vm1534_vm4, %v13665_v19, -inf  ;;  %v10541_v63 = vmax.f32 %v10312_v9, %v6771_v28  ;;  %v6820_v35 = vrot.slane %v6819_v25, 1  ;;  %v10550_v62 = vmax.f32 %v6792_v20, %v6793_v26 }
 0x1d9   : > { %v10543_v5 = vmax.f32 %v6833_v39, %v6834_v13  ;;  %v10545_v56 = vmax.f32 %v6840_v0, %v6841_v53  ;;  %v10552_v19 = vmax.f32 %v6801_v1, %v6802_v49  ;;  %v13668_v47 = vmax.f32 %v10527_v37, 0.0  ;;  %v10561_v39 = vpop.permute.xlu0 %2704  ;;  %4908 = vrot.lane.b32.xlu1 %v9362_v36, %s8425_s23  ;;  %v14047_v53 = vld [vmem:[#allocation13_spill] sm:$0xff] }
 0x1da   : > { %14032 = vst [vmem:[#allocation75_spill] sm:$0xff] %v10541_v63  ;;  %14035 = vst [vmem:[#allocation117_spill] sm:$0xff] %v10550_v62  ;;  %v14038_v40 = vrot.slane %v14037_v44, 2  ;;  %v14039_v28 = vmax.f32 %v10149_v48, 0.0  ;;  %v10566_v31 = vmax.f32 %v6810_v29, %v6811_v8  ;;  %v14043_v1 = vrot.slane %v13936_v30, 2  ;;  %v14045_v48 = vld [vmem:[#allocation11_spill] sm:$0xff] }
 0x1db   : > { %14033 = vst [vmem:[#allocation8_spill] sm:$0xff] %v10543_v5  ;;  %8133 = vmatmul.mubr.msk.f32.gmra.mrb[104].mxu1 %vm1534_vm4, %v14034_v15  ;;  %14036 = vst [vmem:[#allocation118_spill] sm:$0xff] %v10552_v19  ;;  %v10568_v15 = vmax.f32 %v6826_v33, %v6827_v7  ;;  %v14046_v49 = vrot.slane %v14045_v48, 1  ;;  %v14049_v29 = vld [vmem:[#allocation14_spill] sm:$0xff]  ;;  %v10583_v33 = vpop.permute.xlu1 %2706  ;;  %v10585_v8 = vpop.f32.mrb[4].mxu1  ;;  %v14112_v5 = vld [vmem:[#allocation43_spill] sm:$0xff] }
 0x1dc   : > { %v6333_v9 = vmax.f32 %v14037_v44, %v14038_v40  ;;  %8135 = vmatprep.mubr.msk.f32.mxu1 %vm1534_vm4, %v14039_v28  ;;  %14040 = vst [vmem:[#allocation12_spill] sm:$0xff] %v10561_v39  ;;  %14041 = vst [vmem:[#allocation119_spill] sm:$0xff] %v10566_v31  ;;  %v6342_v26 = vmax.f32 %v13936_v30, %v14043_v1  ;;  %v10573_v44 = vmax.f32 %v6819_v25, %v6820_v35  ;;  %v14052_v28 = vld [vmem:[#allocation64_spill] sm:$0xff]  ;;  %v14110_v19 = vld [vmem:[#allocation114_spill] sm:$0xff] }
 0x1dd   : > { %14042 = vst [vmem:[#allocation120_spill] sm:$0xff] %v10568_v15  ;;  %v6326_v13 = vmax.f32 %v14045_v48, %v14046_v49  ;;  %v14048_v40 = vrot.slane %v14047_v53, 4  ;;  %4898 = vrot.lane.b32.xlu0 %v14049_v29, %s8425_s23  ;;  %14050 = vst [vmem:[#allocation11_spill] sm:$0xff] %v10583_v33  ;;  %v10591_v25 = vsel %vm1534_vm4, %v13668_v47, -inf  ;;  %v14051_v35 = vmax.f32 %v10165_v21, 0.0  ;;  %v10598_v48 = vpop.f32.mrb[5].mxu1  ;;  %v10605_v20 = vpop.permute.xlu0 %2724  ;;  %4924 = vrot.lane.b32.xlu1 %v13985_v27, %s8425_s23 }
 0x1de   : > { %14044 = vst [vmem:[#allocation121_spill] sm:$0xff] %v10573_v44  ;;  %v6334_v0 = vrot.slane %v6333_v9, 1  ;;  %v6343_v7 = vrot.slane %v6342_v26, 1  ;;  %v2821_v1 = vadd.f32 %v10585_v8, %v14052_v28  ;;  %v2820_v29 = vadd.f32 %v14052_v28, %v10598_v48  ;;  %14054 = vst [vmem:[#allocation13_spill] sm:$0xff] %v10605_v20  ;;  %v955_v33 = vld [vmem:[%s8571_s20 + $0x3f8] sm:$0xff] }
 0x1df   : > { %v6349_v36 = vmax.f32 %v14047_v53, %v14048_v40  ;;  %8136 = vmatmul.mubr.msk.f32.gmra.mrb[106].mxu1 %vm1534_vm4, %v14051_v35  ;;  %v14053_v40 = vmax.f32 %v10185_v24, 0.0  ;;  %v10614_v28 = vpop.permute.xlu1 %2726  ;;  %v14111_v62 = vmax.f32 %v14110_v19, 0.0 }
 0x1e0   : > { %v6335_v49 = vmax.f32 %v6333_v9, %v6334_v0  ;;  %v6344_v21 = vmax.f32 %v6342_v26, %v6343_v7  ;;  %v2949_v35 = vmax.f32 %v2821_v1, 0.0  ;;  %v14055_v9 = vld [vmem:[#allocation6_spill] sm:$0xff]  ;;  %v14056_v0 = vld [vmem:[#allocation7_spill] sm:$0xff]  ;;  %v2948_v47 = vmax.f32 %v2820_v29, 0.0  ;;  %14057 = vst [vmem:[#allocation14_spill] sm:$0xff] %v10614_v28  ;;  %v10625_v29 = vpop.f32.mrb[6].mxu1 }
 0x1e1   : > { %v6350_v53 = vrot.slane %v6349_v36, 2  ;;  %8138 = vmatprep.mubr.msk.f32.mxu1 %vm1534_vm4, %v14053_v40  ;;  %v7201_v24 = vsel %vm6922_vm5, %v14056_v0, %v14055_v9  ;;  %4906 = vrot.lane.b32.xlu0 %v9329_v59, %s8425_s23  ;;  %v14058_v40 = vld [vmem:[#allocation10_spill] sm:$0xff]  ;;  %v14059_v26 = vld [vmem:[#allocation23_spill] sm:$0xff]  ;;  %v14062_v59 = vld [vmem:[#allocation16_spill] sm:$0xff] }
 0x1e2   : > { %v7202_v27 = vsel %vm6924_vm6, %v14058_v40, %v7201_v24  ;;  %v14060_v7 = vrot.slane %v14059_v26, 2  ;;  %v14063_v28 = vld [vmem:[#allocation30_spill] sm:$0xff]  ;;  %v14064_v24 = vmax.f32 %v10214_v45, 0.0  ;;  %v5706_v40 = vsel %vm1534_vm4, %v2948_v47, -inf  ;;  %4926 = vrot.lane.b32.xlu1 %v13990_v10, %s8425_s23  ;;  %8178 = vmatprep.mubr.msk.f32.mxu0 %vm1534_vm4, %v2948_v47 }
 0x1e3   : > { %v6351_v30 = vmax.f32 %v6349_v36, %v6350_v53  ;;  %v14061_v36 = vmax.f32 %v10194_v3, 0.0  ;;  %v5707_v53 = vsel %vm1534_vm4, %v2949_v35, -inf  ;;  %v7203_v0 = vsel %vm6926_vm7, %v14062_v59, %v7202_v27  ;;  %v14065_v3 = vld [vmem:[#allocation91_spill] sm:$0xff]  ;;  %8179 = vmatmul.mubr.msk.f32.vlgmr.msra.gmra.mrb[4].mxu0 %vm1534_vm4, %v2949_v35  ;;  %v10651_v10 = vpop.permute.xlu1 %4824 }
 0x1e4   : > { %v6405_v1 = vmax.f32 %v14059_v26, %v14060_v7  ;;  %v6413_v20 = vrot.slane %v14063_v28, 2  ;;  %v2823_v26 = vadd.f32 %v10625_v29, %v14065_v3  ;;  %v10636_v7 = vpop.f32.mrb[7].mxu1  ;;  %v7204_v27 = vsel %vm6928_vm8, %v6326_v13, %v7203_v0  ;;  %14067 = vst [vmem:[#allocation6_spill] sm:$0xff] %v10651_v10 }
 0x1e5   : > { %8139 = vmatmul.mubr.msk.f32.gmra.mrb[108].mxu1 %vm1534_vm4, %v14061_v36  ;;  %v6352_v9 = vrot.slane %v6351_v30, 1  ;;  %v10638_v36 = vpop.permute.xlu0 %4822  ;;  %v5708_v63 = vmax.f32 %v5706_v40, %v5707_v53  ;;  %v2822_v45 = vadd.f32 %v14065_v3, %v10636_v7  ;;  %v7205_v52 = vsel %vm6930_vm9, %v6335_v49, %v7204_v27  ;;  %4922 = vrot.lane.b32.xlu0 %v13975_v61, %s8425_s23  ;;  %v14068_v53 = vld [vmem:[#allocation28_spill] sm:$0xff]  ;;  %v14071_v61 = vld [vmem:[#allocation27_spill] sm:$0xff]  ;;  %v14074_v27 = vld [vmem:[#allocation21_spill] sm:$0xff] }
 0x1e6   : > { %8141 = vmatprep.mubr.msk.f32.mxu1 %vm1534_vm4, %v14064_v24  ;;  %14066 = vst [vmem:[#allocation64_spill] sm:$0xff] %v10638_v36  ;;  %v6406_v59 = vrot.slane %v6405_v1, 1  ;;  %v2951_v39 = vmax.f32 %v2823_v26, 0.0  ;;  %v7206_v13 = vsel %vm6932_vm10, %v6344_v21, %v7205_v52  ;;  %v14069_v0 = vrot.slane %v14068_v53, 1  ;;  %4928 = vrot.lane.b32.xlu1 %v9512_v32, %s8425_s23 }
 0x1e7   : > { %v6353_v24 = vmax.f32 %v6351_v30, %v6352_v9  ;;  %v6414_v47 = vmax.f32 %v14063_v28, %v6413_v20  ;;  %v5709_v30 = vrot.slane %v5708_v63, 4  ;;  %v14070_v49 = vmax.f32 %v10245_v6, 0.0  ;;  %v10671_v20 = vpop.f32.mrb[8].mxu1 }
 0x1e8   : > { %v6398_v40 = vmax.f32 %v14068_v53, %v14069_v0  ;;  %v2950_v9 = vmax.f32 %v2822_v45, 0.0  ;;  %v14072_v3 = vrot.slane %v14071_v61, 4  ;;  %v14073_v52 = vmax.f32 %v10253_v42, 0.0  ;;  %v14075_v45 = vld [vmem:[#allocation24_spill] sm:$0xff]  ;;  %v14076_v0 = vld [vmem:[#allocation65_spill] sm:$0xff] }
 0x1e9   : > { %8142 = vmatmul.mubr.msk.f32.gmra.mrb[110].mxu1 %vm1534_vm4, %v14070_v49  ;;  %v10662_v35 = vsel %vm6934_vm11, %v6353_v24, %v7206_v13  ;;  %v5716_v21 = vsel %vm1534_vm4, %v2951_v39, -inf  ;;  %v10673_v28 = vpop.permute.xlu0 %2680  ;;  %v6407_v6 = vmax.f32 %v6405_v1, %v6406_v59  ;;  %v7208_v24 = vsel %vm6922_vm5, %v14075_v45, %v14074_v27  ;;  %4910 = vrot.lane.b32.xlu0 %v9651_v34, %s8425_s23  ;;  %v14079_v27 = vld [vmem:[#allocation29_spill] sm:$0xff] }
 0x1ea   : > { %v6421_v26 = vmax.f32 %v14071_v61, %v14072_v3  ;;  %8144 = vmatprep.mubr.msk.f32.mxu1 %vm1534_vm4, %v14073_v52  ;;  %v10681_v13 = vadd.f32 %v14029_v50, %v955_v33  ;;  %v5710_v42 = vmax.f32 %v5708_v63, %v5709_v30  ;;  %v5715_v53 = vsel %vm1534_vm4, %v2950_v9, -inf  ;;  %v10686_v61 = vpop.f32.mrb[9].mxu1  ;;  %8181 = vmatprep.mubr.msk.f32.mxu0 %vm1534_vm4, %v2950_v9  ;;  %v10694_v63 = vpop.permute.xlu1 %2682 }
 0x1eb   : > { %v2825_v49 = vadd.f32 %v10671_v20, %v14076_v0  ;;  %v5717_v32 = vmax.f32 %v5715_v53, %v5716_v21  ;;  %v2824_v1 = vadd.f32 %v14076_v0, %v10686_v61  ;;  %8182 = vmatmul.mubr.msk.f32.gmra.mrb[6].mxu0 %vm1534_vm4, %v2951_v39  ;;  %14077 = vst [vmem:[#allocation7_spill] sm:$0xff] %v10694_v63  ;;  %v6415_v33 = vrot.slane %v6414_v47, 1  ;;  %v10705_v0 = vpop.f32.mrb[10].mxu1 }
 0x1ec   : > { %v6422_v3 = vrot.slane %v6421_v26, 2  ;;  %v13678_v59 = vmax.f32 %v10681_v13, 0.0  ;;  %v5711_v30 = vrot.slane %v5710_v42, 2  ;;  %v14078_v52 = vmax.f32 %v10263_v41, 0.0  ;;  %4930 = vrot.lane.b32.xlu1 %v14003_v14, %s8425_s23  ;;  %v14082_v41 = vld [vmem:[#allocation31_spill] sm:$0xff] }
 0x1ed   : > { %v2953_v9 = vmax.f32 %v2825_v49, 0.0  ;;  %v7209_v45 = vsel %vm6924_vm6, %v14079_v27, %v7208_v24  ;;  %v5718_v53 = vrot.slane %v5717_v32, 4  ;;  %v14080_v39 = vmax.f32 %v10303_v38, 0.0  ;;  %v10707_v10 = vpop.permute.xlu0 %2684  ;;  %4912 = vrot.lane.b32.xlu0 %v9743_v18, %s8425_s23 }
 0x1ee   : > { %8145 = vmatmul.mubr.msk.f32.gmra.mrb[112].mxu1 %vm1534_vm4, %v14078_v52  ;;  %v6423_v21 = vmax.f32 %v6421_v26, %v6422_v3  ;;  %v2952_v34 = vmax.f32 %v2824_v1, 0.0  ;;  %14081 = vst [vmem:[#allocation10_spill] sm:$0xff] %v10707_v10  ;;  %v7210_v49 = vsel %vm6926_vm7, %v14082_v41, %v7209_v45  ;;  %v6850_v26 = vsel %vm1534_vm4, %v13678_v59, -inf  ;;  %v14083_v3 = vld [vmem:[#allocation93_spill] sm:$0xff]  ;;  %v10719_v52 = vpop.f32.mrb[11].mxu1 }
 0x1ef   : > { %8147 = vmatprep.mubr.msk.f32.mxu1 %vm1534_vm4, %v14080_v39  ;;  %v5712_v24 = vmax.f32 %v5710_v42, %v5711_v30  ;;  %v5725_v38 = vsel %vm1534_vm4, %v2953_v9, -inf  ;;  %v2827_v1 = vadd.f32 %v10705_v0, %v14083_v3  ;;  %v5719_v39 = vmax.f32 %v5717_v32, %v5718_v53  ;;  %v10727_v42 = vpop.permute.xlu1 %2686  ;;  %v10737_v44 = vpop.f32.mrb[12].mxu1 }
 0x1f0   : > { %v6424_v27 = vrot.slane %v6423_v21, 1  ;;  %v5724_v36 = vsel %vm1534_vm4, %v2952_v34, -inf  ;;  %v2826_v14 = vadd.f32 %v14083_v3, %v10719_v52  ;;  %8184 = vmatprep.mubr.msk.f32.mxu0 %vm1534_vm4, %v2952_v34  ;;  %14084 = vst [vmem:[#allocation23_spill] sm:$0xff] %v10727_v42  ;;  %v7211_v30 = vsel %vm6928_vm8, %v6398_v40, %v7210_v49  ;;  %4932 = vrot.lane.b32.xlu1 %v14010_v43, %s8425_s23 }
 0x1f1   : > { %v5713_v45 = vrot.slane %v5712_v24, 1  ;;  %v5726_v41 = vmax.f32 %v5724_v36, %v5725_v38  ;;  %v14085_v59 = vmax.f32 %v10324_v57, 0.0  ;;  %v2955_v32 = vmax.f32 %v2827_v1, 0.0  ;;  %8185 = vmatmul.mubr.msk.f32.gmra.mrb[8].mxu0 %vm1534_vm4, %v2953_v9  ;;  %v10739_v31 = vpop.permute.xlu0 %2744  ;;  %4914 = vrot.lane.b32.xlu0 %v9731_v16, %s8425_s23 }
 0x1f2   : > { %v6416_v53 = vmax.f32 %v6414_v47, %v6415_v33  ;;  %v5720_v3 = vrot.slane %v5719_v39, 2  ;;  %v14086_v34 = vmax.f32 %v10327_v22, 0.0  ;;  %v2954_v18 = vmax.f32 %v2826_v14, 0.0  ;;  %14087 = vst [vmem:[#allocation16_spill] sm:$0xff] %v10739_v31  ;;  %v10750_v33 = vpop.f32.mrb[13].mxu1 }
 0x1f3   : > { %8148 = vmatmul.mubr.msk.f32.gmra.mrb[114].mxu1 %vm1534_vm4, %v14085_v59  ;;  %v7212_v57 = vsel %vm6930_vm9, %v6407_v6, %v7211_v30  ;;  %v10745_v36 = vmax.f32 %v10591_v25, %v6850_v26  ;;  %v5727_v40 = vrot.slane %v5726_v41, 4  ;;  %v5734_v47 = vsel %vm1534_vm4, %v2955_v32, -inf  ;;  %v10758_v25 = vpop.permute.xlu1 %2746  ;;  %v10771_v30 = vpop.f32.mrb[14].mxu1 }
 0x1f4   : > { %8150 = vmatprep.mubr.msk.f32.mxu1 %vm1534_vm4, %v14086_v34  ;;  %v2829_v22 = vadd.f32 %v10737_v44, %v10059_v54  ;;  %v6425_v59 = vmax.f32 %v6423_v21, %v6424_v27  ;;  %v5721_v9 = vmax.f32 %v5719_v39, %v5720_v3  ;;  %v5733_v49 = vsel %vm1534_vm4, %v2954_v18, -inf  ;;  %8187 = vmatprep.mubr.msk.f32.mxu0 %vm1534_vm4, %v2954_v18 }
 0x1f5   : > { %14088 = vst [vmem:[#allocation30_spill] sm:$0xff] %v10745_v36  ;;  %v2828_v43 = vadd.f32 %v10059_v54, %v10750_v33  ;;  %14089 = vst [vmem:[#allocation91_spill] sm:$0xff] %v10758_v25  ;;  %v7213_v6 = vsel %vm6932_vm10, %v6416_v53, %v7212_v57  ;;  %v5728_v26 = vmax.f32 %v5726_v41, %v5727_v40  ;;  %v14090_v1 = vmax.f32 %v10338_v58, 0.0  ;;  %v10773_v41 = vpop.permute.xlu0 %2748  ;;  %v14120_v36 = vld [vmem:[#allocation60_spill] sm:$0xff] }
 0x1f6   : > { %v5735_v38 = vmax.f32 %v5733_v49, %v5734_v47  ;;  %v2957_v21 = vmax.f32 %v2829_v22, 0.0  ;;  %8188 = vmatmul.mubr.msk.f32.gmra.mrb[10].mxu0 %vm1534_vm4, %v2955_v32  ;;  %v10766_v54 = vsel %vm6934_vm11, %v6425_v59, %v7213_v6  ;;  %v5714_v27 = vmax.f32 %v5712_v24, %v5713_v45  ;;  %14092 = vst [vmem:[#allocation28_spill] sm:$0xff] %v10773_v41  ;;  %v14093_v24 = vld [vmem:[#allocation96_spill] sm:$0xff] }
 0x1f7   : > { %8151 = vmatmul.mubr.msk.f32.gmra.mrb[116].mxu1 %vm1534_vm4, %v14090_v1  ;;  %v5722_v39 = vrot.slane %v5721_v9, 1  ;;  %v14091_v16 = vmax.f32 %v10362_v23, 0.0  ;;  %v2956_v14 = vmax.f32 %v2828_v43, 0.0  ;;  %2738 = vrot.lane.b32.xlu1 %v13970_v46, %s8424_s22  ;;  %v5729_v32 = vrot.slane %v5728_v26, 2  ;;  %v10781_v23 = vpop.f32.mrb[15].mxu1  ;;  %v10789_v40 = vpop.permute.xlu1 %2750  ;;  %v14095_v47 = vld [vmem:[#allocation36_spill] sm:$0xff] }
 0x1f8   : > { %v5736_v53 = vrot.slane %v5735_v38, 4  ;;  %v5743_v3 = vsel %vm1534_vm4, %v2957_v21, -inf  ;;  %v2831_v45 = vadd.f32 %v10771_v30, %v14093_v24  ;;  %v2830_v57 = vadd.f32 %v14093_v24, %v10781_v23  ;;  %4916 = vrot.lane.b32.xlu0 %v9802_v4, %s8425_s23  ;;  %14094 = vst [vmem:[#allocation27_spill] sm:$0xff] %v10789_v40 }
 0x1f9   : > { %8153 = vmatprep.mubr.msk.f32.mxu1 %vm1534_vm4, %v14091_v16  ;;  %v5723_v34 = vmax.f32 %v5721_v9, %v5722_v39  ;;  %v5742_v18 = vsel %vm1534_vm4, %v2956_v14, -inf  ;;  %8190 = vmatprep.mubr.msk.f32.mxu0 %vm1534_vm4, %v2956_v14  ;;  %v14096_v22 = vrot.slane %v14095_v47, 2  ;;  %v5730_v49 = vmax.f32 %v5728_v26, %v5729_v32  ;;  %v10804_v14 = vpop.f32.mrb[16].mxu1  ;;  %v10806_v26 = vpop.permute.xlu0 %2664  ;;  %v14100_v32 = vld [vmem:[#allocation41_spill] sm:$0xff] }
 0x1fa   : > { %v5737_v43 = vmax.f32 %v5735_v38, %v5736_v53  ;;  %v5744_v6 = vmax.f32 %v5742_v18, %v5743_v3  ;;  %v14097_v9 = vmax.f32 %v10379_v55, 0.0  ;;  %v2959_v1 = vmax.f32 %v2831_v45, 0.0  ;;  %8191 = vmatmul.mubr.msk.f32.gmra.mrb[12].mxu0 %vm1534_vm4, %v2957_v21  ;;  %v14099_v38 = vld [vmem:[#allocation26_spill] sm:$0xff]  ;;  %v10813_v24 = vpop.f32.mrb[17].mxu1 }
 0x1fb   : > { %v6477_v59 = vmax.f32 %v14095_v47, %v14096_v22  ;;  %v10799_v39 = vsel %vm6922_vm5, %v5723_v34, %v5714_v27  ;;  %v14098_v4 = vmax.f32 %v10382_v51, 0.0  ;;  %v2958_v16 = vmax.f32 %v2830_v57, 0.0  ;;  %4856 = vrot.lane.b32.xlu1 %v14099_v38, %s8425_s23  ;;  %v14101_v51 = vld [vmem:[#allocation37_spill] sm:$0xff]  ;;  %v14103_v22 = vld [vmem:[#allocation32_spill] sm:$0xff] }
 0x1fc   : > { %8154 = vmatmul.mubr.msk.f32.gmra.mrb[118].mxu1 %vm1534_vm4, %v14097_v9  ;;  %v6485_v53 = vrot.slane %v14100_v32, 2  ;;  %v5738_v21 = vrot.slane %v5737_v43, 2  ;;  %v5745_v3 = vrot.slane %v5744_v6, 4  ;;  %v5752_v27 = vsel %vm1534_vm4, %v2959_v1, -inf  ;;  %4902 = vrot.lane.b32.xlu0 %v14103_v22, %s8425_s23  ;;  %v10828_v9 = vpop.permute.xlu1 %2666  ;;  %v10837_v22 = vpop.f32.mrb[18].mxu1 }
 0x1fd   : > { %8156 = vmatprep.mubr.msk.f32.mxu1 %vm1534_vm4, %v14098_v4  ;;  %v14102_v45 = vrot.slane %v14101_v51, 1  ;;  %v5751_v18 = vsel %vm1534_vm4, %v2958_v16, -inf  ;;  %v2833_v57 = vadd.f32 %v10804_v14, %v10464_v2  ;;  %v2832_v47 = vadd.f32 %v10464_v2, %v10813_v24  ;;  %8193 = vmatprep.mubr.msk.f32.mxu0 %vm1534_vm4, %v2958_v16  ;;  %v10839_v41 = vpop.permute.xlu0 %2668 }
 0x1fe   : > { %v6478_v4 = vrot.slane %v6477_v59, 1  ;;  %v5731_v38 = vrot.slane %v5730_v49, 1  ;;  %v5739_v55 = vmax.f32 %v5737_v43, %v5738_v21  ;;  %v14104_v58 = vmax.f32 %v10392_v11, 0.0  ;;  %8194 = vmatmul.mubr.msk.f32.gmra.mrb[14].mxu0 %vm1534_vm4, %v2959_v1  ;;  %v10851_v1 = vpop.f32.mrb[19].mxu1 }
 0x1ff   : > { %v10818_v34 = vmax.f32 %v14101_v51, %v14102_v45  ;;  %v5746_v51 = vmax.f32 %v5744_v6, %v5745_v3  ;;  %v5753_v45 = vmax.f32 %v5751_v18, %v5752_v27  ;;  %v14105_v40 = vmax.f32 %v10401_v12, 0.0  ;;  %v14106_v6 = vld [vmem:[#allocation44_spill] sm:$0xff] }
 0x200   : > { %8157 = vmatmul.mubr.msk.f32.gmra.mrb[120].mxu1 %vm1534_vm4, %v14104_v58  ;;  %v2961_v2 = vmax.f32 %v2833_v57, 0.0  ;;  %v2960_v16 = vmax.f32 %v2832_v47, 0.0  ;;  %v10842_v43 = vmax.f32 %v14100_v32, %v6485_v53  ;;  %v14107_v21 = vrot.slane %v14106_v6, 4  ;;  %v14108_v27 = vld [vmem:[#allocation92_spill] sm:$0xff]  ;;  %v14109_v57 = vld [vmem:[#allocation74_spill] sm:$0xff]  ;;  %v10860_v47 = vpop.permute.xlu1 %2670 }
 0x201   : > { %8159 = vmatprep.mubr.msk.f32.mxu1 %vm1534_vm4, %v14105_v40  ;;  %v5740_v58 = vrot.slane %v5739_v55, 1  ;;  %v5747_v3 = vrot.slane %v5746_v51, 2  ;;  %v5754_v12 = vrot.slane %v5753_v45, 4  ;;  %v2835_v40 = vadd.f32 %v10837_v22, %v10512_v60  ;;  %4918 = vrot.lane.b32.xlu1 %v14108_v27, %s8425_s23 }
 0x202   : > { %v6493_v11 = vmax.f32 %v14106_v6, %v14107_v21  ;;  %v5761_v18 = vsel %vm1534_vm4, %v2961_v2, -inf  ;;  %v5760_v32 = vsel %vm1534_vm4, %v2960_v16, -inf  ;;  %v2834_v53 = vadd.f32 %v10512_v60, %v10851_v1  ;;  %8196 = vmatprep.mubr.msk.f32.mxu0 %vm1534_vm4, %v2960_v16  ;;  %4934 = vrot.lane.b32.xlu0 %v14109_v57, %s8425_s23  ;;  %v10873_v57 = vpop.f32.mrb[20].mxu1 }
 0x203   : > { %v10862_v6 = vmax.f32 %v6477_v59, %v6478_v4  ;;  %v10864_v21 = vmax.f32 %v5730_v49, %v5731_v38  ;;  %v5748_v27 = vmax.f32 %v5746_v51, %v5747_v3  ;;  %v5755_v25 = vmax.f32 %v5753_v45, %v5754_v12  ;;  %8197 = vmatmul.mubr.msk.f32.gmra.mrb[16].mxu0 %vm1534_vm4, %v2961_v2  ;;  %v10875_v59 = vpop.permute.xlu0 %2728  ;;  %v14116_v45 = vld [vmem:[#allocation34_spill] sm:$0xff]  ;;  %v10884_v3 = vpop.f32.mrb[21].mxu1 }
 0x204   : > { %v5762_v31 = vmax.f32 %v5760_v32, %v5761_v18  ;;  %8160 = vmatmul.mubr.msk.f32.gmra.mrb[122].mxu1 %vm1534_vm4, %v14111_v62  ;;  %v14113_v60 = vmax.f32 %v14112_v5, 0.0  ;;  %v2963_v16 = vmax.f32 %v2835_v40, 0.0  ;;  %v2962_v15 = vmax.f32 %v2834_v53, 0.0  ;;  %14114 = vst [vmem:[#allocation21_spill] sm:$0xff] %v10875_v59  ;;  %v14115_v62 = vld [vmem:[#allocation48_spill] sm:$0xff] }
 0x205   : > { %v6487_v49 = vrot.slane %v10842_v43, 1  ;;  %v6494_v4 = vrot.slane %v6493_v11, 2  ;;  %v10878_v38 = vmax.f32 %v5739_v55, %v5740_v58  ;;  %v5756_v19 = vrot.slane %v5755_v25, 2  ;;  %4904 = vrot.lane.b32.xlu1 %v14116_v45, %s8425_s23  ;;  %v10893_v55 = vpop.permute.xlu1 %4844  ;;  %v14118_v45 = vld [vmem:[#allocation22_spill] sm:$0xff] }
 0x206   : > { %8162 = vmatprep.mubr.msk.f32.mxu1 %vm1534_vm4, %v14113_v60  ;;  %v5763_v51 = vrot.slane %v5762_v31, 4  ;;  %v2837_v5 = vadd.f32 %v10873_v57, %v14115_v62  ;;  %v5770_v2 = vsel %vm1534_vm4, %v2963_v16, -inf  ;;  %v5769_v12 = vsel %vm1534_vm4, %v2962_v15, -inf  ;;  %8199 = vmatprep.mubr.msk.f32.mxu0 %vm1534_vm4, %v2962_v15  ;;  %14117 = vst [vmem:[#allocation24_spill] sm:$0xff] %v10893_v55 }
 0x207   : > { %v2836_v40 = vadd.f32 %v14115_v62, %v10884_v3  ;;  %4920 = vrot.lane.b32.xlu0 %v13970_v46, %s8425_s23  ;;  %v6495_v58 = vmax.f32 %v6493_v11, %v6494_v4  ;;  %v5749_v18 = vrot.slane %v5748_v27, 1  ;;  %v5757_v32 = vmax.f32 %v5755_v25, %v5756_v19  ;;  %8200 = vmatmul.mubr.msk.f32.gmra.mrb[18].mxu0 %vm1534_vm4, %v2963_v16  ;;  %v10902_v46 = vpop.f32.mrb[22].mxu1  ;;  %v10904_v55 = vpop.permute.xlu0 %2732  ;;  %v14123_v25 = vld [vmem:[#allocation38_spill] sm:$0xff] }
 0x208   : > { %v5764_v53 = vmax.f32 %v5762_v31, %v5763_v51  ;;  %v5771_v60 = vmax.f32 %v5769_v12, %v5770_v2  ;;  %v14119_v59 = vmax.f32 %v14118_v45, 0.0  ;;  %v14121_v42 = vmax.f32 %v14120_v36, 0.0  ;;  %14122 = vst [vmem:[#allocation65_spill] sm:$0xff] %v10904_v55  ;;  %v14124_v31 = vld [vmem:[#allocation39_spill] sm:$0xff]  ;;  %v14125_v2 = vld [vmem:[#allocation50_spill] sm:$0xff]  ;;  %v14127_v55 = vld [vmem:[#allocation4_spill] sm:$0xff] }
 0x209   : > { %v2965_v62 = vmax.f32 %v2837_v5, 0.0  ;;  %v2964_v15 = vmax.f32 %v2836_v40, 0.0  ;;  %v6496_v11 = vrot.slane %v6495_v58, 1  ;;  %v7215_v4 = vsel %vm6922_vm5, %v14124_v31, %v14123_v25  ;;  %4936 = vrot.lane.b32.xlu1 %v14029_v50, %s8425_s23  ;;  %v10920_v40 = vpop.permute.xlu1 %2730 }
 0x20a   : > { %8163 = vmatmul.mubr.msk.f32.gmra.mrb[124].mxu1 %vm1534_vm4, %v14119_v59  ;;  %v5758_v19 = vrot.slane %v5757_v32, 1  ;;  %v5765_v51 = vrot.slane %v5764_v53, 2  ;;  %v5772_v59 = vrot.slane %v5771_v60, 4  ;;  %v2839_v36 = vadd.f32 %v10902_v46, %v14125_v2  ;;  %14126 = vst [vmem:[#allocation29_spill] sm:$0xff] %v10920_v40 }
 0x20b   : > { %8165 = vmatprep.mubr.msk.f32.mxu1 %vm1534_vm4, %v14121_v42  ;;  %v10913_v42 = vpop.f32.mrb[23].mxu1  ;;  %v5779_v16 = vsel %vm1534_vm4, %v2965_v62, -inf  ;;  %v5778_v5 = vsel %vm1534_vm4, %v2964_v15, -inf  ;;  %8202 = vmatprep.mubr.msk.f32.mxu0 %vm1534_vm4, %v2964_v15  ;;  %v6488_v45 = vmax.f32 %v10842_v43, %v6487_v49  ;;  %v10925_v50 = vmax.f32 %v5748_v27, %v5749_v18  ;;  %v10938_v43 = vpop.permute.xlu0 %2688  ;;  %v14130_v27 = vld [vmem:[#allocation40_spill] sm:$0xff] }
 0x20c   : > { %v2838_v12 = vadd.f32 %v14125_v2, %v10913_v42  ;;  %7257 = vrot.lane.b32.xlu0 %v10662_v35, %s8426_s8  ;;  %v10927_v25 = vmax.f32 %v5771_v60, %v5772_v59  ;;  %v5780_v31 = vmax.f32 %v5778_v5, %v5779_v16  ;;  %v14128_v10 = vmax.f32 %v14127_v55, 0.0  ;;  %8203 = vmatmul.mubr.msk.f32.gmra.mrb[20].mxu0 %vm1534_vm4, %v2965_v62  ;;  %v14137_v5 = vld [vmem:[#allocation9_spill] sm:$0xff] }
 0x20d   : > { %v6497_v2 = vmax.f32 %v6495_v58, %v6496_v11  ;;  %v10932_v63 = vmax.f32 %v5757_v32, %v5758_v19  ;;  %v14129_v15 = vmax.f32 %v10501_v17, 0.0  ;;  %v2967_v40 = vmax.f32 %v2839_v36, 0.0  ;;  %7259 = vrot.lane.b32.xlu1 %v10766_v54, %s8426_s8  ;;  %v14132_v58 = vld [vmem:[#allocation55_spill] sm:$0xff]  ;;  %v14135_v19 = vld [vmem:[#allocation56_spill] sm:$0xff] }
 0x20e   : > { %8166 = vmatmul.mubr.msk.f32.gmra.mrb[126].mxu1 %vm1534_vm4, %v14128_v10  ;;  %v2966_v35 = vmax.f32 %v2838_v12, 0.0  ;;  %v7216_v49 = vsel %vm6924_vm6, %v14130_v27, %v7215_v4  ;;  %v10942_v18 = vmax.f32 %v5764_v53, %v5765_v51  ;;  %v5781_v55 = vrot.slane %v5780_v31, 4  ;;  %v14131_v10 = vld [vmem:[#allocation46_spill] sm:$0xff]  ;;  %v10954_v4 = vpop.permute.xlu1 %2734 }
 0x20f   : > { %8168 = vmatprep.mubr.msk.f32.mxu1 %vm1534_vm4, %v14129_v15  ;;  %v7217_v17 = vsel %vm6926_vm7, %v14131_v10, %v7216_v49  ;;  %v14133_v32 = vrot.slane %v14132_v58, 1  ;;  %v5788_v62 = vsel %vm1534_vm4, %v2967_v40, -inf  ;;  %14134 = vst [vmem:[#allocation31_spill] sm:$0xff] %v10954_v4  ;;  %v14136_v54 = vrot.slane %v14135_v19, 2  ;;  %v10972_v27 = vpop.permute.xlu0 %2752  ;;  %v14142_v10 = vld [vmem:[#allocation61_spill] sm:$0xff] }
 0x210   : > { %v5787_v11 = vsel %vm1534_vm4, %v2966_v35, -inf  ;;  %8205 = vmatprep.mubr.msk.f32.mxu0 %vm1534_vm4, %v2966_v35  ;;  %v7218_v53 = vsel %vm6928_vm8, %v10818_v34, %v7217_v17  ;;  %v5774_v59 = vrot.slane %v10927_v25, 2  ;;  %v5782_v36 = vmax.f32 %v5780_v31, %v5781_v55  ;;  %14140 = vst [vmem:[#allocation93_spill] sm:$0xff] %v10972_v27  ;;  %v14141_v31 = vld [vmem:[#allocation66_spill] sm:$0xff] }
 0x211   : > { %v6542_v60 = vmax.f32 %v14132_v58, %v14133_v32  ;;  %v6549_v51 = vmax.f32 %v14135_v19, %v14136_v54  ;;  %v5789_v16 = vmax.f32 %v5787_v11, %v5788_v62  ;;  %v14138_v12 = vmax.f32 %v14137_v5, 0.0  ;;  %8206 = vmatmul.mubr.msk.f32.gmra.mrb[22].mxu0 %vm1534_vm4, %v2967_v40  ;;  %v14145_v11 = vld [vmem:[#allocation58_spill] sm:$0xff]  ;;  %v14146_v5 = vld [vmem:[#allocation59_spill] sm:$0xff] }
 0x212   : > { %v7219_v15 = vsel %vm6930_vm9, %v10862_v6, %v7218_v53  ;;  %v14139_v35 = vmax.f32 %v10527_v37, 0.0  ;;  %v6557_v55 = vrot.slane %v14141_v31, 2  ;;  %v14143_v17 = vrot.slane %v14142_v10, 4  ;;  %v14144_v37 = vld [vmem:[#allocation52_spill] sm:$0xff] }
 0x213   : > { %8169 = vmatmul.mubr.msk.f32.gmra.mrb[128].mxu1 %vm1534_vm4, %v14138_v12  ;;  %v7220_v34 = vsel %vm6932_vm10, %v6488_v45, %v7219_v15  ;;  %v6550_v49 = vrot.slane %v6549_v51, 1  ;;  %v5783_v32 = vrot.slane %v5782_v36, 2  ;;  %v5790_v62 = vrot.slane %v5789_v16, 4  ;;  %v10982_v45 = vpop.f32.mrb[24].mxu1  ;;  %v10988_v15 = vpop.permute.xlu1 %2690 }
 0x214   : > { %8171 = vmatprep.mubr.msk.f32.mxu1 %vm1534_vm4, %v14139_v35  ;;  %v6565_v58 = vmax.f32 %v14142_v10, %v14143_v17  ;;  %v7221_v6 = vsel %vm6934_vm11, %v6497_v2, %v7220_v34  ;;  %v7222_v53 = vsel %vm6922_vm5, %v14145_v11, %v14144_v37  ;;  %v6558_v19 = vmax.f32 %v14141_v31, %v6557_v55  ;;  %v14148_v2 = vld [vmem:[#allocation71_spill] sm:$0xff]  ;;  %v10992_v17 = vpop.f32.mrb[25].mxu1 }
 0x215   : > { %7261 = vrot.lane.b32.xlu0 %v7221_v6, %s8426_s8  ;;  %v6551_v40 = vmax.f32 %v6549_v51, %v6550_v49  ;;  %v7223_v12 = vsel %vm6924_vm6, %v14146_v5, %v7222_v53  ;;  %14147 = vst [vmem:[#allocation96_spill] sm:$0xff] %v10988_v15  ;;  %v5784_v35 = vmax.f32 %v5782_v36, %v5783_v32  ;;  %v14149_v37 = vmax.f32 %v10681_v13, 0.0  ;;  %v14150_v51 = vld [vmem:[#allocation63_spill] sm:$0xff] }
 0x216   : > { %v6566_v54 = vrot.slane %v6565_v58, 2  ;;  %v5791_v10 = vmax.f32 %v5789_v16, %v5790_v62  ;;  %v2841_v34 = vadd.f32 %v10982_v45, %v14148_v2  ;;  %v7224_v49 = vsel %vm6926_vm7, %v14150_v51, %v7223_v12  ;;  %v11002_v16 = vpop.permute.xlu0 %2672 }
 0x217   : > { %8172 = vmatmul.mubr.msk.f32.gmra.mrb[130].mxu1 %vm1534_vm4, %v14149_v37  ;;  %v2840_v31 = vadd.f32 %v14148_v2, %v10992_v17  ;;  %v6559_v55 = vrot.slane %v6558_v19, 1  ;;  %v7225_v36 = vsel %vm6928_vm8, %v6542_v60, %v7224_v49  ;;  %v5767_v32 = vrot.slane %v10942_v18, 1  ;;  %v11006_v37 = vpop.f32.mrb[26].mxu1  ;;  %v14152_v49 = vld [vmem:[#allocation72_spill] sm:$0xff] }
 0x218   : > { %v6567_v6 = vmax.f32 %v6565_v58, %v6566_v54  ;;  %v5792_v62 = vrot.slane %v5791_v10, 2  ;;  %v2969_v11 = vmax.f32 %v2841_v34, 0.0  ;;  %v7226_v13 = vsel %vm6930_vm9, %v6551_v40, %v7225_v36  ;;  %v11010_v58 = vpop.permute.xlu1 %2754  ;;  %v11016_v40 = vpop.f32.mrb[27].mxu1 }
 0x219   : > { %v5785_v53 = vrot.slane %v5784_v35, 1  ;;  %v2968_v5 = vmax.f32 %v2840_v31, 0.0  ;;  %v6560_v12 = vmax.f32 %v6558_v19, %v6559_v55  ;;  %4298 = vrot.lane.b32.xlu0 %v10598_v48, %s8424_s22  ;;  %14151 = vst [vmem:[#allocation36_spill] sm:$0xff] %v11010_v58  ;;  %v5775_v60 = vmax.f32 %v10927_v25, %v5774_v59 }
 0x21a   : > { %v6568_v51 = vrot.slane %v6567_v6, 1  ;;  %v5793_v54 = vmax.f32 %v5791_v10, %v5792_v62  ;;  %v5797_v2 = vsel %vm1534_vm4, %v2969_v11, -inf  ;;  %v2843_v34 = vadd.f32 %v11006_v37, %v14152_v49  ;;  %v11023_v55 = vpop.permute.xlu0 %4842 }
 0x21b   : > { %v5796_v31 = vsel %vm1534_vm4, %v2968_v5, -inf  ;;  %v7227_v19 = vsel %vm6932_vm10, %v6560_v12, %v7226_v13  ;;  %v2842_v48 = vadd.f32 %v14152_v49, %v11016_v40  ;;  %8208 = vmatprep.mubr.msk.f32.mxu0 %vm1534_vm4, %v2968_v5  ;;  %14153 = vst [vmem:[#allocation26_spill] sm:$0xff] %v11023_v55  ;;  %v5768_v62 = vmax.f32 %v10942_v18, %v5767_v32  ;;  %v14154_v18 = vld [vmem:[#allocation73_spill] sm:$0xff] }
 0x21c   : > { %v6569_v36 = vmax.f32 %v6567_v6, %v6568_v51  ;;  %v5794_v25 = vrot.slane %v5793_v54, 1  ;;  %v5798_v59 = vmax.f32 %v5796_v31, %v5797_v2  ;;  %v2971_v10 = vmax.f32 %v2843_v34, 0.0  ;;  %8209 = vmatmul.mubr.msk.f32.gmra.mrb[24].mxu0 %vm1534_vm4, %v2969_v11  ;;  %v11028_v51 = vpop.f32.mrb[28].mxu1  ;;  %v11032_v13 = vpop.permute.xlu1 %2674 }
 0x21d   : > { %v5786_v58 = vmax.f32 %v5784_v35, %v5785_v53  ;;  %v2970_v6 = vmax.f32 %v2842_v48, 0.0  ;;  %4302 = vrot.lane.b32.xlu0 %v10636_v7, %s8424_s22  ;;  %v7058_v5 = vsel %vm6924_vm6, %v10864_v21, %v10799_v39  ;;  %v2845_v35 = vadd.f32 %v11028_v51, %v14154_v18  ;;  %v11041_v32 = vpop.f32.mrb[29].mxu1 }
 0x21e   : > { %v7228_v27 = vsel %vm6934_vm11, %v6569_v36, %v7227_v19  ;;  %v5795_v12 = vmax.f32 %v5793_v54, %v5794_v25  ;;  %v5799_v2 = vrot.slane %v5798_v59, 4  ;;  %v5806_v11 = vsel %vm1534_vm4, %v2971_v10, -inf  ;;  %v11047_v49 = vpop.permute.xlu0 %4846  ;;  %v11055_v19 = vpop.f32.mrb[30].mxu1 }
 0x21f   : > { %7263 = vrot.lane.b32.xlu1 %v7228_v27, %s8426_s8  ;;  %v5805_v53 = vsel %vm1534_vm4, %v2970_v6, -inf  ;;  %v2844_v7 = vadd.f32 %v14154_v18, %v11041_v32  ;;  %8211 = vmatprep.mubr.msk.f32.mxu0 %vm1534_vm4, %v2970_v6  ;;  %14155 = vst [vmem:[#allocation41_spill] sm:$0xff] %v11047_v49  ;;  %v5776_v39 = vrot.slane %v5775_v60, 1  ;;  %v7059_v21 = vsel %vm6926_vm7, %v10878_v38, %v7058_v5  ;;  %v14157_v38 = vld [vmem:[#allocation100_spill] sm:$0xff] }
 0x220   : > { %v11052_v27 = vsel %vm6922_vm5, %v5795_v12, %v5786_v58  ;;  %v5800_v54 = vmax.f32 %v5798_v59, %v5799_v2  ;;  %v5807_v34 = vmax.f32 %v5805_v53, %v5806_v11  ;;  %v2973_v31 = vmax.f32 %v2845_v35, 0.0  ;;  %8212 = vmatmul.mubr.msk.f32.gmra.mrb[26].mxu0 %vm1534_vm4, %v2971_v10  ;;  %v11059_v48 = vpop.permute.xlu1 %4848  ;;  %v14159_v59 = vld [vmem:[#allocation99_spill] sm:$0xff] }
 0x221   : > { %v2972_v36 = vmax.f32 %v2844_v7, 0.0  ;;  %4306 = vrot.lane.b32.xlu0 %v10686_v61, %s8424_s22  ;;  %14156 = vst [vmem:[#allocation37_spill] sm:$0xff] %v11059_v48  ;;  %v7060_v25 = vsel %vm6928_vm8, %v10925_v50, %v7059_v21  ;;  %v14158_v6 = vrot.slane %v14157_v38, 1  ;;  %v14160_v5 = vrot.slane %v14159_v59, 2  ;;  %v14161_v61 = vld [vmem:[#allocation78_spill] sm:$0xff]  ;;  %v11076_v50 = vpop.f32.mrb[31].mxu1 }
 0x222   : > { %v5801_v12 = vrot.slane %v5800_v54, 2  ;;  %v5808_v2 = vrot.slane %v5807_v34, 4  ;;  %v5815_v11 = vsel %vm1534_vm4, %v2973_v31, -inf  ;;  %v2847_v18 = vadd.f32 %v11055_v19, %v14161_v61  ;;  %v11082_v7 = vpop.permute.xlu0 %2736  ;;  %v11087_v49 = vpop.f32.mrb[32].mxu1 }
 0x223   : > { %v11066_v58 = vmax.f32 %v14157_v38, %v14158_v6  ;;  %v6693_v10 = vmax.f32 %v14159_v59, %v14160_v5  ;;  %4300 = vrot.lane.b32.xlu1 %v10585_v8, %s8424_s22  ;;  %v5814_v35 = vsel %vm1534_vm4, %v2972_v36, -inf  ;;  %v2846_v53 = vadd.f32 %v14161_v61, %v11076_v50  ;;  %8214 = vmatprep.mubr.msk.f32.mxu0 %vm1534_vm4, %v2972_v36 }
 0x224   : > { %14162 = vst [vmem:[#allocation32_spill] sm:$0xff] %v11082_v7  ;;  %v5777_v21 = vmax.f32 %v5775_v60, %v5776_v39  ;;  %v7061_v38 = vsel %vm6930_vm9, %v10932_v63, %v7060_v25  ;;  %v5802_v6 = vmax.f32 %v5800_v54, %v5801_v12  ;;  %v5809_v8 = vmax.f32 %v5807_v34, %v5808_v2  ;;  %v11091_v61 = vpop.permute.xlu1 %4852  ;;  %v14164_v39 = vld [vmem:[#allocation47_spill] sm:$0xff] }
 0x225   : > { %v5816_v59 = vmax.f32 %v5814_v35, %v5815_v11  ;;  %v2975_v5 = vmax.f32 %v2847_v18, 0.0  ;;  %8215 = vmatmul.mubr.msk.f32.gmra.mrb[28].mxu0 %vm1534_vm4, %v2973_v31  ;;  %v2974_v48 = vmax.f32 %v2846_v53, 0.0  ;;  %4310 = vrot.lane.b32.xlu0 %v10719_v52, %s8424_s22  ;;  %14163 = vst [vmem:[#allocation44_spill] sm:$0xff] %v11091_v61  ;;  %v7062_v36 = vsel %vm6932_vm10, %v5768_v62, %v7061_v38  ;;  %v11098_v31 = vpop.f32.mrb[33].mxu1  ;;  %v14165_v52 = vld [vmem:[#allocation20_spill] sm:$0xff] }
 0x226   : > { %v6694_v60 = vrot.slane %v6693_v10, 1  ;;  %v6701_v55 = vrot.slane %v14164_v39, 2  ;;  %v5803_v63 = vrot.slane %v5802_v6, 1  ;;  %v5810_v54 = vrot.slane %v5809_v8, 2  ;;  %v11106_v11 = vpop.permute.xlu0 %4850  ;;  %v11112_v4 = vpop.f32.mrb[34].mxu1 }
 0x227   : > { %v5817_v34 = vrot.slane %v5816_v59, 4  ;;  %v5824_v25 = vsel %vm1534_vm4, %v2975_v5, -inf  ;;  %4304 = vrot.lane.b32.xlu1 %v10625_v29, %s8424_s22  ;;  %v5823_v12 = vsel %vm1534_vm4, %v2974_v48, -inf  ;;  %v2849_v2 = vadd.f32 %v11087_v49, %v14165_v52  ;;  %8217 = vmatprep.mubr.msk.f32.mxu0 %vm1534_vm4, %v2974_v48  ;;  %14166 = vst [vmem:[#allocation92_spill] sm:$0xff] %v11106_v11  ;;  %v14176_v11 = vld [vmem:[#allocation95_spill] sm:$0xff] }
 0x228   : > { %v2848_v62 = vadd.f32 %v14165_v52, %v11098_v31  ;;  %v11109_v18 = vsel %vm6934_vm11, %v5777_v21, %v7062_v36  ;;  %v5804_v35 = vmax.f32 %v5802_v6, %v5803_v63  ;;  %v5811_v53 = vmax.f32 %v5809_v8, %v5810_v54  ;;  %v11116_v52 = vpop.permute.xlu1 %4860  ;;  %v11127_v63 = vpop.f32.mrb[35].mxu1 }
 0x229   : > { %v5818_v29 = vmax.f32 %v5816_v59, %v5817_v34  ;;  %v5825_v38 = vmax.f32 %v5823_v12, %v5824_v25  ;;  %8218 = vmatmul.mubr.msk.f32.gmra.mrb[30].mxu0 %vm1534_vm4, %v2975_v5  ;;  %v2977_v61 = vmax.f32 %v2849_v2, 0.0  ;;  %4314 = vrot.lane.b32.xlu0 %v10750_v33, %s8424_s22  ;;  %14167 = vst [vmem:[#allocation74_spill] sm:$0xff] %v11116_v52  ;;  %v14168_v5 = vld [vmem:[#allocation106_spill] sm:$0xff] }
 0x22a   : > { %v2976_v7 = vmax.f32 %v2848_v62, 0.0  ;;  %v11118_v48 = vmax.f32 %v6693_v10, %v6694_v60  ;;  %v11121_v21 = vmax.f32 %v14164_v39, %v6701_v55  ;;  %v5812_v6 = vrot.slane %v5811_v53, 1  ;;  %v11134_v55 = vpop.permute.xlu0 %4854  ;;  %v11139_v62 = vpop.f32.mrb[36].mxu1  ;;  %v14171_v52 = vld [vmem:[#allocation102_spill] sm:$0xff] }
 0x22b   : > { %v5819_v8 = vrot.slane %v5818_v29, 2  ;;  %v5826_v59 = vrot.slane %v5825_v38, 4  ;;  %4308 = vrot.lane.b32.xlu1 %v10671_v20, %s8424_s22  ;;  %v2851_v36 = vadd.f32 %v11112_v4, %v14168_v5  ;;  %v5833_v33 = vsel %vm1534_vm4, %v2977_v61, -inf  ;;  %14169 = vst [vmem:[#allocation114_spill] sm:$0xff] %v11134_v55 }
 0x22c   : > { %v5832_v54 = vsel %vm1534_vm4, %v2976_v7, -inf  ;;  %v2850_v10 = vadd.f32 %v14168_v5, %v11127_v63  ;;  %8220 = vmatprep.mubr.msk.f32.mxu0 %vm1534_vm4, %v2976_v7  ;;  %v7065_v60 = vsel %vm6924_vm6, %v5804_v35, %v11052_v27  ;;  %v5813_v20 = vmax.f32 %v5811_v53, %v5812_v6  ;;  %v11143_v5 = vpop.permute.xlu1 %4864  ;;  %v11153_v6 = vpop.f32.mrb[37].mxu1 }
 0x22d   : > { %v5820_v39 = vmax.f32 %v5818_v29, %v5819_v8  ;;  %v5827_v34 = vmax.f32 %v5825_v38, %v5826_v59  ;;  %v5834_v25 = vmax.f32 %v5832_v54, %v5833_v33  ;;  %8221 = vmatmul.mubr.msk.f32.gmra.mrb[32].mxu0 %vm1534_vm4, %v2977_v61  ;;  %v2979_v12 = vmax.f32 %v2851_v36, 0.0  ;;  %4318 = vrot.lane.b32.xlu0 %v10781_v23, %s8424_s22  ;;  %v14173_v61 = vld [vmem:[#allocation3_spill] sm:$0xff] }
 0x22e   : > { %v2978_v2 = vmax.f32 %v2850_v10, 0.0  ;;  %14170 = vst [vmem:[#allocation43_spill] sm:$0xff] %v11143_v5  ;;  %v14172_v55 = vrot.slane %v14171_v52, 4  ;;  %v2853_v38 = vadd.f32 %v11139_v62, %v14173_v61  ;;  %v2852_v59 = vadd.f32 %v14173_v61, %v11153_v6  ;;  %v11164_v5 = vpop.f32.mrb[38].mxu1 }
 0x22f   : > { %v5821_v35 = vrot.slane %v5820_v39, 1  ;;  %v5828_v53 = vrot.slane %v5827_v34, 2  ;;  %v5835_v29 = vrot.slane %v5834_v25, 4  ;;  %4312 = vrot.lane.b32.xlu1 %v10705_v0, %s8424_s22  ;;  %v5842_v23 = vsel %vm1534_vm4, %v2979_v12, -inf }
 0x230   : > { %v6709_v27 = vmax.f32 %v14171_v52, %v14172_v55  ;;  %v5841_v8 = vsel %vm1534_vm4, %v2978_v2, -inf  ;;  %8223 = vmatprep.mubr.msk.f32.mxu0 %vm1534_vm4, %v2978_v2  ;;  %v11160_v52 = vpop.permute.xlu0 %4858  ;;  %v7066_v36 = vsel %vm6926_vm7, %v5813_v20, %v7065_v60  ;;  %v2981_v55 = vmax.f32 %v2853_v38, 0.0  ;;  %v11168_v61 = vpop.permute.xlu1 %4868 }
 0x231   : > { %14174 = vst [vmem:[#allocation48_spill] sm:$0xff] %v11160_v52  ;;  %v5822_v33 = vmax.f32 %v5820_v39, %v5821_v35  ;;  %v5829_v0 = vmax.f32 %v5827_v34, %v5828_v53  ;;  %v5836_v54 = vmax.f32 %v5834_v25, %v5835_v29  ;;  %v5843_v10 = vmax.f32 %v5841_v8, %v5842_v23  ;;  %v14177_v52 = vld [vmem:[#allocation97_spill] sm:$0xff]  ;;  %v14178_v25 = vld [vmem:[#allocation15_spill] sm:$0xff]  ;;  %v11177_v35 = vpop.f32.mrb[39].mxu1 }
 0x232   : > { %8224 = vmatmul.mubr.msk.f32.gmra.mrb[34].mxu0 %vm1534_vm4, %v2979_v12  ;;  %v2980_v7 = vmax.f32 %v2852_v59, 0.0  ;;  %4322 = vrot.lane.b32.xlu0 %v10813_v24, %s8424_s22  ;;  %14175 = vst [vmem:[#allocation34_spill] sm:$0xff] %v11168_v61  ;;  %v6710_v2 = vrot.slane %v6709_v27, 2  ;;  %v7236_v60 = vsel %vm6922_vm5, %v14177_v52, %v14176_v11  ;;  %v2855_v12 = vadd.f32 %v11164_v5, %v14178_v25  ;;  %v11188_v15 = vpop.f32.mrb[40].mxu1 }
 0x233   : > { %v5830_v20 = vrot.slane %v5829_v0, 1  ;;  %v5837_v39 = vrot.slane %v5836_v54, 2  ;;  %v5844_v34 = vrot.slane %v5843_v10, 4  ;;  %4316 = vrot.lane.b32.xlu1 %v10737_v44, %s8424_s22  ;;  %v5851_v24 = vsel %vm1534_vm4, %v2981_v55, -inf }
 0x234   : > { %v5850_v53 = vsel %vm1534_vm4, %v2980_v7, -inf  ;;  %v2854_v29 = vadd.f32 %v14178_v25, %v11177_v35  ;;  %8226 = vmatprep.mubr.msk.f32.mxu0 %vm1534_vm4, %v2980_v7  ;;  %v11184_v11 = vpop.permute.xlu0 %4862  ;;  %v7067_v38 = vsel %vm6928_vm8, %v5822_v33, %v7066_v36  ;;  %v2983_v52 = vmax.f32 %v2855_v12, 0.0  ;;  %v11192_v25 = vpop.permute.xlu1 %4872 }
 0x235   : > { %14179 = vst [vmem:[#allocation22_spill] sm:$0xff] %v11184_v11  ;;  %v5831_v23 = vmax.f32 %v5829_v0, %v5830_v20  ;;  %v5838_v44 = vmax.f32 %v5836_v54, %v5837_v39  ;;  %v5845_v8 = vmax.f32 %v5843_v10, %v5844_v34  ;;  %v5852_v59 = vmax.f32 %v5850_v53, %v5851_v24  ;;  %v14181_v11 = vld [vmem:[#allocation98_spill] sm:$0xff] }
 0x236   : > { %8227 = vmatmul.mubr.msk.f32.gmra.mrb[36].mxu0 %vm1534_vm4, %v2981_v55  ;;  %v2982_v61 = vmax.f32 %v2854_v29, 0.0  ;;  %4326 = vrot.lane.b32.xlu0 %v10851_v1, %s8424_s22  ;;  %14180 = vst [vmem:[#allocation60_spill] sm:$0xff] %v11192_v25  ;;  %v11194_v7 = vmax.f32 %v6709_v27, %v6710_v2  ;;  %v7237_v36 = vsel %vm6924_vm6, %v14181_v11, %v7236_v60  ;;  %v11202_v55 = vpop.f32.mrb[41].mxu1  ;;  %v5860_v1 = vsel %vm1534_vm4, %v2983_v52, -inf  ;;  %v14184_v11 = vld [vmem:[#allocation105_spill] sm:$0xff] }
 0x237   : > { %v5839_v33 = vrot.slane %v5838_v44, 1  ;;  %v5846_v0 = vrot.slane %v5845_v8, 2  ;;  %v5853_v54 = vrot.slane %v5852_v59, 4  ;;  %4320 = vrot.lane.b32.xlu1 %v10771_v30, %s8424_s22  ;;  %v2857_v10 = vadd.f32 %v11188_v15, %v10806_v26  ;;  %v11213_v53 = vpop.f32.mrb[42].mxu1 }
 0x238   : > { %v5859_v20 = vsel %vm1534_vm4, %v2982_v61, -inf  ;;  %v2856_v27 = vadd.f32 %v10806_v26, %v11202_v55  ;;  %8229 = vmatprep.mubr.msk.f32.mxu0 %vm1534_vm4, %v2982_v61  ;;  %v11209_v2 = vpop.permute.xlu0 %4866  ;;  %v7068_v60 = vsel %vm6930_vm9, %v5831_v23, %v7067_v38  ;;  %v11217_v29 = vpop.permute.xlu1 %4876  ;;  %v6712_v61 = vrot.slane %v11194_v7, 1 }
 0x239   : > { %14182 = vst [vmem:[#allocation38_spill] sm:$0xff] %v11209_v2  ;;  %v5847_v39 = vmax.f32 %v5845_v8, %v5846_v0  ;;  %v5854_v30 = vmax.f32 %v5852_v59, %v5853_v54  ;;  %v5861_v34 = vmax.f32 %v5859_v20, %v5860_v1  ;;  %v2985_v12 = vmax.f32 %v2857_v10, 0.0  ;;  %14183 = vst [vmem:[#allocation39_spill] sm:$0xff] %v11217_v29  ;;  %v11227_v0 = vpop.f32.mrb[43].mxu1 }
 0x23a   : > { %8230 = vmatmul.mubr.msk.f32.gmra.mrb[38].mxu0 %vm1534_vm4, %v2983_v52  ;;  %v2984_v24 = vmax.f32 %v2856_v27, 0.0  ;;  %4330 = vrot.lane.b32.xlu0 %v10884_v3, %s8424_s22  ;;  %v5840_v26 = vmax.f32 %v5838_v44, %v5839_v33  ;;  %v7238_v38 = vsel %vm6926_vm7, %v14184_v11, %v7237_v36  ;;  %v2859_v52 = vadd.f32 %v11213_v53, %v10828_v9  ;;  %v11237_v11 = vpop.f32.mrb[44].mxu1 }
 0x23b   : > { %v5855_v23 = vrot.slane %v5854_v30, 2  ;;  %v5862_v8 = vrot.slane %v5861_v34, 4  ;;  %v5869_v59 = vsel %vm1534_vm4, %v2985_v12, -inf  ;;  %4324 = vrot.lane.b32.xlu1 %v10804_v14, %s8424_s22  ;;  %v2858_v44 = vadd.f32 %v10828_v9, %v11227_v0 }
 0x23c   : > { %v5868_v3 = vsel %vm1534_vm4, %v2984_v24, -inf  ;;  %8232 = vmatprep.mubr.msk.f32.mxu0 %vm1534_vm4, %v2984_v24  ;;  %v11233_v36 = vpop.permute.xlu0 %4870  ;;  %v5848_v33 = vrot.slane %v5847_v39, 1  ;;  %v7069_v54 = vsel %vm6932_vm10, %v5840_v26, %v7068_v60  ;;  %v2987_v20 = vmax.f32 %v2859_v52, 0.0  ;;  %v11241_v9 = vpop.permute.xlu1 %4880 }
 0x23d   : > { %14185 = vst [vmem:[#allocation50_spill] sm:$0xff] %v11233_v36  ;;  %v5856_v10 = vmax.f32 %v5854_v30, %v5855_v23  ;;  %v5863_v1 = vmax.f32 %v5861_v34, %v5862_v8  ;;  %v5870_v14 = vmax.f32 %v5868_v3, %v5869_v59  ;;  %v2986_v27 = vmax.f32 %v2858_v44, 0.0  ;;  %14186 = vst [vmem:[#allocation4_spill] sm:$0xff] %v11241_v9  ;;  %v11251_v23 = vpop.f32.mrb[45].mxu1  ;;  %v14218_v9 = vld [vmem:[#allocation82_spill] sm:$0xff] }
 0x23e   : > { %8233 = vmatmul.mubr.msk.f32.gmra.mrb[40].mxu0 %vm1534_vm4, %v2985_v12  ;;  %4334 = vrot.lane.b32.xlu0 %v10913_v42, %s8424_s22  ;;  %v5849_v24 = vmax.f32 %v5847_v39, %v5848_v33  ;;  %v14187_v29 = vrot.slane %v11121_v21, 1  ;;  %v7239_v60 = vsel %vm6928_vm8, %v11066_v58, %v7238_v38  ;;  %v5878_v12 = vsel %vm1534_vm4, %v2987_v20, -inf  ;;  %v11266_v33 = vpop.f32.mrb[46].mxu1 }
 0x23f   : > { %v5857_v30 = vrot.slane %v5856_v10, 1  ;;  %v5864_v34 = vrot.slane %v5863_v1, 2  ;;  %v5871_v26 = vrot.slane %v5870_v14, 4  ;;  %4328 = vrot.lane.b32.xlu1 %v10837_v22, %s8424_s22  ;;  %v5877_v42 = vsel %vm1534_vm4, %v2986_v27, -inf  ;;  %8235 = vmatprep.mubr.msk.f32.mxu0 %vm1534_vm4, %v2986_v27 }
 0x240   : > { %v6704_v25 = vmax.f32 %v11121_v21, %v14187_v29  ;;  %v2861_v39 = vadd.f32 %v11237_v11, %v10839_v41  ;;  %v2860_v21 = vadd.f32 %v10839_v41, %v11251_v23  ;;  %v11259_v58 = vpop.permute.xlu0 %4874  ;;  %v11262_v29 = vsel %vm6934_vm11, %v5849_v24, %v7069_v54  ;;  %v11270_v41 = vpop.permute.xlu1 %4884 }
 0x241   : > { %14188 = vst [vmem:[#allocation40_spill] sm:$0xff] %v11259_v58  ;;  %v5865_v38 = vmax.f32 %v5863_v1, %v5864_v34  ;;  %v5872_v8 = vmax.f32 %v5870_v14, %v5871_v26  ;;  %v5879_v22 = vmax.f32 %v5877_v42, %v5878_v12  ;;  %v6713_v59 = vmax.f32 %v11194_v7, %v6712_v61  ;;  %v11278_v61 = vpop.f32.mrb[47].mxu1 }
 0x242   : > { %8236 = vmatmul.mubr.msk.f32.gmra.mrb[42].mxu0 %vm1534_vm4, %v2987_v20  ;;  %v5858_v52 = vmax.f32 %v5856_v10, %v5857_v30  ;;  %v2989_v3 = vmax.f32 %v2861_v39, 0.0  ;;  %v2988_v44 = vmax.f32 %v2860_v21, 0.0  ;;  %4338 = vrot.lane.b32.xlu0 %v10992_v17, %s8424_s22  ;;  %14189 = vst [vmem:[#allocation46_spill] sm:$0xff] %v11270_v41  ;;  %v7240_v54 = vsel %vm6930_vm9, %v11118_v48, %v7239_v60 }
 0x243   : > { %v5866_v1 = vrot.slane %v5865_v38, 1  ;;  %v5873_v14 = vrot.slane %v5872_v8, 2  ;;  %v5880_v27 = vrot.slane %v5879_v22, 4  ;;  %4332 = vrot.lane.b32.xlu1 %v10873_v57, %s8424_s22  ;;  %v2863_v7 = vadd.f32 %v11266_v33, %v10860_v47 }
 0x244   : > { %v5887_v10 = vsel %vm1534_vm4, %v2989_v3, -inf  ;;  %v5886_v17 = vsel %vm1534_vm4, %v2988_v44, -inf  ;;  %v2862_v20 = vadd.f32 %v10860_v47, %v11278_v61  ;;  %8238 = vmatprep.mubr.msk.f32.mxu0 %vm1534_vm4, %v2988_v44  ;;  %v11285_v48 = vpop.permute.xlu0 %4878  ;;  %v7241_v24 = vsel %vm6932_vm10, %v6704_v25, %v7240_v54  ;;  %v11294_v47 = vpop.f32.mrb[48].mxu1 }
 0x245   : > { %14190 = vst [vmem:[#allocation55_spill] sm:$0xff] %v11285_v48  ;;  %v5867_v60 = vmax.f32 %v5865_v38, %v5866_v1  ;;  %v5874_v57 = vmax.f32 %v5872_v8, %v5873_v14  ;;  %v5881_v30 = vmax.f32 %v5879_v22, %v5880_v27  ;;  %v5888_v34 = vmax.f32 %v5886_v17, %v5887_v10  ;;  %v11298_v21 = vpop.permute.xlu1 %4888 }
 0x246   : > { %8239 = vmatmul.mubr.msk.f32.gmra.mrb[44].mxu0 %vm1534_vm4, %v2989_v3  ;;  %v14191_v26 = vrot.slane %v10545_v56, 4  ;;  %v2991_v42 = vmax.f32 %v2863_v7, 0.0  ;;  %v2990_v39 = vmax.f32 %v2862_v20, 0.0  ;;  %4342 = vrot.lane.b32.xlu0 %v11016_v40, %s8424_s22  ;;  %14192 = vst [vmem:[#allocation56_spill] sm:$0xff] %v11298_v21  ;;  %v11301_v25 = vsel %vm6934_vm11, %v6713_v59, %v7241_v24  ;;  %v14202_v21 = vld [vmem:[#allocation94_spill] sm:$0xff] }
 0x247   : > { %14193 = vst [vmem:[#allocation9_spill] sm:$0xff] %v11301_v25  ;;  %v7071_v38 = vsel %vm6922_vm5, %v5867_v60, %v5858_v52  ;;  %v5875_v8 = vrot.slane %v5874_v57, 1  ;;  %v5882_v22 = vrot.slane %v5881_v30, 2  ;;  %v5889_v3 = vrot.slane %v5888_v34, 4  ;;  %4336 = vrot.lane.b32.xlu1 %v10902_v46, %s8424_s22 }
 0x248   : > { %v11292_v12 = vmax.f32 %v10545_v56, %v14191_v26  ;;  %v11306_v56 = vpop.f32.mrb[49].mxu1  ;;  %v5896_v44 = vsel %vm1534_vm4, %v2991_v42, -inf  ;;  %v5895_v54 = vsel %vm1534_vm4, %v2990_v39, -inf  ;;  %v2865_v40 = vadd.f32 %v11294_v47, %v11002_v16  ;;  %8241 = vmatprep.mubr.msk.f32.mxu0 %vm1534_vm4, %v2990_v39  ;;  %v11315_v52 = vpop.permute.xlu0 %4882 }
 0x249   : > { %v2864_v59 = vadd.f32 %v11002_v16, %v11306_v56  ;;  %14194 = vst [vmem:[#allocation66_spill] sm:$0xff] %v11315_v52  ;;  %v5876_v1 = vmax.f32 %v5874_v57, %v5875_v8  ;;  %v5883_v14 = vmax.f32 %v5881_v30, %v5882_v22  ;;  %v5890_v27 = vmax.f32 %v5888_v34, %v5889_v3  ;;  %v11318_v17 = vpop.f32.mrb[50].mxu1  ;;  %v11322_v20 = vpop.permute.xlu1 %4892  ;;  %v14196_v16 = vld [vmem:[#allocation79_spill] sm:$0xff]  ;;  %v14198_v57 = vld [vmem:[#allocation80_spill] sm:$0xff] }
 0x24a   : > { %v5897_v46 = vmax.f32 %v5895_v54, %v5896_v44  ;;  %8242 = vmatmul.mubr.msk.f32.gmra.mrb[46].mxu0 %vm1534_vm4, %v2991_v42  ;;  %v2993_v7 = vmax.f32 %v2865_v40, 0.0  ;;  %4346 = vrot.lane.b32.xlu0 %v11041_v32, %s8424_s22  ;;  %14195 = vst [vmem:[#allocation61_spill] sm:$0xff] %v11322_v20  ;;  %v14197_v24 = vrot.slane %v14196_v16, 1  ;;  %v14199_v30 = vrot.slane %v14198_v57, 2  ;;  %v11336_v8 = vpop.f32.mrb[51].mxu1 }
 0x24b   : > { %v2992_v10 = vmax.f32 %v2864_v59, 0.0  ;;  %v5884_v26 = vrot.slane %v5883_v14, 1  ;;  %v5891_v42 = vrot.slane %v5890_v27, 2  ;;  %4340 = vrot.lane.b32.xlu1 %v10982_v45, %s8424_s22  ;;  %v2867_v32 = vadd.f32 %v11318_v17, %v11032_v13  ;;  %v11347_v20 = vpop.f32.mrb[52].mxu1 }
 0x24c   : > { %v11327_v60 = vmax.f32 %v14196_v16, %v14197_v24  ;;  %v6621_v34 = vmax.f32 %v14198_v57, %v14199_v30  ;;  %v5898_v39 = vrot.slane %v5897_v46, 4  ;;  %v5905_v22 = vsel %vm1534_vm4, %v2993_v7, -inf  ;;  %v11343_v54 = vpop.permute.xlu0 %4886 }
 0x24d   : > { %v5904_v3 = vsel %vm1534_vm4, %v2992_v10, -inf  ;;  %v2866_v44 = vadd.f32 %v11032_v13, %v11336_v8  ;;  %8244 = vmatprep.mubr.msk.f32.mxu0 %vm1534_vm4, %v2992_v10  ;;  %14200 = vst [vmem:[#allocation52_spill] sm:$0xff] %v11343_v54  ;;  %v7072_v40 = vsel %vm6924_vm6, %v5876_v1, %v7071_v38  ;;  %v5885_v59 = vmax.f32 %v5883_v14, %v5884_v26  ;;  %v11351_v13 = vpop.permute.xlu1 %4896 }
 0x24e   : > { %v5892_v45 = vmax.f32 %v5890_v27, %v5891_v42  ;;  %v5899_v16 = vmax.f32 %v5897_v46, %v5898_v39  ;;  %v5906_v24 = vmax.f32 %v5904_v3, %v5905_v22  ;;  %8245 = vmatmul.mubr.msk.f32.gmra.mrb[48].mxu0 %vm1534_vm4, %v2993_v7  ;;  %v2995_v57 = vmax.f32 %v2867_v32, 0.0  ;;  %7113 = vrot.lane.b32.xlu0 %v11109_v18, %s8427_s10  ;;  %v14203_v27 = vld [vmem:[#allocation107_spill] sm:$0xff]  ;;  %v11358_v7 = vpop.f32.mrb[53].mxu1 }
 0x24f   : > { %v2994_v30 = vmax.f32 %v2866_v44, 0.0  ;;  %14201 = vst [vmem:[#allocation58_spill] sm:$0xff] %v11351_v13  ;;  %v6622_v10 = vrot.slane %v6621_v34, 1  ;;  %v6629_v54 = vrot.slane %v14202_v21, 2  ;;  %4344 = vrot.lane.b32.xlu1 %v11006_v37, %s8424_s22  ;;  %v2869_v46 = vadd.f32 %v11347_v20, %v14203_v27  ;;  %v11369_v52 = vpop.f32.mrb[54].mxu1 }
 0x250   : > { %v5893_v38 = vrot.slane %v5892_v45, 1  ;;  %v5900_v1 = vrot.slane %v5899_v16, 2  ;;  %v5907_v14 = vrot.slane %v5906_v24, 4  ;;  %v5914_v26 = vsel %vm1534_vm4, %v2995_v57, -inf  ;;  %v11365_v39 = vpop.permute.xlu0 %4890 }
 0x251   : > { %v5913_v18 = vsel %vm1534_vm4, %v2994_v30, -inf  ;;  %v2868_v42 = vadd.f32 %v14203_v27, %v11358_v7  ;;  %8247 = vmatprep.mubr.msk.f32.mxu0 %vm1534_vm4, %v2994_v30  ;;  %14204 = vst [vmem:[#allocation59_spill] sm:$0xff] %v11365_v39  ;;  %v7073_v32 = vsel %vm6926_vm7, %v5885_v59, %v7072_v40  ;;  %v2997_v13 = vmax.f32 %v2869_v46, 0.0  ;;  %v11373_v27 = vpop.permute.xlu1 %4900 }
 0x252   : > { %v5894_v22 = vmax.f32 %v5892_v45, %v5893_v38  ;;  %v5901_v37 = vmax.f32 %v5899_v16, %v5900_v1  ;;  %v5908_v3 = vmax.f32 %v5906_v24, %v5907_v14  ;;  %v5915_v44 = vmax.f32 %v5913_v18, %v5914_v26  ;;  %8248 = vmatmul.mubr.msk.f32.gmra.mrb[50].mxu0 %vm1534_vm4, %v2995_v57  ;;  %v14206_v16 = vld [vmem:[#allocation5_spill] sm:$0xff]  ;;  %v11384_v57 = vpop.f32.mrb[55].mxu1 }
 0x253   : > { %v2996_v41 = vmax.f32 %v2868_v42, 0.0  ;;  %4350 = vrot.lane.b32.xlu0 %v11076_v50, %s8424_s22  ;;  %14205 = vst [vmem:[#allocation71_spill] sm:$0xff] %v11373_v27  ;;  %v11375_v30 = vmax.f32 %v6621_v34, %v6622_v10  ;;  %v11378_v39 = vmax.f32 %v14202_v21, %v6629_v54  ;;  %4348 = vrot.lane.b32.xlu1 %v11028_v51, %s8424_s22  ;;  %v5923_v50 = vsel %vm1534_vm4, %v2997_v13, -inf  ;;  %v11395_v18 = vpop.f32.mrb[56].mxu1 }
 0x254   : > { %v5902_v40 = vrot.slane %v5901_v37, 1  ;;  %v5909_v59 = vrot.slane %v5908_v3, 2  ;;  %v5916_v45 = vrot.slane %v5915_v44, 4  ;;  %v2871_v24 = vadd.f32 %v11369_v52, %v14206_v16  ;;  %v11391_v21 = vpop.permute.xlu0 %4894 }
 0x255   : > { %v5922_v38 = vsel %vm1534_vm4, %v2996_v41, -inf  ;;  %v2870_v34 = vadd.f32 %v14206_v16, %v11384_v57  ;;  %8250 = vmatprep.mubr.msk.f32.mxu0 %vm1534_vm4, %v2996_v41  ;;  %14207 = vst [vmem:[#allocation63_spill] sm:$0xff] %v11391_v21  ;;  %v7074_v54 = vsel %vm6928_vm8, %v5894_v22, %v7073_v32  ;;  %v11399_v42 = vpop.permute.xlu1 %4908  ;;  %v6631_v41 = vrot.slane %v11378_v39, 1  ;;  %v14209_v16 = vld [vmem:[#allocation85_spill] sm:$0xff] }
 0x256   : > { %v5903_v10 = vmax.f32 %v5901_v37, %v5902_v40  ;;  %v5910_v51 = vmax.f32 %v5908_v3, %v5909_v59  ;;  %v5917_v1 = vmax.f32 %v5915_v44, %v5916_v45  ;;  %v5924_v14 = vmax.f32 %v5922_v38, %v5923_v50  ;;  %8251 = vmatmul.mubr.msk.f32.gmra.mrb[52].mxu0 %vm1534_vm4, %v2997_v13  ;;  %v11411_v44 = vpop.f32.mrb[57].mxu1  ;;  %v14214_v21 = vld [vmem:[#allocation77_spill] sm:$0xff] }
 0x257   : > { %v2999_v46 = vmax.f32 %v2871_v24, 0.0  ;;  %v2998_v26 = vmax.f32 %v2870_v34, 0.0  ;;  %4354 = vrot.lane.b32.xlu0 %v11098_v31, %s8424_s22  ;;  %14208 = vst [vmem:[#allocation72_spill] sm:$0xff] %v11399_v42  ;;  %v14210_v27 = vrot.slane %v14209_v16, 4  ;;  %4352 = vrot.lane.b32.xlu1 %v11055_v19, %s8424_s22  ;;  %v2873_v13 = vadd.f32 %v11395_v18, %v10673_v28 }
 0x258   : > { %v5911_v22 = vrot.slane %v5910_v51, 1  ;;  %v5918_v37 = vrot.slane %v5917_v1, 2  ;;  %v5925_v3 = vrot.slane %v5924_v14, 4  ;;  %v2872_v59 = vadd.f32 %v10673_v28, %v11411_v44 }
 0x259   : > { %v11405_v32 = vmax.f32 %v14209_v16, %v14210_v27  ;;  %v5932_v31 = vsel %vm1534_vm4, %v2999_v46, -inf  ;;  %v5931_v40 = vsel %vm1534_vm4, %v2998_v26, -inf  ;;  %8253 = vmatprep.mubr.msk.f32.mxu0 %vm1534_vm4, %v2998_v26  ;;  %v11418_v27 = vpop.permute.xlu0 %4898  ;;  %v7075_v45 = vsel %vm6930_vm9, %v5903_v10, %v7074_v54  ;;  %v11422_v16 = vpop.f32.mrb[58].mxu1 }
 0x25a   : > { %14211 = vst [vmem:[#allocation73_spill] sm:$0xff] %v11418_v27  ;;  %v5919_v24 = vmax.f32 %v5917_v1, %v5918_v37  ;;  %v5926_v19 = vmax.f32 %v5924_v14, %v5925_v3  ;;  %v5933_v50 = vmax.f32 %v5931_v40, %v5932_v31  ;;  %v3001_v38 = vmax.f32 %v2873_v13, 0.0  ;;  %8254 = vmatmul.mubr.msk.f32.gmra.mrb[54].mxu0 %vm1534_vm4, %v2999_v46  ;;  %v11426_v42 = vpop.permute.xlu1 %4924  ;;  %v14213_v27 = vld [vmem:[#allocation76_spill] sm:$0xff]  ;;  %v14215_v46 = vld [vmem:[#allocation7_spill] sm:$0xff] }
 0x25b   : > { %v3000_v34 = vmax.f32 %v2872_v59, 0.0  ;;  %4358 = vrot.lane.b32.xlu0 %v11127_v63, %s8424_s22  ;;  %14212 = vst [vmem:[#allocation100_spill] sm:$0xff] %v11426_v42  ;;  %v5912_v28 = vmax.f32 %v5910_v51, %v5911_v22  ;;  %v6638_v26 = vrot.slane %v11405_v32, 2  ;;  %v7229_v54 = vsel %vm6922_vm5, %v14214_v21, %v14213_v27  ;;  %4356 = vrot.lane.b32.xlu1 %v11087_v49, %s8424_s22  ;;  %v11437_v63 = vpop.f32.mrb[59].mxu1 }
 0x25c   : > { %v5927_v10 = vrot.slane %v5926_v19, 2  ;;  %v5934_v1 = vrot.slane %v5933_v50, 4  ;;  %v5941_v14 = vsel %vm1534_vm4, %v3001_v38, -inf  ;;  %v2875_v37 = vadd.f32 %v11422_v16, %v14215_v46  ;;  %v11447_v42 = vpop.f32.mrb[60].mxu1 }
 0x25d   : > { %v5940_v51 = vsel %vm1534_vm4, %v3000_v34, -inf  ;;  %v2874_v22 = vadd.f32 %v14215_v46, %v11437_v63  ;;  %8256 = vmatprep.mubr.msk.f32.mxu0 %vm1534_vm4, %v3000_v34  ;;  %v11443_v21 = vpop.permute.xlu0 %4906  ;;  %v5920_v3 = vrot.slane %v5919_v24, 1  ;;  %v7076_v13 = vsel %vm6932_vm10, %v5912_v28, %v7075_v45 }
 0x25e   : > { %14216 = vst [vmem:[#allocation99_spill] sm:$0xff] %v11443_v21  ;;  %v5928_v31 = vmax.f32 %v5926_v19, %v5927_v10  ;;  %v5935_v40 = vmax.f32 %v5933_v50, %v5934_v1  ;;  %v5942_v49 = vmax.f32 %v5940_v51, %v5941_v14  ;;  %v3003_v59 = vmax.f32 %v2875_v37, 0.0  ;;  %8257 = vmatmul.mubr.msk.f32.gmra.mrb[56].mxu0 %vm1534_vm4, %v3001_v38  ;;  %v11451_v46 = vpop.permute.xlu1 %4926  ;;  %v11461_v10 = vpop.f32.mrb[61].mxu1  ;;  %v14219_v1 = vld [vmem:[#allocation10_spill] sm:$0xff] }
 0x25f   : > { %v3002_v27 = vmax.f32 %v2874_v22, 0.0  ;;  %4362 = vrot.lane.b32.xlu0 %v11153_v6, %s8424_s22  ;;  %14217 = vst [vmem:[#allocation78_spill] sm:$0xff] %v11451_v46  ;;  %v5921_v34 = vmax.f32 %v5919_v24, %v5920_v3  ;;  %v11454_v21 = vmax.f32 %v11378_v39, %v6631_v41  ;;  %v7230_v45 = vsel %vm6924_vm6, %v14218_v9, %v7229_v54  ;;  %v11476_v46 = vpop.f32.mrb[62].mxu1 }
 0x260   : > { %v5929_v19 = vrot.slane %v5928_v31, 1  ;;  %v5936_v50 = vrot.slane %v5935_v40, 2  ;;  %v5943_v28 = vrot.slane %v5942_v49, 4  ;;  %v5950_v38 = vsel %vm1534_vm4, %v3003_v59, -inf  ;;  %4360 = vrot.lane.b32.xlu1 %v11112_v4, %s8424_s22 }
 0x261   : > { %v5949_v6 = vsel %vm1534_vm4, %v3002_v27, -inf  ;;  %v2877_v24 = vadd.f32 %v11447_v42, %v14219_v1  ;;  %v2876_v39 = vadd.f32 %v14219_v1, %v11461_v10  ;;  %8259 = vmatprep.mubr.msk.f32.mxu0 %vm1534_vm4, %v3002_v27  ;;  %v11469_v9 = vpop.permute.xlu0 %4922  ;;  %v11472_v41 = vsel %vm6934_vm11, %v5921_v34, %v7076_v13  ;;  %v14222_v1 = vld [vmem:[#allocation84_spill] sm:$0xff] }
 0x262   : > { %14220 = vst [vmem:[#allocation47_spill] sm:$0xff] %v11469_v9  ;;  %v5937_v54 = vmax.f32 %v5935_v40, %v5936_v50  ;;  %v5944_v14 = vmax.f32 %v5942_v49, %v5943_v28  ;;  %v5951_v4 = vmax.f32 %v5949_v6, %v5950_v38  ;;  %8260 = vmatmul.mubr.msk.f32.gmra.mrb[58].mxu0 %vm1534_vm4, %v3003_v59  ;;  %v11480_v27 = vpop.permute.xlu1 %4928 }
 0x263   : > { %v6639_v37 = vmax.f32 %v11405_v32, %v6638_v26  ;;  %v5930_v51 = vmax.f32 %v5928_v31, %v5929_v19  ;;  %v3005_v22 = vmax.f32 %v2877_v24, 0.0  ;;  %v3004_v3 = vmax.f32 %v2876_v39, 0.0  ;;  %4366 = vrot.lane.b32.xlu0 %v11177_v35, %s8424_s22  ;;  %14221 = vst [vmem:[#allocation20_spill] sm:$0xff] %v11480_v27  ;;  %v14223_v32 = vld [vmem:[#allocation23_spill] sm:$0xff]  ;;  %v11488_v31 = vpop.f32.mrb[63].mxu1 }
 0x264   : > { %v7231_v13 = vsel %vm6926_vm7, %v14222_v1, %v7230_v45  ;;  %v5938_v40 = vrot.slane %v5937_v54, 1  ;;  %v5945_v49 = vrot.slane %v5944_v14, 2  ;;  %v5952_v34 = vrot.slane %v5951_v4, 4  ;;  %4364 = vrot.lane.b32.xlu1 %v11139_v62, %s8424_s22  ;;  %v11500_v1 = vpop.f32.mrb[64].mxu1 }
 0x265   : > { %v2879_v26 = vadd.f32 %v11476_v46, %v14223_v32  ;;  %v5959_v59 = vsel %vm1534_vm4, %v3005_v22, -inf  ;;  %v5958_v35 = vsel %vm1534_vm4, %v3004_v3, -inf  ;;  %v2878_v19 = vadd.f32 %v14223_v32, %v11488_v31  ;;  %8262 = vmatprep.mubr.msk.f32.mxu0 %vm1534_vm4, %v3004_v3  ;;  %v11495_v45 = vpop.permute.xlu0 %4910 }
 0x266   : > { %14224 = vst [vmem:[#allocation106_spill] sm:$0xff] %v11495_v45  ;;  %v7232_v50 = vsel %vm6928_vm8, %v11327_v60, %v7231_v13  ;;  %v5939_v62 = vmax.f32 %v5937_v54, %v5938_v40  ;;  %v5946_v28 = vmax.f32 %v5944_v14, %v5945_v49  ;;  %v5953_v38 = vmax.f32 %v5951_v4, %v5952_v34  ;;  %v11504_v32 = vpop.permute.xlu1 %4930 }
 0x267   : > { %v5960_v6 = vmax.f32 %v5958_v35, %v5959_v59  ;;  %8263 = vmatmul.mubr.msk.f32.gmra.mrb[60].mxu0 %vm1534_vm4, %v3005_v22  ;;  %v3007_v24 = vmax.f32 %v2879_v26, 0.0  ;;  %v3006_v39 = vmax.f32 %v2878_v19, 0.0  ;;  %4370 = vrot.lane.b32.xlu0 %v11202_v55, %s8424_s22  ;;  %14225 = vst [vmem:[#allocation102_spill] sm:$0xff] %v11504_v32  ;;  %v6640_v3 = vrot.slane %v6639_v37, 1  ;;  %v11511_v22 = vpop.f32.mrb[65].mxu1 }
 0x268   : > { %v7233_v27 = vsel %vm6930_vm9, %v11375_v30, %v7232_v50  ;;  %v7078_v60 = vsel %vm6922_vm5, %v5939_v62, %v5930_v51  ;;  %v5947_v54 = vrot.slane %v5946_v28, 1  ;;  %v5954_v14 = vrot.slane %v5953_v38, 2  ;;  %4368 = vrot.lane.b32.xlu1 %v11164_v5, %s8424_s22  ;;  %v11523_v19 = vpop.f32.mrb[66].mxu1 }
 0x269   : > { %v5961_v4 = vrot.slane %v5960_v6, 4  ;;  %v5968_v13 = vsel %vm1534_vm4, %v3007_v24, -inf  ;;  %v5967_v55 = vsel %vm1534_vm4, %v3006_v39, -inf  ;;  %v2881_v40 = vadd.f32 %v11500_v1, %v10938_v43  ;;  %8265 = vmatprep.mubr.msk.f32.mxu0 %vm1534_vm4, %v3006_v39  ;;  %v11520_v51 = vpop.permute.xlu0 %4912 }
 0x26a   : > { %v2880_v30 = vadd.f32 %v10938_v43, %v11511_v22  ;;  %14226 = vst [vmem:[#allocation3_spill] sm:$0xff] %v11520_v51  ;;  %v5948_v49 = vmax.f32 %v5946_v28, %v5947_v54  ;;  %v5955_v34 = vmax.f32 %v5953_v38, %v5954_v14  ;;  %v5969_v5 = vmax.f32 %v5967_v55, %v5968_v13  ;;  %v11527_v50 = vpop.permute.xlu1 %4932  ;;  %v11535_v54 = vpop.f32.mrb[67].mxu1  ;;  %v14230_v55 = vld [vmem:[#allocation30_spill] sm:$0xff] }
 0x26b   : > { %v5962_v26 = vmax.f32 %v5960_v6, %v5961_v4  ;;  %8266 = vmatmul.mubr.msk.f32.gmra.mrb[62].mxu0 %vm1534_vm4, %v3007_v24  ;;  %v3009_v59 = vmax.f32 %v2881_v40, 0.0  ;;  %4374 = vrot.lane.b32.xlu0 %v11227_v0, %s8424_s22  ;;  %14227 = vst [vmem:[#allocation95_spill] sm:$0xff] %v11527_v50  ;;  %v6641_v43 = vmax.f32 %v6639_v37, %v6640_v3  ;;  %v14228_v6 = vld [vmem:[#allocation96_spill] sm:$0xff]  ;;  %v11547_v32 = vpop.f32.mrb[68].mxu1 }
 0x26c   : > { %v3008_v35 = vmax.f32 %v2880_v30, 0.0  ;;  %v7234_v62 = vsel %vm6932_vm10, %v11454_v21, %v7233_v27  ;;  %v5956_v39 = vrot.slane %v5955_v34, 1  ;;  %v5970_v38 = vrot.slane %v5969_v5, 4  ;;  %4372 = vrot.lane.b32.xlu1 %v11188_v15, %s8424_s22 }
 0x26d   : > { %v5963_v28 = vrot.slane %v5962_v26, 2  ;;  %v2883_v24 = vadd.f32 %v11523_v19, %v14228_v6  ;;  %v5977_v14 = vsel %vm1534_vm4, %v3009_v59, -inf  ;;  %v2882_v37 = vadd.f32 %v14228_v6, %v11535_v54  ;;  %v11542_v21 = vpop.permute.xlu0 %4914 }
 0x26e   : > { %v5976_v0 = vsel %vm1534_vm4, %v3008_v35, -inf  ;;  %8268 = vmatprep.mubr.msk.f32.mxu0 %vm1534_vm4, %v3008_v35  ;;  %14229 = vst [vmem:[#allocation97_spill] sm:$0xff] %v11542_v21  ;;  %v7079_v27 = vsel %vm6924_vm6, %v5948_v49, %v7078_v60  ;;  %v5957_v3 = vmax.f32 %v5955_v34, %v5956_v39  ;;  %v5971_v4 = vmax.f32 %v5969_v5, %v5970_v38  ;;  %v11551_v35 = vpop.permute.xlu1 %2738 }
 0x26f   : > { %v5964_v15 = vmax.f32 %v5962_v26, %v5963_v28  ;;  %v5978_v13 = vmax.f32 %v5976_v0, %v5977_v14  ;;  %8269 = vmatmul.mubr.msk.f32.gmra.mrb[64].mxu0 %vm1534_vm4, %v3009_v59  ;;  %v3011_v30 = vmax.f32 %v2883_v24, 0.0  ;;  %v3010_v50 = vmax.f32 %v2882_v37, 0.0  ;;  %4378 = vrot.lane.b32.xlu0 %v11251_v23, %s8424_s22  ;;  %v14232_v26 = vld [vmem:[#allocation67_spill] sm:$0xff]  ;;  %v11560_v59 = vpop.f32.mrb[69].mxu1 }
 0x270   : > { %v11554_v6 = vsel %vm6934_vm11, %v6641_v43, %v7234_v62  ;;  %v5972_v49 = vrot.slane %v5971_v4, 2  ;;  %4376 = vrot.lane.b32.xlu1 %v11213_v53, %s8424_s22  ;;  %v2885_v5 = vadd.f32 %v11547_v32, %v14232_v26  ;;  %v2884_v28 = vadd.f32 %v14232_v26, %v11560_v59  ;;  %v11571_v40 = vpop.f32.mrb[70].mxu1  ;;  %v14234_v26 = vld [vmem:[#allocation120_spill] sm:$0xff] }
 0x271   : > { %14231 = vst [vmem:[#allocation15_spill] sm:$0xff] %v11554_v6  ;;  %v5965_v60 = vrot.slane %v5964_v15, 1  ;;  %v5979_v34 = vrot.slane %v5978_v13, 4  ;;  %v5986_v39 = vsel %vm1534_vm4, %v3011_v30, -inf  ;;  %v5985_v23 = vsel %vm1534_vm4, %v3010_v50, -inf  ;;  %8271 = vmatprep.mubr.msk.f32.mxu0 %vm1534_vm4, %v3010_v50  ;;  %v11567_v43 = vpop.permute.xlu0 %4916 }
 0x272   : > { %14233 = vst [vmem:[#allocation98_spill] sm:$0xff] %v11567_v43  ;;  %v7080_v62 = vsel %vm6926_vm7, %v5957_v3, %v7079_v27  ;;  %v5973_v53 = vmax.f32 %v5971_v4, %v5972_v49  ;;  %v5987_v14 = vmax.f32 %v5985_v23, %v5986_v39  ;;  %v3013_v0 = vmax.f32 %v2885_v5, 0.0  ;;  %v14236_v43 = vld [vmem:[#allocation8_spill] sm:$0xff]  ;;  %v11591_v49 = vpop.permute.xlu1 %4856 }
 0x273   : > { %v5966_v38 = vmax.f32 %v5964_v15, %v5965_v60  ;;  %v5980_v24 = vmax.f32 %v5978_v13, %v5979_v34  ;;  %8272 = vmatmul.mubr.msk.f32.gmra.mrb[66].mxu0 %vm1534_vm4, %v3011_v30  ;;  %v3012_v37 = vmax.f32 %v2884_v28, 0.0  ;;  %4382 = vrot.lane.b32.xlu0 %v11278_v61, %s8424_s22  ;;  %v14235_v9 = vrot.slane %v14234_v26, 1  ;;  %v14238_v30 = vld [vmem:[#allocation68_spill] sm:$0xff]  ;;  %v11589_v61 = vpop.f32.mrb[71].mxu1  ;;  %14239 = vst [vmem:[#allocation105_spill] sm:$0xff] %v11591_v49 }
 0x274   : > { %v14237_v27 = vrot.slane %v14236_v43, 2  ;;  %v5974_v15 = vrot.slane %v5973_v53, 1  ;;  %v5988_v13 = vrot.slane %v5987_v14, 4  ;;  %4380 = vrot.lane.b32.xlu1 %v11237_v11, %s8424_s22  ;;  %v2887_v60 = vadd.f32 %v11571_v40, %v14238_v30  ;;  %v11602_v51 = vpop.f32.mrb[72].mxu1 }
 0x275   : > { %v11578_v50 = vmax.f32 %v14234_v26, %v14235_v9  ;;  %v5981_v4 = vrot.slane %v5980_v24, 2  ;;  %v5995_v9 = vsel %vm1534_vm4, %v3013_v0, -inf  ;;  %v5994_v34 = vsel %vm1534_vm4, %v3012_v37, -inf  ;;  %8274 = vmatprep.mubr.msk.f32.mxu0 %vm1534_vm4, %v3012_v37  ;;  %v11598_v39 = vpop.permute.xlu0 %4902 }
 0x276   : > { %v11583_v3 = vmax.f32 %v14236_v43, %v14237_v27  ;;  %v2886_v5 = vadd.f32 %v14238_v30, %v11589_v61  ;;  %14240 = vst [vmem:[#allocation79_spill] sm:$0xff] %v11598_v39  ;;  %v7081_v11 = vsel %vm6928_vm8, %v5966_v38, %v7080_v62  ;;  %v5975_v23 = vmax.f32 %v5973_v53, %v5974_v15  ;;  %v14241_v38 = vld [vmem:[#allocation17_spill] sm:$0xff] }
 0x277   : > { %v5982_v28 = vmax.f32 %v5980_v24, %v5981_v4  ;;  %v5989_v43 = vmax.f32 %v5987_v14, %v5988_v13  ;;  %v5996_v26 = vmax.f32 %v5994_v34, %v5995_v9  ;;  %8275 = vmatmul.mubr.msk.f32.gmra.mrb[68].mxu0 %vm1534_vm4, %v3013_v0  ;;  %v3015_v27 = vmax.f32 %v2887_v60, 0.0  ;;  %4386 = vrot.lane.b32.xlu0 %v11306_v56, %s8424_s22  ;;  %v11612_v24 = vpop.f32.mrb[73].mxu1  ;;  %v11623_v34 = vpop.permute.xlu1 %4918 }
 0x278   : > { %v3014_v21 = vmax.f32 %v2886_v5, 0.0  ;;  %v6838_v30 = vrot.slane %v11583_v3, 1  ;;  %v6845_v37 = vrot.slane %v11292_v12, 2  ;;  %7115 = vrot.lane.b32.xlu1 %v11262_v29, %s8427_s10  ;;  %v2889_v53 = vadd.f32 %v11602_v51, %v14241_v38  ;;  %14243 = vst [vmem:[#allocation94_spill] sm:$0xff] %v11623_v34  ;;  %v11625_v48 = vpop.f32.mrb[74].mxu1 }
 0x279   : > { %v5983_v45 = vrot.slane %v5982_v28, 1  ;;  %v5990_v39 = vrot.slane %v5989_v43, 2  ;;  %v5997_v62 = vrot.slane %v5996_v26, 4  ;;  %v6004_v14 = vsel %vm1534_vm4, %v3015_v27, -inf  ;;  %v11619_v15 = vpop.permute.xlu0 %4934 }
 0x27a   : > { %v6003_v0 = vsel %vm1534_vm4, %v3014_v21, -inf  ;;  %v2888_v56 = vadd.f32 %v14241_v38, %v11612_v24  ;;  %8277 = vmatprep.mubr.msk.f32.mxu0 %vm1534_vm4, %v3014_v21  ;;  %14242 = vst [vmem:[#allocation80_spill] sm:$0xff] %v11619_v15  ;;  %v7082_v4 = vsel %vm6930_vm9, %v5975_v23, %v7081_v11  ;;  %v3017_v9 = vmax.f32 %v2889_v53, 0.0 }
 0x27b   : > { %v5991_v13 = vmax.f32 %v5989_v43, %v5990_v39  ;;  %v5998_v29 = vmax.f32 %v5996_v26, %v5997_v62  ;;  %v6005_v60 = vmax.f32 %v6003_v0, %v6004_v14  ;;  %8278 = vmatmul.mubr.msk.f32.gmra.mrb[70].mxu0 %vm1534_vm4, %v3015_v27  ;;  %4390 = vrot.lane.b32.xlu0 %v11336_v8, %s8424_s22  ;;  %v14244_v11 = vrot.slane %v14230_v55, 4  ;;  %v14245_v27 = vld [vmem:[#allocation101_spill] sm:$0xff]  ;;  %v11642_v8 = vpop.f32.mrb[75].mxu1 }
 0x27c   : > { %v3016_v5 = vmax.f32 %v2888_v56, 0.0  ;;  %v5984_v38 = vmax.f32 %v5982_v28, %v5983_v45  ;;  %v11630_v21 = vmax.f32 %v11292_v12, %v6845_v37  ;;  %v6013_v26 = vsel %vm1534_vm4, %v3017_v9, -inf  ;;  %4384 = vrot.lane.b32.xlu1 %v11266_v33, %s8424_s22 }
 0x27d   : > { %v11635_v39 = vmax.f32 %v14230_v55, %v14244_v11  ;;  %v5999_v23 = vrot.slane %v5998_v29, 2  ;;  %v6006_v43 = vrot.slane %v6005_v60, 4  ;;  %v2891_v62 = vadd.f32 %v11625_v48, %v14245_v27  ;;  %v11648_v55 = vpop.permute.xlu0 %4920  ;;  %v11652_v11 = vpop.f32.mrb[76].mxu1 }
 0x27e   : > { %v6012_v12 = vsel %vm1534_vm4, %v3016_v5, -inf  ;;  %v2890_v45 = vadd.f32 %v14245_v27, %v11642_v8  ;;  %8280 = vmatprep.mubr.msk.f32.mxu0 %vm1534_vm4, %v3016_v5  ;;  %14246 = vst [vmem:[#allocation107_spill] sm:$0xff] %v11648_v55  ;;  %v5992_v28 = vrot.slane %v5991_v13, 1  ;;  %v7083_v37 = vsel %vm6932_vm10, %v5984_v38, %v7082_v4  ;;  %v11665_v38 = vpop.permute.xlu1 %4904 }
 0x27f   : > { %v6000_v53 = vmax.f32 %v5998_v29, %v5999_v23  ;;  %v6007_v14 = vmax.f32 %v6005_v60, %v6006_v43  ;;  %v6014_v33 = vmax.f32 %v6012_v12, %v6013_v26  ;;  %v3019_v0 = vmax.f32 %v2891_v62, 0.0  ;;  %8281 = vmatmul.mubr.msk.f32.gmra.mrb[72].mxu0 %vm1534_vm4, %v3017_v9  ;;  %4394 = vrot.lane.b32.xlu0 %v11358_v7, %s8424_s22  ;;  %v11663_v9 = vpop.f32.mrb[77].mxu1 }
 0x280   : > { %v3018_v56 = vmax.f32 %v2890_v45, 0.0  ;;  %v5993_v27 = vmax.f32 %v5991_v13, %v5992_v28  ;;  %v11657_v5 = vmax.f32 %v11583_v3, %v6838_v30  ;;  %v6854_v15 = vrot.slane %v11635_v39, 2  ;;  %4388 = vrot.lane.b32.xlu1 %v11294_v47, %s8424_s22  ;;  %14247 = vst [vmem:[#allocation5_spill] sm:$0xff] %v11665_v38  ;;  %v14248_v13 = vld [vmem:[#allocation103_spill] sm:$0xff]  ;;  %v11678_v34 = vpop.f32.mrb[78].mxu1 }
 0x281   : > { %v6001_v55 = vrot.slane %v6000_v53, 1  ;;  %v6008_v4 = vrot.slane %v6007_v14, 2  ;;  %v6015_v29 = vrot.slane %v6014_v33, 4  ;;  %v6022_v60 = vsel %vm1534_vm4, %v3019_v0, -inf }
 0x282   : > { %v6021_v7 = vsel %vm1534_vm4, %v3018_v56, -inf  ;;  %v2893_v3 = vadd.f32 %v11652_v11, %v14248_v13  ;;  %v2892_v30 = vadd.f32 %v14248_v13, %v11663_v9  ;;  %8283 = vmatprep.mubr.msk.f32.mxu0 %vm1534_vm4, %v3018_v56  ;;  %v11674_v23 = vsel %vm6934_vm11, %v5993_v27, %v7083_v37  ;;  %v11682_v13 = vpop.permute.xlu0 %7257  ;;  %v14250_v56 = vld [vmem:[#allocation117_spill] sm:$0xff]  ;;  %v14251_v37 = vld [vmem:[#allocation118_spill] sm:$0xff] }
 0x283   : > { %v6009_v43 = vmax.f32 %v6007_v14, %v6008_v4  ;;  %v6016_v26 = vmax.f32 %v6014_v33, %v6015_v29  ;;  %v6023_v47 = vmax.f32 %v6021_v7, %v6022_v60  ;;  %8284 = vmatmul.mubr.msk.f32.gmra.mrb[74].mxu0 %vm1534_vm4, %v3019_v0  ;;  %v6847_v62 = vrot.slane %v11630_v21, 1  ;;  %4398 = vrot.lane.b32.xlu0 %v11384_v57, %s8424_s22  ;;  %v11691_v0 = vpop.f32.mrb[79].mxu1  ;;  %v14253_v7 = vld [vmem:[#allocation119_spill] sm:$0xff] }
 0x284   : > { %v6002_v12 = vmax.f32 %v6000_v53, %v6001_v55  ;;  %v3021_v45 = vmax.f32 %v2893_v3, 0.0  ;;  %v3020_v28 = vmax.f32 %v2892_v30, 0.0  ;;  %14249 = vst [vmem:[#allocation85_spill] sm:$0xff] %v11682_v13  ;;  %v7250_v14 = vsel %vm6922_vm5, %v14251_v37, %v14250_v56  ;;  %4392 = vrot.lane.b32.xlu1 %v11318_v17, %s8424_s22  ;;  %v14252_v55 = vld [vmem:[#allocation18_spill] sm:$0xff]  ;;  %v11700_v13 = vpop.permute.xlu1 %4936  ;;  %v11703_v36 = vpop.f32.mrb[80].mxu1 }
 0x285   : > { %v6010_v33 = vrot.slane %v6009_v43, 1  ;;  %v6017_v27 = vrot.slane %v6016_v26, 2  ;;  %v6024_v4 = vrot.slane %v6023_v47, 4  ;;  %v2895_v53 = vadd.f32 %v11678_v34, %v14252_v55  ;;  %14254 = vst [vmem:[#allocation76_spill] sm:$0xff] %v11700_v13 }
 0x286   : > { %v6031_v29 = vsel %vm1534_vm4, %v3021_v45, -inf  ;;  %v6030_v57 = vsel %vm1534_vm4, %v3020_v28, -inf  ;;  %v2894_v60 = vadd.f32 %v14252_v55, %v11691_v0  ;;  %8286 = vmatprep.mubr.msk.f32.mxu0 %vm1534_vm4, %v3020_v28  ;;  %v7251_v3 = vsel %vm6924_vm6, %v14253_v7, %v7250_v14  ;;  %v14255_v55 = vld [vmem:[#allocation121_spill] sm:$0xff] }
 0x287   : > { %v6011_v30 = vmax.f32 %v6009_v43, %v6010_v33  ;;  %v6018_v56 = vmax.f32 %v6016_v26, %v6017_v27  ;;  %v6025_v17 = vmax.f32 %v6023_v47, %v6024_v4  ;;  %v6032_v37 = vmax.f32 %v6030_v57, %v6031_v29  ;;  %8287 = vmatmul.mubr.msk.f32.gmra.mrb[76].mxu0 %vm1534_vm4, %v3021_v45  ;;  %v11715_v45 = vpop.f32.mrb[81].mxu1  ;;  %v14256_v4 = vld [vmem:[#allocation12_spill] sm:$0xff] }
 0x288   : > { %v3023_v38 = vmax.f32 %v2895_v53, 0.0  ;;  %v3022_v58 = vmax.f32 %v2894_v60, 0.0  ;;  %4402 = vrot.lane.b32.xlu0 %v11411_v44, %s8424_s22  ;;  %v11708_v28 = vmax.f32 %v11635_v39, %v6854_v15  ;;  %v7252_v43 = vsel %vm6926_vm7, %v14255_v55, %v7251_v3  ;;  %4396 = vrot.lane.b32.xlu1 %v11347_v20, %s8424_s22  ;;  %v11727_v3 = vpop.f32.mrb[82].mxu1 }
 0x289   : > { %v7085_v26 = vsel %vm6922_vm5, %v6011_v30, %v6002_v12  ;;  %v6019_v47 = vrot.slane %v6018_v56, 1  ;;  %v6026_v14 = vrot.slane %v6025_v17, 2  ;;  %v6033_v33 = vrot.slane %v6032_v37, 4  ;;  %v11724_v12 = vpop.permute.xlu0 %7261 }
 0x28a   : > { %v6040_v27 = vsel %vm1534_vm4, %v3023_v38, -inf  ;;  %v6039_v44 = vsel %vm1534_vm4, %v3022_v58, -inf  ;;  %v2897_v15 = vadd.f32 %v11703_v36, %v14256_v4  ;;  %v2896_v39 = vadd.f32 %v14256_v4, %v11715_v45  ;;  %8289 = vmatprep.mubr.msk.f32.mxu0 %vm1534_vm4, %v3022_v58  ;;  %14257 = vst [vmem:[#allocation77_spill] sm:$0xff] %v11724_v12 }
 0x28b   : > { %v6020_v53 = vmax.f32 %v6018_v56, %v6019_v47  ;;  %v6027_v29 = vmax.f32 %v6025_v17, %v6026_v14  ;;  %v6034_v57 = vmax.f32 %v6032_v37, %v6033_v33  ;;  %v6041_v20 = vmax.f32 %v6039_v44, %v6040_v27  ;;  %8290 = vmatmul.mubr.msk.f32.gmra.mrb[78].mxu0 %vm1534_vm4, %v3023_v38  ;;  %v11736_v17 = vpop.permute.xlu1 %7259  ;;  %v14259_v38 = vld [vmem:[#allocation11_spill] sm:$0xff]  ;;  %v11740_v47 = vpop.f32.mrb[83].mxu1 }
 0x28c   : > { %v3025_v60 = vmax.f32 %v2897_v15, 0.0  ;;  %v3024_v7 = vmax.f32 %v2896_v39, 0.0  ;;  %4406 = vrot.lane.b32.xlu0 %v11437_v63, %s8424_s22  ;;  %v6848_v30 = vmax.f32 %v11630_v21, %v6847_v62  ;;  %v7253_v58 = vsel %vm6928_vm8, %v11578_v50, %v7252_v43  ;;  %4400 = vrot.lane.b32.xlu1 %v11369_v52, %s8424_s22  ;;  %14258 = vst [vmem:[#allocation7_spill] sm:$0xff] %v11736_v17  ;;  %v11751_v39 = vpop.f32.mrb[84].mxu1 }
 0x28d   : > { %v6028_v55 = vrot.slane %v6027_v29, 1  ;;  %v6035_v4 = vrot.slane %v6034_v57, 2  ;;  %v6042_v56 = vrot.slane %v6041_v20, 4  ;;  %v2899_v37 = vadd.f32 %v11727_v3, %v14259_v38  ;;  %v11747_v62 = vpop.permute.xlu0 %4298 }
 0x28e   : > { %v6049_v63 = vsel %vm1534_vm4, %v3025_v60, -inf  ;;  %v6048_v21 = vsel %vm1534_vm4, %v3024_v7, -inf  ;;  %v2898_v50 = vadd.f32 %v14259_v38, %v11740_v47  ;;  %8292 = vmatprep.mubr.msk.f32.mxu0 %vm1534_vm4, %v3024_v7  ;;  %v7086_v52 = vsel %vm6924_vm6, %v6020_v53, %v7085_v26 }
 0x28f   : > { %v6029_v43 = vmax.f32 %v6027_v29, %v6028_v55  ;;  %v6036_v14 = vmax.f32 %v6034_v57, %v6035_v4  ;;  %v6043_v33 = vmax.f32 %v6041_v20, %v6042_v56  ;;  %v6050_v27 = vmax.f32 %v6048_v21, %v6049_v63  ;;  %8293 = vmatmul.mubr.msk.f32.gmra.mrb[80].mxu0 %vm1534_vm4, %v3025_v60  ;;  %v14260_v29 = vld [vmem:[#allocation53_spill] sm:$0xff]  ;;  %v11762_v20 = vpop.f32.mrb[85].mxu1 }
 0x290   : > { %v3027_v44 = vmax.f32 %v2899_v37, 0.0  ;;  %v3026_v15 = vmax.f32 %v2898_v50, 0.0  ;;  %4410 = vrot.lane.b32.xlu0 %v11461_v10, %s8424_s22  ;;  %v6856_v38 = vrot.slane %v11708_v28, 1  ;;  %v7254_v7 = vsel %vm6930_vm9, %v11657_v5, %v7253_v58  ;;  %4404 = vrot.lane.b32.xlu1 %v11395_v18, %s8424_s22  ;;  %v11775_v12 = vpop.f32.mrb[86].mxu1 }
 0x291   : > { %v6037_v13 = vrot.slane %v6036_v14, 1  ;;  %v6044_v26 = vrot.slane %v6043_v33, 2  ;;  %v6051_v53 = vrot.slane %v6050_v27, 4  ;;  %v2901_v57 = vadd.f32 %v11751_v39, %v14260_v29  ;;  %v11769_v5 = vpop.permute.xlu0 %4302  ;;  %v11772_v63 = vpop.permute.xlu1 %7263 }
 0x292   : > { %v6058_v60 = vsel %vm1534_vm4, %v3027_v44, -inf  ;;  %v6057_v10 = vsel %vm1534_vm4, %v3026_v15, -inf  ;;  %v2900_v55 = vadd.f32 %v14260_v29, %v11762_v20  ;;  %8295 = vmatprep.mubr.msk.f32.mxu0 %vm1534_vm4, %v3026_v15  ;;  %v7087_v58 = vsel %vm6926_vm7, %v6029_v43, %v7086_v52  ;;  %14261 = vst [vmem:[#allocation82_spill] sm:$0xff] %v11772_v63 }
 0x293   : > { %v6038_v4 = vmax.f32 %v6036_v14, %v6037_v13  ;;  %v6045_v18 = vmax.f32 %v6043_v33, %v6044_v26  ;;  %v6052_v56 = vmax.f32 %v6050_v27, %v6051_v53  ;;  %v6059_v37 = vmax.f32 %v6057_v10, %v6058_v60  ;;  %8296 = vmatmul.mubr.msk.f32.gmra.mrb[82].mxu0 %vm1534_vm4, %v3027_v44  ;;  %v14262_v14 = vld [vmem:[#allocation54_spill] sm:$0xff]  ;;  %v11785_v27 = vpop.f32.mrb[87].mxu1 }
 0x294   : > { %v3029_v21 = vmax.f32 %v2901_v57, 0.0  ;;  %v3028_v50 = vmax.f32 %v2900_v55, 0.0  ;;  %7117 = vrot.lane.b32.xlu0 %v11472_v41, %s8427_s10  ;;  %v6857_v15 = vmax.f32 %v11708_v28, %v6856_v38  ;;  %v7255_v29 = vsel %vm6932_vm10, %v6848_v30, %v7254_v7  ;;  %4408 = vrot.lane.b32.xlu1 %v11422_v16, %s8424_s22  ;;  %v11798_v55 = vpop.f32.mrb[88].mxu1 }
 0x295   : > { %v6046_v52 = vrot.slane %v6045_v18, 1  ;;  %v6053_v13 = vrot.slane %v6052_v56, 2  ;;  %v6060_v43 = vrot.slane %v6059_v37, 4  ;;  %v2903_v33 = vadd.f32 %v11775_v12, %v14262_v14  ;;  %v11792_v28 = vpop.permute.xlu0 %4306  ;;  %v11795_v57 = vpop.permute.xlu1 %4300 }
 0x296   : > { %v6067_v44 = vsel %vm1534_vm4, %v3029_v21, -inf  ;;  %v6066_v26 = vsel %vm1534_vm4, %v3028_v50, -inf  ;;  %v2902_v41 = vadd.f32 %v14262_v14, %v11785_v27  ;;  %8298 = vmatprep.mubr.msk.f32.mxu0 %vm1534_vm4, %v3028_v50  ;;  %14263 = vst [vmem:[#allocation10_spill] sm:$0xff] %v11792_v28  ;;  %v7088_v30 = vsel %vm6928_vm8, %v6038_v4, %v7087_v58  ;;  %v14265_v14 = vld [vmem:[#allocation113_spill] sm:$0xff] }
 0x297   : > { %v6047_v38 = vmax.f32 %v6045_v18, %v6046_v52  ;;  %v6054_v16 = vmax.f32 %v6052_v56, %v6053_v13  ;;  %v6061_v7 = vmax.f32 %v6059_v37, %v6060_v43  ;;  %v6068_v53 = vmax.f32 %v6066_v26, %v6067_v44  ;;  %8299 = vmatmul.mubr.msk.f32.gmra.mrb[84].mxu0 %vm1534_vm4, %v3029_v21  ;;  %v14267_v21 = vld [vmem:[#allocation81_spill] sm:$0xff]  ;;  %v11814_v13 = vpop.f32.mrb[89].mxu1 }
 0x298   : > { %v3031_v60 = vmax.f32 %v2903_v33, 0.0  ;;  %v3030_v10 = vmax.f32 %v2902_v41, 0.0  ;;  %4414 = vrot.lane.b32.xlu0 %v11488_v31, %s8424_s22  ;;  %v11803_v50 = vsel %vm6934_vm11, %v6857_v15, %v7255_v29  ;;  %v14266_v58 = vrot.slane %v14265_v14, 2  ;;  %4412 = vrot.lane.b32.xlu1 %v11447_v42, %s8424_s22  ;;  %v11828_v6 = vpop.f32.mrb[90].mxu1 }
 0x299   : > { %14264 = vst [vmem:[#allocation84_spill] sm:$0xff] %v11803_v50  ;;  %v6055_v18 = vrot.slane %v6054_v16, 1  ;;  %v6062_v56 = vrot.slane %v6061_v7, 2  ;;  %v6069_v37 = vrot.slane %v6068_v53, 4  ;;  %v2905_v52 = vadd.f32 %v11798_v55, %v14267_v21  ;;  %v11821_v43 = vpop.permute.xlu0 %4310  ;;  %v11824_v41 = vpop.permute.xlu1 %4304 }
 0x29a   : > { %v11808_v4 = vmax.f32 %v14265_v14, %v14266_v58  ;;  %v6076_v31 = vsel %vm1534_vm4, %v3031_v60, -inf  ;;  %v6075_v15 = vsel %vm1534_vm4, %v3030_v10, -inf  ;;  %v2904_v29 = vadd.f32 %v14267_v21, %v11814_v13  ;;  %8301 = vmatprep.mubr.msk.f32.mxu0 %vm1534_vm4, %v3030_v10  ;;  %14268 = vst [vmem:[#allocation23_spill] sm:$0xff] %v11821_v43  ;;  %v14269_v58 = vld [vmem:[#allocation49_spill] sm:$0xff] }
 0x29b   : > { %v7089_v33 = vsel %vm6930_vm9, %v6047_v38, %v7088_v30  ;;  %v6063_v44 = vmax.f32 %v6061_v7, %v6062_v56  ;;  %v6070_v42 = vmax.f32 %v6068_v53, %v6069_v37  ;;  %v6077_v26 = vmax.f32 %v6075_v15, %v6076_v31  ;;  %8302 = vmatmul.mubr.msk.f32.gmra.mrb[86].mxu0 %vm1534_vm4, %v3031_v60  ;;  %v14270_v53 = vld [vmem:[#allocation83_spill] sm:$0xff]  ;;  %v11838_v56 = vpop.f32.mrb[91].mxu1 }
 0x29c   : > { %v3033_v14 = vmax.f32 %v2905_v52, 0.0  ;;  %v6780_v63 = vrot.slane %v14269_v58, 4  ;;  %v3032_v17 = vmax.f32 %v2904_v29, 0.0  ;;  %4418 = vrot.lane.b32.xlu0 %v11511_v22, %s8424_s22  ;;  %v6056_v10 = vmax.f32 %v6054_v16, %v6055_v18  ;;  %4416 = vrot.lane.b32.xlu1 %v11476_v46, %s8424_s22  ;;  %v11850_v50 = vpop.f32.mrb[92].mxu1 }
 0x29d   : > { %v6766_v21 = vrot.slane %v11808_v4, 1  ;;  %v6071_v30 = vrot.slane %v6070_v42, 2  ;;  %v6078_v38 = vrot.slane %v6077_v26, 4  ;;  %v2907_v60 = vadd.f32 %v11828_v6, %v14270_v53  ;;  %v11844_v16 = vpop.permute.xlu0 %4314  ;;  %v11847_v29 = vpop.permute.xlu1 %4308  ;;  %14272 = vst [vmem:[#allocation30_spill] sm:$0xff] %v11850_v50 }
 0x29e   : > { %v6085_v7 = vsel %vm1534_vm4, %v3033_v14, -inf  ;;  %v6084_v37 = vsel %vm1534_vm4, %v3032_v17, -inf  ;;  %v2906_v22 = vadd.f32 %v14270_v53, %v11838_v56  ;;  %8304 = vmatprep.mubr.msk.f32.mxu0 %vm1534_vm4, %v3032_v17  ;;  %14271 = vst [vmem:[#allocation96_spill] sm:$0xff] %v11844_v16  ;;  %v6064_v18 = vrot.slane %v6063_v44, 1  ;;  %v14273_v53 = vld [vmem:[#allocation111_spill] sm:$0xff] }
 0x29f   : > { %v7090_v52 = vsel %vm6932_vm10, %v6056_v10, %v7089_v33  ;;  %v6072_v31 = vmax.f32 %v6070_v42, %v6071_v30  ;;  %v6079_v15 = vmax.f32 %v6077_v26, %v6078_v38  ;;  %v6086_v46 = vmax.f32 %v6084_v37, %v6085_v7  ;;  %8305 = vmatmul.mubr.msk.f32.gmra.mrb[88].mxu0 %vm1534_vm4, %v3033_v14  ;;  %v14275_v33 = vld [vmem:[#allocation75_spill] sm:$0xff]  ;;  %v11863_v14 = vpop.f32.mrb[93].mxu1 }
 0x2a0   : > { %v3035_v2 = vmax.f32 %v2907_v60, 0.0  ;;  %v3034_v49 = vmax.f32 %v2906_v22, 0.0  ;;  %4422 = vrot.lane.b32.xlu0 %v11535_v54, %s8424_s22  ;;  %v6065_v17 = vmax.f32 %v6063_v44, %v6064_v18  ;;  %v14274_v25 = vrot.slane %v14273_v53, 1  ;;  %4420 = vrot.lane.b32.xlu1 %v11500_v1, %s8424_s22  ;;  %v14276_v44 = vld [vmem:[#allocation86_spill] sm:$0xff] }
 0x2a1   : > { %v6773_v42 = vrot.slane %v14275_v33, 2  ;;  %v6073_v26 = vrot.slane %v6072_v31, 1  ;;  %v6080_v10 = vrot.slane %v6079_v15, 2  ;;  %v6087_v30 = vrot.slane %v6086_v46, 4  ;;  %v11871_v60 = vpop.permute.xlu0 %4318 }
 0x2a2   : > { %v11857_v16 = vmax.f32 %v14273_v53, %v14274_v25  ;;  %v6094_v38 = vsel %vm1534_vm4, %v3035_v2, -inf  ;;  %v6093_v54 = vsel %vm1534_vm4, %v3034_v49, -inf  ;;  %v2909_v7 = vadd.f32 %v11850_v50, %v14276_v44  ;;  %8307 = vmatprep.mubr.msk.f32.mxu0 %vm1534_vm4, %v3034_v49  ;;  %14277 = vst [vmem:[#allocation67_spill] sm:$0xff] %v11871_v60  ;;  %v11876_v53 = vpop.permute.xlu1 %4312 }
 0x2a3   : > { %v2908_v25 = vadd.f32 %v14276_v44, %v11863_v14  ;;  %v11874_v37 = vsel %vm6934_vm11, %v6065_v17, %v7090_v52  ;;  %v6081_v22 = vmax.f32 %v6079_v15, %v6080_v10  ;;  %v6088_v18 = vmax.f32 %v6086_v46, %v6087_v30  ;;  %8308 = vmatmul.mubr.msk.f32.gmra.mrb[90].mxu0 %vm1534_vm4, %v3035_v2  ;;  %v11882_v44 = vpop.f32.mrb[94].mxu1  ;;  %v14279_v2 = vld [vmem:[#allocation87_spill] sm:$0xff] }
 0x2a4   : > { %v6095_v1 = vmax.f32 %v6093_v54, %v6094_v38  ;;  %v11880_v43 = vmax.f32 %v11808_v4, %v6766_v21  ;;  %v3037_v50 = vmax.f32 %v2909_v7, 0.0  ;;  %14278 = vst [vmem:[#allocation120_spill] sm:$0xff] %v11882_v44  ;;  %4426 = vrot.lane.b32.xlu0 %v11560_v59, %s8424_s22  ;;  %v11887_v49 = vmax.f32 %v14275_v33, %v6773_v42  ;;  %v11896_v21 = vpop.f32.mrb[95].mxu1 }
 0x2a5   : > { %v3036_v28 = vmax.f32 %v2908_v25, 0.0  ;;  %v11890_v52 = vmax.f32 %v14269_v58, %v6780_v63  ;;  %v6082_v15 = vrot.slane %v6081_v22, 1  ;;  %v6089_v46 = vrot.slane %v6088_v18, 2  ;;  %4424 = vrot.lane.b32.xlu1 %v11523_v19, %s8424_s22  ;;  %v11903_v58 = vpop.permute.xlu0 %4322  ;;  %v11908_v7 = vpop.f32.mrb[96].mxu1 }
 0x2a6   : > { %v6096_v17 = vrot.slane %v6095_v1, 4  ;;  %v2911_v4 = vadd.f32 %v11882_v44, %v14279_v2  ;;  %v6074_v10 = vmax.f32 %v6072_v31, %v6073_v26  ;;  %v6103_v59 = vsel %vm1534_vm4, %v3037_v50, -inf  ;;  %14280 = vst [vmem:[#allocation8_spill] sm:$0xff] %v11903_v58  ;;  %v11905_v54 = vpop.permute.xlu1 %4316  ;;  %14282 = vst [vmem:[#allocation17_spill] sm:$0xff] %v11908_v7 }
 0x2a7   : > { %v6102_v33 = vsel %vm1534_vm4, %v3036_v28, -inf  ;;  %v2910_v63 = vadd.f32 %v14279_v2, %v11896_v21  ;;  %8310 = vmatprep.mubr.msk.f32.mxu0 %vm1534_vm4, %v3036_v28  ;;  %v6083_v42 = vmax.f32 %v6081_v22, %v6082_v15  ;;  %v6090_v30 = vmax.f32 %v6088_v18, %v6089_v46  ;;  %14281 = vst [vmem:[#allocation68_spill] sm:$0xff] %v11905_v54  ;;  %v14283_v28 = vld [vmem:[#allocation33_spill] sm:$0xff]  ;;  %v14284_v2 = vld [vmem:[#allocation108_spill] sm:$0xff] }
 0x2a8   : > { %v6097_v19 = vmax.f32 %v6095_v1, %v6096_v17  ;;  %v6104_v38 = vmax.f32 %v6102_v33, %v6103_v59  ;;  %8311 = vmatmul.mubr.msk.f32.gmra.mrb[92].mxu0 %vm1534_vm4, %v3037_v50  ;;  %v3039_v31 = vmax.f32 %v2911_v4, 0.0  ;;  %4430 = vrot.lane.b32.xlu0 %v11589_v61, %s8424_s22  ;;  %v6775_v25 = vrot.slane %v11887_v49, 1  ;;  %v11919_v50 = vpop.f32.mrb[97].mxu1  ;;  %v14285_v4 = vld [vmem:[#allocation35_spill] sm:$0xff] }
 0x2a9   : > { %v3038_v26 = vmax.f32 %v2910_v63, 0.0  ;;  %v7243_v22 = vsel %vm6922_vm5, %v14284_v2, %v14283_v28  ;;  %v7092_v18 = vsel %vm6922_vm5, %v6083_v42, %v6074_v10  ;;  %v6091_v1 = vrot.slane %v6090_v30, 1  ;;  %4428 = vrot.lane.b32.xlu1 %v11547_v32, %s8424_s22  ;;  %v11928_v10 = vpop.permute.xlu0 %4326  ;;  %v11933_v54 = vpop.f32.mrb[98].mxu1 }
 0x2aa   : > { %v6098_v15 = vrot.slane %v6097_v19, 2  ;;  %v6105_v46 = vrot.slane %v6104_v38, 4  ;;  %v6112_v17 = vsel %vm1534_vm4, %v3039_v31, -inf  ;;  %v2913_v59 = vadd.f32 %v11908_v7, %v14285_v4  ;;  %14286 = vst [vmem:[#allocation101_spill] sm:$0xff] %v11928_v10  ;;  %v11930_v2 = vpop.permute.xlu1 %4320  ;;  %14288 = vst [vmem:[#allocation117_spill] sm:$0xff] %v11933_v54 }
 0x2ab   : > { %v6111_v61 = vsel %vm1534_vm4, %v3038_v26, -inf  ;;  %v2912_v33 = vadd.f32 %v14285_v4, %v11919_v50  ;;  %8313 = vmatprep.mubr.msk.f32.mxu0 %vm1534_vm4, %v3038_v26  ;;  %v6092_v63 = vmax.f32 %v6090_v30, %v6091_v1  ;;  %14287 = vst [vmem:[#allocation103_spill] sm:$0xff] %v11930_v2  ;;  %v6782_v4 = vrot.slane %v11890_v52, 2  ;;  %v14289_v26 = vld [vmem:[#allocation109_spill] sm:$0xff]  ;;  %v14290_v1 = vld [vmem:[#allocation112_spill] sm:$0xff] }
 0x2ac   : > { %v6099_v42 = vmax.f32 %v6097_v19, %v6098_v15  ;;  %v6106_v28 = vmax.f32 %v6104_v38, %v6105_v46  ;;  %v6113_v32 = vmax.f32 %v6111_v61, %v6112_v17  ;;  %8314 = vmatmul.mubr.msk.f32.gmra.mrb[94].mxu0 %vm1534_vm4, %v3039_v31  ;;  %v3041_v58 = vmax.f32 %v2913_v59, 0.0  ;;  %4434 = vrot.lane.b32.xlu0 %v11612_v24, %s8424_s22  ;;  %v11944_v15 = vpop.f32.mrb[99].mxu1 }
 0x2ad   : > { %v3040_v60 = vmax.f32 %v2912_v33, 0.0  ;;  %v7244_v10 = vsel %vm6924_vm6, %v14289_v26, %v7243_v22  ;;  %4432 = vrot.lane.b32.xlu1 %v11571_v40, %s8424_s22  ;;  %v2915_v31 = vadd.f32 %v11933_v54, %v14290_v1  ;;  %v2914_v17 = vadd.f32 %v14290_v1, %v11944_v15  ;;  %v11951_v22 = vpop.permute.xlu0 %4330  ;;  %v11957_v44 = vpop.f32.mrb[100].mxu1  ;;  %v14292_v1 = vld [vmem:[#allocation110_spill] sm:$0xff] }
 0x2ae   : > { %v6100_v30 = vrot.slane %v6099_v42, 1  ;;  %v6107_v19 = vrot.slane %v6106_v28, 2  ;;  %v6114_v38 = vrot.slane %v6113_v32, 4  ;;  %v6121_v46 = vsel %vm1534_vm4, %v3041_v58, -inf  ;;  %14291 = vst [vmem:[#allocation118_spill] sm:$0xff] %v11951_v22  ;;  %v11954_v54 = vpop.permute.xlu1 %4324 }
 0x2af   : > { %v6120_v24 = vsel %vm1534_vm4, %v3040_v60, -inf  ;;  %8316 = vmatprep.mubr.msk.f32.mxu0 %vm1534_vm4, %v3040_v60  ;;  %v7093_v61 = vsel %vm6924_vm6, %v6092_v63, %v7092_v18  ;;  %v3043_v2 = vmax.f32 %v2915_v31, 0.0  ;;  %v3042_v7 = vmax.f32 %v2914_v17, 0.0 }
 0x2b0   : > { %v6101_v59 = vmax.f32 %v6099_v42, %v6100_v30  ;;  %v6108_v40 = vmax.f32 %v6106_v28, %v6107_v19  ;;  %v6115_v33 = vmax.f32 %v6113_v32, %v6114_v38  ;;  %v6122_v26 = vmax.f32 %v6120_v24, %v6121_v46  ;;  %8317 = vmatmul.mubr.msk.f32.gmra.mrb[96].mxu0 %vm1534_vm4, %v3041_v58  ;;  %v14293_v58 = vld [vmem:[#allocation13_spill] sm:$0xff]  ;;  %v11970_v30 = vpop.f32.mrb[101].mxu1 }
 0x2b1   : > { %4438 = vrot.lane.b32.xlu0 %v11642_v8, %s8424_s22  ;;  %v11962_v60 = vmax.f32 %v11887_v49, %v6775_v25  ;;  %v7245_v18 = vsel %vm6926_vm7, %v14292_v1, %v7244_v10  ;;  %4436 = vrot.lane.b32.xlu1 %v11602_v51, %s8424_s22  ;;  %v2917_v32 = vadd.f32 %v11957_v44, %v14293_v58  ;;  %v6130_v19 = vsel %vm1534_vm4, %v3043_v2, -inf  ;;  %v11977_v25 = vpop.permute.xlu0 %4334  ;;  %v11983_v22 = vpop.f32.mrb[102].mxu1 }
 0x2b2   : > { %v6109_v63 = vrot.slane %v6108_v40, 1  ;;  %v6116_v42 = vrot.slane %v6115_v33, 2  ;;  %v6123_v28 = vrot.slane %v6122_v26, 4  ;;  %v6129_v8 = vsel %vm1534_vm4, %v3042_v7, -inf  ;;  %8319 = vmatprep.mubr.msk.f32.mxu0 %vm1534_vm4, %v3042_v7  ;;  %14294 = vst [vmem:[#allocation18_spill] sm:$0xff] %v11977_v25  ;;  %v11980_v24 = vpop.permute.xlu1 %4328 }
 0x2b3   : > { %v2916_v49 = vadd.f32 %v14293_v58, %v11970_v30  ;;  %v7094_v10 = vsel %vm6926_vm7, %v6101_v59, %v7093_v61  ;;  %v6131_v46 = vmax.f32 %v6129_v8, %v6130_v19  ;;  %v3045_v17 = vmax.f32 %v2917_v32, 0.0 }
 0x2b4   : > { %v6110_v38 = vmax.f32 %v6108_v40, %v6109_v63  ;;  %v6117_v51 = vmax.f32 %v6115_v33, %v6116_v42  ;;  %v6124_v31 = vmax.f32 %v6122_v26, %v6123_v28  ;;  %8320 = vmatmul.mubr.msk.f32.gmra.mrb[98].mxu0 %vm1534_vm4, %v3043_v2  ;;  %v6783_v7 = vmax.f32 %v11890_v52, %v6782_v4  ;;  %v14295_v26 = vld [vmem:[#allocation14_spill] sm:$0xff]  ;;  %v11994_v63 = vpop.f32.mrb[103].mxu1 }
 0x2b5   : > { %v3044_v1 = vmax.f32 %v2916_v49, 0.0  ;;  %4442 = vrot.lane.b32.xlu0 %v11663_v9, %s8424_s22  ;;  %v7246_v61 = vsel %vm6928_vm8, %v11857_v16, %v7245_v18  ;;  %v6132_v33 = vrot.slane %v6131_v46, 4  ;;  %4440 = vrot.lane.b32.xlu1 %v11625_v48, %s8424_s22  ;;  %v2919_v2 = vadd.f32 %v11983_v22, %v14295_v26  ;;  %v12001_v16 = vpop.permute.xlu0 %4338  ;;  %v12007_v49 = vpop.f32.mrb[104].mxu1 }
 0x2b6   : > { %v6118_v59 = vrot.slane %v6117_v51, 1  ;;  %v6125_v40 = vrot.slane %v6124_v31, 2  ;;  %v6139_v42 = vsel %vm1534_vm4, %v3045_v17, -inf  ;;  %v2918_v52 = vadd.f32 %v14295_v26, %v11994_v63  ;;  %14296 = vst [vmem:[#allocation119_spill] sm:$0xff] %v12001_v16  ;;  %v12004_v32 = vpop.permute.xlu1 %4332 }
 0x2b7   : > { %v6138_v9 = vsel %vm1534_vm4, %v3044_v1, -inf  ;;  %8322 = vmatprep.mubr.msk.f32.mxu0 %vm1534_vm4, %v3044_v1  ;;  %v7095_v4 = vsel %vm6928_vm8, %v6110_v38, %v7094_v10  ;;  %v6133_v28 = vmax.f32 %v6131_v46, %v6132_v33  ;;  %v3047_v19 = vmax.f32 %v2919_v2, 0.0 }
 0x2b8   : > { %v6119_v18 = vmax.f32 %v6117_v51, %v6118_v59  ;;  %v6126_v48 = vmax.f32 %v6124_v31, %v6125_v40  ;;  %v6140_v58 = vmax.f32 %v6138_v9, %v6139_v42  ;;  %8323 = vmatmul.mubr.msk.f32.gmra.mrb[100].mxu0 %vm1534_vm4, %v3045_v17  ;;  %v3046_v8 = vmax.f32 %v2918_v52, 0.0  ;;  %v14297_v31 = vld [vmem:[#allocation21_spill] sm:$0xff]  ;;  %v12017_v17 = vpop.f32.mrb[105].mxu1 }
 0x2b9   : > { %4446 = vrot.lane.b32.xlu0 %v11691_v0, %s8424_s22  ;;  %v6784_v1 = vrot.slane %v6783_v7, 1  ;;  %v7247_v26 = vsel %vm6930_vm9, %v11880_v43, %v7246_v61  ;;  %v6134_v38 = vrot.slane %v6133_v28, 2  ;;  %4444 = vrot.lane.b32.xlu1 %v11652_v11, %s8424_s22  ;;  %v2921_v46 = vadd.f32 %v12007_v49, %v14297_v31  ;;  %v12024_v43 = vpop.permute.xlu0 %4342  ;;  %v12030_v16 = vpop.f32.mrb[106].mxu1 }
 0x2ba   : > { %v6127_v10 = vrot.slane %v6126_v48, 1  ;;  %v6141_v51 = vrot.slane %v6140_v58, 4  ;;  %v6148_v59 = vsel %vm1534_vm4, %v3047_v19, -inf  ;;  %v6147_v40 = vsel %vm1534_vm4, %v3046_v8, -inf  ;;  %8325 = vmatprep.mubr.msk.f32.mxu0 %vm1534_vm4, %v3046_v8  ;;  %14298 = vst [vmem:[#allocation121_spill] sm:$0xff] %v12024_v43  ;;  %v12027_v42 = vpop.permute.xlu1 %4336 }
 0x2bb   : > { %v2920_v0 = vadd.f32 %v14297_v31, %v12017_v17  ;;  %v7096_v61 = vsel %vm6930_vm9, %v6119_v18, %v7095_v4  ;;  %v6135_v33 = vmax.f32 %v6133_v28, %v6134_v38  ;;  %v6149_v2 = vmax.f32 %v6147_v40, %v6148_v59  ;;  %v12041_v38 = vpop.f32.mrb[107].mxu1 }
 0x2bc   : > { %v6142_v11 = vmax.f32 %v6140_v58, %v6141_v51  ;;  %v3049_v9 = vmax.f32 %v2921_v46, 0.0  ;;  %8326 = vmatmul.mubr.msk.f32.gmra.mrb[102].mxu0 %vm1534_vm4, %v3047_v19  ;;  %v6128_v31 = vmax.f32 %v6126_v48, %v6127_v10  ;;  %v6785_v8 = vmax.f32 %v6783_v7, %v6784_v1  ;;  %v14299_v58 = vld [vmem:[#allocation29_spill] sm:$0xff]  ;;  %v12053_v40 = vpop.f32.mrb[108].mxu1 }
 0x2bd   : > { %v3048_v52 = vmax.f32 %v2920_v0, 0.0  ;;  %4450 = vrot.lane.b32.xlu0 %v11715_v45, %s8424_s22  ;;  %v7248_v43 = vsel %vm6932_vm10, %v11962_v60, %v7247_v26  ;;  %v6150_v18 = vrot.slane %v6149_v2, 4  ;;  %7119 = vrot.lane.b32.xlu1 %v11674_v23, %s8427_s10  ;;  %v2923_v19 = vadd.f32 %v12030_v16, %v14299_v58  ;;  %v12047_v60 = vpop.permute.xlu0 %4346 }
 0x2be   : > { %v6143_v4 = vrot.slane %v6142_v11, 2  ;;  %v6157_v28 = vsel %vm1534_vm4, %v3049_v9, -inf  ;;  %v2922_v45 = vadd.f32 %v14299_v58, %v12041_v38  ;;  %14300 = vst [vmem:[#allocation12_spill] sm:$0xff] %v12047_v60  ;;  %v6136_v7 = vrot.slane %v6135_v33, 1  ;;  %v12050_v10 = vpop.permute.xlu1 %4340 }
 0x2bf   : > { %v6156_v51 = vsel %vm1534_vm4, %v3048_v52, -inf  ;;  %8328 = vmatprep.mubr.msk.f32.mxu0 %vm1534_vm4, %v3048_v52  ;;  %v7097_v48 = vsel %vm6932_vm10, %v6128_v31, %v7096_v61  ;;  %v6151_v26 = vmax.f32 %v6149_v2, %v6150_v18  ;;  %14301 = vst [vmem:[#allocation11_spill] sm:$0xff] %v12050_v10  ;;  %v3051_v46 = vmax.f32 %v2923_v19, 0.0  ;;  %v12063_v31 = vpop.f32.mrb[109].mxu1 }
 0x2c0   : > { %v6144_v1 = vmax.f32 %v6142_v11, %v6143_v4  ;;  %v6158_v23 = vmax.f32 %v6156_v51, %v6157_v28  ;;  %8329 = vmatmul.mubr.msk.f32.gmra.mrb[104].mxu0 %vm1534_vm4, %v3049_v9  ;;  %v3050_v59 = vmax.f32 %v2922_v45, 0.0  ;;  %v6137_v0 = vmax.f32 %v6135_v33, %v6136_v7  ;;  %v14303_v4 = vld [vmem:[#allocation65_spill] sm:$0xff]  ;;  %v8180_v51 = vpop.f32.mrb[4].mxu0  ;;  %v12079_v60 = vpop.f32.mrb[110].mxu1 }
 0x2c1   : > { %4454 = vrot.lane.b32.xlu0 %v11740_v47, %s8424_s22  ;;  %v12058_v52 = vsel %vm6934_vm11, %v6785_v8, %v7248_v43  ;;  %v6152_v61 = vrot.slane %v6151_v26, 2  ;;  %v6166_v2 = vsel %vm1534_vm4, %v3051_v46, -inf  ;;  %4448 = vrot.lane.b32.xlu1 %v11678_v34, %s8424_s22  ;;  %v2925_v18 = vadd.f32 %v12053_v40, %v14303_v4  ;;  %v12071_v43 = vpop.permute.xlu0 %7113 }
 0x2c2   : > { %14302 = vst [vmem:[#allocation53_spill] sm:$0xff] %v12058_v52  ;;  %v6145_v58 = vrot.slane %v6144_v1, 1  ;;  %v6159_v11 = vrot.slane %v6158_v23, 4  ;;  %v6165_v9 = vsel %vm1534_vm4, %v3050_v59, -inf  ;;  %v2924_v47 = vadd.f32 %v14303_v4, %v12063_v31  ;;  %8331 = vmatprep.mubr.msk.f32.mxu0 %vm1534_vm4, %v3050_v59  ;;  %14304 = vst [vmem:[#allocation54_spill] sm:$0xff] %v12071_v43  ;;  %v12076_v19 = vpop.permute.xlu1 %4344 }
 0x2c3   : > { %v12074_v33 = vsel %vm6934_vm11, %v6137_v0, %v7097_v48  ;;  %v6153_v8 = vmax.f32 %v6151_v26, %v6152_v61  ;;  %v6167_v34 = vmax.f32 %v6165_v9, %v6166_v2  ;;  %14305 = vst [vmem:[#allocation113_spill] sm:$0xff] %v12076_v19  ;;  %v3053_v7 = vmax.f32 %v2925_v18, 0.0  ;;  %v3531_v48 = vpop.f32.mrb[5].mxu0  ;;  %v14306_v61 = vld [vmem:[#allocation31_spill] sm:$0xff]  ;;  %v14308_v2 = vld [vmem:[#allocation69_spill] sm:$0xff] }
 0x2c4   : > { %v6160_v28 = vmax.f32 %v6158_v23, %v6159_v11  ;;  %8332 = vmatmul.mubr.msk.f32.gmra.mrb[106].mxu0 %vm1534_vm4, %v3051_v46  ;;  %v6146_v45 = vmax.f32 %v6144_v1, %v6145_v58  ;;  %v3052_v52 = vmax.f32 %v2924_v47, 0.0  ;;  %v4683_v59 = vadd.f32 %v8180_v51, %v11795_v57  ;;  %v12088_v1 = vpop.f32.mrb[111].mxu1  ;;  %v8183_v43 = vpop.f32.mrb[6].mxu0 }
 0x2c5   : > { %4458 = vrot.lane.b32.xlu0 %v11762_v20, %s8424_s22  ;;  %v6154_v0 = vrot.slane %v6153_v8, 1  ;;  %v6168_v23 = vrot.slane %v6167_v34, 4  ;;  %4452 = vrot.lane.b32.xlu1 %v11703_v36, %s8424_s22  ;;  %v2927_v46 = vadd.f32 %v12079_v60, %v14306_v61  ;;  %v6175_v58 = vsel %vm1534_vm4, %v3053_v7, -inf  ;;  %v12095_v57 = vpop.permute.xlu0 %4350  ;;  %v12101_v25 = vpop.f32.mrb[112].mxu1 }
 0x2c6   : > { %v6161_v26 = vrot.slane %v6160_v28, 2  ;;  %v6174_v11 = vsel %vm1534_vm4, %v3052_v52, -inf  ;;  %v2926_v20 = vadd.f32 %v14306_v61, %v12088_v1  ;;  %8334 = vmatprep.mubr.msk.f32.mxu0 %vm1534_vm4, %v3052_v52  ;;  %14307 = vst [vmem:[#allocation81_spill] sm:$0xff] %v12095_v57  ;;  %v5003_v9 = vadd.f32 %v14308_v2, %v4683_v59  ;;  %v12098_v51 = vpop.permute.xlu1 %4348  ;;  %14310 = vst [vmem:[#allocation83_spill] sm:$0xff] %v12101_v25  ;;  %v3541_v52 = vpop.f32.mrb[7].mxu0 }
 0x2c7   : > { %v6155_v4 = vmax.f32 %v6153_v8, %v6154_v0  ;;  %v6169_v18 = vmax.f32 %v6167_v34, %v6168_v23  ;;  %v6176_v47 = vmax.f32 %v6174_v11, %v6175_v58  ;;  %14309 = vst [vmem:[#allocation49_spill] sm:$0xff] %v12098_v51  ;;  %v3055_v19 = vmax.f32 %v2927_v46, 0.0 }
 0x2c8   : > { %v6162_v36 = vmax.f32 %v6160_v28, %v6161_v26  ;;  %8335 = vmatmul.mubr.msk.f32.gmra.mrb[108].mxu0 %vm1534_vm4, %v3053_v7  ;;  %v3054_v10 = vmax.f32 %v2926_v20, 0.0  ;;  %v4682_v61 = vadd.f32 %v11747_v62, %v3531_v48  ;;  %v12111_v7 = vpop.f32.mrb[113].mxu1  ;;  %v14312_v26 = vld [vmem:[#allocation32_spill] sm:$0xff]  ;;  %v5131_v58 = vsel %vm1534_vm4, %v5003_v9, -inf }
 0x2c9   : > { %4462 = vrot.lane.b32.xlu0 %v11785_v27, %s8424_s22  ;;  %v12107_v8 = vsel %vm6922_vm5, %v6155_v4, %v6146_v45  ;;  %v6170_v28 = vrot.slane %v6169_v18, 2  ;;  %v6177_v34 = vrot.slane %v6176_v47, 4  ;;  %4456 = vrot.lane.b32.xlu1 %v11727_v3, %s8424_s22  ;;  %v6184_v59 = vsel %vm1534_vm4, %v3055_v19, -inf  ;;  %v12120_v45 = vpop.permute.xlu0 %4354 }
 0x2ca   : > { %14311 = vst [vmem:[#allocation111_spill] sm:$0xff] %v12107_v8  ;;  %v6183_v0 = vsel %vm1534_vm4, %v3054_v10, -inf  ;;  %v2929_v62 = vadd.f32 %v12101_v25, %v14312_v26  ;;  %v2928_v27 = vadd.f32 %v14312_v26, %v12111_v7  ;;  %8337 = vmatprep.mubr.msk.f32.mxu0 %vm1534_vm4, %v3054_v10  ;;  %14313 = vst [vmem:[#allocation75_spill] sm:$0xff] %v12120_v45  ;;  %v6163_v48 = vrot.slane %v6162_v36, 1  ;;  %v12122_v3 = vpop.permute.xlu1 %4352  ;;  %v12127_v8 = vpop.f32.mrb[114].mxu1 }
 0x2cb   : > { %v6178_v23 = vmax.f32 %v6176_v47, %v6177_v34  ;;  %v6185_v46 = vmax.f32 %v6183_v0, %v6184_v59  ;;  %14314 = vst [vmem:[#allocation86_spill] sm:$0xff] %v12122_v3  ;;  %v5002_v4 = vadd.f32 %v14308_v2, %v4682_v61  ;;  %14315 = vst [vmem:[#allocation87_spill] sm:$0xff] %v12127_v8  ;;  %v8186_v10 = vpop.f32.mrb[8].mxu0  ;;  %v12138_v9 = vpop.f32.mrb[115].mxu1  ;;  %v14318_v3 = vld [vmem:[#allocation70_spill] sm:$0xff] }
 0x2cc   : > { %8338 = vmatmul.mubr.msk.f32.gmra.mrb[110].mxu0 %vm1534_vm4, %v3055_v19  ;;  %v3057_v11 = vmax.f32 %v2929_v62, 0.0  ;;  %v3056_v20 = vmax.f32 %v2928_v27, 0.0  ;;  %v4685_v26 = vadd.f32 %v8183_v43, %v11824_v41  ;;  %v12132_v47 = vmax.f32 %v6169_v18, %v6170_v28  ;;  %v12140_v2 = vpop.f32.mrb[9].mxu0 }
 0x2cd   : > { %4466 = vrot.lane.b32.xlu0 %v11814_v13, %s8424_s22  ;;  %v6179_v34 = vrot.slane %v6178_v23, 2  ;;  %v6186_v59 = vrot.slane %v6185_v46, 4  ;;  %4460 = vrot.lane.b32.xlu1 %v11751_v39, %s8424_s22  ;;  %v2931_v19 = vadd.f32 %v12127_v8, %v11551_v35  ;;  %v5130_v13 = vsel %vm1534_vm4, %v5002_v4, -inf  ;;  %v12148_v61 = vpop.permute.xlu0 %4358  ;;  %v12154_v4 = vpop.f32.mrb[116].mxu1 }
 0x2ce   : > { %v6193_v41 = vsel %vm1534_vm4, %v3057_v11, -inf  ;;  %v6192_v43 = vsel %vm1534_vm4, %v3056_v20, -inf  ;;  %v2930_v18 = vadd.f32 %v11551_v35, %v12138_v9  ;;  %8340 = vmatprep.mubr.msk.f32.mxu0 %vm1534_vm4, %v3056_v20  ;;  %14316 = vst [vmem:[#allocation33_spill] sm:$0xff] %v12148_v61  ;;  %v12150_v62 = vpop.permute.xlu1 %4356  ;;  %v5132_v27 = vmax.f32 %v5130_v13, %v5131_v58  ;;  %14319 = vst [vmem:[#allocation35_spill] sm:$0xff] %v12154_v4  ;;  %v12158_v35 = vpop.f32.mrb[10].mxu0 }
 0x2cf   : > { %v6180_v39 = vmax.f32 %v6178_v23, %v6179_v34  ;;  %v6187_v28 = vmax.f32 %v6185_v46, %v6186_v59  ;;  %v6194_v0 = vmax.f32 %v6192_v43, %v6193_v41  ;;  %14317 = vst [vmem:[#allocation108_spill] sm:$0xff] %v12150_v62  ;;  %v3059_v45 = vmax.f32 %v2931_v19, 0.0  ;;  %v12167_v34 = vpop.f32.mrb[11].mxu0 }
 0x2d0   : > { %8341 = vmatmul.mubr.msk.f32.gmra.mrb[112].mxu0 %vm1534_vm4, %v3057_v11  ;;  %v3058_v57 = vmax.f32 %v2930_v18, 0.0  ;;  %v5005_v8 = vadd.f32 %v14318_v3, %v4685_v26  ;;  %v12160_v20 = vmax.f32 %v6162_v36, %v6163_v48  ;;  %v4684_v58 = vadd.f32 %v11769_v5, %v3541_v52  ;;  %v12165_v11 = vpop.f32.mrb[117].mxu1  ;;  %v14323_v18 = vld [vmem:[#allocation115_spill] sm:$0xff] }
 0x2d1   : > { %4470 = vrot.lane.b32.xlu0 %v11838_v56, %s8424_s22  ;;  %v6188_v23 = vrot.slane %v6187_v28, 2  ;;  %v6195_v46 = vrot.slane %v6194_v0, 4  ;;  %4464 = vrot.lane.b32.xlu1 %v11775_v12, %s8424_s22  ;;  %v6172_v26 = vrot.slane %v12132_v47, 1  ;;  %v5133_v59 = vrot.slane %v5132_v27, 4  ;;  %v12173_v36 = vpop.permute.xlu0 %4362  ;;  %v12184_v61 = vpop.f32.mrb[118].mxu1 }
 0x2d2   : > { %14320 = vst [vmem:[#allocation109_spill] sm:$0xff] %v12160_v20  ;;  %v6202_v56 = vsel %vm1534_vm4, %v3059_v45, -inf  ;;  %v6201_v19 = vsel %vm1534_vm4, %v3058_v57, -inf  ;;  %8343 = vmatprep.mubr.msk.f32.mxu0 %vm1534_vm4, %v3058_v57  ;;  %14321 = vst [vmem:[#allocation112_spill] sm:$0xff] %v12173_v36  ;;  %v6181_v48 = vrot.slane %v6180_v39, 1  ;;  %v5140_v5 = vsel %vm1534_vm4, %v5005_v8, -inf  ;;  %v12176_v52 = vpop.permute.xlu1 %4360 }
 0x2d3   : > { %v6196_v41 = vmax.f32 %v6194_v0, %v6195_v46  ;;  %v6203_v12 = vmax.f32 %v6201_v19, %v6202_v56  ;;  %14322 = vst [vmem:[#allocation110_spill] sm:$0xff] %v12176_v52  ;;  %v5134_v43 = vmax.f32 %v5132_v27, %v5133_v59  ;;  %v5004_v13 = vadd.f32 %v14318_v3, %v4684_v58  ;;  %v12188_v0 = vpop.f32.mrb[12].mxu0  ;;  %v12195_v27 = vpop.f32.mrb[119].mxu1 }
 0x2d4   : > { %8344 = vmatmul.mubr.msk.f32.gmra.mrb[114].mxu0 %vm1534_vm4, %v3059_v45  ;;  %v2933_v20 = vadd.f32 %v12154_v4, %v14323_v18  ;;  %v2932_v57 = vadd.f32 %v14323_v18, %v12165_v11  ;;  %14324 = vst [vmem:[#allocation13_spill] sm:$0xff] %v12184_v61  ;;  %v12190_v8 = vmax.f32 %v6187_v28, %v6188_v23  ;;  %14325 = vst [vmem:[#allocation14_spill] sm:$0xff] %v12195_v27  ;;  %v12197_v58 = vpop.f32.mrb[13].mxu0 }
 0x2d5   : > { %4474 = vrot.lane.b32.xlu0 %v11863_v14, %s8424_s22  ;;  %v6197_v46 = vrot.slane %v6196_v41, 2  ;;  %v6204_v45 = vrot.slane %v6203_v12, 4  ;;  %4468 = vrot.lane.b32.xlu1 %v11798_v55, %s8424_s22  ;;  %v4687_v3 = vadd.f32 %v8186_v10, %v11847_v29  ;;  %v5135_v59 = vrot.slane %v5134_v43, 2  ;;  %v12200_v18 = vpop.permute.xlu0 %4366 }
 0x2d6   : > { %v5139_v56 = vsel %vm1534_vm4, %v5004_v13, -inf  ;;  %v3061_v19 = vmax.f32 %v2933_v20, 0.0  ;;  %v3060_v14 = vmax.f32 %v2932_v57, 0.0  ;;  %14326 = vst [vmem:[#allocation21_spill] sm:$0xff] %v12200_v18  ;;  %v12203_v28 = vmax.f32 %v12132_v47, %v6172_v26  ;;  %v12209_v29 = vpop.permute.xlu1 %4364  ;;  %v14330_v13 = vld [vmem:[#allocation104_spill] sm:$0xff]  ;;  %v12215_v57 = vpop.f32.mrb[120].mxu1 }
 0x2d7   : > { %v12205_v23 = vmax.f32 %v6180_v39, %v6181_v48  ;;  %v12207_v36 = vmax.f32 %v6203_v12, %v6204_v45  ;;  %v5141_v55 = vmax.f32 %v5139_v56, %v5140_v5  ;;  %14329 = vst [vmem:[#allocation31_spill] sm:$0xff] %v12209_v29  ;;  %v5136_v10 = vmax.f32 %v5134_v43, %v5135_v59  ;;  %v12225_v12 = vpop.f32.mrb[121].mxu1  ;;  %v12227_v5 = vpop.f32.mrb[14].mxu0  ;;  %v14334_v59 = vld [vmem:[#allocation51_spill] sm:$0xff] }
 0x2d8   : > { %14327 = vst [vmem:[#allocation29_spill] sm:$0xff] %v12203_v28  ;;  %v6211_v52 = vsel %vm1534_vm4, %v3061_v19, -inf  ;;  %v6210_v62 = vsel %vm1534_vm4, %v3060_v14, -inf  ;;  %v5007_v20 = vadd.f32 %v14330_v13, %v4687_v3  ;;  %8346 = vmatprep.mubr.msk.f32.mxu0 %vm1534_vm4, %v3060_v14  ;;  %14331 = vst [vmem:[#allocation69_spill] sm:$0xff] %v12215_v57  ;;  %v12220_v39 = vmax.f32 %v6196_v41, %v6197_v46  ;;  %v14338_v28 = vld [vmem:[#allocation23_spill] sm:$0xff] }
 0x2d9   : > { %14328 = vst [vmem:[#allocation65_spill] sm:$0xff] %v12205_v23  ;;  %7121 = vrot.lane.b32.xlu0 %v11874_v37, %s8427_s10  ;;  %v5142_v26 = vrot.slane %v5141_v55, 4  ;;  %v6212_v48 = vmax.f32 %v6210_v62, %v6211_v52  ;;  %4472 = vrot.lane.b32.xlu1 %v11828_v6, %s8424_s22  ;;  %14332 = vst [vmem:[#allocation32_spill] sm:$0xff] %v12225_v12  ;;  %v5137_v43 = vrot.slane %v5136_v10, 1  ;;  %v14333_v37 = vld [vmem:[#allocation10_spill] sm:$0xff]  ;;  %v12234_v46 = vpop.permute.xlu0 %4370  ;;  %v12236_v62 = vpop.f32.mrb[15].mxu0 }
 0x2da   : > { %8347 = vmatmul.mubr.msk.f32.gmra.mrb[116].mxu0 %vm1534_vm4, %v3061_v19  ;;  %v4686_v3 = vadd.f32 %v14333_v37, %v12140_v2  ;;  %v2935_v41 = vadd.f32 %v12184_v61, %v14334_v59  ;;  %14335 = vst [vmem:[#allocation70_spill] sm:$0xff] %v12234_v46  ;;  %v5149_v56 = vsel %vm1534_vm4, %v5007_v20, -inf  ;;  %v2934_v19 = vadd.f32 %v14334_v59, %v12195_v27  ;;  %v12241_v14 = vpop.permute.xlu1 %4368  ;;  %v12246_v23 = vpop.f32.mrb[122].mxu1  ;;  %v14339_v46 = vld [vmem:[#allocation30_spill] sm:$0xff] }
 0x2db   : > { %v5143_v6 = vmax.f32 %v5141_v55, %v5142_v26  ;;  %v6213_v52 = vrot.slane %v6212_v48, 4  ;;  %14336 = vst [vmem:[#allocation115_spill] sm:$0xff] %v12241_v14  ;;  %v5138_v45 = vmax.f32 %v5136_v10, %v5137_v43  ;;  %v4689_v37 = vadd.f32 %v12158_v35, %v11876_v53  ;;  %14337 = vst [vmem:[#allocation104_spill] sm:$0xff] %v12246_v23  ;;  %v12254_v10 = vpop.f32.mrb[123].mxu1  ;;  %v14341_v43 = vld [vmem:[#allocation45_spill] sm:$0xff] }
 0x2dc   : > { %v5006_v47 = vadd.f32 %v14330_v13, %v4686_v3  ;;  %v3063_v2 = vmax.f32 %v2935_v41, 0.0  ;;  %v3062_v20 = vmax.f32 %v2934_v19, 0.0  ;;  %v4688_v59 = vadd.f32 %v14338_v28, %v12167_v34  ;;  %14340 = vst [vmem:[#allocation10_spill] sm:$0xff] %v12254_v10  ;;  %v12256_v13 = vpop.f32.mrb[16].mxu0 }
 0x2dd   : > { %4478 = vrot.lane.b32.xlu0 %v11896_v21, %s8424_s22  ;;  %v5144_v55 = vrot.slane %v5143_v6, 2  ;;  %v6214_v26 = vmax.f32 %v6212_v48, %v6213_v52  ;;  %4476 = vrot.lane.b32.xlu1 %v14339_v46, %s8424_s22  ;;  %v5009_v3 = vadd.f32 %v14341_v43, %v4689_v37  ;;  %v14342_v21 = vld [vmem:[#allocation16_spill] sm:$0xff]  ;;  %v12263_v41 = vpop.permute.xlu0 %4374  ;;  %v12265_v52 = vpop.f32.mrb[17].mxu0 }
 0x2de   : > { %v5148_v53 = vsel %vm1534_vm4, %v5006_v47, -inf  ;;  %v6220_v35 = vsel %vm1534_vm4, %v3063_v2, -inf  ;;  %v2937_v48 = vadd.f32 %v12215_v57, %v14342_v21  ;;  %14343 = vst [vmem:[#allocation51_spill] sm:$0xff] %v12263_v41  ;;  %v6219_v19 = vsel %vm1534_vm4, %v3062_v20, -inf  ;;  %8349 = vmatprep.mubr.msk.f32.mxu0 %vm1534_vm4, %v3062_v20  ;;  %v12269_v18 = vpop.permute.xlu1 %4372  ;;  %v12274_v41 = vpop.f32.mrb[124].mxu1 }
 0x2df   : > { %v5145_v34 = vmax.f32 %v5143_v6, %v5144_v55  ;;  %v6215_v28 = vrot.slane %v6214_v26, 2  ;;  %v5150_v46 = vmax.f32 %v5148_v53, %v5149_v56  ;;  %14344 = vst [vmem:[#allocation23_spill] sm:$0xff] %v12269_v18  ;;  %v6221_v47 = vmax.f32 %v6219_v19, %v6220_v35  ;;  %8350 = vmatmul.mubr.msk.f32.gmra.mrb[118].mxu0 %vm1534_vm4, %v3063_v2  ;;  %v14345_v53 = vld [vmem:[#allocation120_spill] sm:$0xff]  ;;  %v12282_v35 = vpop.f32.mrb[125].mxu1 }
 0x2e0   : > { %v5158_v14 = vsel %vm1534_vm4, %v5009_v3, -inf  ;;  %v5008_v37 = vadd.f32 %v14341_v43, %v4688_v59  ;;  %v3065_v29 = vmax.f32 %v2937_v48, 0.0  ;;  %v2936_v20 = vadd.f32 %v14342_v21, %v12225_v12  ;;  %v12284_v59 = vpop.f32.mrb[18].mxu0  ;;  %v14346_v48 = vld [vmem:[#allocation68_spill] sm:$0xff]  ;;  %v14349_v12 = vld [vmem:[#allocation19_spill] sm:$0xff] }
 0x2e1   : > { %4482 = vrot.lane.b32.xlu0 %v11919_v50, %s8424_s22  ;;  %v5146_v6 = vrot.slane %v5145_v34, 1  ;;  %v6216_v56 = vmax.f32 %v6214_v26, %v6215_v28  ;;  %v5151_v55 = vrot.slane %v5150_v46, 4  ;;  %4480 = vrot.lane.b32.xlu1 %v14345_v53, %s8424_s22  ;;  %v6222_v43 = vrot.slane %v6221_v47, 4  ;;  %v12290_v26 = vpop.permute.xlu0 %4378  ;;  %v12292_v28 = vpop.f32.mrb[19].mxu0 }
 0x2e2   : > { %v5157_v2 = vsel %vm1534_vm4, %v5008_v37, -inf  ;;  %v6229_v3 = vsel %vm1534_vm4, %v3065_v29, -inf  ;;  %v4691_v50 = vadd.f32 %v12188_v0, %v14346_v48  ;;  %14347 = vst [vmem:[#allocation30_spill] sm:$0xff] %v12290_v26  ;;  %v12294_v57 = vpop.permute.xlu1 %4376  ;;  %v3064_v4 = vmax.f32 %v2936_v20, 0.0  ;;  %v14350_v37 = vld [vmem:[#allocation96_spill] sm:$0xff]  ;;  %v12299_v25 = vpop.f32.mrb[126].mxu1 }
 0x2e3   : > { %v5147_v21 = vmax.f32 %v5145_v34, %v5146_v6  ;;  %v6217_v19 = vrot.slane %v6216_v56, 1  ;;  %v5152_v18 = vmax.f32 %v5150_v46, %v5151_v55  ;;  %v5159_v53 = vmax.f32 %v5157_v2, %v5158_v14  ;;  %14348 = vst [vmem:[#allocation45_spill] sm:$0xff] %v12294_v57  ;;  %v14351_v14 = vld [vmem:[#allocation17_spill] sm:$0xff]  ;;  %v12308_v55 = vpop.f32.mrb[20].mxu0 }
 0x2e4   : > { %v6223_v61 = vmax.f32 %v6221_v47, %v6222_v43  ;;  %v5011_v51 = vadd.f32 %v14349_v12, %v4691_v50  ;;  %v4690_v27 = vadd.f32 %v14350_v37, %v12197_v58  ;;  %v12306_v47 = vpop.f32.mrb[127].mxu1  ;;  %v6228_v58 = vsel %vm1534_vm4, %v3064_v4, -inf  ;;  %8352 = vmatprep.mubr.msk.f32.mxu0 %vm1534_vm4, %v3064_v4 }
 0x2e5   : > { %4486 = vrot.lane.b32.xlu0 %v11944_v15, %s8424_s22  ;;  %v6923_v0 = vsel %vm6922_vm5, %v5147_v21, %v5138_v45  ;;  %v6218_v34 = vmax.f32 %v6216_v56, %v6217_v19  ;;  %v5153_v6 = vrot.slane %v5152_v18, 2  ;;  %v5160_v46 = vrot.slane %v5159_v53, 4  ;;  %4484 = vrot.lane.b32.xlu1 %v14351_v14, %s8424_s22  ;;  %v12314_v15 = vpop.permute.xlu0 %4382  ;;  %v12316_v45 = vpop.f32.mrb[21].mxu0  ;;  %v14353_v21 = vld [vmem:[#allocation91_spill] sm:$0xff] }
 0x2e6   : > { %v6224_v20 = vrot.slane %v6223_v61, 2  ;;  %v5167_v43 = vsel %vm1534_vm4, %v5011_v51, -inf  ;;  %v5010_v2 = vadd.f32 %v14349_v12, %v4690_v27  ;;  %14352 = vst [vmem:[#allocation16_spill] sm:$0xff] %v12314_v15  ;;  %v6230_v50 = vmax.f32 %v6228_v58, %v6229_v3  ;;  %8353 = vmatmul.mubr.msk.f32.gmra.mrb[120].mxu0 %vm1534_vm4, %v3065_v29  ;;  %v12321_v37 = vpop.permute.xlu1 %4380  ;;  %v14355_v27 = vld [vmem:[#allocation103_spill] sm:$0xff]  ;;  %v12328_v15 = vpop.f32.mrb[128].mxu1 }
 0x2e7   : > { %v5154_v56 = vmax.f32 %v5152_v18, %v5153_v6  ;;  %v5161_v48 = vmax.f32 %v5159_v53, %v5160_v46  ;;  %v2939_v19 = vadd.f32 %v12246_v23, %v14353_v21  ;;  %14354 = vst [vmem:[#allocation120_spill] sm:$0xff] %v12321_v37  ;;  %v2938_v4 = vadd.f32 %v14353_v21, %v12254_v10  ;;  %v14356_v6 = vld [vmem:[#allocation117_spill] sm:$0xff]  ;;  %v12336_v46 = vpop.f32.mrb[22].mxu0 }
 0x2e8   : > { %v6225_v14 = vmax.f32 %v6223_v61, %v6224_v20  ;;  %v5166_v51 = vsel %vm1534_vm4, %v5010_v2, -inf  ;;  %v4693_v12 = vadd.f32 %v12227_v5, %v14355_v27  ;;  %v6231_v53 = vrot.slane %v6230_v50, 4  ;;  %v12334_v61 = vpop.f32.mrb[129].mxu1  ;;  %v14358_v5 = vld [vmem:[#allocation2_spill] sm:$0xff]  ;;  %v12341_v26 = vpop.f32.mrb[23].mxu0 }
 0x2e9   : > { %4490 = vrot.lane.b32.xlu0 %v11970_v30, %s8424_s22  ;;  %v5155_v18 = vrot.slane %v5154_v56, 1  ;;  %v5162_v3 = vrot.slane %v5161_v48, 2  ;;  %v5168_v29 = vmax.f32 %v5166_v51, %v5167_v43  ;;  %4488 = vrot.lane.b32.xlu1 %v14356_v6, %s8424_s22  ;;  %14357 = vst [vmem:[#allocation68_spill] sm:$0xff] %v12334_v61  ;;  %v3067_v58 = vmax.f32 %v2939_v19, 0.0  ;;  %v12339_v27 = vpop.permute.xlu0 %4386 }
 0x2ea   : > { %v6226_v20 = vrot.slane %v6225_v14, 1  ;;  %v3066_v2 = vmax.f32 %v2938_v4, 0.0  ;;  %v5013_v21 = vadd.f32 %v14358_v5, %v4693_v12  ;;  %v6232_v57 = vmax.f32 %v6230_v50, %v6231_v53  ;;  %v12343_v51 = vpop.permute.xlu1 %7115  ;;  %v12349_v4 = vpop.f32.mrb[130].mxu1  ;;  %v14361_v53 = vld [vmem:[#allocation67_spill] sm:$0xff] }
 0x2eb   : > { %v5156_v30 = vmax.f32 %v5154_v56, %v5155_v18  ;;  %v5163_v37 = vmax.f32 %v5161_v48, %v5162_v3  ;;  %v5169_v43 = vrot.slane %v5168_v29, 4  ;;  %14359 = vst [vmem:[#allocation19_spill] sm:$0xff] %v12343_v51  ;;  %v6238_v23 = vsel %vm1534_vm4, %v3067_v58, -inf }
 0x2ec   : > { %v6227_v6 = vmax.f32 %v6225_v14, %v6226_v20  ;;  %v6237_v10 = vsel %vm1534_vm4, %v3066_v2, -inf  ;;  %v5176_v19 = vsel %vm1534_vm4, %v5013_v21, -inf  ;;  %8355 = vmatprep.mubr.msk.f32.mxu0 %vm1534_vm4, %v3066_v2  ;;  %v6233_v50 = vrot.slane %v6232_v57, 2  ;;  %v12357_v14 = vpop.f32.mrb[131].mxu1 }
 0x2ed   : > { %4494 = vrot.lane.b32.xlu0 %v11994_v63, %s8424_s22  ;;  %v6925_v56 = vsel %vm6924_vm6, %v5156_v30, %v6923_v0  ;;  %v5164_v48 = vrot.slane %v5163_v37, 1  ;;  %v5170_v12 = vmax.f32 %v5168_v29, %v5169_v43  ;;  %8356 = vmatmul.mubr.msk.f32.gmra.mrb[122].mxu0 %vm1534_vm4, %v3067_v58  ;;  %v6239_v3 = vmax.f32 %v6237_v10, %v6238_v23  ;;  %v14362_v63 = vld [vmem:[#allocation28_spill] sm:$0xff]  ;;  %v12366_v2 = vpop.permute.xlu0 %4390 }
 0x2ee   : > { %4492 = vrot.lane.b32.xlu1 %v11957_v44, %s8424_s22  ;;  %v12360_v18 = vsel %vm6922_vm5, %v6227_v6, %v6218_v34  ;;  %v4692_v20 = vadd.f32 %v14361_v53, %v12236_v62  ;;  %v2941_v0 = vadd.f32 %v12274_v41, %v14362_v63  ;;  %v6234_v21 = vmax.f32 %v6232_v57, %v6233_v50  ;;  %v12370_v30 = vpop.permute.xlu1 %4384 }
 0x2ef   : > { %14360 = vst [vmem:[#allocation96_spill] sm:$0xff] %v12360_v18  ;;  %v5165_v29 = vmax.f32 %v5163_v37, %v5164_v48  ;;  %v5171_v58 = vrot.slane %v5170_v12, 2  ;;  %v2940_v44 = vadd.f32 %v14362_v63, %v12282_v35  ;;  %v6240_v43 = vrot.slane %v6239_v3, 4  ;;  %v12391_v53 = vpop.f32.mrb[24].mxu0  ;;  %v14369_v37 = vld [vmem:[#allocation101_spill] sm:$0xff] }
 0x2f0   : > { %v5012_v34 = vadd.f32 %v14358_v5, %v4692_v20  ;;  %v3069_v23 = vmax.f32 %v2941_v0, 0.0  ;;  %v4695_v62 = vadd.f32 %v12256_v13, %v11954_v54  ;;  %v14363_v10 = vrot.slane %v12190_v8, 1 }
 0x2f1   : > { %4498 = vrot.lane.b32.xlu0 %v12017_v17, %s8424_s22  ;;  %v12384_v6 = vsel %vm6926_vm7, %v5165_v29, %v6925_v56  ;;  %v3068_v48 = vmax.f32 %v2940_v44, 0.0  ;;  %v6241_v5 = vmax.f32 %v6239_v3, %v6240_v43  ;;  %v14365_v17 = vld [vmem:[#allocation64_spill] sm:$0xff]  ;;  %v14366_v20 = vrot.slane %v12207_v36, 2  ;;  %v12404_v29 = vpop.f32.mrb[25].mxu0 }
 0x2f2   : > { %v12380_v57 = vmax.f32 %v12190_v8, %v14363_v10  ;;  %14364 = vst [vmem:[#allocation17_spill] sm:$0xff] %v12384_v6  ;;  %4496 = vrot.lane.b32.xlu1 %v11983_v22, %s8424_s22  ;;  %v5175_v54 = vsel %vm1534_vm4, %v5012_v34, -inf  ;;  %v6247_v13 = vsel %vm1534_vm4, %v3069_v23, -inf  ;;  %v5015_v50 = vadd.f32 %v14365_v17, %v4695_v62  ;;  %v12393_v8 = vpop.permute.xlu0 %4394  ;;  %v12402_v3 = vpop.permute.xlu1 %4388  ;;  %v14367_v62 = vld [vmem:[#allocation8_spill] sm:$0xff] }
 0x2f3   : > { %v12398_v56 = vmax.f32 %v12207_v36, %v14366_v20  ;;  %v6235_v63 = vrot.slane %v6234_v21, 1  ;;  %v5177_v0 = vmax.f32 %v5175_v54, %v5176_v19  ;;  %v6246_v22 = vsel %vm1534_vm4, %v3068_v48, -inf  ;;  %8358 = vmatprep.mubr.msk.f32.mxu0 %vm1534_vm4, %v3068_v48  ;;  %v14368_v54 = vld [vmem:[#allocation27_spill] sm:$0xff] }
 0x2f4   : > { %v5172_v44 = vmax.f32 %v5170_v12, %v5171_v58  ;;  %v6242_v43 = vrot.slane %v6241_v5, 2  ;;  %v6248_v34 = vmax.f32 %v6246_v22, %v6247_v13  ;;  %v4694_v10 = vadd.f32 %v14367_v62, %v12265_v52  ;;  %8359 = vmatmul.mubr.msk.f32.gmra.mrb[124].mxu0 %vm1534_vm4, %v3069_v23 }
 0x2f5   : > { %4502 = vrot.lane.b32.xlu0 %v12041_v38, %s8424_s22  ;;  %v5178_v36 = vrot.slane %v5177_v0, 4  ;;  %v5185_v19 = vsel %vm1534_vm4, %v5015_v50, -inf  ;;  %v2943_v48 = vadd.f32 %v12299_v25, %v14368_v54  ;;  %v2942_v20 = vadd.f32 %v14368_v54, %v12306_v47  ;;  %v12421_v38 = vpop.f32.mrb[26].mxu0 }
 0x2f6   : > { %4500 = vrot.lane.b32.xlu1 %v12007_v49, %s8424_s22  ;;  %v6243_v12 = vmax.f32 %v6241_v5, %v6242_v43  ;;  %v6249_v58 = vrot.slane %v6248_v34, 4  ;;  %v5014_v52 = vadd.f32 %v14365_v17, %v4694_v10  ;;  %v4697_v23 = vadd.f32 %v12284_v59, %v11980_v24  ;;  %v12423_v13 = vpop.permute.xlu0 %4398  ;;  %v12427_v6 = vpop.permute.xlu1 %4392  ;;  %v14371_v24 = vld [vmem:[#allocation6_spill] sm:$0xff] }
 0x2f7   : > { %v5179_v50 = vmax.f32 %v5177_v0, %v5178_v36  ;;  %v3071_v22 = vmax.f32 %v2943_v48, 0.0  ;;  %v3070_v62 = vmax.f32 %v2942_v20, 0.0  ;;  %v4696_v54 = vadd.f32 %v14369_v37, %v12292_v28  ;;  %v12429_v49 = vpop.f32.mrb[27].mxu0 }
 0x2f8   : > { %v12431_v5 = vmax.f32 %v6234_v21, %v6235_v63  ;;  %v6250_v17 = vmax.f32 %v6248_v34, %v6249_v58  ;;  %v5184_v43 = vsel %vm1534_vm4, %v5014_v52, -inf  ;;  %v5017_v59 = vadd.f32 %v14371_v24, %v4697_v23  ;;  %v12443_v48 = vpop.f32.mrb[28].mxu0  ;;  %v14372_v52 = vld [vmem:[#allocation93_spill] sm:$0xff] }
 0x2f9   : > { %4506 = vrot.lane.b32.xlu0 %v12063_v31, %s8424_s22  ;;  %v5180_v0 = vrot.slane %v5179_v50, 2  ;;  %v5186_v10 = vmax.f32 %v5184_v43, %v5185_v19  ;;  %v6256_v36 = vsel %vm1534_vm4, %v3071_v22, -inf  ;;  %v6255_v28 = vsel %vm1534_vm4, %v3070_v62, -inf  ;;  %8361 = vmatprep.mubr.msk.f32.mxu0 %vm1534_vm4, %v3070_v62 }
 0x2fa   : > { %14370 = vst [vmem:[#allocation91_spill] sm:$0xff] %v12431_v5  ;;  %4504 = vrot.lane.b32.xlu1 %v12030_v16, %s8424_s22  ;;  %v5173_v21 = vrot.slane %v5172_v44, 1  ;;  %v6244_v37 = vrot.slane %v6243_v12, 1  ;;  %v6251_v63 = vrot.slane %v6250_v17, 2  ;;  %v6257_v34 = vmax.f32 %v6255_v28, %v6256_v36  ;;  %8362 = vmatmul.mubr.msk.f32.gmra.mrb[126].mxu0 %vm1534_vm4, %v3071_v22  ;;  %v12445_v31 = vpop.permute.xlu0 %4402  ;;  %v12451_v62 = vpop.permute.xlu1 %4396 }
 0x2fb   : > { %v5187_v19 = vrot.slane %v5186_v10, 4  ;;  %v5194_v20 = vsel %vm1534_vm4, %v5017_v59, -inf  ;;  %v5016_v58 = vadd.f32 %v14371_v24, %v4696_v54  ;;  %v2945_v23 = vadd.f32 %v12328_v15, %v14372_v52  ;;  %v12453_v16 = vpop.f32.mrb[29].mxu0 }
 0x2fc   : > { %v5181_v43 = vmax.f32 %v5179_v50, %v5180_v0  ;;  %v6258_v36 = vrot.slane %v6257_v34, 4  ;;  %v2944_v22 = vadd.f32 %v14372_v52, %v12334_v61  ;;  %v4699_v28 = vadd.f32 %v12308_v55, %v12004_v32  ;;  %v12466_v52 = vpop.f32.mrb[30].mxu0 }
 0x2fd   : > { %4510 = vrot.lane.b32.xlu0 %v12088_v1, %s8424_s22  ;;  %v6252_v59 = vmax.f32 %v6250_v17, %v6251_v63  ;;  %v5188_v54 = vmax.f32 %v5186_v10, %v5187_v19  ;;  %v5193_v24 = vsel %vm1534_vm4, %v5016_v58, -inf  ;;  %v3073_v51 = vmax.f32 %v2945_v23, 0.0  ;;  %v14374_v17 = vld [vmem:[#allocation57_spill] sm:$0xff]  ;;  %v12476_v19 = vpop.f32.mrb[31].mxu0  ;;  %v14375_v58 = vld [vmem:[#allocation118_spill] sm:$0xff] }
 0x2fe   : > { %4508 = vrot.lane.b32.xlu1 %v12053_v40, %s8424_s22  ;;  %v12464_v5 = vmax.f32 %v5172_v44, %v5173_v21  ;;  %v6259_v50 = vmax.f32 %v6257_v34, %v6258_v36  ;;  %v5195_v0 = vmax.f32 %v5193_v24, %v5194_v20  ;;  %v3072_v18 = vmax.f32 %v2944_v22, 0.0  ;;  %v12468_v61 = vpop.permute.xlu0 %4406  ;;  %v12474_v63 = vpop.permute.xlu1 %4400 }
 0x2ff   : > { %v12470_v32 = vmax.f32 %v6243_v12, %v6244_v37  ;;  %v5189_v1 = vrot.slane %v5188_v54, 2  ;;  %v6265_v55 = vsel %vm1534_vm4, %v3073_v51, -inf  ;;  %v5019_v10 = vadd.f32 %v14374_v17, %v4699_v28  ;;  %v14376_v28 = vld [vmem:[#allocation36_spill] sm:$0xff] }
 0x300   : > { %14373 = vst [vmem:[#allocation103_spill] sm:$0xff] %v12464_v5  ;;  %v5182_v40 = vrot.slane %v5181_v43, 1  ;;  %v6260_v44 = vrot.slane %v6259_v50, 2  ;;  %v5196_v21 = vrot.slane %v5195_v0, 4  ;;  %v6264_v34 = vsel %vm1534_vm4, %v3072_v18, -inf  ;;  %8364 = vmatprep.mubr.msk.f32.mxu0 %vm1534_vm4, %v3072_v18 }
 0x301   : > { %4514 = vrot.lane.b32.xlu0 %v12111_v7, %s8424_s22  ;;  %v6253_v12 = vrot.slane %v6252_v59, 1  ;;  %v5190_v37 = vmax.f32 %v5188_v54, %v5189_v1  ;;  %v6266_v20 = vmax.f32 %v6264_v34, %v6265_v55  ;;  %v4698_v23 = vadd.f32 %v14375_v58, %v12316_v45  ;;  %8365 = vmatmul.mubr.msk.f32.gmra.mrb[128].mxu0 %vm1534_vm4, %v3073_v51  ;;  %v12491_v7 = vpop.f32.mrb[32].mxu0 }
 0x302   : > { %7123 = vrot.lane.b32.xlu1 %v12074_v33, %s8427_s10  ;;  %v6261_v36 = vmax.f32 %v6259_v50, %v6260_v44  ;;  %v5197_v22 = vmax.f32 %v5195_v0, %v5196_v21  ;;  %v2947_v24 = vadd.f32 %v12349_v4, %v14376_v28  ;;  %v2946_v18 = vadd.f32 %v14376_v28, %v12357_v14  ;;  %v12493_v54 = vpop.permute.xlu0 %4410  ;;  %v12499_v50 = vpop.permute.xlu1 %4404 }
 0x303   : > { %v6267_v1 = vrot.slane %v6266_v20, 4  ;;  %v5203_v45 = vsel %vm1534_vm4, %v5019_v10, -inf  ;;  %v5018_v51 = vadd.f32 %v14374_v17, %v4698_v23  ;;  %v4701_v33 = vadd.f32 %v12336_v46, %v12027_v42  ;;  %v12501_v0 = vpop.f32.mrb[33].mxu0  ;;  %v14378_v17 = vld [vmem:[#allocation62_spill] sm:$0xff] }
 0x304   : > { %v12503_v55 = vmax.f32 %v5181_v43, %v5182_v40  ;;  %v5198_v44 = vrot.slane %v5197_v22, 2  ;;  %v3075_v21 = vmax.f32 %v2947_v24, 0.0  ;;  %v3074_v34 = vmax.f32 %v2946_v18, 0.0 }
 0x305   : > { %4518 = vrot.lane.b32.xlu0 %v12138_v9, %s8424_s22  ;;  %v5191_v58 = vrot.slane %v5190_v37, 1  ;;  %v6268_v28 = vmax.f32 %v6266_v20, %v6267_v1  ;;  %v5202_v10 = vsel %vm1534_vm4, %v5018_v51, -inf  ;;  %v5021_v23 = vadd.f32 %v14378_v17, %v4701_v33  ;;  %v12513_v40 = vpop.f32.mrb[34].mxu0  ;;  %v14381_v1 = vld [vmem:[#allocation18_spill] sm:$0xff] }
 0x306   : > { %14377 = vst [vmem:[#allocation117_spill] sm:$0xff] %v12503_v55  ;;  %4512 = vrot.lane.b32.xlu1 %v12079_v60, %s8424_s22  ;;  %v6262_v42 = vrot.slane %v6261_v36, 1  ;;  %v5199_v46 = vmax.f32 %v5197_v22, %v5198_v44  ;;  %v5204_v5 = vmax.f32 %v5202_v10, %v5203_v45  ;;  %v6274_v43 = vsel %vm1534_vm4, %v3075_v21, -inf  ;;  %8367 = vmatprep.mubr.msk.f32.mxu0 %vm1534_vm4, %v3074_v34  ;;  %v12515_v24 = vpop.permute.xlu0 %7117  ;;  %v12523_v60 = vpop.permute.xlu1 %4408  ;;  %v14382_v10 = vld [vmem:[#allocation11_spill] sm:$0xff] }
 0x307   : > { %14379 = vst [vmem:[#allocation2_spill] sm:$0xff] %v12515_v24  ;;  %v12517_v9 = vmax.f32 %v6252_v59, %v6253_v12  ;;  %v6269_v20 = vrot.slane %v6268_v28, 2  ;;  %v6273_v18 = vsel %vm1534_vm4, %v3074_v34, -inf  ;;  %v4700_v51 = vadd.f32 %v14381_v1, %v12341_v26  ;;  %8368 = vmatmul.mubr.msk.f32.gmra.mrb[130].mxu0 %vm1534_vm4, %v3075_v21  ;;  %v12525_v22 = vpop.f32.mrb[35].mxu0  ;;  %v14383_v26 = vld [vmem:[#allocation119_spill] sm:$0xff]  ;;  %v14384_v1 = vld [vmem:[#allocation113_spill] sm:$0xff] }
 0x308   : > { %v5205_v45 = vrot.slane %v5204_v5, 4  ;;  %v6275_v33 = vmax.f32 %v6273_v18, %v6274_v43  ;;  %v5212_v44 = vsel %vm1534_vm4, %v5021_v23, -inf  ;;  %v4703_v59 = vadd.f32 %v12391_v53, %v14382_v10  ;;  %v14385_v55 = vld [vmem:[#allocation83_spill] sm:$0xff]  ;;  %v14388_v18 = vld [vmem:[#allocation25_spill] sm:$0xff] }
 0x309   : > { %14380 = vst [vmem:[#allocation67_spill] sm:$0xff] %v12517_v9  ;;  %4522 = vrot.lane.b32.xlu0 %v12165_v11, %s8424_s22  ;;  %v5200_v12 = vrot.slane %v5199_v46, 1  ;;  %v5020_v34 = vadd.f32 %v14378_v17, %v4700_v51  ;;  %v4702_v21 = vadd.f32 %v14383_v26, %v12404_v29  ;;  %v4705_v24 = vadd.f32 %v12421_v38, %v14384_v1  ;;  %v12544_v11 = vpop.f32.mrb[36].mxu0  ;;  %v14389_v51 = vld [vmem:[#allocation88_spill] sm:$0xff]  ;;  %v14394_v1 = vld [vmem:[#allocation87_spill] sm:$0xff] }
 0x30a   : > { %4516 = vrot.lane.b32.xlu1 %v14385_v55, %s8424_s22  ;;  %v12539_v43 = vmax.f32 %v5190_v37, %v5191_v58  ;;  %v12541_v23 = vmax.f32 %v6261_v36, %v6262_v42  ;;  %v5206_v53 = vmax.f32 %v5204_v5, %v5205_v45  ;;  %v5023_v10 = vadd.f32 %v14388_v18, %v4703_v59  ;;  %v12546_v9 = vpop.permute.xlu0 %4414  ;;  %v12553_v55 = vpop.permute.xlu1 %4412  ;;  %v14390_v45 = vld [vmem:[#allocation14_spill] sm:$0xff]  ;;  %v14392_v59 = vld [vmem:[#allocation121_spill] sm:$0xff] }
 0x30b   : > { %v12548_v17 = vmax.f32 %v6268_v28, %v6269_v20  ;;  %v5211_v29 = vsel %vm1534_vm4, %v5020_v34, -inf  ;;  %v5022_v38 = vadd.f32 %v14388_v18, %v4702_v21  ;;  %v5025_v26 = vadd.f32 %v14389_v51, %v4705_v24  ;;  %v12555_v37 = vpop.f32.mrb[37].mxu0  ;;  %v14393_v24 = vld [vmem:[#allocation49_spill] sm:$0xff] }
 0x30c   : > { %14386 = vst [vmem:[#allocation28_spill] sm:$0xff] %v12539_v43  ;;  %14387 = vst [vmem:[#allocation64_spill] sm:$0xff] %v12541_v23  ;;  %v5207_v36 = vrot.slane %v5206_v53, 2  ;;  %v6276_v5 = vrot.slane %v6275_v33, 4  ;;  %v5213_v58 = vmax.f32 %v5211_v29, %v5212_v44  ;;  %v5221_v42 = vsel %vm1534_vm4, %v5023_v10, -inf }
 0x30d   : > { %4526 = vrot.lane.b32.xlu0 %v14390_v45, %s8424_s22  ;;  %v12560_v28 = vmax.f32 %v5199_v46, %v5200_v12  ;;  %v5220_v20 = vsel %vm1534_vm4, %v5022_v38, -inf  ;;  %v4704_v34 = vadd.f32 %v14392_v59, %v12429_v49  ;;  %v4707_v21 = vadd.f32 %v12443_v48, %v14393_v24  ;;  %v12570_v43 = vpop.f32.mrb[38].mxu0  ;;  %v14396_v38 = vld [vmem:[#allocation89_spill] sm:$0xff]  ;;  %v14397_v49 = vld [vmem:[#allocation12_spill] sm:$0xff]  ;;  %v14398_v48 = vld [vmem:[#allocation86_spill] sm:$0xff] }
 0x30e   : > { %4520 = vrot.lane.b32.xlu1 %v14394_v1, %s8424_s22  ;;  %v5208_v18 = vmax.f32 %v5206_v53, %v5207_v36  ;;  %v5214_v44 = vrot.slane %v5213_v58, 4  ;;  %v5222_v29 = vmax.f32 %v5220_v20, %v5221_v42  ;;  %v5230_v10 = vsel %vm1534_vm4, %v5025_v26, -inf  ;;  %v12572_v46 = vpop.permute.xlu0 %4418  ;;  %v12580_v1 = vpop.permute.xlu1 %4416 }
 0x30f   : > { %14391 = vst [vmem:[#allocation8_spill] sm:$0xff] %v12560_v28  ;;  %14395 = vst [vmem:[#allocation27_spill] sm:$0xff] %v12572_v46  ;;  %v5024_v12 = vadd.f32 %v14389_v51, %v4704_v34  ;;  %v5027_v45 = vadd.f32 %v14396_v38, %v4707_v21  ;;  %v4706_v59 = vadd.f32 %v14397_v49, %v12453_v16  ;;  %v12582_v53 = vpop.f32.mrb[39].mxu0  ;;  %v14399_v28 = vld [vmem:[#allocation32_spill] sm:$0xff]  ;;  %v14400_v21 = vld [vmem:[#allocation90_spill] sm:$0xff] }
 0x310   : > { %v4709_v24 = vadd.f32 %v12466_v52, %v14398_v48  ;;  %v5209_v36 = vrot.slane %v5208_v18, 1  ;;  %v12584_v26 = vmax.f32 %v6275_v33, %v6276_v5  ;;  %v5215_v42 = vmax.f32 %v5213_v58, %v5214_v44  ;;  %v14401_v49 = vld [vmem:[#allocation35_spill] sm:$0xff] }
 0x311   : > { %v5223_v20 = vrot.slane %v5222_v29, 4  ;;  %4530 = vrot.lane.b32.xlu0 %v14399_v28, %s8424_s22  ;;  %v5229_v51 = vsel %vm1534_vm4, %v5024_v12, -inf  ;;  %v5239_v34 = vsel %vm1534_vm4, %v5027_v45, -inf  ;;  %v5026_v16 = vadd.f32 %v14396_v38, %v4706_v59  ;;  %v12594_v58 = vpop.f32.mrb[40].mxu0  ;;  %v14403_v45 = vld [vmem:[#allocation81_spill] sm:$0xff]  ;;  %v14404_v59 = vld [vmem:[#allocation108_spill] sm:$0xff] }
 0x312   : > { %v5029_v52 = vadd.f32 %v14400_v21, %v4709_v24  ;;  %4524 = vrot.lane.b32.xlu1 %v14401_v49, %s8424_s22  ;;  %v5210_v48 = vmax.f32 %v5208_v18, %v5209_v36  ;;  %v5216_v46 = vrot.slane %v5215_v42, 2  ;;  %v5231_v5 = vmax.f32 %v5229_v51, %v5230_v10  ;;  %v12596_v44 = vpop.permute.xlu0 %4422  ;;  %v12604_v23 = vpop.permute.xlu1 %4420  ;;  %v14406_v51 = vld [vmem:[#allocation10_spill] sm:$0xff] }
 0x313   : > { %v5224_v33 = vmax.f32 %v5222_v29, %v5223_v20  ;;  %14402 = vst [vmem:[#allocation101_spill] sm:$0xff] %v12596_v44  ;;  %v5238_v28 = vsel %vm1534_vm4, %v5026_v16, -inf  ;;  %v4708_v38 = vadd.f32 %v14403_v45, %v12476_v19  ;;  %v4711_v24 = vadd.f32 %v12491_v7, %v14404_v59  ;;  %14405 = vst [vmem:[#allocation6_spill] sm:$0xff] %v12604_v23  ;;  %v12606_v18 = vpop.f32.mrb[41].mxu0  ;;  %v14408_v19 = vld [vmem:[#allocation75_spill] sm:$0xff]  ;;  %v14409_v44 = vld [vmem:[#allocation110_spill] sm:$0xff] }
 0x314   : > { %v5248_v12 = vsel %vm1534_vm4, %v5029_v52, -inf  ;;  %v5217_v29 = vmax.f32 %v5215_v42, %v5216_v46  ;;  %v5232_v36 = vrot.slane %v5231_v5, 4  ;;  %v5240_v20 = vmax.f32 %v5238_v28, %v5239_v34  ;;  %v14407_v52 = vld [vmem:[#allocation116_spill] sm:$0xff]  ;;  %v14410_v59 = vld [vmem:[#allocation13_spill] sm:$0xff] }
 0x315   : > { %v5225_v10 = vrot.slane %v5224_v33, 2  ;;  %4534 = vrot.lane.b32.xlu0 %v14406_v51, %s8424_s22  ;;  %v5028_v16 = vadd.f32 %v14400_v21, %v4708_v38  ;;  %v5031_v49 = vadd.f32 %v14407_v52, %v4711_v24  ;;  %v4710_v45 = vadd.f32 %v14408_v19, %v12501_v0  ;;  %v12618_v28 = vpop.f32.mrb[42].mxu0  ;;  %v14412_v24 = vld [vmem:[#allocation42_spill] sm:$0xff] }
 0x316   : > { %v4713_v7 = vadd.f32 %v12513_v40, %v14409_v44  ;;  %4528 = vrot.lane.b32.xlu1 %v14410_v59, %s8424_s22  ;;  %v5218_v46 = vrot.slane %v5217_v29, 1  ;;  %v5233_v23 = vmax.f32 %v5231_v5, %v5232_v36  ;;  %v5241_v34 = vrot.slane %v5240_v20, 4  ;;  %v12620_v51 = vpop.permute.xlu0 %4426  ;;  %v12628_v44 = vpop.f32.mrb[43].mxu0 }
 0x317   : > { %v5226_v42 = vmax.f32 %v5224_v33, %v5225_v10  ;;  %14411 = vst [vmem:[#allocation93_spill] sm:$0xff] %v12620_v51  ;;  %v5247_v21 = vsel %vm1534_vm4, %v5028_v16, -inf  ;;  %v5257_v38 = vsel %vm1534_vm4, %v5031_v49, -inf  ;;  %v5030_v0 = vadd.f32 %v14407_v52, %v4710_v45  ;;  %v12626_v40 = vpop.permute.xlu1 %4424  ;;  %v14414_v52 = vld [vmem:[#allocation33_spill] sm:$0xff] }
 0x318   : > { %v5033_v19 = vadd.f32 %v14412_v24, %v4713_v7  ;;  %14413 = vst [vmem:[#allocation57_spill] sm:$0xff] %v12626_v40  ;;  %v5219_v59 = vmax.f32 %v5217_v29, %v5218_v46  ;;  %v5234_v5 = vrot.slane %v5233_v23, 2  ;;  %v5242_v10 = vmax.f32 %v5240_v20, %v5241_v34  ;;  %v14415_v7 = vld [vmem:[#allocation69_spill] sm:$0xff] }
 0x319   : > { %v5227_v33 = vrot.slane %v5226_v42, 1  ;;  %4538 = vrot.lane.b32.xlu0 %v12282_v35, %s8424_s22  ;;  %v5249_v36 = vmax.f32 %v5247_v21, %v5248_v12  ;;  %v5256_v16 = vsel %vm1534_vm4, %v5030_v0, -inf  ;;  %v4712_v45 = vadd.f32 %v14414_v52, %v12525_v22  ;;  %v12639_v20 = vpop.f32.mrb[44].mxu0  ;;  %v14417_v0 = vld [vmem:[#allocation31_spill] sm:$0xff] }
 0x31a   : > { %v5266_v49 = vsel %vm1534_vm4, %v5033_v19, -inf  ;;  %4532 = vrot.lane.b32.xlu1 %v14415_v7, %s8424_s22  ;;  %v6936_v51 = vsel %vm6922_vm5, %v5219_v59, %v5210_v48  ;;  %v5235_v46 = vmax.f32 %v5233_v23, %v5234_v5  ;;  %v5243_v40 = vrot.slane %v5242_v10, 2  ;;  %v12641_v34 = vpop.permute.xlu0 %4430  ;;  %v12648_v52 = vpop.f32.mrb[45].mxu0  ;;  %v14418_v59 = vld [vmem:[#allocation112_spill] sm:$0xff] }
 0x31b   : > { %v5228_v29 = vmax.f32 %v5226_v42, %v5227_v33  ;;  %14416 = vst [vmem:[#allocation118_spill] sm:$0xff] %v12641_v34  ;;  %v5250_v35 = vrot.slane %v5249_v36, 4  ;;  %v5258_v12 = vmax.f32 %v5256_v16, %v5257_v38  ;;  %v5032_v21 = vadd.f32 %v14412_v24, %v4712_v45  ;;  %v12646_v22 = vpop.permute.xlu1 %4428  ;;  %v14419_v16 = vld [vmem:[#allocation26_spill] sm:$0xff]  ;;  %v14420_v45 = vld [vmem:[#allocation104_spill] sm:$0xff] }
 0x31c   : > { %v4715_v19 = vadd.f32 %v12544_v11, %v14417_v0  ;;  %v5236_v42 = vrot.slane %v5235_v46, 1  ;;  %v5244_v23 = vmax.f32 %v5242_v10, %v5243_v40  ;;  %v4714_v33 = vadd.f32 %v14418_v59, %v12555_v37 }
 0x31d   : > { %v6937_v48 = vsel %vm6924_vm6, %v5228_v29, %v6936_v51  ;;  %v5251_v5 = vmax.f32 %v5249_v36, %v5250_v35  ;;  %v5259_v7 = vrot.slane %v5258_v12, 4  ;;  %v5265_v38 = vsel %vm1534_vm4, %v5032_v21, -inf  ;;  %v12659_v29 = vpop.f32.mrb[46].mxu0  ;;  %v14422_v35 = vld [vmem:[#allocation115_spill] sm:$0xff] }
 0x31e   : > { %v5035_v24 = vadd.f32 %v14419_v16, %v4715_v19  ;;  %4536 = vrot.lane.b32.xlu1 %v14420_v45, %s8424_s22  ;;  %v6278_v11 = vrot.slane %v12584_v26, 2  ;;  %v5237_v0 = vmax.f32 %v5235_v46, %v5236_v42  ;;  %v5267_v34 = vmax.f32 %v5265_v38, %v5266_v49  ;;  %v12661_v40 = vpop.permute.xlu0 %4434  ;;  %v12668_v59 = vpop.f32.mrb[47].mxu0 }
 0x31f   : > { %v5034_v51 = vadd.f32 %v14419_v16, %v4714_v33  ;;  %14421 = vst [vmem:[#allocation36_spill] sm:$0xff] %v12661_v40  ;;  %v5252_v37 = vrot.slane %v5251_v5, 2  ;;  %v5260_v10 = vmax.f32 %v5258_v12, %v5259_v7  ;;  %v4717_v21 = vadd.f32 %v12570_v43, %v14422_v35  ;;  %v12666_v19 = vpop.permute.xlu1 %4432  ;;  %v14425_v12 = vld [vmem:[#allocation24_spill] sm:$0xff]  ;;  %v14427_v40 = vld [vmem:[#allocation23_spill] sm:$0xff] }
 0x320   : > { %v5275_v36 = vsel %vm1534_vm4, %v5035_v24, -inf  ;;  %14423 = vst [vmem:[#allocation62_spill] sm:$0xff] %v12666_v19  ;;  %v12671_v46 = vsel %vm6926_vm7, %v5237_v0, %v6937_v48  ;;  %v5245_v49 = vrot.slane %v5244_v23, 1  ;;  %v5268_v42 = vrot.slane %v5267_v34, 4  ;;  %v14426_v24 = vld [vmem:[#allocation21_spill] sm:$0xff]  ;;  %v14428_v0 = vld [vmem:[#allocation70_spill] sm:$0xff] }
 0x321   : > { %14424 = vst [vmem:[#allocation18_spill] sm:$0xff] %v12671_v46  ;;  %v5274_v33 = vsel %vm1534_vm4, %v5034_v51, -inf  ;;  %v5253_v38 = vmax.f32 %v5251_v5, %v5252_v37  ;;  %v5261_v16 = vrot.slane %v5260_v10, 2  ;;  %v5037_v7 = vadd.f32 %v14425_v12, %v4717_v21  ;;  %v12683_v19 = vpop.f32.mrb[48].mxu0 }
 0x322   : > { %v5276_v45 = vmax.f32 %v5274_v33, %v5275_v36  ;;  %4540 = vrot.lane.b32.xlu1 %v12274_v41, %s8424_s22  ;;  %v5269_v43 = vmax.f32 %v5267_v34, %v5268_v42  ;;  %v4716_v35 = vadd.f32 %v14426_v24, %v12582_v53  ;;  %v4719_v48 = vadd.f32 %v12594_v58, %v14427_v40  ;;  %v12692_v21 = vpop.f32.mrb[49].mxu0  ;;  %v14429_v40 = vld [vmem:[#allocation41_spill] sm:$0xff] }
 0x323   : > { %v4718_v46 = vadd.f32 %v14428_v0, %v12606_v18  ;;  %v12685_v5 = vpop.permute.xlu0 %4438  ;;  %v5254_v37 = vrot.slane %v5253_v38, 1  ;;  %v12688_v36 = vmax.f32 %v5260_v10, %v5261_v16  ;;  %v12690_v34 = vpop.permute.xlu1 %4436  ;;  %v5284_v53 = vsel %vm1534_vm4, %v5037_v7, -inf  ;;  %v14431_v16 = vld [vmem:[#allocation45_spill] sm:$0xff] }
 0x324   : > { %v5277_v41 = vrot.slane %v5276_v45, 4  ;;  %v5036_v58 = vadd.f32 %v14425_v12, %v4716_v35  ;;  %v5039_v18 = vadd.f32 %v14429_v40, %v4719_v48  ;;  %v12699_v33 = vmax.f32 %v12584_v26, %v6278_v11 }
 0x325   : > { %v5038_v42 = vadd.f32 %v14429_v40, %v4718_v46  ;;  %v12701_v24 = vmax.f32 %v5244_v23, %v5245_v49  ;;  %v4721_v0 = vadd.f32 %v12618_v28, %v14431_v16  ;;  %v5270_v51 = vrot.slane %v5269_v43, 2  ;;  %v12710_v46 = vpop.f32.mrb[50].mxu0  ;;  %v14435_v40 = vld [vmem:[#allocation51_spill] sm:$0xff] }
 0x326   : > { %v5278_v10 = vmax.f32 %v5276_v45, %v5277_v41  ;;  %4544 = vrot.lane.b32.xlu1 %v12299_v25, %s8424_s22  ;;  %v5283_v7 = vsel %vm1534_vm4, %v5036_v58, -inf  ;;  %v5293_v12 = vsel %vm1534_vm4, %v5039_v18, -inf  ;;  %v12714_v23 = vmax.f32 %v5253_v38, %v5254_v37  ;;  %v12718_v48 = vpop.f32.mrb[51].mxu0  ;;  %v14434_v41 = vld [vmem:[#allocation37_spill] sm:$0xff]  ;;  %v14438_v25 = vld [vmem:[#allocation92_spill] sm:$0xff] }
 0x327   : > { %14430 = vst [vmem:[#allocation11_spill] sm:$0xff] %v12701_v24  ;;  %v5292_v35 = vsel %vm1534_vm4, %v5038_v42, -inf  ;;  %v12712_v26 = vpop.permute.xlu0 %4442  ;;  %v5285_v49 = vmax.f32 %v5283_v7, %v5284_v53  ;;  %v12716_v28 = vpop.permute.xlu1 %4440  ;;  %v5041_v58 = vadd.f32 %v14434_v41, %v4721_v0  ;;  %v4720_v18 = vadd.f32 %v14435_v40, %v12628_v44  ;;  %v14436_v42 = vld [vmem:[#allocation120_spill] sm:$0xff]  ;;  %v14437_v53 = vld [vmem:[#allocation30_spill] sm:$0xff] }
 0x328   : > { %14432 = vst [vmem:[#allocation119_spill] sm:$0xff] %v12712_v26  ;;  %14433 = vst [vmem:[#allocation113_spill] sm:$0xff] %v12714_v23  ;;  %v5279_v11 = vrot.slane %v5278_v10, 2  ;;  %v5294_v45 = vmax.f32 %v5292_v35, %v5293_v12  ;;  %v4723_v16 = vadd.f32 %v12639_v20, %v14436_v42  ;;  %v4722_v7 = vadd.f32 %v14437_v53, %v12648_v52 }
 0x329   : > { %v5286_v38 = vrot.slane %v5285_v49, 4  ;;  %v12730_v12 = vmax.f32 %v5269_v43, %v5270_v51  ;;  %v5302_v35 = vsel %vm1534_vm4, %v5041_v58, -inf  ;;  %v5040_v0 = vadd.f32 %v14434_v41, %v4720_v18  ;;  %v12735_v40 = vpop.f32.mrb[52].mxu0  ;;  %v14440_v58 = vld [vmem:[#allocation16_spill] sm:$0xff] }
 0x32a   : > { %v5280_v24 = vmax.f32 %v5278_v10, %v5279_v11  ;;  %v5295_v37 = vrot.slane %v5294_v45, 4  ;;  %4548 = vrot.lane.b32.xlu1 %v12328_v15, %s8424_s22  ;;  %v5043_v44 = vadd.f32 %v14438_v25, %v4723_v16  ;;  %v5042_v52 = vadd.f32 %v14438_v25, %v4722_v7  ;;  %v12742_v15 = vpop.f32.mrb[53].mxu0 }
 0x32b   : > { %v12737_v20 = vpop.permute.xlu0 %4446  ;;  %v5287_v11 = vmax.f32 %v5285_v49, %v5286_v38  ;;  %v12740_v53 = vpop.permute.xlu1 %4444  ;;  %v5301_v43 = vsel %vm1534_vm4, %v5040_v0, -inf  ;;  %v4725_v41 = vadd.f32 %v12659_v29, %v12370_v30  ;;  %v4724_v18 = vadd.f32 %v14440_v58, %v12668_v59  ;;  %v14441_v38 = vld [vmem:[#allocation44_spill] sm:$0xff] }
 0x32c   : > { %14439 = vst [vmem:[#allocation83_spill] sm:$0xff] %v12737_v20  ;;  %v5281_v10 = vrot.slane %v5280_v24, 1  ;;  %v5296_v42 = vmax.f32 %v5294_v45, %v5295_v37  ;;  %v5311_v51 = vsel %vm1534_vm4, %v5043_v44, -inf  ;;  %v5303_v45 = vmax.f32 %v5301_v43, %v5302_v35 }
 0x32d   : > { %v5288_v23 = vrot.slane %v5287_v11, 2  ;;  %v5310_v25 = vsel %vm1534_vm4, %v5042_v52, -inf  ;;  %v5045_v37 = vadd.f32 %v14441_v38, %v4725_v41  ;;  %v5044_v7 = vadd.f32 %v14441_v38, %v4724_v18  ;;  %v12758_v29 = vpop.f32.mrb[54].mxu0  ;;  %v14445_v18 = vld [vmem:[#allocation111_spill] sm:$0xff] }
 0x32e   : > { %v5282_v16 = vmax.f32 %v5280_v24, %v5281_v10  ;;  %v5297_v49 = vrot.slane %v5296_v42, 2  ;;  %4552 = vrot.lane.b32.xlu1 %v12349_v4, %s8424_s22  ;;  %v14442_v0 = vrot.slane %v12220_v39, 1  ;;  %v5304_v35 = vrot.slane %v5303_v45, 4  ;;  %v12764_v4 = vpop.f32.mrb[55].mxu0 }
 0x32f   : > { %v12760_v59 = vpop.permute.xlu0 %4450  ;;  %v5289_v24 = vmax.f32 %v5287_v11, %v5288_v23  ;;  %v5312_v10 = vmax.f32 %v5310_v25, %v5311_v51  ;;  %v12762_v43 = vpop.permute.xlu1 %7119  ;;  %v5320_v52 = vsel %vm1534_vm4, %v5045_v37, -inf  ;;  %v5319_v41 = vsel %vm1534_vm4, %v5044_v7, -inf  ;;  %v14448_v25 = vld [vmem:[#allocation29_spill] sm:$0xff] }
 0x330   : > { %v6200_v30 = vmax.f32 %v12220_v39, %v14442_v0  ;;  %14443 = vst [vmem:[#allocation25_spill] sm:$0xff] %v12760_v59  ;;  %v5298_v44 = vmax.f32 %v5296_v42, %v5297_v49  ;;  %14444 = vst [vmem:[#allocation88_spill] sm:$0xff] %v12762_v43  ;;  %v6208_v58 = vrot.slane %v12398_v56, 1  ;;  %v14446_v39 = vld [vmem:[#allocation109_spill] sm:$0xff]  ;;  %v5305_v23 = vmax.f32 %v5303_v45, %v5304_v35 }
 0x331   : > { %v7100_v38 = vsel %vm6924_vm6, %v14446_v39, %v14445_v18  ;;  %v5290_v0 = vrot.slane %v5289_v24, 1  ;;  %v5313_v11 = vrot.slane %v5312_v10, 4  ;;  %v14447_v42 = vld [vmem:[#allocation9_spill] sm:$0xff]  ;;  %v5321_v51 = vmax.f32 %v5319_v41, %v5320_v52  ;;  %v12779_v43 = vpop.f32.mrb[56].mxu0 }
 0x332   : > { %v5299_v59 = vrot.slane %v5298_v44, 1  ;;  %7267 = vrot.lane.b32.xlu1 %v14447_v42, %s8426_s8  ;;  %v6209_v49 = vmax.f32 %v12398_v56, %v6208_v58  ;;  %v7101_v37 = vsel %vm6926_vm7, %v14448_v25, %v7100_v38  ;;  %v4727_v7 = vadd.f32 %v12683_v19, %v12402_v3  ;;  %v12785_v42 = vpop.f32.mrb[57].mxu0  ;;  %v14449_v56 = vld [vmem:[#allocation65_spill] sm:$0xff]  ;;  %v14450_v58 = vld [vmem:[#allocation114_spill] sm:$0xff] }
 0x333   : > { %v12781_v20 = vpop.permute.xlu0 %4454  ;;  %v5291_v18 = vmax.f32 %v5289_v24, %v5290_v0  ;;  %v5306_v45 = vrot.slane %v5305_v23, 2  ;;  %v5314_v35 = vmax.f32 %v5312_v10, %v5313_v11  ;;  %v12783_v26 = vpop.permute.xlu1 %4448  ;;  %v5322_v52 = vrot.slane %v5321_v51, 4 }
 0x334   : > { %v5300_v39 = vmax.f32 %v5298_v44, %v5299_v59  ;;  %v7102_v41 = vsel %vm6928_vm8, %v14449_v56, %v7101_v37  ;;  %v5047_v38 = vadd.f32 %v14450_v58, %v4727_v7  ;;  %v4726_v3 = vadd.f32 %v12339_v27, %v12692_v21  ;;  %v14451_v44 = vld [vmem:[#allocation84_spill] sm:$0xff] }
 0x335   : > { %v6943_v19 = vsel %vm6922_vm5, %v5291_v18, %v5282_v16  ;;  %v5307_v25 = vmax.f32 %v5305_v23, %v5306_v45  ;;  %v5315_v24 = vrot.slane %v5314_v35, 2  ;;  %v7103_v59 = vsel %vm6930_vm9, %v12380_v57, %v7102_v41  ;;  %v8261_v7 = vpop.f32.mrb[58].mxu0 }
 0x336   : > { %7271 = vrot.lane.b32.xlu1 %v14451_v44, %s8426_s8  ;;  %v6944_v10 = vsel %vm6924_vm6, %v5300_v39, %v6943_v19  ;;  %v5323_v0 = vmax.f32 %v5321_v51, %v5322_v52  ;;  %v7104_v11 = vsel %vm6932_vm10, %v6200_v30, %v7103_v59  ;;  %v5329_v37 = vsel %vm1534_vm4, %v5047_v38, -inf  ;;  %v12808_v18 = vpop.f32.mrb[59].mxu0  ;;  %v8406_v38 = vld [vmem:[%s8491_s9 + $0x8] sm:$0xff] }
 0x337   : > { %v12800_v56 = vpop.permute.xlu0 %4458  ;;  %v5308_v27 = vrot.slane %v5307_v25, 1  ;;  %v12802_v21 = vmax.f32 %v5314_v35, %v5315_v24  ;;  %v7105_v16 = vsel %vm6934_vm11, %v6209_v49, %v7104_v11  ;;  %v5046_v57 = vadd.f32 %v14450_v58, %v4726_v3  ;;  %v12806_v23 = vpop.permute.xlu1 %4452 }
 0x338   : > { %v5324_v51 = vrot.slane %v5323_v0, 2  ;;  %7125 = vrot.lane.b32.xlu0 %v7105_v16, %s8427_s10  ;;  %v4729_v30 = vadd.f32 %v12710_v46, %v12427_v6  ;;  %v4728_v39 = vadd.f32 %v12366_v2, %v12718_v48  ;;  %v4731_v45 = vadd.f32 %v12735_v40, %v12451_v62  ;;  %v14453_v46 = vld [vmem:[#allocation105_spill] sm:$0xff] }
 0x339   : > { %v14452_v49 = vrot.slane %v12688_v36, 1  ;;  %v5309_v52 = vmax.f32 %v5307_v25, %v5308_v27  ;;  %v5328_v41 = vsel %vm1534_vm4, %v5046_v57, -inf  ;;  %v4730_v58 = vadd.f32 %v12393_v8, %v12742_v15  ;;  %v14454_v8 = vld [vmem:[#allocation48_spill] sm:$0xff] }
 0x33a   : > { %7283 = vrot.lane.b32.xlu1 %v8406_v38, %s8428_s11  ;;  %v5325_v6 = vmax.f32 %v5323_v0, %v5324_v51  ;;  %v5330_v2 = vmax.f32 %v5328_v41, %v5329_v37  ;;  %v5049_v48 = vadd.f32 %v14453_v46, %v4729_v30  ;;  %v5048_v62 = vadd.f32 %v14453_v46, %v4728_v39  ;;  %v8264_v40 = vpop.f32.mrb[60].mxu0  ;;  %v8407_v51 = vld [vmem:[%s8491_s9 + $0x18] sm:$0xff] }
 0x33b   : > { %v12820_v35 = vmax.f32 %v12688_v36, %v14452_v49  ;;  %v12829_v3 = vpop.permute.xlu0 %4462  ;;  %v5272_v36 = vrot.slane %v12730_v12, 1  ;;  %v12833_v19 = vsel %vm6926_vm7, %v5309_v52, %v6944_v10  ;;  %v5051_v15 = vadd.f32 %v14454_v8, %v4731_v45  ;;  %v12837_v24 = vpop.permute.xlu1 %4456 }
 0x33c   : > { %v5050_v25 = vadd.f32 %v14454_v8, %v4730_v58  ;;  %v3811_v59 = vpop.f32.mrb[61].mxu0  ;;  %v5317_v44 = vrot.slane %v12802_v21, 1  ;;  %v5331_v0 = vrot.slane %v5330_v2, 4  ;;  %4542 = vrot.lane.b32.xlu0 %v12306_v47, %s8424_s22  ;;  %v5338_v11 = vsel %vm1534_vm4, %v5049_v48, -inf  ;;  %v14455_v58 = vld [vmem:[#allocation74_spill] sm:$0xff] }
 0x33d   : > { %v5337_v37 = vsel %vm1534_vm4, %v5048_v62, -inf  ;;  %v5347_v10 = vsel %vm1534_vm4, %v5051_v15, -inf  ;;  %v4733_v57 = vadd.f32 %v12758_v29, %v12474_v63  ;;  %v5326_v30 = vrot.slane %v5325_v6, 1 }
 0x33e   : > { %v5339_v27 = vmax.f32 %v5337_v37, %v5338_v11  ;;  %v5346_v16 = vsel %vm1534_vm4, %v5050_v25, -inf  ;;  %7287 = vrot.lane.b32.xlu1 %v8407_v51, %s8428_s11  ;;  %v5332_v39 = vmax.f32 %v5330_v2, %v5331_v0  ;;  %v4732_v47 = vadd.f32 %v12423_v13, %v12764_v4  ;;  %v8267_v49 = vpop.f32.mrb[62].mxu0  ;;  %v14456_v13 = vld [vmem:[#allocation68_spill] sm:$0xff]  ;;  %v14458_v51 = vld [vmem:[#allocation43_spill] sm:$0xff] }
 0x33f   : > { %v5348_v45 = vmax.f32 %v5346_v16, %v5347_v10  ;;  %v12852_v52 = vpop.permute.xlu0 %4466  ;;  %v5053_v38 = vadd.f32 %v14455_v58, %v4733_v57  ;;  %v4735_v46 = vadd.f32 %v12779_v43, %v12499_v50  ;;  %v4734_v63 = vadd.f32 %v12445_v31, %v12785_v42  ;;  %v12859_v29 = vpop.permute.xlu1 %4460  ;;  %v14457_v50 = vld [vmem:[#allocation22_spill] sm:$0xff]  ;;  %v8408_v42 = vld [vmem:[%s8491_s9 + $0x28] sm:$0xff] }
 0x340   : > { %v5340_v41 = vrot.slane %v5339_v27, 4  ;;  %v12861_v2 = vpop.f32.mrb[63].mxu0  ;;  %v5333_v48 = vrot.slane %v5332_v39, 2  ;;  %4546 = vrot.lane.b32.xlu0 %v14456_v13, %s8424_s22  ;;  %v5052_v62 = vadd.f32 %v14455_v58, %v4732_v47  ;;  %v4737_v8 = vadd.f32 %v8261_v7, %v12523_v60 }
 0x341   : > { %v5349_v4 = vrot.slane %v5348_v45, 4  ;;  %v5356_v25 = vsel %vm1534_vm4, %v5053_v38, -inf  ;;  %v5055_v43 = vadd.f32 %v14457_v50, %v4735_v46  ;;  %v5054_v31 = vadd.f32 %v14457_v50, %v4734_v63 }
 0x342   : > { %v5341_v15 = vmax.f32 %v5339_v27, %v5340_v41  ;;  %7291 = vrot.lane.b32.xlu1 %v8408_v42, %s8428_s11  ;;  %v12873_v0 = vmax.f32 %v12730_v12, %v5272_v36  ;;  %v12875_v11 = vmax.f32 %v5332_v39, %v5333_v48  ;;  %v5355_v10 = vsel %vm1534_vm4, %v5052_v62, -inf  ;;  %v12878_v16 = vpop.f32.mrb[64].mxu0 }
 0x343   : > { %v5350_v37 = vmax.f32 %v5348_v45, %v5349_v4  ;;  %v12880_v60 = vpop.permute.xlu0 %4470  ;;  %v5357_v7 = vmax.f32 %v5355_v10, %v5356_v25  ;;  %v5365_v27 = vsel %vm1534_vm4, %v5055_v43, -inf  ;;  %v5364_v57 = vsel %vm1534_vm4, %v5054_v31, -inf  ;;  %v12885_v41 = vpop.permute.xlu1 %4464  ;;  %v14461_v25 = vld [vmem:[#allocation38_spill] sm:$0xff] }
 0x344   : > { %v5057_v47 = vadd.f32 %v14458_v51, %v4737_v8  ;;  %v12887_v12 = vpop.f32.mrb[65].mxu0  ;;  %v12890_v36 = vmax.f32 %v12802_v21, %v5317_v44  ;;  %v12892_v39 = vmax.f32 %v5325_v6, %v5326_v30  ;;  %4550 = vrot.lane.b32.xlu0 %v12357_v14, %s8424_s22  ;;  %v5366_v58 = vmax.f32 %v5364_v57, %v5365_v27 }
 0x345   : > { %v5351_v45 = vrot.slane %v5350_v37, 2  ;;  %v5342_v38 = vrot.slane %v5341_v15, 2  ;;  %v5358_v46 = vrot.slane %v5357_v7, 4  ;;  %v4736_v63 = vadd.f32 %v12468_v61, %v12808_v18 }
 0x346   : > { %14459 = vst [vmem:[#allocation14_spill] sm:$0xff] %v12890_v36  ;;  %14460 = vst [vmem:[#allocation121_spill] sm:$0xff] %v12892_v39  ;;  %v4739_v48 = vadd.f32 %v8264_v40, %v12553_v55  ;;  %v5335_v13 = vrot.slane %v12875_v11, 1  ;;  %v5367_v62 = vrot.slane %v5366_v58, 4  ;;  %v4738_v21 = vadd.f32 %v12493_v54, %v3811_v59  ;;  %v12901_v6 = vpop.f32.mrb[66].mxu0  ;;  %v14462_v40 = vld [vmem:[#allocation15_spill] sm:$0xff] }
 0x347   : > { %v5352_v4 = vmax.f32 %v5350_v37, %v5351_v45  ;;  %v12903_v44 = vpop.permute.xlu0 %4474  ;;  %v5359_v30 = vmax.f32 %v5357_v7, %v5358_v46  ;;  %v5374_v14 = vsel %vm1534_vm4, %v5057_v47, -inf  ;;  %v5056_v8 = vadd.f32 %v14458_v51, %v4736_v63  ;;  %v12908_v61 = vpop.permute.xlu1 %4468  ;;  %v14464_v63 = vld [vmem:[#allocation34_spill] sm:$0xff] }
 0x348   : > { %v5059_v50 = vadd.f32 %v14461_v25, %v4739_v48  ;;  %v12910_v55 = vpop.f32.mrb[67].mxu0  ;;  %7265 = vrot.lane.b32.xlu0 %v14462_v40, %s8426_s8  ;;  %v5368_v54 = vmax.f32 %v5366_v58, %v5367_v62  ;;  %v5058_v59 = vadd.f32 %v14461_v25, %v4738_v21  ;;  %v4741_v43 = vadd.f32 %v8267_v49, %v12580_v1 }
 0x349   : > { %v5353_v18 = vrot.slane %v5352_v4, 1  ;;  %v12916_v31 = vmax.f32 %v5341_v15, %v5342_v38  ;;  %v5360_v42 = vrot.slane %v5359_v30, 2  ;;  %v5373_v37 = vsel %vm1534_vm4, %v5056_v8, -inf }
 0x34a   : > { %v5383_v10 = vsel %vm1534_vm4, %v5059_v50, -inf  ;;  %v5369_v27 = vrot.slane %v5368_v54, 2  ;;  %v5375_v57 = vmax.f32 %v5373_v37, %v5374_v14  ;;  %v5382_v51 = vsel %vm1534_vm4, %v5058_v59, -inf  ;;  %v8276_v47 = vpop.f32.mrb[68].mxu0  ;;  %v14468_v59 = vld [vmem:[#allocation91_spill] sm:$0xff] }
 0x34b   : > { %v5354_v7 = vmax.f32 %v5352_v4, %v5353_v18  ;;  %v12921_v45 = vpop.permute.xlu0 %7121  ;;  %v5361_v58 = vmax.f32 %v5359_v30, %v5360_v42  ;;  %v5384_v46 = vmax.f32 %v5382_v51, %v5383_v10  ;;  %v5061_v48 = vadd.f32 %v14464_v63, %v4741_v43  ;;  %v12926_v49 = vpop.permute.xlu1 %4472  ;;  %v14465_v4 = vld [vmem:[#allocation53_spill] sm:$0xff] }
 0x34c   : > { %14463 = vst [vmem:[#allocation49_spill] sm:$0xff] %v12921_v45  ;;  %v4740_v1 = vadd.f32 %v12546_v9, %v12861_v2  ;;  %v12928_v15 = vpop.f32.mrb[69].mxu0  ;;  %v5370_v38 = vmax.f32 %v5368_v54, %v5369_v27  ;;  %7269 = vrot.lane.b32.xlu0 %v14465_v4, %s8426_s8  ;;  %v5376_v62 = vrot.slane %v5375_v57, 4  ;;  %v14466_v21 = vrot.slane %v12548_v17, 1  ;;  %v14467_v54 = vld [vmem:[#allocation96_spill] sm:$0xff] }
 0x34d   : > { %v6280_v30 = vrot.slane %v12699_v33, 1  ;;  %v5362_v8 = vrot.slane %v5361_v58, 1  ;;  %v5385_v25 = vrot.slane %v5384_v46, 4  ;;  %v5392_v50 = vsel %vm1534_vm4, %v5061_v48, -inf }
 0x34e   : > { %v6272_v14 = vmax.f32 %v12548_v17, %v14466_v21  ;;  %v5060_v9 = vadd.f32 %v14464_v63, %v4740_v1  ;;  %v5371_v2 = vrot.slane %v5370_v38, 1  ;;  %v5377_v18 = vmax.f32 %v5375_v57, %v5376_v62  ;;  %v12942_v42 = vpop.f32.mrb[70].mxu0  ;;  %v8409_v1 = vld [vmem:[%s8491_s9] sm:$0xff]  ;;  %v14469_v62 = vld [vmem:[#allocation67_spill] sm:$0xff] }
 0x34f   : > { %v6281_v40 = vmax.f32 %v12699_v33, %v6280_v30  ;;  %v7107_v43 = vsel %vm6924_vm6, %v14468_v59, %v14467_v54  ;;  %v12944_v17 = vpop.permute.xlu0 %4478  ;;  %v5363_v37 = vmax.f32 %v5361_v58, %v5362_v8  ;;  %v5386_v10 = vmax.f32 %v5384_v46, %v5385_v25  ;;  %v12949_v63 = vpop.permute.xlu1 %4476  ;;  %v14470_v30 = vld [vmem:[#allocation64_spill] sm:$0xff] }
 0x350   : > { %v5391_v27 = vsel %vm1534_vm4, %v5060_v9, -inf  ;;  %v7108_v51 = vsel %vm6926_vm7, %v12470_v32, %v7107_v43  ;;  %v3861_v57 = vpop.f32.mrb[71].mxu0  ;;  %v5372_v48 = vmax.f32 %v5370_v38, %v5371_v2  ;;  %v5378_v33 = vrot.slane %v5377_v18, 2  ;;  %7281 = vrot.lane.b32.xlu0 %v8409_v1, %s8428_s11  ;;  %v14471_v32 = vld [vmem:[#allocation6_spill] sm:$0xff] }
 0x351   : > { %v5393_v4 = vmax.f32 %v5391_v27, %v5392_v50  ;;  %v7109_v21 = vsel %vm6928_vm8, %v14469_v62, %v7108_v51  ;;  %v6950_v58 = vsel %vm6922_vm5, %v5363_v37, %v5354_v7  ;;  %v5387_v46 = vrot.slane %v5386_v10, 2  ;;  %v14473_v37 = vld [vmem:[#allocation50_spill] sm:$0xff]  ;;  %v14475_v62 = vld [vmem:[#allocation57_spill] sm:$0xff] }
 0x352   : > { %v7110_v8 = vsel %vm6930_vm9, %v14470_v30, %v7109_v21  ;;  %v4743_v25 = vadd.f32 %v12878_v16, %v14471_v32  ;;  %v6951_v38 = vsel %vm6924_vm6, %v5372_v48, %v6950_v58  ;;  %v5379_v9 = vmax.f32 %v5377_v18, %v5378_v33  ;;  %v8282_v50 = vpop.f32.mrb[72].mxu0  ;;  %v14474_v16 = vld [vmem:[#allocation27_spill] sm:$0xff] }
 0x353   : > { %v5394_v2 = vrot.slane %v5393_v4, 4  ;;  %v7111_v54 = vsel %vm6932_vm10, %v6272_v14, %v7110_v8  ;;  %v12962_v59 = vpop.permute.xlu0 %4482  ;;  %v12967_v7 = vmax.f32 %v12875_v11, %v5335_v13  ;;  %v4742_v51 = vadd.f32 %v14474_v16, %v12887_v12  ;;  %v12973_v48 = vpop.permute.xlu1 %4480  ;;  %v8410_v14 = vld [vmem:[%s8491_s9 + $0x10] sm:$0xff]  ;;  %v14476_v13 = vld [vmem:[#allocation101_spill] sm:$0xff] }
 0x354   : > { %v7112_v43 = vsel %vm6934_vm11, %v6281_v40, %v7111_v54  ;;  %v5063_v27 = vadd.f32 %v14473_v37, %v4743_v25  ;;  %v3871_v18 = vpop.f32.mrb[73].mxu0  ;;  %v5380_v33 = vrot.slane %v5379_v9, 1  ;;  %7285 = vrot.lane.b32.xlu0 %v8410_v14, %s8428_s11  ;;  %v4745_v11 = vadd.f32 %v12901_v6, %v14475_v62  ;;  %v8412_v62 = vld [vmem:[%s8491_s9 + $0x38] sm:$0xff] }
 0x355   : > { %14472 = vst [vmem:[#allocation87_spill] sm:$0xff] %v12967_v7  ;;  %v5395_v1 = vmax.f32 %v5393_v4, %v5394_v2  ;;  %7127 = vrot.lane.b32.xlu1 %v7112_v43, %s8427_s10  ;;  %v4744_v40 = vadd.f32 %v14476_v13, %v12910_v55  ;;  %v12982_v21 = vmax.f32 %v5386_v10, %v5387_v46  ;;  %v14477_v4 = vld [vmem:[#allocation60_spill] sm:$0xff]  ;;  %v5344_v55 = vrot.slane %v12916_v31, 1 }
 0x356   : > { %v5401_v12 = vsel %vm1534_vm4, %v5063_v27, -inf  ;;  %v5062_v58 = vadd.f32 %v14473_v37, %v4742_v51  ;;  %v4747_v30 = vadd.f32 %v8276_v47, %v12646_v22  ;;  %v5381_v8 = vmax.f32 %v5379_v9, %v5380_v33  ;;  %v8285_v6 = vpop.f32.mrb[74].mxu0  ;;  %v14478_v46 = vld [vmem:[#allocation40_spill] sm:$0xff]  ;;  %v14479_v37 = vld [vmem:[#allocation93_spill] sm:$0xff]  ;;  %v8411_v51 = vld [vmem:[%s8491_s9 + $0x20] sm:$0xff] }
 0x357   : > { %v5396_v32 = vrot.slane %v5395_v1, 2  ;;  %v5065_v25 = vadd.f32 %v14477_v4, %v4745_v11  ;;  %v5064_v2 = vadd.f32 %v14477_v4, %v4744_v40  ;;  %v12989_v54 = vpop.permute.xlu0 %4486  ;;  %v4746_v27 = vadd.f32 %v14479_v37, %v12928_v15  ;;  %v12996_v22 = vpop.permute.xlu1 %4484  ;;  %v14480_v40 = vld [vmem:[#allocation62_spill] sm:$0xff] }
 0x358   : > { %v5400_v10 = vsel %vm1534_vm4, %v5062_v58, -inf  ;;  %v5067_v43 = vadd.f32 %v14478_v46, %v4747_v30  ;;  %v3881_v47 = vpop.f32.mrb[75].mxu0  ;;  %v12999_v9 = vsel %vm6926_vm7, %v5381_v8, %v6951_v38  ;;  %7289 = vrot.lane.b32.xlu0 %v8411_v51, %s8428_s11  ;;  %v4749_v38 = vadd.f32 %v12942_v42, %v14480_v40 }
 0x359   : > { %v13001_v16 = vmax.f32 %v5395_v1, %v5396_v32  ;;  %v5402_v33 = vmax.f32 %v5400_v10, %v5401_v12  ;;  %v5410_v14 = vsel %vm1534_vm4, %v5065_v25, -inf  ;;  %7295 = vrot.lane.b32.xlu1 %v8412_v62, %s8428_s11  ;;  %v5409_v11 = vsel %vm1534_vm4, %v5064_v2, -inf  ;;  %v14481_v12 = vld [vmem:[#allocation118_spill] sm:$0xff]  ;;  %v14482_v25 = vld [vmem:[#allocation39_spill] sm:$0xff] }
 0x35a   : > { %v5419_v15 = vsel %vm1534_vm4, %v5067_v43, -inf  ;;  %v5066_v13 = vadd.f32 %v14478_v46, %v4746_v27  ;;  %v5389_v1 = vrot.slane %v12982_v21, 1  ;;  %v5411_v30 = vmax.f32 %v5409_v11, %v5410_v14  ;;  %v8288_v32 = vpop.f32.mrb[76].mxu0  ;;  %v14483_v43 = vld [vmem:[#allocation36_spill] sm:$0xff] }
 0x35b   : > { %v5403_v58 = vrot.slane %v5402_v33, 4  ;;  %v4748_v8 = vadd.f32 %v14481_v12, %v3861_v57  ;;  %v5069_v10 = vadd.f32 %v14482_v25, %v4749_v38  ;;  %v4751_v2 = vadd.f32 %v8282_v50, %v12690_v34  ;;  %v13019_v46 = vpop.permute.xlu1 %4488  ;;  %v3891_v27 = vpop.f32.mrb[77].mxu0  ;;  %v8413_v14 = vld [vmem:[%s8491_s9 + $0x30] sm:$0xff]  ;;  %v14484_v34 = vld [vmem:[#allocation55_spill] sm:$0xff] }
 0x35c   : > { %v5418_v4 = vsel %vm1534_vm4, %v5066_v13, -inf  ;;  %v4750_v37 = vadd.f32 %v14483_v43, %v3871_v18  ;;  %v5398_v42 = vrot.slane %v13001_v16, 1  ;;  %v5412_v62 = vrot.slane %v5411_v30, 4  ;;  %7293 = vrot.lane.b32.xlu0 %v8413_v14, %s8428_s11  ;;  %v13024_v57 = vpop.permute.xlu0 %4490 }
 0x35d   : > { %v5404_v51 = vmax.f32 %v5402_v33, %v5403_v58  ;;  %v5420_v40 = vmax.f32 %v5418_v4, %v5419_v15  ;;  %v5428_v11 = vsel %vm1534_vm4, %v5069_v10, -inf  ;;  %v5068_v13 = vadd.f32 %v14482_v25, %v4748_v8 }
 0x35e   : > { %v5071_v50 = vadd.f32 %v14484_v34, %v4751_v2  ;;  %v5070_v18 = vadd.f32 %v14484_v34, %v4750_v37  ;;  %v5413_v12 = vmax.f32 %v5411_v30, %v5412_v62  ;;  %v4753_v33 = vadd.f32 %v8285_v6, %v12716_v28  ;;  %v8291_v58 = vpop.f32.mrb[78].mxu0  ;;  %v14485_v34 = vld [vmem:[#allocation4_spill] sm:$0xff] }
 0x35f   : > { %v5405_v38 = vrot.slane %v5404_v51, 2  ;;  %v5421_v43 = vrot.slane %v5420_v40, 4  ;;  %v5427_v15 = vsel %vm1534_vm4, %v5068_v13, -inf  ;;  %v4752_v10 = vadd.f32 %v12685_v5, %v3881_v47  ;;  %v3901_v8 = vpop.f32.mrb[79].mxu0 }
 0x360   : > { %v5437_v4 = vsel %vm1534_vm4, %v5071_v50, -inf  ;;  %v5436_v14 = vsel %vm1534_vm4, %v5070_v18, -inf  ;;  %v13035_v45 = vpop.permute.xlu1 %4492  ;;  %v5414_v2 = vrot.slane %v5413_v12, 2  ;;  %v5429_v30 = vmax.f32 %v5427_v15, %v5428_v11 }
 0x361   : > { %v13037_v25 = vmax.f32 %v5404_v51, %v5405_v38  ;;  %v5422_v37 = vmax.f32 %v5420_v40, %v5421_v43  ;;  %v5438_v62 = vmax.f32 %v5436_v14, %v5437_v4  ;;  %v5073_v28 = vadd.f32 %v14485_v34, %v4753_v33  ;;  %v13048_v51 = vpop.permute.xlu0 %4494  ;;  %v14487_v33 = vld [vmem:[#allocation66_spill] sm:$0xff] }
 0x362   : > { %v5072_v6 = vadd.f32 %v14485_v34, %v4752_v10  ;;  %v4755_v13 = vadd.f32 %v8288_v32, %v12740_v53  ;;  %v13043_v50 = vmax.f32 %v12916_v31, %v5344_v55  ;;  %v13046_v5 = vmax.f32 %v12982_v21, %v5389_v1  ;;  %v8294_v38 = vpop.f32.mrb[80].mxu0  ;;  %v14488_v34 = vld [vmem:[#allocation119_spill] sm:$0xff] }
 0x363   : > { %v5423_v47 = vrot.slane %v5422_v37, 2  ;;  %v5430_v18 = vrot.slane %v5429_v30, 4  ;;  %v5439_v40 = vrot.slane %v5438_v62, 4  ;;  %v5446_v11 = vsel %vm1534_vm4, %v5073_v28, -inf  ;;  %v3911_v53 = vpop.f32.mrb[81].mxu0  ;;  %v14489_v21 = vld [vmem:[#allocation83_spill] sm:$0xff] }
 0x364   : > { %14486 = vst [vmem:[#allocation89_spill] sm:$0xff] %v13043_v50  ;;  %v5445_v43 = vsel %vm1534_vm4, %v5072_v6, -inf  ;;  %v5075_v15 = vadd.f32 %v14487_v33, %v4755_v13  ;;  %v13053_v4 = vpop.permute.xlu1 %4496  ;;  %v13056_v31 = vmax.f32 %v13001_v16, %v5398_v42  ;;  %v13059_v32 = vmax.f32 %v5413_v12, %v5414_v2 }
 0x365   : > { %v5424_v55 = vmax.f32 %v5422_v37, %v5423_v47  ;;  %v5431_v1 = vmax.f32 %v5429_v30, %v5430_v18  ;;  %v5440_v14 = vmax.f32 %v5438_v62, %v5439_v40  ;;  %v5447_v10 = vmax.f32 %v5445_v43, %v5446_v11  ;;  %v14490_v47 = vld [vmem:[#allocation46_spill] sm:$0xff]  ;;  %v13070_v40 = vpop.permute.xlu0 %4498 }
 0x366   : > { %v4754_v28 = vadd.f32 %v14488_v34, %v3891_v27  ;;  %v5455_v13 = vsel %vm1534_vm4, %v5075_v15, -inf  ;;  %v4757_v7 = vadd.f32 %v8291_v58, %v12783_v26  ;;  %v8297_v39 = vpop.f32.mrb[82].mxu0  ;;  %v4756_v37 = vadd.f32 %v14489_v21, %v3901_v8  ;;  %v14491_v21 = vld [vmem:[#allocation52_spill] sm:$0xff] }
 0x367   : > { %v5425_v50 = vrot.slane %v5424_v55, 1  ;;  %v5432_v6 = vrot.slane %v5431_v1, 2  ;;  %v5441_v36 = vrot.slane %v5440_v14, 2  ;;  %v5448_v16 = vrot.slane %v5447_v10, 4  ;;  %v3921_v12 = vpop.f32.mrb[83].mxu0 }
 0x368   : > { %v5074_v42 = vadd.f32 %v14487_v33, %v4754_v28  ;;  %v13066_v30 = vpop.permute.xlu1 %4500  ;;  %v5077_v27 = vadd.f32 %v14490_v47, %v4757_v7  ;;  %v4759_v18 = vadd.f32 %v8294_v38, %v12806_v23  ;;  %v5076_v43 = vadd.f32 %v14490_v47, %v4756_v37  ;;  %v14492_v23 = vld [vmem:[#allocation25_spill] sm:$0xff] }
 0x369   : > { %v5426_v2 = vmax.f32 %v5424_v55, %v5425_v50  ;;  %v5433_v62 = vmax.f32 %v5431_v1, %v5432_v6  ;;  %v5442_v11 = vmax.f32 %v5440_v14, %v5441_v36  ;;  %v5449_v26 = vmax.f32 %v5447_v10, %v5448_v16 }
 0x36a   : > { %v5454_v58 = vsel %vm1534_vm4, %v5074_v42, -inf  ;;  %v5464_v8 = vsel %vm1534_vm4, %v5077_v27, -inf  ;;  %v5079_v34 = vadd.f32 %v14491_v21, %v4759_v18  ;;  %v8300_v50 = vpop.f32.mrb[84].mxu0  ;;  %v5463_v7 = vsel %vm1534_vm4, %v5076_v43, -inf  ;;  %v13085_v43 = vpop.permute.xlu0 %4502 }
 0x36b   : > { %v5434_v33 = vrot.slane %v5433_v62, 1  ;;  %v5456_v15 = vmax.f32 %v5454_v58, %v5455_v13  ;;  %v5443_v55 = vrot.slane %v5442_v11, 1  ;;  %v5450_v1 = vrot.slane %v5449_v26, 2  ;;  %v3931_v36 = vpop.f32.mrb[85].mxu0 }
 0x36c   : > { %v4758_v38 = vadd.f32 %v14492_v23, %v3911_v53  ;;  %v13078_v28 = vpop.permute.xlu1 %4504  ;;  %v5465_v6 = vmax.f32 %v5463_v7, %v5464_v8  ;;  %v5473_v16 = vsel %vm1534_vm4, %v5079_v34, -inf  ;;  %v4761_v47 = vadd.f32 %v8297_v39, %v12837_v24 }
 0x36d   : > { %v5435_v14 = vmax.f32 %v5433_v62, %v5434_v33  ;;  %v5457_v10 = vrot.slane %v5456_v15, 4  ;;  %v5444_v13 = vmax.f32 %v5442_v11, %v5443_v55  ;;  %v5451_v42 = vmax.f32 %v5449_v26, %v5450_v1  ;;  %v14493_v26 = vld [vmem:[#allocation56_spill] sm:$0xff] }
 0x36e   : > { %v5078_v37 = vadd.f32 %v14491_v21, %v4758_v38  ;;  %v5466_v58 = vrot.slane %v5465_v6, 4  ;;  %v4760_v53 = vadd.f32 %v12781_v20, %v3921_v12  ;;  %v8303_v23 = vpop.f32.mrb[86].mxu0  ;;  %v5081_v8 = vadd.f32 %v14493_v26, %v4761_v47  ;;  %v14494_v47 = vld [vmem:[#allocation59_spill] sm:$0xff] }
 0x36f   : > { %v6957_v27 = vsel %vm6922_vm5, %v5435_v14, %v5426_v2  ;;  %v5458_v18 = vmax.f32 %v5456_v15, %v5457_v10  ;;  %v5452_v33 = vrot.slane %v5451_v42, 1  ;;  %v3941_v24 = vpop.f32.mrb[87].mxu0  ;;  %v4763_v55 = vadd.f32 %v8300_v50, %v12859_v29 }
 0x370   : > { %v13088_v62 = vsel %vm6924_vm6, %v5444_v13, %v6957_v27  ;;  %v5472_v11 = vsel %vm1534_vm4, %v5078_v37, -inf  ;;  %v13092_v21 = vpop.permute.xlu1 %4508  ;;  %v5467_v2 = vmax.f32 %v5465_v6, %v5466_v58  ;;  %v5080_v34 = vadd.f32 %v14493_v26, %v4760_v53  ;;  %v14495_v26 = vld [vmem:[#allocation61_spill] sm:$0xff] }
 0x371   : > { %v5459_v39 = vrot.slane %v5458_v18, 2  ;;  %v5474_v15 = vmax.f32 %v5472_v11, %v5473_v16  ;;  %v13095_v20 = vmax.f32 %v5451_v42, %v5452_v33  ;;  %v5482_v12 = vsel %vm1534_vm4, %v5081_v8, -inf }
 0x372   : > { %v4762_v1 = vadd.f32 %v12800_v56, %v3931_v36  ;;  %v5468_v38 = vrot.slane %v5467_v2, 2  ;;  %v5481_v10 = vsel %vm1534_vm4, %v5080_v34, -inf  ;;  %v8306_v13 = vpop.f32.mrb[88].mxu0  ;;  %v5083_v6 = vadd.f32 %v14494_v47, %v4763_v55  ;;  %v13106_v56 = vpop.permute.xlu0 %4506 }
 0x373   : > { %v5460_v7 = vmax.f32 %v5458_v18, %v5459_v39  ;;  %v5475_v14 = vrot.slane %v5474_v15, 4  ;;  %v5483_v37 = vmax.f32 %v5481_v10, %v5482_v12  ;;  %v4765_v42 = vadd.f32 %v8303_v23, %v12885_v41  ;;  %v3951_v58 = vpop.f32.mrb[89].mxu0 }
 0x374   : > { %v5082_v16 = vadd.f32 %v14494_v47, %v4762_v1  ;;  %v13104_v27 = vpop.permute.xlu1 %7123  ;;  %v5469_v29 = vmax.f32 %v5467_v2, %v5468_v38  ;;  %v4764_v36 = vadd.f32 %v12829_v3, %v3941_v24  ;;  %v5491_v33 = vsel %vm1534_vm4, %v5083_v6, -inf }
 0x375   : > { %v5461_v53 = vrot.slane %v5460_v7, 1  ;;  %v5476_v50 = vmax.f32 %v5474_v15, %v5475_v14  ;;  %v5484_v18 = vrot.slane %v5483_v37, 4  ;;  %v5085_v8 = vadd.f32 %v14495_v26, %v4765_v42 }
 0x376   : > { %v5490_v11 = vsel %vm1534_vm4, %v5082_v16, -inf  ;;  %v5470_v41 = vrot.slane %v5469_v29, 1  ;;  %v8309_v12 = vpop.f32.mrb[90].mxu0  ;;  %v5084_v15 = vadd.f32 %v14495_v26, %v4764_v36  ;;  %v4767_v3 = vadd.f32 %v8306_v13, %v12908_v61  ;;  %v14496_v16 = vld [vmem:[#allocation63_spill] sm:$0xff]  ;;  %v13125_v61 = vpop.permute.xlu0 %4510 }
 0x377   : > { %v13112_v39 = vmax.f32 %v5460_v7, %v5461_v53  ;;  %v5477_v23 = vrot.slane %v5476_v50, 2  ;;  %v5492_v34 = vmax.f32 %v5490_v11, %v5491_v33  ;;  %v5485_v55 = vmax.f32 %v5483_v37, %v5484_v18  ;;  %v3961_v1 = vpop.f32.mrb[91].mxu0  ;;  %v14497_v11 = vld [vmem:[#allocation58_spill] sm:$0xff] }
 0x378   : > { %v5500_v2 = vsel %vm1534_vm4, %v5085_v8, -inf  ;;  %v13117_v24 = vpop.permute.xlu1 %4512  ;;  %v13119_v38 = vmax.f32 %v5469_v29, %v5470_v41  ;;  %v4766_v7 = vadd.f32 %v12852_v52, %v3951_v58  ;;  %v5499_v6 = vsel %vm1534_vm4, %v5084_v15, -inf }
 0x379   : > { %v5478_v14 = vmax.f32 %v5476_v50, %v5477_v23  ;;  %v5493_v10 = vrot.slane %v5492_v34, 4  ;;  %v5486_v47 = vrot.slane %v5485_v55, 2  ;;  %v5087_v37 = vadd.f32 %v14496_v16, %v4767_v3 }
 0x37a   : > { %v4769_v42 = vadd.f32 %v8309_v12, %v12926_v49  ;;  %v5501_v18 = vmax.f32 %v5499_v6, %v5500_v2  ;;  %v5086_v13 = vadd.f32 %v14496_v16, %v4766_v7  ;;  %v4768_v58 = vadd.f32 %v12880_v60, %v3961_v1 }
 0x37b   : > { %v5479_v53 = vrot.slane %v5478_v14, 1  ;;  %v5494_v36 = vmax.f32 %v5492_v34, %v5493_v10  ;;  %v8312_v29 = vpop.f32.mrb[92].mxu0  ;;  %v5487_v33 = vmax.f32 %v5485_v55, %v5486_v47  ;;  %v5509_v50 = vsel %vm1534_vm4, %v5087_v37, -inf }
 0x37c   : > { %v5089_v52 = vadd.f32 %v14497_v11, %v4769_v42  ;;  %v13131_v26 = vpop.permute.xlu1 %4516  ;;  %v3971_v8 = vpop.f32.mrb[93].mxu0  ;;  %v5502_v23 = vrot.slane %v5501_v18, 4  ;;  %v5508_v34 = vsel %vm1534_vm4, %v5086_v13, -inf  ;;  %v5088_v55 = vadd.f32 %v14497_v11, %v4768_v58  ;;  %v14499_v11 = vld [vmem:[#allocation71_spill] sm:$0xff] }
 0x37d   : > { %v13133_v41 = vmax.f32 %v5478_v14, %v5479_v53  ;;  %v5495_v49 = vrot.slane %v5494_v36, 2  ;;  %v5488_v12 = vrot.slane %v5487_v33, 1  ;;  %v5510_v2 = vmax.f32 %v5508_v34, %v5509_v50  ;;  %v13146_v50 = vpop.permute.xlu0 %4514 }
 0x37e   : > { %v5518_v15 = vsel %vm1534_vm4, %v5089_v52, -inf  ;;  %v5503_v10 = vmax.f32 %v5501_v18, %v5502_v23  ;;  %v4771_v7 = vadd.f32 %v8312_v29, %v12949_v63  ;;  %v4770_v60 = vadd.f32 %v12903_v44, %v3971_v8  ;;  %v14498_v18 = vld [vmem:[#allocation73_spill] sm:$0xff] }
 0x37f   : > { %v5496_v3 = vmax.f32 %v5494_v36, %v5495_v49  ;;  %v8315_v1 = vpop.f32.mrb[94].mxu0  ;;  %v5511_v47 = vrot.slane %v5510_v2, 4  ;;  %v5517_v14 = vsel %vm1534_vm4, %v5088_v55, -inf  ;;  %v13144_v42 = vmax.f32 %v5487_v33, %v5488_v12 }
 0x380   : > { %v13141_v6 = vpop.permute.xlu1 %4520  ;;  %v4773_v16 = vadd.f32 %v8315_v1, %v12973_v48  ;;  %v3981_v37 = vpop.f32.mrb[95].mxu0  ;;  %v5504_v13 = vrot.slane %v5503_v10, 2  ;;  %v5519_v36 = vmax.f32 %v5517_v14, %v5518_v15  ;;  %v5091_v63 = vadd.f32 %v14498_v18, %v4771_v7 }
 0x381   : > { %v5497_v53 = vrot.slane %v5496_v3, 1  ;;  %v5512_v29 = vmax.f32 %v5510_v2, %v5511_v47  ;;  %v5090_v44 = vadd.f32 %v14498_v18, %v4770_v60  ;;  %v4772_v58 = vadd.f32 %v12944_v17, %v3981_v37 }
 0x382   : > { %v5093_v52 = vadd.f32 %v14499_v11, %v4773_v16  ;;  %v5505_v49 = vmax.f32 %v5503_v10, %v5504_v13  ;;  %v5520_v48 = vrot.slane %v5519_v36, 4  ;;  %v5527_v33 = vsel %vm1534_vm4, %v5091_v63, -inf  ;;  %v13164_v13 = vpop.permute.xlu0 %4518 }
 0x383   : > { %v5498_v8 = vmax.f32 %v5496_v3, %v5497_v53  ;;  %v8318_v23 = vpop.f32.mrb[96].mxu0  ;;  %v5513_v34 = vrot.slane %v5512_v29, 2  ;;  %v5526_v12 = vsel %vm1534_vm4, %v5090_v44, -inf  ;;  %v5092_v55 = vadd.f32 %v14499_v11, %v4772_v58  ;;  %v14500_v11 = vld [vmem:[#allocation79_spill] sm:$0xff] }
 0x384   : > { %v5536_v15 = vsel %vm1534_vm4, %v5093_v52, -inf  ;;  %v13156_v2 = vpop.permute.xlu1 %4524  ;;  %v3991_v7 = vpop.f32.mrb[97].mxu0  ;;  %v5506_v60 = vrot.slane %v5505_v49, 1  ;;  %v5521_v1 = vmax.f32 %v5519_v36, %v5520_v48  ;;  %v5528_v47 = vmax.f32 %v5526_v12, %v5527_v33  ;;  %v14501_v12 = vld [vmem:[#allocation5_spill] sm:$0xff] }
 0x385   : > { %v4775_v17 = vadd.f32 %v8318_v23, %v12996_v22  ;;  %v5514_v3 = vmax.f32 %v5512_v29, %v5513_v34  ;;  %v5535_v10 = vsel %vm1534_vm4, %v5092_v55, -inf  ;;  %v4774_v14 = vadd.f32 %v12962_v59, %v3991_v7 }
 0x386   : > { %v6959_v16 = vsel %vm6926_vm7, %v13095_v20, %v13088_v62  ;;  %v5507_v37 = vmax.f32 %v5505_v49, %v5506_v60  ;;  %v5522_v53 = vrot.slane %v5521_v1, 2  ;;  %v5529_v18 = vrot.slane %v5528_v47, 4 }
 0x387   : > { %v5537_v63 = vmax.f32 %v5535_v10, %v5536_v15  ;;  %v8321_v44 = vpop.f32.mrb[98].mxu0  ;;  %v5515_v36 = vrot.slane %v5514_v3, 1  ;;  %v5095_v52 = vadd.f32 %v14500_v11, %v4775_v17  ;;  %v5094_v22 = vadd.f32 %v14500_v11, %v4774_v14  ;;  %v14502_v11 = vld [vmem:[#allocation99_spill] sm:$0xff] }
 0x388   : > { %v13168_v29 = vpop.permute.xlu1 %4528  ;;  %v4777_v59 = vadd.f32 %v8321_v44, %v13019_v46  ;;  %v4001_v58 = vpop.f32.mrb[99].mxu0  ;;  %v6964_v48 = vsel %vm6922_vm5, %v5507_v37, %v5498_v8  ;;  %v5523_v62 = vmax.f32 %v5521_v1, %v5522_v53  ;;  %v5530_v20 = vmax.f32 %v5528_v47, %v5529_v18 }
 0x389   : > { %v5538_v49 = vrot.slane %v5537_v63, 4  ;;  %v5516_v33 = vmax.f32 %v5514_v3, %v5515_v36  ;;  %v5545_v23 = vsel %vm1534_vm4, %v5095_v52, -inf  ;;  %v5544_v34 = vsel %vm1534_vm4, %v5094_v22, -inf  ;;  %v13181_v18 = vpop.permute.xlu0 %4522 }
 0x38a   : > { %v5097_v15 = vadd.f32 %v14501_v12, %v4777_v59  ;;  %v5524_v55 = vrot.slane %v5523_v62, 1  ;;  %v5531_v7 = vrot.slane %v5530_v20, 2  ;;  %v5546_v17 = vmax.f32 %v5544_v34, %v5545_v23 }
 0x38b   : > { %v5539_v60 = vmax.f32 %v5537_v63, %v5538_v49  ;;  %v8324_v10 = vpop.f32.mrb[100].mxu0  ;;  %v6965_v46 = vsel %vm6924_vm6, %v5516_v33, %v6964_v48  ;;  %v4776_v8 = vadd.f32 %v12989_v54, %v4001_v58  ;;  %v6960_v54 = vsel %vm6928_vm8, %v13112_v39, %v6959_v16 }
 0x38c   : > { %v5554_v14 = vsel %vm1534_vm4, %v5097_v15, -inf  ;;  %v13178_v1 = vpop.permute.xlu1 %4532  ;;  %v4779_v47 = vadd.f32 %v8324_v10, %v13035_v45  ;;  %v4011_v3 = vpop.f32.mrb[101].mxu0  ;;  %v5525_v37 = vmax.f32 %v5523_v62, %v5524_v55  ;;  %v5532_v53 = vmax.f32 %v5530_v20, %v5531_v7  ;;  %v14503_v7 = vld [vmem:[#allocation72_spill] sm:$0xff] }
 0x38d   : > { %v5540_v44 = vrot.slane %v5539_v60, 2  ;;  %v5547_v36 = vrot.slane %v5546_v17, 4  ;;  %v5096_v63 = vadd.f32 %v14501_v12, %v4776_v8  ;;  %v4778_v22 = vadd.f32 %v13024_v57, %v4011_v3  ;;  %v13200_v8 = vpop.permute.xlu0 %4526 }
 0x38e   : > { %v5099_v52 = vadd.f32 %v14502_v11, %v4779_v47  ;;  %v5533_v59 = vrot.slane %v5532_v53, 1  ;;  %v6966_v62 = vsel %vm6926_vm7, %v5525_v37, %v6965_v46  ;;  %v6961_v10 = vsel %vm6930_vm9, %v13119_v38, %v6960_v54 }
 0x38f   : > { %v5541_v58 = vmax.f32 %v5539_v60, %v5540_v44  ;;  %v5548_v48 = vmax.f32 %v5546_v17, %v5547_v36  ;;  %v8327_v45 = vpop.f32.mrb[102].mxu0  ;;  %v5553_v20 = vsel %vm1534_vm4, %v5096_v63, -inf  ;;  %v5098_v33 = vadd.f32 %v14502_v11, %v4778_v22 }
 0x390   : > { %v5563_v49 = vsel %vm1534_vm4, %v5099_v52, -inf  ;;  %v13192_v23 = vpop.permute.xlu1 %4536  ;;  %v4781_v34 = vadd.f32 %v8327_v45, %v13053_v4  ;;  %v4021_v57 = vpop.f32.mrb[103].mxu0  ;;  %v5534_v12 = vmax.f32 %v5532_v53, %v5533_v59  ;;  %v5555_v16 = vmax.f32 %v5553_v20, %v5554_v14  ;;  %v14504_v59 = vld [vmem:[#allocation106_spill] sm:$0xff] }
 0x391   : > { %v5542_v15 = vrot.slane %v5541_v58, 1  ;;  %v5549_v39 = vrot.slane %v5548_v48, 2  ;;  %v5562_v55 = vsel %vm1534_vm4, %v5098_v33, -inf  ;;  %v4780_v17 = vadd.f32 %v13048_v51, %v4021_v57 }
 0x392   : > { %v5101_v60 = vadd.f32 %v14503_v7, %v4781_v34  ;;  %v5556_v3 = vrot.slane %v5555_v16, 4  ;;  %v5564_v4 = vmax.f32 %v5562_v55, %v5563_v49  ;;  %v6967_v51 = vsel %vm6928_vm8, %v5534_v12, %v6966_v62 }
 0x393   : > { %v5543_v46 = vmax.f32 %v5541_v58, %v5542_v15  ;;  %v5550_v47 = vmax.f32 %v5548_v48, %v5549_v39  ;;  %v8330_v37 = vpop.f32.mrb[104].mxu0  ;;  %v5100_v14 = vadd.f32 %v14503_v7, %v4780_v17  ;;  %v6962_v45 = vsel %vm6932_vm10, %v13133_v41, %v6961_v10 }
 0x394   : > { %v5572_v53 = vsel %vm1534_vm4, %v5101_v60, -inf  ;;  %v13204_v44 = vpop.permute.xlu1 %4540  ;;  %v4783_v36 = vadd.f32 %v8330_v37, %v13066_v30  ;;  %v4031_v63 = vpop.f32.mrb[105].mxu0  ;;  %v5557_v38 = vmax.f32 %v5555_v16, %v5556_v3  ;;  %v5565_v52 = vrot.slane %v5564_v4, 4 }
 0x395   : > { %v5551_v11 = vrot.slane %v5550_v47, 1  ;;  %v4782_v22 = vadd.f32 %v13070_v40, %v4031_v63  ;;  %v5571_v54 = vsel %vm1534_vm4, %v5100_v14, -inf  ;;  %v6968_v48 = vsel %vm6930_vm9, %v5543_v46, %v6967_v51  ;;  %v13223_v16 = vpop.permute.xlu0 %4530  ;;  %v14505_v46 = vld [vmem:[#allocation3_spill] sm:$0xff] }
 0x396   : > { %v5103_v58 = vadd.f32 %v14504_v59, %v4783_v36  ;;  %v5558_v49 = vrot.slane %v5557_v38, 2  ;;  %v5566_v30 = vmax.f32 %v5564_v4, %v5565_v52  ;;  %v5573_v33 = vmax.f32 %v5571_v54, %v5572_v53 }
 0x397   : > { %v5552_v20 = vmax.f32 %v5550_v47, %v5551_v11  ;;  %v8333_v34 = vpop.f32.mrb[106].mxu0  ;;  %v5102_v57 = vadd.f32 %v14504_v59, %v4782_v22  ;;  %v13221_v39 = vsel %vm6934_vm11, %v13144_v42, %v6962_v45  ;;  %v5416_v17 = vrot.slane %v13059_v32, 1  ;;  %v14506_v11 = vld [vmem:[#allocation18_spill] sm:$0xff]  ;;  %v14508_v45 = vld [vmem:[#allocation97_spill] sm:$0xff] }
 0x398   : > { %v5581_v62 = vsel %vm1534_vm4, %v5103_v58, -inf  ;;  %v13216_v12 = vpop.permute.xlu1 %4544  ;;  %v4785_v40 = vadd.f32 %v8333_v34, %v13078_v28  ;;  %v4041_v15 = vpop.f32.mrb[107].mxu0  ;;  %v5559_v41 = vmax.f32 %v5557_v38, %v5558_v49  ;;  %v5567_v55 = vrot.slane %v5566_v30, 2  ;;  %v14507_v38 = vld [vmem:[#allocation11_spill] sm:$0xff] }
 0x399   : > { %v5574_v7 = vrot.slane %v5573_v33, 4  ;;  %v4784_v60 = vadd.f32 %v13085_v43, %v4041_v15  ;;  %v5580_v10 = vsel %vm1534_vm4, %v5102_v57, -inf  ;;  %v6969_v28 = vsel %vm6932_vm10, %v5552_v20, %v6968_v48  ;;  %v13243_v34 = vpop.permute.xlu0 %4534 }
 0x39a   : > { %v5105_v47 = vadd.f32 %v14505_v46, %v4785_v40  ;;  %v5560_v3 = vrot.slane %v5559_v41, 1  ;;  %v5568_v4 = vmax.f32 %v5566_v30, %v5567_v55  ;;  %v5582_v42 = vmax.f32 %v5580_v10, %v5581_v62  ;;  %v14509_v30 = vld [vmem:[#allocation113_spill] sm:$0xff] }
 0x39b   : > { %v5575_v37 = vmax.f32 %v5573_v33, %v5574_v7  ;;  %v8336_v53 = vpop.f32.mrb[108].mxu0  ;;  %v5104_v36 = vadd.f32 %v14505_v46, %v4784_v60  ;;  %v6939_v52 = vsel %vm6928_vm8, %v14507_v38, %v14506_v11 }
 0x39c   : > { %v5590_v14 = vsel %vm1534_vm4, %v5105_v47, -inf  ;;  %v13232_v63 = vpop.permute.xlu1 %4548  ;;  %v4787_v43 = vadd.f32 %v8336_v53, %v13092_v21  ;;  %v4051_v51 = vpop.f32.mrb[109].mxu0  ;;  %v5569_v22 = vrot.slane %v5568_v4, 1  ;;  %v5583_v59 = vrot.slane %v5582_v42, 4 }
 0x39d   : > { %v5576_v54 = vrot.slane %v5575_v37, 2  ;;  %v4786_v58 = vadd.f32 %v13106_v56, %v4051_v51  ;;  %v5589_v48 = vsel %vm1534_vm4, %v5104_v36, -inf  ;;  %v5561_v49 = vmax.f32 %v5559_v41, %v5560_v3 }
 0x39e   : > { %v5107_v20 = vadd.f32 %v14508_v45, %v4787_v43  ;;  %v6940_v33 = vsel %vm6930_vm9, %v14509_v30, %v6939_v52  ;;  %v5570_v21 = vmax.f32 %v5568_v4, %v5569_v22  ;;  %v5584_v57 = vmax.f32 %v5582_v42, %v5583_v59  ;;  %v14510_v42 = vld [vmem:[#allocation98_spill] sm:$0xff]  ;;  %v13267_v59 = vpop.permute.xlu0 %4538 }
 0x39f   : > { %v5577_v62 = vmax.f32 %v5575_v37, %v5576_v54  ;;  %v5591_v40 = vmax.f32 %v5589_v48, %v5590_v14  ;;  %v8339_v15 = vpop.f32.mrb[110].mxu0  ;;  %v5106_v7 = vadd.f32 %v14508_v45, %v4786_v58  ;;  %v6970_v41 = vsel %vm6934_vm11, %v5561_v49, %v6969_v28 }
 0x3a0   : > { %v5599_v55 = vsel %vm1534_vm4, %v5107_v20, -inf  ;;  %v13247_v56 = vpop.permute.xlu1 %4552  ;;  %v4789_v60 = vadd.f32 %v8339_v15, %v13117_v24  ;;  %v4061_v10 = vpop.f32.mrb[111].mxu0  ;;  %v5585_v47 = vrot.slane %v5584_v57, 2  ;;  %v13256_v14 = vsel %vm1534_vm4, %v6970_v41, %v13104_v27 }
 0x3a1   : > { %v5578_v46 = vrot.slane %v5577_v62, 1  ;;  %v5592_v3 = vrot.slane %v5591_v40, 4  ;;  %v4788_v4 = vadd.f32 %v13125_v61, %v4061_v10  ;;  %v5598_v37 = vsel %vm1534_vm4, %v5106_v7, -inf }
 0x3a2   : > { %v5109_v53 = vadd.f32 %v14510_v42, %v4789_v60  ;;  %v6941_v36 = vsel %vm6932_vm10, %v12820_v35, %v6940_v33  ;;  %v5586_v43 = vmax.f32 %v5584_v57, %v5585_v47  ;;  %v5600_v28 = vmax.f32 %v5598_v37, %v5599_v55  ;;  %v14512_v33 = vld [vmem:[#allocation94_spill] sm:$0xff]  ;;  %v14513_v37 = vld [vmem:[#allocation107_spill] sm:$0xff] }
 0x3a3   : > { %v5579_v24 = vmax.f32 %v5577_v62, %v5578_v46  ;;  %v5593_v51 = vmax.f32 %v5591_v40, %v5592_v3  ;;  %v8342_v11 = vpop.f32.mrb[112].mxu0  ;;  %v5108_v61 = vadd.f32 %v14510_v42, %v4788_v4  ;;  %v6942_v27 = vsel %vm6934_vm11, %v12873_v0, %v6941_v36  ;;  %v14514_v42 = vld [vmem:[#allocation19_spill] sm:$0xff] }
 0x3a4   : > { %v5608_v38 = vsel %vm1534_vm4, %v5109_v53, -inf  ;;  %v13262_v52 = vpop.permute.xlu1 %7267  ;;  %v4791_v22 = vadd.f32 %v8342_v11, %v13131_v26  ;;  %v4071_v54 = vpop.f32.mrb[113].mxu0  ;;  %v5587_v58 = vrot.slane %v5586_v43, 1  ;;  %v5601_v45 = vrot.slane %v5600_v28, 4 }
 0x3a5   : > { %v6971_v35 = vsel %vm6922_vm5, %v5579_v24, %v5570_v21  ;;  %v5594_v48 = vrot.slane %v5593_v51, 2  ;;  %v14511_v20 = vrot.slane %v13037_v25, 1  ;;  %v5607_v30 = vsel %vm1534_vm4, %v5108_v61, -inf }
 0x3a6   : > { %v5111_v26 = vadd.f32 %v14512_v33, %v4791_v22  ;;  %v4790_v62 = vadd.f32 %v13146_v50, %v4071_v54  ;;  %v5588_v57 = vmax.f32 %v5586_v43, %v5587_v58  ;;  %v5602_v40 = vmax.f32 %v5600_v28, %v5601_v45  ;;  %v14515_v54 = vld [vmem:[#allocation7_spill] sm:$0xff]  ;;  %v14516_v45 = vld [vmem:[#allocation17_spill] sm:$0xff] }
 0x3a7   : > { %v13273_v49 = vmax.f32 %v13037_v25, %v14511_v20  ;;  %v5595_v0 = vmax.f32 %v5593_v51, %v5594_v48  ;;  %v5609_v15 = vmax.f32 %v5607_v30, %v5608_v38  ;;  %v8345_v55 = vpop.f32.mrb[114].mxu0  ;;  %v13281_v21 = vmax.f32 %v13059_v32, %v5416_v17  ;;  %v14517_v20 = vld [vmem:[#allocation103_spill] sm:$0xff] }
 0x3a8   : > { %v5617_v7 = vsel %vm1534_vm4, %v5111_v26, -inf  ;;  %v5110_v25 = vadd.f32 %v14512_v33, %v4790_v62  ;;  %v13285_v60 = vpop.permute.xlu1 %7271  ;;  %v4793_v10 = vadd.f32 %v8345_v55, %v13141_v6  ;;  %v4081_v50 = vpop.f32.mrb[115].mxu0  ;;  %v6972_v41 = vsel %vm6924_vm6, %v5588_v57, %v6971_v35  ;;  %v14518_v55 = vld [vmem:[#allocation117_spill] sm:$0xff] }
 0x3a9   : > { %v5596_v46 = vrot.slane %v5595_v0, 1  ;;  %v5603_v47 = vrot.slane %v5602_v40, 2  ;;  %v5610_v3 = vrot.slane %v5609_v15, 4  ;;  %v4792_v17 = vadd.f32 %v13164_v13, %v4081_v50 }
 0x3aa   : > { %v5616_v4 = vsel %vm1534_vm4, %v5110_v25, -inf  ;;  %v5113_v32 = vadd.f32 %v14513_v37, %v4793_v10  ;;  %v7306_v53 = vsel %vm1534_vm4, %v6942_v27, %v14514_v42  ;;  %v13294_v36 = vpop.permute.xlu0 %7125  ;;  %v6929_v30 = vsel %vm6928_vm8, %v14517_v20, %v14516_v45  ;;  %v14519_v25 = vld [vmem:[#allocation47_spill] sm:$0xff] }
 0x3ab   : > { %v5597_v24 = vmax.f32 %v5595_v0, %v5596_v46  ;;  %v5604_v43 = vmax.f32 %v5602_v40, %v5603_v47  ;;  %v5611_v6 = vmax.f32 %v5609_v15, %v5610_v3  ;;  %v5618_v51 = vmax.f32 %v5616_v4, %v5617_v7  ;;  %v14520_v4 = vld [vmem:[#allocation28_spill] sm:$0xff] }
 0x3ac   : > { %v5626_v28 = vsel %vm1534_vm4, %v5113_v32, -inf  ;;  %v5112_v11 = vadd.f32 %v14513_v37, %v4792_v17  ;;  %v7284_v13 = vpop.permute.xlu1 %7283  ;;  %v7314_v27 = vsel %vm298_vm0, %v7306_v53, %v14515_v54  ;;  %v6931_v7 = vsel %vm6930_vm9, %v14518_v55, %v6929_v30  ;;  %v14521_v32 = vld [vmem:[#allocation8_spill] sm:$0xff] }
 0x3ad   : > { %v13306_v38 = vsel %vm6926_vm7, %v5597_v24, %v6972_v41  ;;  %v5612_v61 = vrot.slane %v5611_v6, 2  ;;  %v5619_v22 = vrot.slane %v5618_v51, 4  ;;  %v8348_v35 = vpop.f32.mrb[116].mxu0  ;;  %v7323_v48 = vsel %vm7321_vm12, %v7314_v27, %v7284_v13 }
 0x3ae   : > { %v5625_v58 = vsel %vm1534_vm4, %v5112_v11, -inf  ;;  %v4795_v33 = vadd.f32 %v8348_v35, %v13156_v2  ;;  %v4091_v26 = vpop.f32.mrb[117].mxu0  ;;  %v13316_v62 = vpop.permute.xlu0 %4542  ;;  %v5605_v57 = vrot.slane %v5604_v43, 1  ;;  %7332 = vst.msk [vmem:[%s13301_s13 + $0x8] sm:$0xff] %vm7330_vm13, %v7323_v48  ;;  %v6953_v2 = vsel %vm6928_vm8, %v13046_v5, %v12999_v9  ;;  %v14524_v48 = vld [vmem:[#allocation121_spill] sm:$0xff] }
 0x3af   : > { %v5613_v0 = vmax.f32 %v5611_v6, %v5612_v61  ;;  %v5620_v40 = vmax.f32 %v5618_v51, %v5619_v22  ;;  %v5627_v15 = vmax.f32 %v5625_v58, %v5626_v28  ;;  %v4794_v50 = vadd.f32 %v13181_v18, %v4091_v26  ;;  %v14522_v61 = vld [vmem:[#allocation14_spill] sm:$0xff] }
 0x3b0   : > { %v5115_v10 = vadd.f32 %v14519_v25, %v4795_v33  ;;  %v7288_v41 = vpop.permute.xlu1 %7287  ;;  %v6933_v37 = vsel %vm6932_vm10, %v14520_v4, %v6931_v7  ;;  %v6954_v18 = vsel %vm6930_vm9, %v13056_v31, %v6953_v2  ;;  %v5606_v9 = vmax.f32 %v5604_v43, %v5605_v57  ;;  %v14527_v7 = vld [vmem:[#allocation100_spill] sm:$0xff] }
 0x3b1   : > { %v5614_v46 = vrot.slane %v5613_v0, 1  ;;  %v5621_v47 = vrot.slane %v5620_v40, 2  ;;  %v5628_v3 = vrot.slane %v5627_v15, 4  ;;  %v6935_v17 = vsel %vm6934_vm11, %v14521_v32, %v6933_v37 }
 0x3b2   : > { %v5635_v42 = vsel %vm1534_vm4, %v5115_v10, -inf  ;;  %v5114_v53 = vadd.f32 %v14519_v25, %v4794_v50  ;;  %v13335_v24 = vpop.permute.xlu0 %4546  ;;  %v7318_v5 = vsel %vm298_vm0, %v13256_v14, %v13262_v52  ;;  %v6955_v13 = vsel %vm6932_vm10, %v13273_v49, %v6954_v18  ;;  %v8351_v31 = vpop.f32.mrb[118].mxu0  ;;  %v14523_v52 = vld [vmem:[#allocation88_spill] sm:$0xff]  ;;  %v14528_v50 = vld [vmem:[#allocation89_spill] sm:$0xff] }
 0x3b3   : > { %v5622_v6 = vmax.f32 %v5620_v40, %v5621_v47  ;;  %v5629_v51 = vmax.f32 %v5627_v15, %v5628_v3  ;;  %v5615_v28 = vmax.f32 %v5613_v0, %v5614_v46  ;;  %v6946_v22 = vsel %vm6928_vm8, %v14522_v61, %v12833_v19  ;;  %v4101_v14 = vpop.f32.mrb[119].mxu0  ;;  %v14526_v15 = vld [vmem:[#allocation87_spill] sm:$0xff]  ;;  %v14529_v61 = vld [vmem:[#allocation78_spill] sm:$0xff] }
 0x3b4   : > { %v5634_v11 = vsel %vm1534_vm4, %v5114_v53, -inf  ;;  %v6956_v35 = vsel %vm6934_vm11, %v13281_v21, %v6955_v13  ;;  %v6947_v45 = vsel %vm6930_vm9, %v14524_v48, %v6946_v22  ;;  %v4797_v49 = vadd.f32 %v8351_v31, %v13168_v29  ;;  %v7292_v19 = vpop.permute.xlu1 %7291  ;;  %v14525_v21 = vld [vmem:[#allocation82_spill] sm:$0xff] }
 0x3b5   : > { %v5623_v54 = vrot.slane %v5622_v6, 1  ;;  %v5630_v27 = vrot.slane %v5629_v51, 2  ;;  %v5636_v43 = vmax.f32 %v5634_v11, %v5635_v42  ;;  %v7308_v58 = vsel %vm1534_vm4, %v6956_v35, %v14523_v52 }
 0x3b6   : > { %v4796_v20 = vadd.f32 %v13200_v8, %v4101_v14  ;;  %v13354_v30 = vpop.permute.xlu0 %4550  ;;  %v7316_v0 = vsel %vm298_vm0, %v7308_v58, %v14525_v21  ;;  %v6948_v55 = vsel %vm6932_vm10, %v14526_v15, %v6947_v45  ;;  %v5117_v25 = vadd.f32 %v14527_v7, %v4797_v49  ;;  %v14531_v45 = vld [vmem:[#allocation85_spill] sm:$0xff] }
 0x3b7   : > { %v5624_v33 = vmax.f32 %v5622_v6, %v5623_v54  ;;  %v5631_v26 = vmax.f32 %v5629_v51, %v5630_v27  ;;  %v5637_v57 = vrot.slane %v5636_v43, 4  ;;  %v7325_v40 = vsel %vm7321_vm12, %v7316_v0, %v7288_v41 }
 0x3b8   : > { %v5116_v29 = vadd.f32 %v14527_v7, %v4796_v20  ;;  %7334 = vst.msk [vmem:[%s13301_s13 + $0x18] sm:$0xff] %vm7330_vm13, %v7325_v40  ;;  %v6949_v2 = vsel %vm6934_vm11, %v14528_v50, %v6948_v55  ;;  %v7327_v46 = vsel %vm7321_vm12, %v7318_v5, %v7292_v19  ;;  %v5644_v47 = vsel %vm1534_vm4, %v5117_v25, -inf  ;;  %v14533_v40 = vld [vmem:[#allocation20_spill] sm:$0xff] }
 0x3b9   : > { %v5632_v8 = vrot.slane %v5631_v26, 1  ;;  %v5638_v10 = vmax.f32 %v5636_v43, %v5637_v57  ;;  %7336 = vst.msk [vmem:[%s13301_s13 + $0x28] sm:$0xff] %vm7330_vm13, %v7327_v46  ;;  %v6974_v3 = vsel %vm6928_vm8, %v5606_v9, %v13306_v38  ;;  %v8354_v53 = vpop.f32.mrb[120].mxu0  ;;  %v14530_v43 = vld [vmem:[#allocation54_spill] sm:$0xff] }
 0x3ba   : > { %v5643_v41 = vsel %vm1534_vm4, %v5116_v29, -inf  ;;  %v7266_v4 = vpop.permute.xlu0 %7265  ;;  %v4799_v18 = vadd.f32 %v8354_v53, %v13178_v1  ;;  %v4111_v6 = vpop.f32.mrb[121].mxu0  ;;  %v6975_v51 = vsel %vm6930_vm9, %v5615_v28, %v6974_v3  ;;  %v7305_v1 = vsel %vm1534_vm4, %v6935_v17, %v14530_v43  ;;  %v14532_v57 = vld [vmem:[#allocation2_spill] sm:$0xff] }
 0x3bb   : > { %v5633_v37 = vmax.f32 %v5631_v26, %v5632_v8  ;;  %v5639_v32 = vrot.slane %v5638_v10, 2  ;;  %v5645_v42 = vmax.f32 %v5643_v41, %v5644_v47  ;;  %v4798_v11 = vadd.f32 %v13223_v16, %v4111_v6  ;;  %v14534_v8 = vld [vmem:[#allocation77_spill] sm:$0xff] }
 0x3bc   : > { %v6976_v13 = vsel %vm6932_vm10, %v5624_v33, %v6975_v51  ;;  %v5119_v22 = vadd.f32 %v14529_v61, %v4799_v18  ;;  %v7313_v49 = vsel %vm298_vm0, %v7305_v1, %v14531_v45  ;;  %v7307_v21 = vsel %vm1534_vm4, %v6949_v2, %v14532_v57 }
 0x3bd   : > { %v5646_v5 = vrot.slane %v5645_v42, 4  ;;  %v6977_v31 = vsel %vm6934_vm11, %v5633_v37, %v6976_v13  ;;  %v5640_v9 = vmax.f32 %v5638_v10, %v5639_v32  ;;  %v5118_v27 = vadd.f32 %v14529_v61, %v4798_v11  ;;  %v14535_v37 = vld [vmem:[#allocation49_spill] sm:$0xff] }
 0x3be   : > { %v7270_v38 = vpop.permute.xlu0 %7269  ;;  %v5653_v35 = vsel %vm1534_vm4, %v5119_v22, -inf  ;;  %v7309_v32 = vsel %vm1534_vm4, %v13221_v39, %v14535_v37  ;;  %v7311_v11 = vsel %vm1534_vm4, %v6977_v31, %v13294_v36  ;;  %v14536_v22 = vld [vmem:[#allocation102_spill] sm:$0xff] }
 0x3bf   : > { %v5647_v54 = vmax.f32 %v5645_v42, %v5646_v5  ;;  %v5652_v16 = vsel %vm1534_vm4, %v5118_v27, -inf  ;;  %v5641_v19 = vrot.slane %v5640_v9, 1  ;;  %v7317_v13 = vsel %vm298_vm0, %v7309_v32, %v7266_v4 }
 0x3c0   : > { %v8357_v14 = vpop.f32.mrb[122].mxu0  ;;  %v5654_v52 = vmax.f32 %v5652_v16, %v5653_v35 }
 0x3c1   : > { %v5648_v28 = vrot.slane %v5647_v54, 2  ;;  %v4801_v58 = vadd.f32 %v8357_v14, %v13192_v23  ;;  %v4121_v48 = vpop.f32.mrb[123].mxu0  ;;  %v5642_v29 = vmax.f32 %v5640_v9, %v5641_v19 }
 0x3c2   : > { %v7282_v20 = vpop.permute.xlu0 %7281  ;;  %v4800_v26 = vadd.f32 %v13243_v34, %v4121_v48  ;;  %v5655_v0 = vrot.slane %v5654_v52, 4  ;;  %v7315_v34 = vsel %vm298_vm0, %v7307_v21, %v14534_v8 }
 0x3c3   : > { %v5649_v33 = vmax.f32 %v5647_v54, %v5648_v28  ;;  %v7322_v17 = vsel %vm7321_vm12, %v7313_v49, %v7282_v20  ;;  %v5121_v15 = vadd.f32 %v14533_v40, %v4801_v58 }
 0x3c4   : > { %7331 = vst.msk [vmem:[%s13301_s13] sm:$0xff] %vm7330_vm13, %v7322_v17  ;;  %v5120_v55 = vadd.f32 %v14533_v40, %v4800_v26  ;;  %v5656_v7 = vmax.f32 %v5654_v52, %v5655_v0 }
 0x3c5   : > { %v5650_v23 = vrot.slane %v5649_v33, 1  ;;  %v5662_v25 = vsel %vm1534_vm4, %v5121_v15, -inf }
 0x3c6   : > { %v7286_v10 = vpop.permute.xlu0 %7285  ;;  %v5661_v2 = vsel %vm1534_vm4, %v5120_v55, -inf  ;;  %v5657_v47 = vrot.slane %v5656_v7, 2 }
 0x3c7   : > { %v5651_v50 = vmax.f32 %v5649_v33, %v5650_v23  ;;  %v7324_v46 = vsel %vm7321_vm12, %v7315_v34, %v7286_v10  ;;  %v5663_v41 = vmax.f32 %v5661_v2, %v5662_v25  ;;  %v8360_v3 = vpop.f32.mrb[124].mxu0 }
 0x3c8   : > { %7333 = vst.msk [vmem:[%s13301_s13 + $0x10] sm:$0xff] %vm7330_vm13, %v7324_v46  ;;  %v4803_v53 = vadd.f32 %v8360_v3, %v13204_v44  ;;  %v4131_v18 = vpop.f32.mrb[125].mxu0  ;;  %v5658_v6 = vmax.f32 %v5656_v7, %v5657_v47 }
 0x3c9   : > { %v6978_v42 = vsel %vm6922_vm5, %v5651_v50, %v5642_v29  ;;  %v5664_v51 = vrot.slane %v5663_v41, 4  ;;  %v4802_v5 = vadd.f32 %v13267_v59, %v4131_v18  ;;  %v7319_v59 = vsel %vm298_vm0, %v7311_v11, %v7270_v38  ;;  %v14537_v38 = vld [vmem:[#allocation95_spill] sm:$0xff]  ;;  %v14538_v29 = vld [vmem:[#allocation80_spill] sm:$0xff] }
 0x3ca   : > { %v7290_v61 = vpop.permute.xlu0 %7289  ;;  %v5123_v39 = vadd.f32 %v14536_v22, %v4803_v53  ;;  %v5659_v54 = vrot.slane %v5658_v6, 1 }
 0x3cb   : > { %v7326_v9 = vsel %vm7321_vm12, %v7317_v13, %v7290_v61  ;;  %v5665_v27 = vmax.f32 %v5663_v41, %v5664_v51  ;;  %v5122_v43 = vadd.f32 %v14536_v22, %v4802_v5 }
 0x3cc   : > { %7335 = vst.msk [vmem:[%s13301_s13 + $0x20] sm:$0xff] %vm7330_vm13, %v7326_v9  ;;  %v5671_v44 = vsel %vm1534_vm4, %v5123_v39, -inf  ;;  %v5660_v1 = vmax.f32 %v5658_v6, %v5659_v54  ;;  %v14539_v6 = vld [vmem:[#allocation76_spill] sm:$0xff] }
 0x3cd   : > { %v5666_v36 = vrot.slane %v5665_v27, 2  ;;  %v5670_v4 = vsel %vm1534_vm4, %v5122_v43, -inf  ;;  %v8363_v31 = vpop.f32.mrb[126].mxu0 }
 0x3ce   : > { %v5672_v35 = vmax.f32 %v5670_v4, %v5671_v44  ;;  %v7294_v28 = vpop.permute.xlu0 %7293  ;;  %v4805_v16 = vadd.f32 %v8363_v31, %v13216_v12  ;;  %v4141_v14 = vpop.f32.mrb[127].mxu0  ;;  %v6979_v52 = vsel %vm6924_vm6, %v5660_v1, %v6978_v42 }
 0x3cf   : > { %v5667_v58 = vmax.f32 %v5665_v27, %v5666_v36  ;;  %v7328_v48 = vsel %vm7321_vm12, %v7319_v59, %v7294_v28  ;;  %v4804_v45 = vadd.f32 %v13316_v62, %v4141_v14  ;;  %v7128_v31 = vpop.permute.xlu1 %7127 }
 0x3d0   : > { %v5673_v49 = vrot.slane %v5672_v35, 4  ;;  %7337 = vst.msk [vmem:[%s13301_s13 + $0x30] sm:$0xff] %vm7330_vm13, %v7328_v48  ;;  %v5125_v20 = vadd.f32 %v14537_v38, %v4805_v16 }
 0x3d1   : > { %v5668_v19 = vrot.slane %v5667_v58, 1  ;;  %v5124_v33 = vadd.f32 %v14537_v38, %v4804_v45 }
 0x3d2   : > { %v5674_v26 = vmax.f32 %v5672_v35, %v5673_v49  ;;  %v5680_v17 = vsel %vm1534_vm4, %v5125_v20, -inf }
 0x3d3   : > { %v5669_v12 = vmax.f32 %v5667_v58, %v5668_v19  ;;  %v5679_v57 = vsel %vm1534_vm4, %v5124_v33, -inf  ;;  %v7296_v16 = vpop.permute.xlu1 %7295 }
 0x3d4   : > { %v5675_v21 = vrot.slane %v5674_v26, 2  ;;  %v5681_v0 = vmax.f32 %v5679_v57, %v5680_v17  ;;  %v8366_v40 = vpop.f32.mrb[128].mxu0 }
 0x3d5   : > { %v6980_v15 = vsel %vm6926_vm7, %v5669_v12, %v6979_v52  ;;  %v4807_v62 = vadd.f32 %v8366_v40, %v13232_v63  ;;  %v4151_v23 = vpop.f32.mrb[129].mxu0 }
 0x3d6   : > { %v5676_v55 = vmax.f32 %v5674_v26, %v5675_v21  ;;  %v5682_v7 = vrot.slane %v5681_v0, 4  ;;  %v4806_v25 = vadd.f32 %v13335_v24, %v4151_v23 }
 0x3d7   : > { %v5127_v8 = vadd.f32 %v14538_v29, %v4807_v62 }
 0x3d8   : > { %v5677_v34 = vrot.slane %v5676_v55, 1  ;;  %v5683_v10 = vmax.f32 %v5681_v0, %v5682_v7  ;;  %v5126_v50 = vadd.f32 %v14538_v29, %v4806_v25 }
 0x3d9   : > { %v5689_v2 = vsel %vm1534_vm4, %v5127_v8, -inf }
 0x3da   : > { %v5678_v46 = vmax.f32 %v5676_v55, %v5677_v34  ;;  %v5684_v47 = vrot.slane %v5683_v10, 2  ;;  %v5688_v41 = vsel %vm1534_vm4, %v5126_v50, -inf  ;;  %v8369_v3 = vpop.f32.mrb[130].mxu0 }
 0x3db   : > { %v5690_v37 = vmax.f32 %v5688_v41, %v5689_v2  ;;  %v4809_v63 = vadd.f32 %v8369_v3, %v13247_v56  ;;  %v4161_v32 = vpop.f32.mrb[131].mxu0 }
 0x3dc   : > { %v5685_v42 = vmax.f32 %v5683_v10, %v5684_v47  ;;  %v4808_v24 = vadd.f32 %v13354_v30, %v4161_v32  ;;  %v6981_v53 = vsel %vm6928_vm8, %v5678_v46, %v6980_v15 }
 0x3dd   : > { %v5691_v18 = vrot.slane %v5690_v37, 4  ;;  %v5129_v51 = vadd.f32 %v14539_v6, %v4809_v63 }
 0x3de   : > { %v5686_v5 = vrot.slane %v5685_v42, 1  ;;  %v5128_v11 = vadd.f32 %v14539_v6, %v4808_v24 }
 0x3df   : > { %v5692_v13 = vmax.f32 %v5690_v37, %v5691_v18  ;;  %v5698_v61 = vsel %vm1534_vm4, %v5129_v51, -inf }
 0x3e0   : > { %v5687_v22 = vmax.f32 %v5685_v42, %v5686_v5  ;;  %v5697_v39 = vsel %vm1534_vm4, %v5128_v11, -inf }
 0x3e1   : > { %v5693_v9 = vrot.slane %v5692_v13, 2  ;;  %v5699_v56 = vmax.f32 %v5697_v39, %v5698_v61 }
 0x3e2   : > { %v6982_v54 = vsel %vm6930_vm9, %v5687_v22, %v6981_v53 }
 0x3e3   : > { %v5694_v27 = vmax.f32 %v5692_v13, %v5693_v9  ;;  %v5700_v30 = vrot.slane %v5699_v56, 4 }
 0x3e5   : > { %v5695_v43 = vrot.slane %v5694_v27, 1  ;;  %v5701_v44 = vmax.f32 %v5699_v56, %v5700_v30 }
 0x3e7   : > { %v5696_v59 = vmax.f32 %v5694_v27, %v5695_v43  ;;  %v5702_v1 = vrot.slane %v5701_v44, 2 }
 0x3e9   : > { %v5703_v36 = vmax.f32 %v5701_v44, %v5702_v1  ;;  %v6983_v4 = vsel %vm6932_vm10, %v5696_v59, %v6982_v54 }
 0x3eb   : > { %v5704_v35 = vrot.slane %v5703_v36, 1 }
 0x3ed   : > { %v5705_v28 = vmax.f32 %v5703_v36, %v5704_v35 }
 0x3ef   : > { %v6984_v14 = vsel %vm6934_vm11, %v5705_v28, %v6983_v4 }
 0x3f0   : > { %v7312_v52 = vsel %vm1534_vm4, %v6984_v14, %v7128_v31 }
 0x3f1   : > { %v7320_v58 = vsel %vm298_vm0, %v7312_v52, %v13285_v60 }
 0x3f2   : > { %v7329_v48 = vsel %vm7321_vm12, %v7320_v58, %v7296_v16 }
 0x3f3   : > { %7338 = vst.msk [vmem:[%s13301_s13 + $0x38] sm:$0xff] %vm7330_vm13, %v7329_v48 }
 0x3f4 PF: > { %s16_s21 = sadd.s32 1, %s8420_s21  }
 0x3f5   : > { %p13_p5 = scmp.ge.s32.totalorder %s16_s21, 4  }
 0x3f7   :  { %15 = sbr.rel (!%p13_p5) target bundleno = 1 (0x1), region = 77 }

</bundles_post_ra>
